<compile_context>
chip_gen: v7x
topology: tpu7x:2x2x1
jax: 0.10.0
libtpu: 0.0.40
codegen_flags: <defaults>
</compile_context>

<pallas_src>
import math
import functools

import jax
import jax.numpy as jnp
from jax import lax
from jax.experimental import pallas as pl
from jax.experimental.pallas import tpu as pltpu


# contract dim 1 of lhs with dim 1 of rhs ("B transposed" matmul, MXU-native)
_NT_DIMS = (((1,), (1,)), ((), ()))


# ------------------------------ Pallas kernel -------------------------------

def _lbp_fused_kernel(T, x_ref,
                      a1_ref, b1_ref, c1_ref,
                      a2_ref, b2_ref, c2_ref,
                      a3_ref, b3_ref, c3_ref,
                      wct_ref, bc_ref,
                      out_ref):
    """Whole LBP_NET forward on one batch tile; everything stays in VMEM.

    a{l} = A_l.T, shape (Din_l, Dout_l); single copy per layer (bf16 for 1/2):
        conv2d(u)_flat           = u_flat @ a
        conv_transpose2d(g)_flat = dot_general(g, a, NT)   (swapped contraction)
    b{l} = bias broadcast to the flat (position, channel) rows, shape (1, Dout_l)
    c{l} = scalar gain broadcast to (1, Dout_l)
    """

    def layer(prev, a_ref, b_ref, c_ref):
        a = a_ref[...]
        b = b_ref[...]
        c = c_ref[...]
        dt = a.dtype                       # bf16 for layers 1/2, f32 for layer 3

        # gamma = relu(c * conv(prev) + b)
        g = jnp.maximum(
            c * jnp.dot(prev.astype(dt), a, preferred_element_type=jnp.float32) + b,
            0.0)

        def refine(_, g):
            # gamma <- relu(gamma - c * conv(conv_T(gamma) - prev) + b)
            r = lax.dot_general(g.astype(dt), a, _NT_DIMS,
                                preferred_element_type=jnp.float32) - prev
            upd = jnp.dot(r.astype(dt), a, preferred_element_type=jnp.float32)
            return jnp.maximum(g - c * upd + b, 0.0)

        if T > 0:
            g = lax.fori_loop(0, T, refine, g, unroll=True)
        return g

    x = x_ref[...]
    g1 = layer(x, a1_ref, b1_ref, c1_ref)
    g2 = layer(g1, a2_ref, b2_ref, c2_ref)
    g3 = layer(g2, a3_ref, b3_ref, c3_ref)

    # classifier head (lane-padded to 128 logits; padded bias lanes are -1e30 so
    # max / logsumexp ignore them) + numerically-stable log_softmax
    logits = jnp.dot(g3, wct_ref[...], preferred_element_type=jnp.float32) + bc_ref[...]
    m = jnp.max(logits, axis=-1, keepdims=True)
    z = logits - m
    lse = jnp.log(jnp.sum(jnp.exp(z), axis=-1, keepdims=True))
    out_ref[...] = (z - lse).astype(out_ref.dtype)


# --------------------------- one-time weight prep ----------------------------

def _conv_operator(W, H, Wd, stride):
    """Dense matrix A (Dout, Din) such that, with channels-last flattening
    idx = (h*W + w)*C + c:
        conv2d(u, W, stride)_flat           = u_flat @ A.T
        conv_transpose2d(g, W, stride)_flat = g_flat @ A
    Exact re-layout of the kernel weights (no approximation)."""
    Cout, Cin, kh, kw = W.shape
    OH = (H - kh) // stride + 1
    OW = (Wd - kw) // stride + 1
    oh = jnp.arange(OH)[:, None, None, None]
    ow = jnp.arange(OW)[None, :, None, None]
    ki = jnp.arange(kh)[None, None, :, None]
    kj = jnp.arange(kw)[None, None, None, :]
    pos = (oh * stride + ki) * Wd + (ow * stride + kj)        # (OH, OW, kh, kw)
    sel = jax.nn.one_hot(pos, H * Wd, dtype=W.dtype)          # (OH, OW, kh, kw, H*Wd)
    A = jnp.einsum('ocij,hwijp->hwopc', W, sel)               # (OH, OW, Cout, H*Wd, Cin)
    return A.reshape(OH * OW * Cout, H * Wd * Cin), OH, OW


def _flat_bias(b, n_pos):
    row = b.reshape(1, -1)                                    # (1, C)
    return jnp.tile(row, (n_pos, 1)).reshape(1, -1)           # (1, n_pos*C)


def prepare_lbp_operators(params, H=28, W=28, big_op_dtype=jnp.bfloat16):
    """One-time (per weight update) prep, hoisted out of the per-call jitted
    path: the one_hot/einsum operator construction is far more work than the
    fused kernel itself and must not run per forward."""
    W1, W2, W3, c1, c2, c3, b1, b2, b3, Wc, bc = params

    A1, OH1, OW1 = _conv_operator(W1, H, W, 2)
    A2, OH2, OW2 = _conv_operator(W2, OH1, OW1, 2)
    A3, OH3, OW3 = _conv_operator(W3, OH2, OW2, 1)
    # classifier consumes gamma3 flattened -> architecture requires 1x1 spatial
    assert OH3 == 1 and OW3 == 1 and A3.shape[0] == Wc.shape[1]

    d1, din = A1.shape
    d2, d3 = A2.shape[0], A3.shape[0]
    pad = (-din) % 128                    # 784 -> 896: lane-dense layer-1 loads

    # Single operator copy per layer; big layers in bf16 (f32 accumulation in
    # the kernel).  Padded a1 rows are zero, matching the zero-padded x lanes.
    a1 = jnp.pad(A1.T, ((0, pad), (0, 0))).astype(big_op_dtype)     # (896, 1152)
    a2 = A2.T.astype(big_op_dtype)                                  # (1152, 256)
    a3 = A3.T.astype(jnp.float32)                                   # (256, 32)

    b1r = _flat_bias(b1, OH1 * OW1).astype(jnp.float32)
    b2r = _flat_bias(b2, OH2 * OW2).astype(jnp.float32)
    b3r = _flat_bias(b3, OH3 * OW3).astype(jnp.float32)
    c1r = jnp.broadcast_to(c1.reshape(1, 1), (1, d1)).astype(jnp.float32)
    c2r = jnp.broadcast_to(c2.reshape(1, 1), (1, d2)).astype(jnp.float32)
    c3r = jnp.broadcast_to(c3.reshape(1, 1), (1, d3)).astype(jnp.float32)

    # lane-dense classifier head: 10 -> 128 logits; padded bias lanes = -1e30
    ncls = Wc.shape[0]
    ncp = 128
    wct = jnp.zeros((d3, ncp), jnp.float32).at[:, :ncls].set(Wc.T.astype(jnp.float32))
    bcr = jnp.full((1, ncp), -1e30, jnp.float32).at[0, :ncls].set(bc.astype(jnp.float32))

    return (a1, b1r, c1r, a2, b2r, c2r, a3, b3r, c3r, wct, bcr)


# ------------------------------- forward pass --------------------------------

def _tpu_caps():
    """(max batch-tile rows, VMEM-limit cap).  Conservative for v7x
    (64 MiB/TC); larger tiles on the 128-MiB-VMEM parts (v5e/v6e)."""
    try:
        kind = jax.devices()[0].device_kind.lower()
    except Exception:
        kind = ""
    if "v5" in kind or "v6" in kind:
        return 1024, 96 * 1024 * 1024
    return 512, 48 * 1024 * 1024


def lbp_net_apply(ops, x, T, num_classes=10):
    """Per-call forward: flatten x, run the single fused Pallas kernel over a
    batch grid, slice the lane-padded logits back to num_classes."""
    (a1, b1r, c1r, a2, b2r, c2r, a3, b3r, c3r, wct, bcr) = ops
    N = x.shape[0]
    din_pad, d1 = a1.shape
    d2 = a2.shape[1]
    d3 = a3.shape[1]
    ncp = wct.shape[1]

    # channels-last flatten (idx = (h*W + w)*C + c), zero-pad features to 896
    x_flat = x.transpose(0, 2, 3, 1).reshape(N, -1).astype(jnp.float32)
    x_flat = jnp.pad(x_flat, ((0, 0), (0, din_pad - x_flat.shape[1])))

    tm_cap, vmem_cap = _tpu_caps()
    tm = N if N <= tm_cap else tm_cap     # block == full dim or an 8/128 multiple
    grid = (pl.cdiv(N, tm),)

    # computed VMEM footprint: double-buffered operands + f32 intermediates
    weight_bytes = 2 * sum(int(a.size) * a.dtype.itemsize for a in ops)
    io_bytes = 2 * tm * (din_pad + ncp) * 4
    act_bytes = 4 * tm * (3 * d1 + 2 * din_pad + 2 * d2 + 2 * d3 + ncp)
    vmem_limit = max(24 << 20,
                     min(int(1.5 * (weight_bytes + io_bytes + act_bytes)) + (4 << 20),
                         vmem_cap))

    def resident(arr):                    # weights/biases: same block every step
        return pl.BlockSpec(arr.shape, lambda i: (0, 0))

    in_specs = [pl.BlockSpec((tm, din_pad), lambda i: (i, 0))] + [resident(a) for a in ops]
    out_specs = pl.BlockSpec((tm, ncp), lambda i: (i, 0))

    out_pad = pl.pallas_call(
        functools.partial(_lbp_fused_kernel, T),
        out_shape=jax.ShapeDtypeStruct((N, ncp), jnp.float32),
        grid=grid,
        in_specs=in_specs,
        out_specs=out_specs,
        compiler_params=pltpu.CompilerParams(
            dimension_semantics=("parallel",),   # batch grid -> both v7x TCs
            vmem_limit_bytes=vmem_limit),
    )(x_flat, *ops)

    return out_pad[:, :num_classes]


def lbp_net_forward(params, x, T):
    # Convenience wrapper; in a real loop hoist prepare_lbp_operators() out of
    # the per-step path (it rebuilds the dense operators otherwise).
    return lbp_net_apply(prepare_lbp_operators(params, x.shape[2], x.shape[3]), x, T)
    # TODO(synk): the `all_out=True` branch (reconstruction via chained
    # conv_transpose) is pure glue around the same operators and is not exposed.


# --------------------------- pure-JAX reference -----------------------------

def _conv_t(y, W, stride):
    # Matches F.conv_transpose2d(y, W, stride) for exact-fit VALID geometry.
    return lax.conv_transpose(
        y, W, (stride, stride), "VALID",
        dimension_numbers=("NCHW", "OIHW", "NCHW"), transpose_kernel=True)


def _ref_forward(params, x, T):
    W1, W2, W3, c1, c2, c3, b1, b2, b3, Wc, bc = params

    def conv(u, W, s):
        return lax.conv_general_dilated(
            u, W, (s, s), "VALID", dimension_numbers=("NCHW", "OIHW", "NCHW"))

    def step(g, prev, W, c, b, s):
        return jax.nn.relu(g - c * conv(_conv_t(g, W, s) - prev, W, s) + b)

    g1 = jax.nn.relu(c1 * conv(x, W1, 2) + b1)
    for _ in range(T):
        g1 = step(g1, x, W1, c1, b1, 2)
    g2 = jax.nn.relu(c2 * conv(g1, W2, 2) + b2)
    for _ in range(T):
        g2 = step(g2, g1, W2, c2, b2, 2)
    g3 = jax.nn.relu(c3 * conv(g2, W3, 1) + b3)
    for _ in range(T):
        g3 = step(g3, g2, W3, c3, b3, 1)
    gamma = g3.reshape(g3.shape[0], -1)
    return jax.nn.log_softmax(gamma @ Wc.T + bc, axis=1)


# ----------------------------------- main ------------------------------------

if __name__ == "__main__":
    m1, m2, m3, T = 8, 16, 32, 1
    N = 2  # batch

    key = jax.random.PRNGKey(0)
    k = jax.random.split(key, 9)
    W1 = (0.1 / math.sqrt(36)) * jax.random.normal(k[0], (m1, 1, 6, 6), jnp.float32)
    W2 = (0.1 / math.sqrt(m1 * 36)) * jax.random.normal(k[1], (m2, m1, 6, 6), jnp.float32)
    W3 = (0.1 / math.sqrt(m2 * 16)) * jax.random.normal(k[2], (m3, m2, 4, 4), jnp.float32)
    # Non-trivial gains / biases so every term of the LISTA update is exercised.
    c1 = jnp.full((1, 1, 1, 1), 1.10, jnp.float32)
    c2 = jnp.full((1, 1, 1, 1), 0.90, jnp.float32)
    c3 = jnp.full((1, 1, 1, 1), 1.05, jnp.float32)
    b1 = 0.01 * jax.random.normal(k[3], (1, m1, 1, 1), jnp.float32)
    b2 = 0.01 * jax.random.normal(k[4], (1, m2, 1, 1), jnp.float32)
    b3 = 0.01 * jax.random.normal(k[5], (1, m3, 1, 1), jnp.float32)
    bound = 1.0 / math.sqrt(m3)
    Wc = jax.random.uniform(k[6], (10, m3), jnp.float32, -bound, bound)
    bc = jax.random.uniform(k[7], (10,), jnp.float32, -bound, bound)
    params = (W1, W2, W3, c1, c2, c3, b1, b2, b3, Wc, bc)

    # MNIST geometry is required by the architecture (28 -> 12 -> 4 -> 1).
    x = jax.random.normal(k[8], (N, 1, 28, 28), jnp.float32)

    # One-time weight prep (hoisted out of the jitted per-call path).
    ops = prepare_lbp_operators(params)
    jax.block_until_ready(ops)

    fwd = jax.jit(functools.partial(lbp_net_apply, T=T))
    out = fwd(ops, x)
    jax.block_until_ready(out)

    ref = jax.jit(functools.partial(_ref_forward, T=T))(params, x)
    assert out.shape == (N, 10)
    err = jnp.max(jnp.abs(out - ref))
    assert jnp.allclose(out, ref, atol=2e-3, rtol=2e-3), f"max abs err {err}"

    print("KERNEL_OK")
</pallas_src>

<mosaic_0001>
module attributes {stable_mosaic.version = 11 : i64} {
  func.func @_lbp_fused_kernel(%arg0: i32, %arg1: memref<2x896xf32, #tpu.memory_space<vmem>>, %arg2: memref<896x1152xbf16, #tpu.memory_space<vmem>>, %arg3: memref<1x1152xf32, #tpu.memory_space<vmem>>, %arg4: memref<1x1152xf32, #tpu.memory_space<vmem>>, %arg5: memref<1152x256xbf16, #tpu.memory_space<vmem>>, %arg6: memref<1x256xf32, #tpu.memory_space<vmem>>, %arg7: memref<1x256xf32, #tpu.memory_space<vmem>>, %arg8: memref<256x32xf32, #tpu.memory_space<vmem>>, %arg9: memref<1x32xf32, #tpu.memory_space<vmem>>, %arg10: memref<1x32xf32, #tpu.memory_space<vmem>>, %arg11: memref<32x128xf32, #tpu.memory_space<vmem>>, %arg12: memref<1x128xf32, #tpu.memory_space<vmem>>, %arg13: memref<2x128xf32, #tpu.memory_space<vmem>>) attributes {dimension_semantics = [#tpu.dimension_semantics<parallel>], iteration_bounds = array<i64: 1>, scalar_prefetch = 0 : i64, scratch_operands = 0 : i64, tpu.core_type = #tpu.core_type<tc>, window_params = [{transform_indices = @transform_0, window_bounds = array<i64: 2, 896>}, {pipeline_mode = #tpu.pipeline_mode<synchronous>, transform_indices = @transform_1, window_bounds = array<i64: 896, 1152>}, {pipeline_mode = #tpu.pipeline_mode<synchronous>, transform_indices = @transform_2, window_bounds = array<i64: 1, 1152>}, {pipeline_mode = #tpu.pipeline_mode<synchronous>, transform_indices = @transform_3, window_bounds = array<i64: 1, 1152>}, {pipeline_mode = #tpu.pipeline_mode<synchronous>, transform_indices = @transform_4, window_bounds = array<i64: 1152, 256>}, {pipeline_mode = #tpu.pipeline_mode<synchronous>, transform_indices = @transform_5, window_bounds = array<i64: 1, 256>}, {pipeline_mode = #tpu.pipeline_mode<synchronous>, transform_indices = @transform_6, window_bounds = array<i64: 1, 256>}, {pipeline_mode = #tpu.pipeline_mode<synchronous>, transform_indices = @transform_7, window_bounds = array<i64: 256, 32>}, {pipeline_mode = #tpu.pipeline_mode<synchronous>, transform_indices = @transform_8, window_bounds = array<i64: 1, 32>}, {pipeline_mode = #tpu.pipeline_mode<synchronous>, transform_indices = @transform_9, window_bounds = array<i64: 1, 32>}, {pipeline_mode = #tpu.pipeline_mode<synchronous>, transform_indices = @transform_10, window_bounds = array<i64: 32, 128>}, {pipeline_mode = #tpu.pipeline_mode<synchronous>, transform_indices = @transform_11, window_bounds = array<i64: 1, 128>}, {transform_indices = @transform_12, window_bounds = array<i64: 2, 128>}]} {
    %c0 = arith.constant 0 : index
    %c0_0 = arith.constant 0 : index
    %0 = vector.load %arg1[%c0, %c0_0] : memref<2x896xf32, #tpu.memory_space<vmem>>, vector<2x896xf32>
    %c0_1 = arith.constant 0 : index
    %c0_2 = arith.constant 0 : index
    %1 = vector.load %arg2[%c0_1, %c0_2] : memref<896x1152xbf16, #tpu.memory_space<vmem>>, vector<896x1152xbf16>
    %c0_3 = arith.constant 0 : index
    %c0_4 = arith.constant 0 : index
    %2 = vector.load %arg3[%c0_3, %c0_4] : memref<1x1152xf32, #tpu.memory_space<vmem>>, vector<1x1152xf32>
    %c0_5 = arith.constant 0 : index
    %c0_6 = arith.constant 0 : index
    %3 = vector.load %arg4[%c0_5, %c0_6] : memref<1x1152xf32, #tpu.memory_space<vmem>>, vector<1x1152xf32>
    %4 = arith.truncf %0 : vector<2x896xf32> to vector<2x896xbf16>
    %cst = arith.constant dense<0.000000e+00> : vector<2x1152xf32>
    %5 = tpu.matmul %4, %1, %cst {dimension_numbers = #tpu.dot_dimension_numbers<[1], [0], [0], [1], [0, 0, 1, 1], [], []>} : vector<2x896xbf16>, vector<896x1152xbf16>, vector<2x1152xf32> -> vector<2x1152xf32>
    %6 = vector.broadcast %3 : vector<1x1152xf32> to vector<2x1152xf32>
    %7 = arith.mulf %6, %5 : vector<2x1152xf32>
    %8 = vector.broadcast %2 : vector<1x1152xf32> to vector<2x1152xf32>
    %9 = arith.addf %7, %8 : vector<2x1152xf32>
    %cst_7 = arith.constant 0.000000e+00 : f32
    %10 = vector.broadcast %cst_7 : f32 to vector<2x1152xf32>
    %11 = arith.maximumf %9, %10 : vector<2x1152xf32>
    %c0_i32 = arith.constant 0 : i32
    %12 = arith.truncf %11 : vector<2x1152xf32> to vector<2x1152xbf16>
    %cst_8 = arith.constant dense<0.000000e+00> : vector<2x896xf32>
    %13 = tpu.matmul %12, %1, %cst_8 {dimension_numbers = #tpu.dot_dimension_numbers<[1], [1], [0], [0], [0, 0, 1, 0], [], []>} : vector<2x1152xbf16>, vector<896x1152xbf16>, vector<2x896xf32> -> vector<2x896xf32>
    %14 = arith.subf %13, %0 : vector<2x896xf32>
    %15 = arith.truncf %14 : vector<2x896xf32> to vector<2x896xbf16>
    %cst_9 = arith.constant dense<0.000000e+00> : vector<2x1152xf32>
    %16 = tpu.matmul %15, %1, %cst_9 {dimension_numbers = #tpu.dot_dimension_numbers<[1], [0], [0], [1], [0, 0, 1, 1], [], []>} : vector<2x896xbf16>, vector<896x1152xbf16>, vector<2x1152xf32> -> vector<2x1152xf32>
    %17 = vector.broadcast %3 : vector<1x1152xf32> to vector<2x1152xf32>
    %18 = arith.mulf %17, %16 : vector<2x1152xf32>
    %19 = arith.subf %11, %18 : vector<2x1152xf32>
    %20 = vector.broadcast %2 : vector<1x1152xf32> to vector<2x1152xf32>
    %21 = arith.addf %19, %20 : vector<2x1152xf32>
    %cst_10 = arith.constant 0.000000e+00 : f32
    %22 = vector.broadcast %cst_10 : f32 to vector<2x1152xf32>
    %23 = arith.maximumf %21, %22 : vector<2x1152xf32>
    %c0_11 = arith.constant 0 : index
    %c0_12 = arith.constant 0 : index
    %24 = vector.load %arg5[%c0_11, %c0_12] : memref<1152x256xbf16, #tpu.memory_space<vmem>>, vector<1152x256xbf16>
    %c0_13 = arith.constant 0 : index
    %c0_14 = arith.constant 0 : index
    %25 = vector.load %arg6[%c0_13, %c0_14] : memref<1x256xf32, #tpu.memory_space<vmem>>, vector<1x256xf32>
    %c0_15 = arith.constant 0 : index
    %c0_16 = arith.constant 0 : index
    %26 = vector.load %arg7[%c0_15, %c0_16] : memref<1x256xf32, #tpu.memory_space<vmem>>, vector<1x256xf32>
    %27 = arith.truncf %23 : vector<2x1152xf32> to vector<2x1152xbf16>
    %cst_17 = arith.constant dense<0.000000e+00> : vector<2x256xf32>
    %28 = tpu.matmul %27, %24, %cst_17 {dimension_numbers = #tpu.dot_dimension_numbers<[1], [0], [0], [1], [0, 0, 1, 1], [], []>} : vector<2x1152xbf16>, vector<1152x256xbf16>, vector<2x256xf32> -> vector<2x256xf32>
    %29 = vector.broadcast %26 : vector<1x256xf32> to vector<2x256xf32>
    %30 = arith.mulf %29, %28 : vector<2x256xf32>
    %31 = vector.broadcast %25 : vector<1x256xf32> to vector<2x256xf32>
    %32 = arith.addf %30, %31 : vector<2x256xf32>
    %cst_18 = arith.constant 0.000000e+00 : f32
    %33 = vector.broadcast %cst_18 : f32 to vector<2x256xf32>
    %34 = arith.maximumf %32, %33 : vector<2x256xf32>
    %c0_i32_19 = arith.constant 0 : i32
    %35 = arith.truncf %34 : vector<2x256xf32> to vector<2x256xbf16>
    %cst_20 = arith.constant dense<0.000000e+00> : vector<2x1152xf32>
    %36 = tpu.matmul %35, %24, %cst_20 {dimension_numbers = #tpu.dot_dimension_numbers<[1], [1], [0], [0], [0, 0, 1, 0], [], []>} : vector<2x256xbf16>, vector<1152x256xbf16>, vector<2x1152xf32> -> vector<2x1152xf32>
    %37 = arith.subf %36, %23 : vector<2x1152xf32>
    %38 = arith.truncf %37 : vector<2x1152xf32> to vector<2x1152xbf16>
    %cst_21 = arith.constant dense<0.000000e+00> : vector<2x256xf32>
    %39 = tpu.matmul %38, %24, %cst_21 {dimension_numbers = #tpu.dot_dimension_numbers<[1], [0], [0], [1], [0, 0, 1, 1], [], []>} : vector<2x1152xbf16>, vector<1152x256xbf16>, vector<2x256xf32> -> vector<2x256xf32>
    %40 = vector.broadcast %26 : vector<1x256xf32> to vector<2x256xf32>
    %41 = arith.mulf %40, %39 : vector<2x256xf32>
    %42 = arith.subf %34, %41 : vector<2x256xf32>
    %43 = vector.broadcast %25 : vector<1x256xf32> to vector<2x256xf32>
    %44 = arith.addf %42, %43 : vector<2x256xf32>
    %cst_22 = arith.constant 0.000000e+00 : f32
    %45 = vector.broadcast %cst_22 : f32 to vector<2x256xf32>
    %46 = arith.maximumf %44, %45 : vector<2x256xf32>
    %c0_23 = arith.constant 0 : index
    %c0_24 = arith.constant 0 : index
    %47 = vector.load %arg8[%c0_23, %c0_24] : memref<256x32xf32, #tpu.memory_space<vmem>>, vector<256x32xf32>
    %c0_25 = arith.constant 0 : index
    %c0_26 = arith.constant 0 : index
    %48 = vector.load %arg9[%c0_25, %c0_26] : memref<1x32xf32, #tpu.memory_space<vmem>>, vector<1x32xf32>
    %c0_27 = arith.constant 0 : index
    %c0_28 = arith.constant 0 : index
    %49 = vector.load %arg10[%c0_27, %c0_28] : memref<1x32xf32, #tpu.memory_space<vmem>>, vector<1x32xf32>
    %cst_29 = arith.constant dense<0.000000e+00> : vector<2x32xf32>
    %50 = tpu.matmul %46, %47, %cst_29 {dimension_numbers = #tpu.dot_dimension_numbers<[1], [0], [0], [1], [0, 0, 1, 1], [], []>} : vector<2x256xf32>, vector<256x32xf32>, vector<2x32xf32> -> vector<2x32xf32>
    %51 = vector.broadcast %49 : vector<1x32xf32> to vector<2x32xf32>
    %52 = arith.mulf %51, %50 : vector<2x32xf32>
    %53 = vector.broadcast %48 : vector<1x32xf32> to vector<2x32xf32>
    %54 = arith.addf %52, %53 : vector<2x32xf32>
    %cst_30 = arith.constant 0.000000e+00 : f32
    %55 = vector.broadcast %cst_30 : f32 to vector<2x32xf32>
    %56 = arith.maximumf %54, %55 : vector<2x32xf32>
    %c0_i32_31 = arith.constant 0 : i32
    %cst_32 = arith.constant dense<0.000000e+00> : vector<2x256xf32>
    %57 = tpu.matmul %56, %47, %cst_32 {dimension_numbers = #tpu.dot_dimension_numbers<[1], [1], [0], [0], [0, 0, 1, 0], [], []>} : vector<2x32xf32>, vector<256x32xf32>, vector<2x256xf32> -> vector<2x256xf32>
    %58 = arith.subf %57, %46 : vector<2x256xf32>
    %cst_33 = arith.constant dense<0.000000e+00> : vector<2x32xf32>
    %59 = tpu.matmul %58, %47, %cst_33 {dimension_numbers = #tpu.dot_dimension_numbers<[1], [0], [0], [1], [0, 0, 1, 1], [], []>} : vector<2x256xf32>, vector<256x32xf32>, vector<2x32xf32> -> vector<2x32xf32>
    %60 = vector.broadcast %49 : vector<1x32xf32> to vector<2x32xf32>
    %61 = arith.mulf %60, %59 : vector<2x32xf32>
    %62 = arith.subf %56, %61 : vector<2x32xf32>
    %63 = vector.broadcast %48 : vector<1x32xf32> to vector<2x32xf32>
    %64 = arith.addf %62, %63 : vector<2x32xf32>
    %cst_34 = arith.constant 0.000000e+00 : f32
    %65 = vector.broadcast %cst_34 : f32 to vector<2x32xf32>
    %66 = arith.maximumf %64, %65 : vector<2x32xf32>
    %c0_35 = arith.constant 0 : index
    %c0_36 = arith.constant 0 : index
    %67 = vector.load %arg11[%c0_35, %c0_36] : memref<32x128xf32, #tpu.memory_space<vmem>>, vector<32x128xf32>
    %cst_37 = arith.constant dense<0.000000e+00> : vector<2x128xf32>
    %68 = tpu.matmul %66, %67, %cst_37 {dimension_numbers = #tpu.dot_dimension_numbers<[1], [0], [0], [1], [0, 0, 1, 1], [], []>} : vector<2x32xf32>, vector<32x128xf32>, vector<2x128xf32> -> vector<2x128xf32>
    %c0_38 = arith.constant 0 : index
    %c0_39 = arith.constant 0 : index
    %69 = vector.load %arg12[%c0_38, %c0_39] : memref<1x128xf32, #tpu.memory_space<vmem>>, vector<1x128xf32>
    %70 = vector.broadcast %69 : vector<1x128xf32> to vector<2x128xf32>
    %71 = arith.addf %68, %70 : vector<2x128xf32>
    %cst_40 = arith.constant dense<0xFF800000> : vector<2xf32>
    %72 = vector.multi_reduction <maximumf>, %71, %cst_40 [1] : vector<2x128xf32> to vector<2xf32>
    %73 = vector.shape_cast %72 : vector<2xf32> to vector<2x1xf32>
    %74 = vector.broadcast %73 : vector<2x1xf32> to vector<2x128xf32>
    %75 = arith.subf %71, %74 : vector<2x128xf32>
    %76 = math.exp %75 : vector<2x128xf32>
    %cst_41 = arith.constant dense<0.000000e+00> : vector<2xf32>
    %77 = vector.multi_reduction <add>, %76, %cst_41 [1] : vector<2x128xf32> to vector<2xf32>
    %78 = vector.shape_cast %77 : vector<2xf32> to vector<2x1xf32>
    %79 = math.log %78 : vector<2x1xf32>
    %80 = vector.broadcast %79 : vector<2x1xf32> to vector<2x128xf32>
    %81 = arith.subf %75, %80 : vector<2x128xf32>
    %c0_42 = arith.constant 0 : index
    %c0_43 = arith.constant 0 : index
    %82 = vector.load %arg13[%c0_42, %c0_43] : memref<2x128xf32, #tpu.memory_space<vmem>>, vector<2x128xf32>
    tpu.vector_store %arg13[%c0_42, %c0_43], %81 {strides = array<i32>} : memref<2x128xf32, #tpu.memory_space<vmem>>, vector<2x128xf32>,
    return
  }
  func.func @transform_0(%arg0: i32) -> (i32, i32) {
    %c0_i32 = arith.constant 0 : i32
    %c0_i32_0 = arith.constant 0 : i32
    return %arg0, %c0_i32 : i32, i32
  }
  func.func @transform_1(%arg0: i32) -> (i32, i32) {
    %c0_i32 = arith.constant 0 : i32
    %c0_i32_0 = arith.constant 0 : i32
    %c0_i32_1 = arith.constant 0 : i32
    return %c0_i32, %c0_i32_0 : i32, i32
  }
  func.func @transform_2(%arg0: i32) -> (i32, i32) {
    %c0_i32 = arith.constant 0 : i32
    %c0_i32_0 = arith.constant 0 : i32
    %c0_i32_1 = arith.constant 0 : i32
    return %c0_i32, %c0_i32_0 : i32, i32
  }
  func.func @transform_3(%arg0: i32) -> (i32, i32) {
    %c0_i32 = arith.constant 0 : i32
    %c0_i32_0 = arith.constant 0 : i32
    %c0_i32_1 = arith.constant 0 : i32
    return %c0_i32, %c0_i32_0 : i32, i32
  }
  func.func @transform_4(%arg0: i32) -> (i32, i32) {
    %c0_i32 = arith.constant 0 : i32
    %c0_i32_0 = arith.constant 0 : i32
    %c0_i32_1 = arith.constant 0 : i32
    return %c0_i32, %c0_i32_0 : i32, i32
  }
  func.func @transform_5(%arg0: i32) -> (i32, i32) {
    %c0_i32 = arith.constant 0 : i32
    %c0_i32_0 = arith.constant 0 : i32
    %c0_i32_1 = arith.constant 0 : i32
    return %c0_i32, %c0_i32_0 : i32, i32
  }
  func.func @transform_6(%arg0: i32) -> (i32, i32) {
    %c0_i32 = arith.constant 0 : i32
    %c0_i32_0 = arith.constant 0 : i32
    %c0_i32_1 = arith.constant 0 : i32
    return %c0_i32, %c0_i32_0 : i32, i32
  }
  func.func @transform_7(%arg0: i32) -> (i32, i32) {
    %c0_i32 = arith.constant 0 : i32
    %c0_i32_0 = arith.constant 0 : i32
    %c0_i32_1 = arith.constant 0 : i32
    return %c0_i32, %c0_i32_0 : i32, i32
  }
  func.func @transform_8(%arg0: i32) -> (i32, i32) {
    %c0_i32 = arith.constant 0 : i32
    %c0_i32_0 = arith.constant 0 : i32
    %c0_i32_1 = arith.constant 0 : i32
    return %c0_i32, %c0_i32_0 : i32, i32
  }
  func.func @transform_9(%arg0: i32) -> (i32, i32) {
    %c0_i32 = arith.constant 0 : i32
    %c0_i32_0 = arith.constant 0 : i32
    %c0_i32_1 = arith.constant 0 : i32
    return %c0_i32, %c0_i32_0 : i32, i32
  }
  func.func @transform_10(%arg0: i32) -> (i32, i32) {
    %c0_i32 = arith.constant 0 : i32
    %c0_i32_0 = arith.constant 0 : i32
    %c0_i32_1 = arith.constant 0 : i32
    return %c0_i32, %c0_i32_0 : i32, i32
  }
  func.func @transform_11(%arg0: i32) -> (i32, i32) {
    %c0_i32 = arith.constant 0 : i32
    %c0_i32_0 = arith.constant 0 : i32
    %c0_i32_1 = arith.constant 0 : i32
    return %c0_i32, %c0_i32_0 : i32, i32
  }
  func.func @transform_12(%arg0: i32) -> (i32, i32) {
    %c0_i32 = arith.constant 0 : i32
    %c0_i32_0 = arith.constant 0 : i32
    return %arg0, %c0_i32 : i32, i32
  }
}

</mosaic_0001>

<bundles_post_ra>
// kernel: lbp_net_apply.1
= control target key start
LH: loop header
LB: loop body
LE: loop exit
PB: predicated region body
PF: predicated region fallthrough
CT: control target
= control target key end

     0   :  { %17 = vsyncpa [#allocation3], 0  ;;  %s13969_s0 = inlined_call_operand.vmem [shape: f32[2,896], index: 0, kind: input, shape index: {}]   ;;  %s13970_s1 = inlined_call_operand.hbm [shape: bf16[896,1152], index: 1, kind: input, shape index: {}]   ;;  %s13971_s2 = inlined_call_operand.hbm [shape: f32[1,1152], index: 2, kind: input, shape index: {}]   ;;  %s13972_s3 = inlined_call_operand.hbm [shape: f32[1,1152], index: 3, kind: input, shape index: {}]   ;;  %s13973_s4 = inlined_call_operand.hbm [shape: bf16[1152,256], index: 4, kind: input, shape index: {}]   ;;  %s13974_s5 = inlined_call_operand.hbm [shape: f32[1,256], index: 5, kind: input, shape index: {}]   ;;  %s13975_s6 = inlined_call_operand.hbm [shape: f32[1,256], index: 6, kind: input, shape index: {}]   ;;  %s13976_s7 = inlined_call_operand.vmem [shape: f32[256,32], index: 7, kind: input, shape index: {}]   ;;  %s13977_s8 = inlined_call_operand.hbm [shape: f32[1,32], index: 8, kind: input, shape index: {}]   ;;  %s13978_s9 = inlined_call_operand.hbm [shape: f32[1,32], index: 9, kind: input, shape index: {}]   ;;  %s13979_s10 = inlined_call_operand.hbm [shape: f32[32,128], index: 10, kind: input, shape index: {}]   ;;  %s13980_s11 = inlined_call_operand.hbm [shape: f32[1,128], index: 11, kind: input, shape index: {}]   ;;  %s13981_s12 = inlined_call_operand.hbm [shape: f32[2,128], index: 12, kind: output, shape index: {}]  }
   0x1   :  { %18 = vsyncpa [#allocation6], 0 }
   0x2   :  { %19 = vsyncpa [#allocation9], 0 }
   0x3   :  { %20 = vsyncpa [#allocation12], 0 }
   0x4   :  { %21 = vsyncpa [#allocation15], 0 }
   0x5   :  { %22 = vsyncpa [#allocation18], 0 }
   0x6   :  { %23 = vsyncpa [#allocation4], 0  ;;  %s11492_s21 = smov [#allocation5]   ;;  %s11493_s23 = smov [#allocation8]  }
   0x7   :  { %s44_s22 = sshll.u32 %s11492_s21, 4  ;;  %s63_s24 = sshll.u32 %s11493_s23, 4  ;;  %s45_s22 = int_to_ptr.vmem [resolvable:$true] %s44_s22  ;;  %s11577_s24 = int_to_ptr.vmem [resolvable:$true] %s63_s24 }
   0x8   :  { %s11236_s27 = scalar_lea.hbm %s13971_s2, 144 }
   0x9   :  { %p11237_p0 = scmp.ne.s32.totalorder %s13971_s2, %s11236_s27  ;;  %p11240_p1 = scmp.lt.u32.totalorder %s11236_s27, %s13971_s2 }
   0xb   :  { %p11242_p2 = pnand %p11240_p1, %p11237_p0 }
   0xd   :  { %11245 = shalt.err (!%p11242_p2)
}
   0xe   :  { %s11246_s14 = scalar_lea.vmem %s45_s22, 144  ;;  %s11250_s15 = scalar_lea.vmem %s45_s22, 160 }
   0xf   :  { %p11247_p3 = scmp.ne.s32.totalorder %s45_s22, %s11246_s14  ;;  %p11251_p4 = scmp.lt.s32.totalorder %s45_s22, %s45_s22 }
  0x10   :  { %p11252_p5 = scmp.lt.s32.totalorder %s11250_s15, %s11246_s14 }
  0x12   :  { %p11253_p6 = por %p11252_p5, %p11251_p4 }
  0x14   :  { %p11254_p7 = pnand %p11253_p6, %p11247_p3 }
  0x16   :  { %11257 = shalt.err (!%p11254_p7)
}
  0x17   :  { %47 = dma.hbm_to_vmem [thread:$0]  %s13971_s2, 144, %s45_s22, [#allocation6]  }
  0x18   :  { %s11258_s20 = scalar_lea.hbm %s13973_s4, 18432 }
  0x19   :  { %p11259_p8 = scmp.ne.s32.totalorder %s13973_s4, %s11258_s20  ;;  %p11262_p9 = scmp.lt.u32.totalorder %s11258_s20, %s13973_s4 }
  0x1b   :  { %p11264_p10 = pnand %p11262_p9, %p11259_p8 }
  0x1d   :  { %11267 = shalt.err (!%p11264_p10)
}
  0x1e   :  { %s11268_s27 = scalar_lea.vmem %s11577_s24, 18432  ;;  %p11273_p12 = scmp.lt.s32.totalorder %s11577_s24, %s11577_s24 }
  0x1f   :  { %p11269_p11 = scmp.ne.s32.totalorder %s11577_s24, %s11268_s27  ;;  %p11274_p13 = scmp.lt.s32.totalorder %s11268_s27, %s11268_s27 }
  0x21   :  { %p11275_p0 = por %p11274_p13, %p11273_p12 }
  0x23   :  { %p11276_p1 = pnand %p11275_p0, %p11269_p11 }
  0x25   :  { %11279 = shalt.err (!%p11276_p1)
}
  0x26   :  { %s11494_s2 = smov 128   ;;  %s11495_s22 = smov 8  }
  0x27   :  { %69 = dma.hbm_to_vmem [thread:$0]  %s13973_s4, 18432, %s11577_s24, [#allocation9], %s11494_s2, %s11494_s2, %s11495_s22  }
  0x28   :  { %s11496_s30 = smov [#allocation11]   ;;  %s11497_s14 = smov [#allocation14]  }
  0x29   :  { %s86_s13 = sshll.u32 %s11496_s30, 4  ;;  %s108_s15 = sshll.u32 %s11497_s14, 4  ;;  %s87_s13 = int_to_ptr.vmem [resolvable:$true] %s86_s13  ;;  %s109_s15 = int_to_ptr.vmem [resolvable:$true] %s108_s15 }
  0x2a   :  { %s11280_s18 = scalar_lea.hbm %s13975_s6, 32 }
  0x2b   :  { %p11281_p2 = scmp.ne.s32.totalorder %s13975_s6, %s11280_s18  ;;  %p11284_p3 = scmp.lt.u32.totalorder %s11280_s18, %s13975_s6 }
  0x2d   :  { %p11286_p4 = pnand %p11284_p3, %p11281_p2 }
  0x2f   :  { %11289 = shalt.err (!%p11286_p4)
}
  0x30   :  { %s11290_s4 = scalar_lea.vmem %s87_s13, 32  ;;  %p11295_p6 = scmp.lt.s32.totalorder %s87_s13, %s87_s13 }
  0x31   :  { %p11291_p5 = scmp.ne.s32.totalorder %s87_s13, %s11290_s4  ;;  %p11296_p7 = scmp.lt.s32.totalorder %s11290_s4, %s11290_s4 }
  0x33   :  { %p11297_p8 = por %p11296_p7, %p11295_p6 }
  0x35   :  { %p11298_p9 = pnand %p11297_p8, %p11291_p5 }
  0x37   :  { %11301 = shalt.err (!%p11298_p9)
}
  0x38   :  { %89 = dma.hbm_to_vmem [thread:$0]  %s13975_s6, 32, %s87_s13, [#allocation12]  }
  0x39   :  { %s11302_s28 = scalar_lea.hbm %s13978_s9, 16 }
  0x3a   :  { %p11303_p10 = scmp.ne.s32.totalorder %s13978_s9, %s11302_s28  ;;  %p11306_p11 = scmp.lt.u32.totalorder %s11302_s28, %s13978_s9 }
  0x3c   :  { %p11308_p12 = pnand %p11306_p11, %p11303_p10 }
  0x3e   :  { %11311 = shalt.err (!%p11308_p12)
}
  0x3f   :  { %s11312_s17 = scalar_lea.vmem %s109_s15, 16  ;;  %s11316_s18 = scalar_lea.vmem %s109_s15, 32 }
  0x40   :  { %p11313_p13 = scmp.ne.s32.totalorder %s109_s15, %s11312_s17  ;;  %p11317_p0 = scmp.lt.s32.totalorder %s109_s15, %s109_s15 }
  0x41   :  { %p11318_p1 = scmp.lt.s32.totalorder %s11316_s18, %s11312_s17 }
  0x43   :  { %p11319_p2 = por %p11318_p1, %p11317_p0 }
  0x45   :  { %p11320_p3 = pnand %p11319_p2, %p11313_p13 }
  0x47   :  { %11323 = shalt.err (!%p11320_p3)
}
  0x48   :  { %111 = dma.hbm_to_vmem [thread:$0]  %s13978_s9, 16, %s109_s15, [#allocation15]  }
  0x49   :  { %s11498_s19 = smov [#allocation2]   ;;  %s11324_s4 = scalar_lea.hbm %s13970_s1, 64512 }
  0x4a   :  { %s31_s20 = sshll.u32 %s11498_s19, 4  ;;  %p11325_p4 = scmp.ne.s32.totalorder %s13970_s1, %s11324_s4  ;;  %s32_s20 = int_to_ptr.vmem [resolvable:$true] %s31_s20 }
  0x4b   :  { %p11328_p5 = scmp.lt.u32.totalorder %s11324_s4, %s13970_s1 }
  0x4d   :  { %p11330_p6 = pnand %p11328_p5, %p11325_p4 }
  0x4f   :  { %11333 = shalt.err (!%p11330_p6)
}
  0x50   :  { %s11334_s28 = scalar_lea.vmem %s32_s20, 64512  ;;  %p11339_p8 = scmp.lt.s32.totalorder %s32_s20, %s32_s20 }
  0x51   :  { %p11335_p7 = scmp.ne.s32.totalorder %s32_s20, %s11334_s28  ;;  %p11340_p9 = scmp.lt.s32.totalorder %s11334_s28, %s11334_s28 }
  0x53   :  { %p11341_p10 = por %p11340_p9, %p11339_p8 }
  0x55   :  { %p11342_p11 = pnand %p11341_p10, %p11335_p7 }
  0x57   :  { %11345 = shalt.err (!%p11342_p11)
}
  0x58   :  { %s11499_s9 = smov 576   ;;  %s11500_s15 = smov 36  }
  0x59   :  { %37 = dma.hbm_to_vmem [thread:$0]  %s13970_s1, 64512, %s32_s20, [#allocation3], %s11499_s9, %s11499_s9, %s11500_s15  }
  0x5a   :  { %s11501_s14 = smov [#allocation7]   ;;  %s11502_s17 = smov [#allocation10]  }
  0x5b   :  { %s54_s16 = sshll.u32 %s11501_s14, 4  ;;  %s76_s18 = sshll.u32 %s11502_s17, 4  ;;  %s55_s16 = int_to_ptr.vmem [resolvable:$true] %s54_s16  ;;  %s77_s18 = int_to_ptr.vmem [resolvable:$true] %s76_s18 }
  0x5c   :  { %s11346_s19 = scalar_lea.hbm %s13972_s3, 144 }
  0x5d   :  { %p11347_p12 = scmp.ne.s32.totalorder %s13972_s3, %s11346_s19  ;;  %p11350_p13 = scmp.lt.u32.totalorder %s11346_s19, %s13972_s3 }
  0x5f   :  { %p11352_p0 = pnand %p11350_p13, %p11347_p12 }
  0x61   :  { %11355 = shalt.err (!%p11352_p0)
}
  0x62   :  { %s11356_s1 = scalar_lea.vmem %s55_s16, 144  ;;  %s11360_s20 = scalar_lea.vmem %s55_s16, 160 }
  0x63   :  { %p11357_p1 = scmp.ne.s32.totalorder %s55_s16, %s11356_s1  ;;  %p11361_p2 = scmp.lt.s32.totalorder %s55_s16, %s55_s16 }
  0x64   :  { %p11362_p3 = scmp.lt.s32.totalorder %s11360_s20, %s11356_s1 }
  0x66   :  { %p11363_p4 = por %p11362_p3, %p11361_p2 }
  0x68   :  { %p11364_p5 = pnand %p11363_p4, %p11357_p1 }
  0x6a   :  { %11367 = shalt.err (!%p11364_p5)
}
  0x6b   :  { %57 = dma.hbm_to_vmem [thread:$0]  %s13972_s3, 144, %s55_s16, [#allocation6]  }
  0x6c   :  { %s11368_s9 = scalar_lea.hbm %s13974_s5, 32 }
  0x6d   :  { %p11369_p6 = scmp.ne.s32.totalorder %s13974_s5, %s11368_s9  ;;  %p11372_p7 = scmp.lt.u32.totalorder %s11368_s9, %s13974_s5 }
  0x6f   :  { %p11374_p8 = pnand %p11372_p7, %p11369_p6 }
  0x71   :  { %11377 = shalt.err (!%p11374_p8)
}
  0x72   :  { %s11378_s17 = scalar_lea.vmem %s77_s18, 32  ;;  %p11383_p10 = scmp.lt.s32.totalorder %s77_s18, %s77_s18 }
  0x73   :  { %p11379_p9 = scmp.ne.s32.totalorder %s77_s18, %s11378_s17  ;;  %p11384_p11 = scmp.lt.s32.totalorder %s11378_s17, %s11378_s17 }
  0x75   :  { %p11385_p12 = por %p11384_p11, %p11383_p10 }
  0x77   :  { %p11386_p13 = pnand %p11385_p12, %p11379_p9 }
  0x79   :  { %11389 = shalt.err (!%p11386_p13)
}
  0x7a   :  { %79 = dma.hbm_to_vmem [thread:$0]  %s13974_s5, 32, %s77_s18, [#allocation9]  }
  0x7b   :  { %s11503_s6 = smov [#allocation13]   ;;  %s11504_s19 = smov [#allocation16]  }
  0x7c   :  { %s98_s13 = sshll.u32 %s11503_s6, 4  ;;  %s117_s21 = sshll.u32 %s11504_s19, 4  ;;  %s99_s13 = int_to_ptr.vmem [resolvable:$true] %s98_s13  ;;  %s118_s21 = int_to_ptr.vmem [resolvable:$true] %s117_s21 }
  0x7d   :  { %s11390_s24 = scalar_lea.hbm %s13977_s8, 16 }
  0x7e   :  { %p11391_p0 = scmp.ne.s32.totalorder %s13977_s8, %s11390_s24  ;;  %p11394_p1 = scmp.lt.u32.totalorder %s11390_s24, %s13977_s8 }
  0x80   :  { %p11396_p2 = pnand %p11394_p1, %p11391_p0 }
  0x82   :  { %11399 = shalt.err (!%p11396_p2)
}
  0x83   :  { %s11400_s5 = scalar_lea.vmem %s99_s13, 16  ;;  %s11404_s18 = scalar_lea.vmem %s99_s13, 32 }
  0x84   :  { %p11401_p3 = scmp.ne.s32.totalorder %s99_s13, %s11400_s5  ;;  %p11405_p4 = scmp.lt.s32.totalorder %s99_s13, %s99_s13 }
  0x85   :  { %p11406_p5 = scmp.lt.s32.totalorder %s11404_s18, %s11400_s5 }
  0x87   :  { %p11407_p6 = por %p11406_p5, %p11405_p4 }
  0x89   :  { %p11408_p7 = pnand %p11407_p6, %p11401_p3 }
  0x8b   :  { %11411 = shalt.err (!%p11408_p7)
}
  0x8c   :  { %101 = dma.hbm_to_vmem [thread:$0]  %s13977_s8, 16, %s99_s13, [#allocation12]  }
  0x8d   :  { %s11412_s29 = scalar_lea.hbm %s13979_s10, 512 }
  0x8e   :  { %p11413_p8 = scmp.ne.s32.totalorder %s13979_s10, %s11412_s29  ;;  %p11416_p9 = scmp.lt.u32.totalorder %s11412_s29, %s13979_s10 }
  0x90   :  { %p11418_p10 = pnand %p11416_p9, %p11413_p8 }
  0x92   :  { %11421 = shalt.err (!%p11418_p10)
}
  0x93   :  { %s11422_s16 = scalar_lea.vmem %s118_s21, 512  ;;  %p11427_p12 = scmp.lt.s32.totalorder %s118_s21, %s118_s21 }
  0x94   :  { %p11423_p11 = scmp.ne.s32.totalorder %s118_s21, %s11422_s16  ;;  %p11428_p13 = scmp.lt.s32.totalorder %s11422_s16, %s11422_s16 }
  0x96   :  { %p11429_p0 = por %p11428_p13, %p11427_p12 }
  0x98   :  { %p11430_p1 = pnand %p11429_p0, %p11423_p11 }
  0x9a   :  { %11433 = shalt.err (!%p11430_p1)
}
  0x9b   :  { %123 = dma.hbm_to_vmem [thread:$0]  %s13979_s10, 512, %s118_s21, [#allocation15], %s11494_s2, %s11494_s2, %s11495_s22  }
  0x9c   :  { %s11505_s13 = smov [#allocation17]   ;;  %s11434_s24 = scalar_lea.hbm %s13980_s11, 16 }
  0x9d   :  { %s130_s19 = sshll.u32 %s11505_s13, 4  ;;  %p11435_p2 = scmp.ne.s32.totalorder %s13980_s11, %s11434_s24  ;;  %s131_s19 = int_to_ptr.vmem [resolvable:$true] %s130_s19 }
  0x9e   :  { %p11438_p3 = scmp.lt.u32.totalorder %s11434_s24, %s13980_s11 }
  0xa0   :  { %p11440_p4 = pnand %p11438_p3, %p11435_p2 }
  0xa2   :  { %11443 = shalt.err (!%p11440_p4)
}
  0xa3   :  { %s11444_s5 = scalar_lea.vmem %s131_s19, 16  ;;  %s11448_s10 = scalar_lea.vmem %s131_s19, 32 }
  0xa4   :  { %p11445_p5 = scmp.ne.s32.totalorder %s131_s19, %s11444_s5  ;;  %p11449_p6 = scmp.lt.s32.totalorder %s131_s19, %s131_s19 }
  0xa5   :  { %p11450_p7 = scmp.lt.s32.totalorder %s11448_s10, %s11444_s5 }
  0xa7   :  { %p11451_p8 = por %p11450_p7, %p11449_p6 }
  0xa9   :  { %p11452_p9 = pnand %p11451_p8, %p11445_p5 }
  0xab   :  { %11455 = shalt.err (!%p11452_p9)
}
  0xac   :  { %133 = dma.hbm_to_vmem [thread:$0]  %s13980_s11, 16, %s131_s19, [#allocation18]  }
  0xad   :  { %11478 = dma.done.wait [#allocation3], 64512  }
  0xae   :  { %11479 = vsyncadd [#allocation3], 4294902784 }
  0xaf   :  { %11480 = dma.done.wait [#allocation6], 288  }
  0xb0   :  { %11481 = vsyncadd [#allocation6], 4294967008 }
  0xb1   :  { %11482 = dma.done.wait [#allocation9], 18464  }
  0xb2   :  { %11483 = vsyncadd [#allocation9], 4294948832 }
  0xb3   :  { %11484 = dma.done.wait [#allocation12], 48  }
  0xb4   :  { %11485 = vsyncadd [#allocation12], 4294967248 }
  0xb5   :  { %11486 = dma.done.wait [#allocation15], 528  }
  0xb6   :  { %11487 = vsyncadd [#allocation15], 4294966768 }
  0xb7   :  { %11488 = dma.done.wait [#allocation18], 16  }
  0xb8   :  { %11489 = vsyncadd [#allocation18], 4294967280  ;;  %v9420_v0 = vld [vmem:[#allocation2 + $0x4] ss:$36 sps:$4 sm:$0xff]   ;;  %v9422_v1 = vld [vmem:[#allocation2 + $0x48c] ss:$36 sps:$4 sm:$0xff]   ;;  %v737_v38 = vlaneseq }
  0xb9   :  { %3356 = vmatprep.subr.bf16.mxu0 %v9420_v0  ;;  %v9424_v2 = vld [vmem:[#allocation2] ss:$36 sps:$4 sm:$0xff]   ;;  %v9425_v3 = vld [vmem:[#allocation2 + $0x488] ss:$36 sps:$4 sm:$0xff]   ;;  %3561 = vmatprep.subr.bf16.mxu1 %v9422_v1  ;;  %v9428_v5 = vld [vmem:[#allocation2 + $0x4d4] ss:$36 sps:$4 sm:$0xff]  }
  0xba   :  { %v9426_v4 = vld [vmem:[#allocation2 + $0x4c] ss:$36 sps:$4 sm:$0xff]   ;;  %3357 = vmatpush1.bf16.msra.mxu0 %v9424_v2  ;;  %3562 = vmatpush1.bf16.msra.mxu1 %v9425_v3  ;;  %v9432_v8 = vld [vmem:[#allocation2 + $0x94] ss:$36 sps:$4 sm:$0xff]   ;;  %v9434_v9 = vld [vmem:[#allocation2 + $0x51c] ss:$36 sps:$4 sm:$0xff]  }
  0xbb   :  { %v9430_v6 = vld [vmem:[#allocation2 + $0x48] ss:$36 sps:$4 sm:$0xff]   ;;  %3358 = vmatprep.subr.bf16.mxu0 %v9426_v4  ;;  %v9431_v7 = vld [vmem:[#allocation2 + $0x4d0] ss:$36 sps:$4 sm:$0xff]   ;;  %3563 = vmatprep.subr.bf16.mxu1 %v9428_v5  ;;  %v9437_v11 = vld [vmem:[#allocation2 + $0x518] ss:$36 sps:$4 sm:$0xff]  }
  0xbc   :  { %v9436_v10 = vld [vmem:[#allocation2 + $0x90] ss:$36 sps:$4 sm:$0xff]   ;;  %v9438_v12 = vld [vmem:[#allocation2 + $0xdc] ss:$36 sps:$4 sm:$0xff]   ;;  %v9440_v13 = vld [vmem:[#allocation2 + $0x564] ss:$36 sps:$4 sm:$0xff]  }
  0xbd   :  { %v9442_v14 = vld [vmem:[#allocation2 + $0xd8] ss:$36 sps:$4 sm:$0xff]   ;;  %v9443_v15 = vld [vmem:[#allocation2 + $0x560] ss:$36 sps:$4 sm:$0xff]   ;;  %v9446_v17 = vld [vmem:[#allocation2 + $0x5ac] ss:$36 sps:$4 sm:$0xff]  }
  0xbe   :  { %3359 = vmatpush1.bf16.msra.mxu0 %v9430_v6  ;;  %3564 = vmatpush1.bf16.msra.mxu1 %v9431_v7  ;;  %v9444_v16 = vld [vmem:[#allocation2 + $0x124] ss:$36 sps:$4 sm:$0xff]   ;;  %v9450_v20 = vld [vmem:[#allocation2 + $0x16c] ss:$36 sps:$4 sm:$0xff]   ;;  %v9452_v21 = vld [vmem:[#allocation2 + $0x5f4] ss:$36 sps:$4 sm:$0xff]  }
  0xbf   :  { %3360 = vmatprep.subr.bf16.mxu0 %v9432_v8  ;;  %3565 = vmatprep.subr.bf16.mxu1 %v9434_v9  ;;  %v9448_v18 = vld [vmem:[#allocation2 + $0x120] ss:$36 sps:$4 sm:$0xff]   ;;  %v9449_v19 = vld [vmem:[#allocation2 + $0x5a8] ss:$36 sps:$4 sm:$0xff]   ;;  %v9455_v23 = vld [vmem:[#allocation2 + $0x5f0] ss:$36 sps:$4 sm:$0xff]  }
  0xc0   :  { %v9454_v22 = vld [vmem:[#allocation2 + $0x168] ss:$36 sps:$4 sm:$0xff]   ;;  %v9456_v24 = vld [vmem:[#allocation2 + $0x1b4] ss:$36 sps:$4 sm:$0xff]   ;;  %v9458_v25 = vld [vmem:[#allocation2 + $0x63c] ss:$36 sps:$4 sm:$0xff]  }
  0xc1   :  { %v9460_v26 = vld [vmem:[#allocation2 + $0x1b0] ss:$36 sps:$4 sm:$0xff]   ;;  %v9461_v27 = vld [vmem:[#allocation2 + $0x638] ss:$36 sps:$4 sm:$0xff]   ;;  %v9464_v29 = vld [vmem:[#allocation2 + $0x684] ss:$36 sps:$4 sm:$0xff]  }
  0xc2   :  { %3361 = vmatpush1.bf16.msra.mxu0 %v9436_v10  ;;  %3566 = vmatpush1.bf16.msra.mxu1 %v9437_v11  ;;  %v9462_v28 = vld [vmem:[#allocation2 + $0x1fc] ss:$36 sps:$4 sm:$0xff]   ;;  %v9468_v32 = vld [vmem:[#allocation2 + $0x244] ss:$36 sps:$4 sm:$0xff]   ;;  %v9470_v33 = vld [vmem:[#allocation2 + $0x6cc] ss:$36 sps:$4 sm:$0xff]  }
  0xc3   :  { %3362 = vmatprep.subr.bf16.mxu0 %v9438_v12  ;;  %3567 = vmatprep.subr.bf16.mxu1 %v9440_v13  ;;  %v9466_v30 = vld [vmem:[#allocation2 + $0x1f8] ss:$36 sps:$4 sm:$0xff]   ;;  %v9467_v31 = vld [vmem:[#allocation2 + $0x680] ss:$36 sps:$4 sm:$0xff]   ;;  %v9473_v35 = vld [vmem:[#allocation2 + $0x6c8] ss:$36 sps:$4 sm:$0xff]  }
  0xc4   :  { %v9472_v34 = vld [vmem:[#allocation2 + $0x240] ss:$36 sps:$4 sm:$0xff]   ;;  %v11506_v36 = vmov 1983009808   ;;  %v9474_v39 = vld [vmem:[#allocation2 + $0x28c] ss:$36 sps:$4 sm:$0xff]  }
  0xc5   :  { %v735_v37 = vunpack.c.l.s4 %v11506_v36  ;;  %v9476_v40 = vld [vmem:[#allocation2 + $0x714] ss:$36 sps:$4 sm:$0xff]   ;;  %v9478_v41 = vld [vmem:[#allocation2 + $0x288] ss:$36 sps:$4 sm:$0xff]   ;;  %v11710_v43 = vshrl.u32 %v737_v38, 7  ;;  %v165_v52 = vld [vmem:[%s13969_s0] sm:$0xff] }
  0xc6   :  { %3363 = vmatpush1.bf16.msra.mxu0 %v9442_v14  ;;  %3568 = vmatpush1.bf16.msra.mxu1 %v9443_v15  ;;  %v9479_v44 = vld [vmem:[#allocation2 + $0x710] ss:$36 sps:$4 sm:$0xff]   ;;  %v9482_v46 = vld [vmem:[#allocation2 + $0x75c] ss:$36 sps:$4 sm:$0xff]   ;;  %v9488_v51 = vld [vmem:[#allocation2 + $0x7a4] ss:$36 sps:$4 sm:$0xff]   ;;  %v733_v55 = vcombine.high %v165_v52, %v165_v52 }
  0xc7   :  { %3364 = vmatprep.subr.bf16.mxu0 %v9444_v16  ;;  %3569 = vmatprep.subr.bf16.mxu1 %v9446_v17  ;;  %v736_v42 = vunpack.c.0.s8 %v735_v37  ;;  %v9480_v45 = vld [vmem:[#allocation2 + $0x2d4] ss:$36 sps:$4 sm:$0xff]   ;;  %v9486_v50 = vld [vmem:[#allocation2 + $0x31c] ss:$36 sps:$4 sm:$0xff]   ;;  %v9492_v57 = vld [vmem:[#allocation2 + $0x364] ss:$36 sps:$4 sm:$0xff]  }
  0xc8   :  { %v9484_v47 = vld [vmem:[#allocation2 + $0x2d0] ss:$36 sps:$4 sm:$0xff]   ;;  %v9485_v48 = vld [vmem:[#allocation2 + $0x758] ss:$36 sps:$4 sm:$0xff]   ;;  %v9491_v56 = vld [vmem:[#allocation2 + $0x7a0] ss:$36 sps:$4 sm:$0xff]  }
  0xc9   :  { %v11713_v49 = vsub.s32 %v736_v42, %v11710_v43  ;;  %v9490_v53 = vld [vmem:[#allocation2 + $0x318] ss:$36 sps:$4 sm:$0xff]   ;;  %v9494_v58 = vld [vmem:[#allocation2 + $0x7ec] ss:$36 sps:$4 sm:$0xff]   ;;  %v9496_v61 = vld [vmem:[#allocation2 + $0x360] ss:$36 sps:$4 sm:$0xff]  }
  0xca   :  { %3365 = vmatpush1.bf16.msra.mxu0 %v9448_v18  ;;  %3570 = vmatpush1.bf16.msra.mxu1 %v9449_v19  ;;  %v9497_v0 = vld [vmem:[#allocation2 + $0x7e8] ss:$36 sps:$4 sm:$0xff]   ;;  %v9500_v2 = vld [vmem:[#allocation2 + $0x834] ss:$36 sps:$4 sm:$0xff]   ;;  %v9506_v7 = vld [vmem:[#allocation2 + $0x87c] ss:$36 sps:$4 sm:$0xff]  }
  0xcb   :  { %3366 = vmatprep.subr.bf16.mxu0 %v9450_v20  ;;  %3571 = vmatprep.subr.bf16.mxu1 %v9452_v21  ;;  %v11719_v54 = vrot.slane %v165_v52, %v11713_v49  ;;  %v11726_v60 = vrot.slane %v733_v55, %v11713_v49  ;;  %v9498_v1 = vld [vmem:[#allocation2 + $0x3ac] ss:$36 sps:$4 sm:$0xff]   ;;  %v9504_v6 = vld [vmem:[#allocation2 + $0x3f4] ss:$36 sps:$4 sm:$0xff]   ;;  %v9510_v10 = vld [vmem:[#allocation2 + $0x43c] ss:$36 sps:$4 sm:$0xff]  }
  0xcc   :  { %v9502_v4 = vld [vmem:[#allocation2 + $0x3a8] ss:$36 sps:$4 sm:$0xff]   ;;  %v9503_v5 = vld [vmem:[#allocation2 + $0x830] ss:$36 sps:$4 sm:$0xff]   ;;  %v9509_v9 = vld [vmem:[#allocation2 + $0x878] ss:$36 sps:$4 sm:$0xff]  }
  0xcd   :  { %14237 = vst [vmem:[#allocation27_spill] sm:$0xff] %v11719_v54  ;;  %v11723_v59 = vcombine.high %v11719_v54, %v11719_v54  ;;  %14239 = vst [vmem:[#allocation29_spill] sm:$0xff] %v11726_v60  ;;  %v11734_v63 = vcombine.high %v11726_v60, %v11726_v60  ;;  %v9508_v8 = vld [vmem:[#allocation2 + $0x3f0] ss:$36 sps:$4 sm:$0xff]   ;;  %v9512_v11 = vld [vmem:[#allocation2 + $0x8c4] ss:$36 sps:$4 sm:$0xff]   ;;  %v11744_v17 = vpack.c.bf16 %v11719_v54, %v11719_v54 }
  0xce   :  { %3367 = vmatpush1.bf16.msra.mxu0 %v9454_v22  ;;  %3572 = vmatpush1.bf16.msra.mxu1 %v9455_v23  ;;  %v9514_v12 = vld [vmem:[#allocation2 + $0x438] ss:$36 sps:$4 sm:$0xff]   ;;  %v9515_v13 = vld [vmem:[#allocation2 + $0x8c0] ss:$36 sps:$4 sm:$0xff]   ;;  %v9522_v15 = vld [vmem:[#allocation2 + $0x90c] ss:$36 sps:$4 sm:$0xff]   ;;  %v11748_v18 = vpack.c.bf16 %v11726_v60, %v11726_v60 }
  0xcf   :  { %3368 = vmatprep.subr.bf16.mxu0 %v9456_v24  ;;  %3573 = vmatprep.subr.bf16.mxu1 %v9458_v25  ;;  %14238 = vst [vmem:[#allocation28_spill] sm:$0xff] %v11723_v59  ;;  %v11730_v62 = vpack.c.bf16 %v11723_v59, %v11723_v59  ;;  %14240 = vst [vmem:[#allocation30_spill] sm:$0xff] %v11734_v63  ;;  %v11738_v3 = vpack.c.bf16 %v11734_v63, %v11734_v63  ;;  %v9518_v14 = vld [vmem:[#allocation2 + $0x484] ss:$36 sps:$4 sm:$0xff]   ;;  %v9525_v20 = vld [vmem:[#allocation2 + $0x4cc] ss:$36 sps:$4 sm:$0xff]  }
  0xd0   :  { %v9516_v16 = vld [vmem:[#allocation2 + $0x480] ss:$36 sps:$4 sm:$0xff]   ;;  %v9520_v19 = vld [vmem:[#allocation2 + $0x908] ss:$36 sps:$4 sm:$0xff]   ;;  %v9528_v21 = vld [vmem:[#allocation2 + $0x954] ss:$36 sps:$4 sm:$0xff]  }
  0xd1   :  { %3388 = vmatprep.mubr.bf16.mxu0 %v11730_v62  ;;  %3593 = vmatprep.mubr.bf16.mxu1 %v11738_v3  ;;  %v9523_v22 = vld [vmem:[#allocation2 + $0x4c8] ss:$36 sps:$4 sm:$0xff]   ;;  %v9526_v23 = vld [vmem:[#allocation2 + $0x950] ss:$36 sps:$4 sm:$0xff]   ;;  %v9534_v25 = vld [vmem:[#allocation2 + $0x99c] ss:$36 sps:$4 sm:$0xff]  }
  0xd2   :  { %3369 = vmatpush1.bf16.msra.mxu0 %v9460_v26  ;;  %3574 = vmatpush1.bf16.msra.mxu1 %v9461_v27  ;;  %v9531_v24 = vld [vmem:[#allocation2 + $0x514] ss:$36 sps:$4 sm:$0xff]   ;;  %v9549_v36 = vld [vmem:[#allocation2 + $0x5ec] ss:$36 sps:$4 sm:$0xff]   ;;  %v9562_v55 = vld [vmem:[#allocation2 + $0xb00] ss:$36 sps:$4 sm:$0xff]  }
  0xd3   :  { %3370 = vmatprep.subr.bf16.mxu0 %v9462_v28  ;;  %3575 = vmatprep.subr.bf16.mxu1 %v9464_v29  ;;  %v9529_v26 = vld [vmem:[#allocation2 + $0x510] ss:$36 sps:$4 sm:$0xff]   ;;  %v9532_v27 = vld [vmem:[#allocation2 + $0x998] ss:$36 sps:$4 sm:$0xff]   ;;  %v9540_v29 = vld [vmem:[#allocation2 + $0x9e4] ss:$36 sps:$4 sm:$0xff]  }
  0xd4   :  { %v9537_v28 = vld [vmem:[#allocation2 + $0x55c] ss:$36 sps:$4 sm:$0xff]   ;;  %v9552_v37 = vld [vmem:[#allocation2 + $0xa74] ss:$36 sps:$4 sm:$0xff]   ;;  %v9547_v38 = vld [vmem:[#allocation2 + $0x5e8] ss:$36 sps:$4 sm:$0xff]  }
  0xd5   :  { %v166_v42 = vld [vmem:[%s13969_s0 + $0x8] sm:$0x3f]  ;;  %vm11509_vm0 = vmmov 0   ;;  %v10429_v60 = vld [vmem:[#allocation2 + $0x638] ss:$36 sps:$4 sm:$0xff]   ;;  %vm7647_vm1 = vcmask 261120  }
  0xd6   :  { %3371 = vmatpush1.bf16.msra.mxu0 %v9466_v30  ;;  %3576 = vmatpush1.bf16.msra.mxu1 %v9467_v31  ;;  %v9535_v30 = vld [vmem:[#allocation2 + $0x558] ss:$36 sps:$4 sm:$0xff]   ;;  %v9538_v31 = vld [vmem:[#allocation2 + $0x9e0] ss:$36 sps:$4 sm:$0xff]   ;;  %vm13882_vm2 = vmpackc.low %vm7647_vm1, %vm7647_vm1  ;;  %vm7978_vm3 = vcmask 1041408  }
  0xd7   :  { %3372 = vmatprep.subr.bf16.mxu0 %v9468_v32  ;;  %3577 = vmatprep.subr.bf16.mxu1 %v9470_v33  ;;  %v9543_v32 = vld [vmem:[#allocation2 + $0x5a4] ss:$36 sps:$4 sm:$0xff]   ;;  %v9546_v33 = vld [vmem:[#allocation2 + $0xa2c] ss:$36 sps:$4 sm:$0xff]   ;;  %v12038_v54 = vld [vmem:[#allocation2 + $0x1fc] ss:$36 sps:$4 sm:$0xff]  }
  0xd8   :  { %14263 = vst [vmem:[#allocation53_spill] sm:$0xff] %v12038_v54 }
  0xda   :  { %3373 = vmatpush1.bf16.msra.mxu0 %v9472_v34  ;;  %3578 = vmatpush1.bf16.msra.mxu1 %v9473_v35  ;;  %v9541_v34 = vld [vmem:[#allocation2 + $0x5a0] ss:$36 sps:$4 sm:$0xff]   ;;  %v9544_v35 = vld [vmem:[#allocation2 + $0xa28] ss:$36 sps:$4 sm:$0xff]  }
  0xdb   :  { %3374 = vmatprep.subr.bf16.mxu0 %v9474_v39  ;;  %3579 = vmatprep.subr.bf16.mxu1 %v9476_v40  ;;  %v9550_v39 = vld [vmem:[#allocation2 + $0xa70] ss:$36 sps:$4 sm:$0xff]  }
  0xdc   :  { %v9555_v40 = vld [vmem:[#allocation2 + $0x634] ss:$36 sps:$4 sm:$0xff]  }
  0xde   :  { %3375 = vmatpush1.bf16.msra.mxu0 %v9478_v41  ;;  %3580 = vmatpush1.bf16.msra.mxu1 %v9479_v44  ;;  %v9558_v41 = vld [vmem:[#allocation2 + $0xabc] ss:$36 sps:$4 sm:$0xff]   ;;  %v9553_v44 = vld [vmem:[#allocation2 + $0x630] ss:$36 sps:$4 sm:$0xff]  }
  0xdf   :  { %3376 = vmatprep.subr.bf16.mxu0 %v9480_v45  ;;  %3581 = vmatprep.subr.bf16.mxu1 %v9482_v46  ;;  %v9556_v45 = vld [vmem:[#allocation2 + $0xab8] ss:$36 sps:$4 sm:$0xff]   ;;  %v11757_v46 = vrot.slane %v166_v42, %v11713_v49 }
  0xe1   :  { %14241 = vst [vmem:[#allocation31_spill] sm:$0xff] %v11757_v46 }
  0xe2   :  { %3377 = vmatpush1.bf16.msra.mxu0 %v9484_v47  ;;  %3582 = vmatpush1.bf16.msra.mxu1 %v9485_v48  ;;  %v750_v47 = vcombine.high %v166_v42, %v166_v42  ;;  %v9561_v48 = vld [vmem:[#allocation2 + $0x67c] ss:$36 sps:$4 sm:$0xff]   ;;  %v13982_v42 = vmov 0  }
  0xe3   :  { %3378 = vmatprep.subr.bf16.mxu0 %v9486_v50  ;;  %3583 = vmatprep.subr.bf16.mxu1 %v9488_v51  ;;  %v9564_v50 = vld [vmem:[#allocation2 + $0xb04] ss:$36 sps:$4 sm:$0xff]   ;;  %v11761_v51 = vcombine.high %v11757_v46, %v11757_v46 }
  0xe4   :  { %v11764_v52 = vrot.slane %v750_v47, %v11713_v49  ;;  %v9573_v49 = vld [vmem:[#allocation2 + $0x70c] ss:$36 sps:$4 sm:$0xff]   ;;  %v9633_v47 = vld [vmem:[#allocation2 + $0x9dc] ss:$36 sps:$4 sm:$0xff]  }
  0xe5   :  { %14242 = vst [vmem:[#allocation32_spill] sm:$0xff] %v11761_v51 }
  0xe6   :  { %3379 = vmatpush1.bf16.msra.mxu0 %v9490_v53  ;;  %3584 = vmatpush1.bf16.msra.mxu1 %v9491_v56  ;;  %14243 = vst [vmem:[#allocation33_spill] sm:$0xff] %v11764_v52  ;;  %v9559_v53 = vld [vmem:[#allocation2 + $0x678] ss:$36 sps:$4 sm:$0xff]   ;;  %v11768_v56 = vpack.c.bf16 %v11761_v51, %v11761_v51 }
  0xe7   :  { %3380 = vmatprep.subr.bf16.mxu0 %v9492_v57  ;;  %3585 = vmatprep.subr.bf16.mxu1 %v9494_v58  ;;  %v9567_v57 = vld [vmem:[#allocation2 + $0x6c4] ss:$36 sps:$4 sm:$0xff]   ;;  %v9570_v58 = vld [vmem:[#allocation2 + $0xb4c] ss:$36 sps:$4 sm:$0xff]  }
  0xea   :  { %3381 = vmatpush1.bf16.msra.mxu0 %v9496_v61  ;;  %3586 = vmatpush1.bf16.msra.mxu1 %v9497_v0  ;;  %v9565_v61 = vld [vmem:[#allocation2 + $0x6c0] ss:$36 sps:$4 sm:$0xff]   ;;  %v9568_v0 = vld [vmem:[#allocation2 + $0xb48] ss:$36 sps:$4 sm:$0xff]  }
  0xeb   :  { %3382 = vmatprep.subr.bf16.mxu0 %v9498_v1  ;;  %3587 = vmatprep.subr.bf16.mxu1 %v9500_v2  ;;  %v9576_v1 = vld [vmem:[#allocation2 + $0xb94] ss:$36 sps:$4 sm:$0xff]   ;;  %v9571_v2 = vld [vmem:[#allocation2 + $0x708] ss:$36 sps:$4 sm:$0xff]  }
  0xee   :  { %3383 = vmatpush1.bf16.msra.mxu0 %v9502_v4  ;;  %3588 = vmatpush1.bf16.msra.mxu1 %v9503_v5  ;;  %v9574_v4 = vld [vmem:[#allocation2 + $0xb90] ss:$36 sps:$4 sm:$0xff]  }
  0xef   :  { %3384 = vmatprep.subr.bf16.mxu0 %v9504_v6  ;;  %3589 = vmatprep.subr.bf16.mxu1 %v9506_v7  ;;  %v9579_v5 = vld [vmem:[#allocation2 + $0x754] ss:$36 sps:$4 sm:$0xff]   ;;  %v9582_v6 = vld [vmem:[#allocation2 + $0xbdc] ss:$36 sps:$4 sm:$0xff]  }
  0xf0   :  { %v9577_v7 = vld [vmem:[#allocation2 + $0x750] ss:$36 sps:$4 sm:$0xff]  }
  0xf2   :  { %3385 = vmatpush1.bf16.msra.mxu0 %v9508_v8  ;;  %3590 = vmatpush1.bf16.msra.mxu1 %v9509_v9  ;;  %v9580_v8 = vld [vmem:[#allocation2 + $0xbd8] ss:$36 sps:$4 sm:$0xff]  }
  0xf3   :  { %3386 = vmatprep.subr.bf16.mxu0 %v9510_v10  ;;  %3591 = vmatprep.subr.bf16.mxu1 %v9512_v11  ;;  %v9585_v9 = vld [vmem:[#allocation2 + $0x79c] ss:$36 sps:$4 sm:$0xff]   ;;  %v9588_v10 = vld [vmem:[#allocation2 + $0xc24] ss:$36 sps:$4 sm:$0xff]  }
  0xf4   :  { %v9583_v11 = vld [vmem:[#allocation2 + $0x798] ss:$36 sps:$4 sm:$0xff]  }
  0xf6   :  { %3387 = vmatpush1.bf16.msra.mxu0 %v9514_v12  ;;  %3592 = vmatpush1.bf16.msra.mxu1 %v9515_v13  ;;  %v9586_v12 = vld [vmem:[#allocation2 + $0xc20] ss:$36 sps:$4 sm:$0xff]  }
  0xf7   :  { %3397 = vmatprep.subr.bf16.mxu0 %v9518_v14  ;;  %3602 = vmatprep.subr.bf16.mxu1 %v9522_v15  ;;  %v9591_v13 = vld [vmem:[#allocation2 + $0x7e4] ss:$36 sps:$4 sm:$0xff]   ;;  %v9594_v14 = vld [vmem:[#allocation2 + $0xc6c] ss:$36 sps:$4 sm:$0xff]  }
  0xf8   :  { %v9589_v15 = vld [vmem:[#allocation2 + $0x7e0] ss:$36 sps:$4 sm:$0xff]  }
  0xf9   :  { %3389 = vmatmul.mubr.bf16.vlgmr.msra.gmra.mrb[0].mxu0 %v11744_v17  ;;  %3594 = vmatmul.mubr.bf16.vlgmr.msra.gmra.mrb[0].mxu1 %v11748_v18 }
  0xfa   :  { %3398 = vmatpush1.bf16.msra.mxu0 %v9516_v16  ;;  %3603 = vmatpush1.bf16.msra.mxu1 %v9520_v19  ;;  %v9592_v16 = vld [vmem:[#allocation2 + $0xc68] ss:$36 sps:$4 sm:$0xff]  }
  0xfb   :  { %3399 = vmatprep.subr.bf16.mxu0 %v9525_v20  ;;  %3604 = vmatprep.subr.bf16.mxu1 %v9528_v21  ;;  %v9597_v19 = vld [vmem:[#allocation2 + $0x82c] ss:$36 sps:$4 sm:$0xff]   ;;  %v9600_v20 = vld [vmem:[#allocation2 + $0xcb4] ss:$36 sps:$4 sm:$0xff]  }
  0xfc   :  { %3429 = vmatprep.mubr.bf16.mxu0 %v11738_v3  ;;  %3634 = vmatprep.mubr.bf16.mxu1 %v11768_v56  ;;  %v9595_v21 = vld [vmem:[#allocation2 + $0x828] ss:$36 sps:$4 sm:$0xff]  }
  0xfe   :  { %3400 = vmatpush1.bf16.msra.mxu0 %v9523_v22  ;;  %3605 = vmatpush1.bf16.msra.mxu1 %v9526_v23  ;;  %v9598_v22 = vld [vmem:[#allocation2 + $0xcb0] ss:$36 sps:$4 sm:$0xff]  }
  0xff   :  { %3401 = vmatprep.subr.bf16.mxu0 %v9531_v24  ;;  %3606 = vmatprep.subr.bf16.mxu1 %v9534_v25  ;;  %v9603_v23 = vld [vmem:[#allocation2 + $0x874] ss:$36 sps:$4 sm:$0xff]   ;;  %v9606_v24 = vld [vmem:[#allocation2 + $0xcfc] ss:$36 sps:$4 sm:$0xff]  }
 0x100   :  { %v9601_v25 = vld [vmem:[#allocation2 + $0x870] ss:$36 sps:$4 sm:$0xff]  }
 0x102   :  { %3402 = vmatpush1.bf16.msra.mxu0 %v9529_v26  ;;  %3607 = vmatpush1.bf16.msra.mxu1 %v9532_v27  ;;  %v9604_v26 = vld [vmem:[#allocation2 + $0xcf8] ss:$36 sps:$4 sm:$0xff]  }
 0x103   :  { %3403 = vmatprep.subr.bf16.mxu0 %v9537_v28  ;;  %3608 = vmatprep.subr.bf16.mxu1 %v9540_v29  ;;  %v9609_v27 = vld [vmem:[#allocation2 + $0x8bc] ss:$36 sps:$4 sm:$0xff]   ;;  %v9612_v28 = vld [vmem:[#allocation2 + $0xd44] ss:$36 sps:$4 sm:$0xff]  }
 0x104   :  { %v9607_v29 = vld [vmem:[#allocation2 + $0x8b8] ss:$36 sps:$4 sm:$0xff]  }
 0x106   :  { %3404 = vmatpush1.bf16.msra.mxu0 %v9535_v30  ;;  %3609 = vmatpush1.bf16.msra.mxu1 %v9538_v31  ;;  %v9610_v30 = vld [vmem:[#allocation2 + $0xd40] ss:$36 sps:$4 sm:$0xff]  }
 0x107   :  { %3405 = vmatprep.subr.bf16.mxu0 %v9543_v32  ;;  %3610 = vmatprep.subr.bf16.mxu1 %v9546_v33  ;;  %v9615_v31 = vld [vmem:[#allocation2 + $0x904] ss:$36 sps:$4 sm:$0xff]   ;;  %v9618_v32 = vld [vmem:[#allocation2 + $0xd8c] ss:$36 sps:$4 sm:$0xff]   ;;  %v11773_v33 = vpack.c.bf16 %v11757_v46, %v11757_v46 }
 0x108   :  { %v12033_v46 = vld [vmem:[#allocation2 + $0x1b0] ss:$36 sps:$4 sm:$0xff]  }
 0x109   :  { %14262 = vst [vmem:[#allocation52_spill] sm:$0xff] %v12033_v46 }
 0x10a   :  { %3406 = vmatpush1.bf16.msra.mxu0 %v9541_v34  ;;  %3611 = vmatpush1.bf16.msra.mxu1 %v9544_v35  ;;  %v9613_v34 = vld [vmem:[#allocation2 + $0x900] ss:$36 sps:$4 sm:$0xff]   ;;  %v9616_v35 = vld [vmem:[#allocation2 + $0xd88] ss:$36 sps:$4 sm:$0xff]  }
 0x10b   :  { %3407 = vmatprep.subr.bf16.mxu0 %v9549_v36  ;;  %3612 = vmatprep.subr.bf16.mxu1 %v9552_v37  ;;  %v9621_v36 = vld [vmem:[#allocation2 + $0x94c] ss:$36 sps:$4 sm:$0xff]   ;;  %v9624_v37 = vld [vmem:[#allocation2 + $0xdd4] ss:$36 sps:$4 sm:$0xff]  }
 0x10e   :  { %3408 = vmatpush1.bf16.msra.mxu0 %v9547_v38  ;;  %3613 = vmatpush1.bf16.msra.mxu1 %v9550_v39  ;;  %v9619_v38 = vld [vmem:[#allocation2 + $0x948] ss:$36 sps:$4 sm:$0xff]   ;;  %v9622_v39 = vld [vmem:[#allocation2 + $0xdd0] ss:$36 sps:$4 sm:$0xff]  }
 0x10f   :  { %3409 = vmatprep.subr.bf16.mxu0 %v9555_v40  ;;  %3614 = vmatprep.subr.bf16.mxu1 %v9558_v41  ;;  %v9627_v40 = vld [vmem:[#allocation2 + $0x994] ss:$36 sps:$4 sm:$0xff]   ;;  %v9630_v41 = vld [vmem:[#allocation2 + $0xe1c] ss:$36 sps:$4 sm:$0xff]  }
 0x112   :  { %3410 = vmatpush1.bf16.msra.mxu0 %v9553_v44  ;;  %3615 = vmatpush1.bf16.msra.mxu1 %v9556_v45  ;;  %v9625_v44 = vld [vmem:[#allocation2 + $0x990] ss:$36 sps:$4 sm:$0xff]   ;;  %v9628_v45 = vld [vmem:[#allocation2 + $0xe18] ss:$36 sps:$4 sm:$0xff]  }
 0x113   :  { %3411 = vmatprep.subr.bf16.mxu0 %v9561_v48  ;;  %3616 = vmatprep.subr.bf16.mxu1 %v9564_v50  ;;  %v9636_v48 = vld [vmem:[#allocation2 + $0xe64] ss:$36 sps:$4 sm:$0xff]   ;;  %v9631_v50 = vld [vmem:[#allocation2 + $0x9d8] ss:$36 sps:$4 sm:$0xff]  }
 0x116   :  { %3412 = vmatpush1.bf16.msra.mxu0 %v9559_v53  ;;  %3617 = vmatpush1.bf16.msra.mxu1 %v9562_v55  ;;  %v9634_v53 = vld [vmem:[#allocation2 + $0xe60] ss:$36 sps:$4 sm:$0xff]  }
 0x117   :  { %3413 = vmatprep.subr.bf16.mxu0 %v9567_v57  ;;  %3618 = vmatprep.subr.bf16.mxu1 %v9570_v58  ;;  %v9639_v55 = vld [vmem:[#allocation2 + $0xa24] ss:$36 sps:$4 sm:$0xff]   ;;  %v9642_v57 = vld [vmem:[#allocation2 + $0xeac] ss:$36 sps:$4 sm:$0xff]  }
 0x118   :  { %v9637_v58 = vld [vmem:[#allocation2 + $0xa20] ss:$36 sps:$4 sm:$0xff]  }
 0x11a   :  { %3414 = vmatpush1.bf16.msra.mxu0 %v9565_v61  ;;  %3619 = vmatpush1.bf16.msra.mxu1 %v9568_v0  ;;  %v9640_v61 = vld [vmem:[#allocation2 + $0xea8] ss:$36 sps:$4 sm:$0xff]  }
 0x11b   :  { %3415 = vmatprep.subr.bf16.mxu0 %v9573_v49  ;;  %3620 = vmatprep.subr.bf16.mxu1 %v9576_v1  ;;  %v9645_v0 = vld [vmem:[#allocation2 + $0xa6c] ss:$36 sps:$4 sm:$0xff]   ;;  %v9648_v49 = vld [vmem:[#allocation2 + $0xef4] ss:$36 sps:$4 sm:$0xff]  }
 0x11c   :  { %v9643_v1 = vld [vmem:[#allocation2 + $0xa68] ss:$36 sps:$4 sm:$0xff]  }
 0x11e   :  { %3416 = vmatpush1.bf16.msra.mxu0 %v9571_v2  ;;  %3621 = vmatpush1.bf16.msra.mxu1 %v9574_v4  ;;  %v9646_v2 = vld [vmem:[#allocation2 + $0xef0] ss:$36 sps:$4 sm:$0xff]  }
 0x11f   :  { %3417 = vmatprep.subr.bf16.mxu0 %v9579_v5  ;;  %3622 = vmatprep.subr.bf16.mxu1 %v9582_v6  ;;  %v9651_v4 = vld [vmem:[#allocation2 + $0xab4] ss:$36 sps:$4 sm:$0xff]   ;;  %v9654_v5 = vld [vmem:[#allocation2 + $0xf3c] ss:$36 sps:$4 sm:$0xff]  }
 0x120   :  { %v9649_v6 = vld [vmem:[#allocation2 + $0xab0] ss:$36 sps:$4 sm:$0xff]  }
 0x122   :  { %3418 = vmatpush1.bf16.msra.mxu0 %v9577_v7  ;;  %3623 = vmatpush1.bf16.msra.mxu1 %v9580_v8  ;;  %v9652_v7 = vld [vmem:[#allocation2 + $0xf38] ss:$36 sps:$4 sm:$0xff]  }
 0x123   :  { %3419 = vmatprep.subr.bf16.mxu0 %v9585_v9  ;;  %3624 = vmatprep.subr.bf16.mxu1 %v9588_v10  ;;  %v9657_v8 = vld [vmem:[#allocation2 + $0xafc] ss:$36 sps:$4 sm:$0xff]   ;;  %v9660_v9 = vld [vmem:[#allocation2 + $0xf84] ss:$36 sps:$4 sm:$0xff]  }
 0x124   :  { %v9655_v10 = vld [vmem:[#allocation2 + $0xaf8] ss:$36 sps:$4 sm:$0xff]  }
 0x126   :  { %3420 = vmatpush1.bf16.msra.mxu0 %v9583_v11  ;;  %3625 = vmatpush1.bf16.msra.mxu1 %v9586_v12  ;;  %v9658_v11 = vld [vmem:[#allocation2 + $0xf80] ss:$36 sps:$4 sm:$0xff]  }
 0x127   :  { %3421 = vmatprep.subr.bf16.mxu0 %v9591_v13  ;;  %3626 = vmatprep.subr.bf16.mxu1 %v9594_v14  ;;  %v9663_v12 = vld [vmem:[#allocation2 + $0xb44] ss:$36 sps:$4 sm:$0xff]   ;;  %v9666_v13 = vld [vmem:[#allocation2 + $0x1c] ss:$36 sps:$4 sm:$0xff]   ;;  %v11781_v14 = vpack.c.bf16 %v11764_v52, %v11764_v52 }
 0x12a   :  { %3422 = vmatpush1.bf16.msra.mxu0 %v9589_v15  ;;  %3627 = vmatpush1.bf16.msra.mxu1 %v9592_v16  ;;  %v9661_v15 = vld [vmem:[#allocation2 + $0xb40] ss:$36 sps:$4 sm:$0xff]   ;;  %v9664_v16 = vld [vmem:[#allocation2 + $0x18] ss:$36 sps:$4 sm:$0xff]  }
 0x12b   :  { %3423 = vmatprep.subr.bf16.mxu0 %v9597_v19  ;;  %3628 = vmatprep.subr.bf16.mxu1 %v9600_v20  ;;  %v9670_v19 = vld [vmem:[#allocation2 + $0xb8c] ss:$36 sps:$4 sm:$0xff]   ;;  %v9673_v20 = vld [vmem:[#allocation2 + $0x64] ss:$36 sps:$4 sm:$0xff]  }
 0x12e   :  { %3424 = vmatpush1.bf16.msra.mxu0 %v9595_v21  ;;  %3629 = vmatpush1.bf16.msra.mxu1 %v9598_v22  ;;  %v9668_v21 = vld [vmem:[#allocation2 + $0xb88] ss:$36 sps:$4 sm:$0xff]   ;;  %v9671_v22 = vld [vmem:[#allocation2 + $0x60] ss:$36 sps:$4 sm:$0xff]  }
 0x12f   :  { %3425 = vmatprep.subr.bf16.mxu0 %v9603_v23  ;;  %3630 = vmatprep.subr.bf16.mxu1 %v9606_v24  ;;  %v9676_v23 = vld [vmem:[#allocation2 + $0xbd4] ss:$36 sps:$4 sm:$0xff]   ;;  %v9679_v24 = vld [vmem:[#allocation2 + $0xac] ss:$36 sps:$4 sm:$0xff]  }
 0x132   :  { %3426 = vmatpush1.bf16.msra.mxu0 %v9601_v25  ;;  %3631 = vmatpush1.bf16.msra.mxu1 %v9604_v26  ;;  %v9674_v25 = vld [vmem:[#allocation2 + $0xbd0] ss:$36 sps:$4 sm:$0xff]   ;;  %v9677_v26 = vld [vmem:[#allocation2 + $0xa8] ss:$36 sps:$4 sm:$0xff]  }
 0x133   :  { %3427 = vmatprep.subr.bf16.mxu0 %v9609_v27  ;;  %3632 = vmatprep.subr.bf16.mxu1 %v9612_v28  ;;  %v9682_v27 = vld [vmem:[#allocation2 + $0xc1c] ss:$36 sps:$4 sm:$0xff]   ;;  %v9685_v28 = vld [vmem:[#allocation2 + $0xf4] ss:$36 sps:$4 sm:$0xff]  }
 0x136   :  { %3428 = vmatpush1.bf16.msra.mxu0 %v9607_v29  ;;  %3633 = vmatpush1.bf16.msra.mxu1 %v9610_v30  ;;  %v9680_v29 = vld [vmem:[#allocation2 + $0xc18] ss:$36 sps:$4 sm:$0xff]   ;;  %v9683_v30 = vld [vmem:[#allocation2 + $0xf0] ss:$36 sps:$4 sm:$0xff]  }
 0x137   :  { %3438 = vmatprep.subr.bf16.mxu0 %v9615_v31  ;;  %3643 = vmatprep.subr.bf16.mxu1 %v9618_v32  ;;  %v9688_v31 = vld [vmem:[#allocation2 + $0xc64] ss:$36 sps:$4 sm:$0xff]   ;;  %v9691_v32 = vld [vmem:[#allocation2 + $0x13c] ss:$36 sps:$4 sm:$0xff]  }
 0x139   :  { %3430 = vmatmul.mubr.bf16.vlgmr.msra.gmra.mrb[0].mxu0 %v11748_v18  ;;  %3635 = vmatmul.mubr.bf16.vlgmr.msra.gmra.mrb[0].mxu1 %v11773_v33 }
 0x13a   :  { %3439 = vmatpush1.bf16.msra.mxu0 %v9613_v34  ;;  %3644 = vmatpush1.bf16.msra.mxu1 %v9616_v35  ;;  %v9686_v34 = vld [vmem:[#allocation2 + $0xc60] ss:$36 sps:$4 sm:$0xff]   ;;  %v9689_v35 = vld [vmem:[#allocation2 + $0x138] ss:$36 sps:$4 sm:$0xff]  }
 0x13b   :  { %3440 = vmatprep.subr.bf16.mxu0 %v9621_v36  ;;  %3645 = vmatprep.subr.bf16.mxu1 %v9624_v37  ;;  %v9694_v36 = vld [vmem:[#allocation2 + $0xcac] ss:$36 sps:$4 sm:$0xff]   ;;  %v9697_v37 = vld [vmem:[#allocation2 + $0x184] ss:$36 sps:$4 sm:$0xff]  }
 0x13c   :  { %3675 = vmatprep.mubr.bf16.mxu1 %v13982_v42  ;;  %3470 = vmatprep.mubr.bf16.mxu0 %v11768_v56 }
 0x13e   :  { %3441 = vmatpush1.bf16.msra.mxu0 %v9619_v38  ;;  %3646 = vmatpush1.bf16.msra.mxu1 %v9622_v39  ;;  %v9692_v38 = vld [vmem:[#allocation2 + $0xca8] ss:$36 sps:$4 sm:$0xff]   ;;  %v9695_v39 = vld [vmem:[#allocation2 + $0x180] ss:$36 sps:$4 sm:$0xff]  }
 0x13f   :  { %3442 = vmatprep.subr.bf16.mxu0 %v9627_v40  ;;  %3647 = vmatprep.subr.bf16.mxu1 %v9630_v41  ;;  %v9700_v40 = vld [vmem:[#allocation2 + $0xcf4] ss:$36 sps:$4 sm:$0xff]   ;;  %v9703_v41 = vld [vmem:[#allocation2 + $0x1cc] ss:$36 sps:$4 sm:$0xff]  }
 0x142   :  { %3443 = vmatpush1.bf16.msra.mxu0 %v9625_v44  ;;  %3648 = vmatpush1.bf16.msra.mxu1 %v9628_v45  ;;  %v9698_v44 = vld [vmem:[#allocation2 + $0xcf0] ss:$36 sps:$4 sm:$0xff]   ;;  %v9701_v45 = vld [vmem:[#allocation2 + $0x1c8] ss:$36 sps:$4 sm:$0xff]  }
 0x143   :  { %3444 = vmatprep.subr.bf16.mxu0 %v9633_v47  ;;  %3649 = vmatprep.subr.bf16.mxu1 %v9636_v48  ;;  %v9706_v47 = vld [vmem:[#allocation2 + $0xd3c] ss:$36 sps:$4 sm:$0xff]   ;;  %v9709_v48 = vld [vmem:[#allocation2 + $0x214] ss:$36 sps:$4 sm:$0xff]  }
 0x146   :  { %3445 = vmatpush1.bf16.msra.mxu0 %v9631_v50  ;;  %3650 = vmatpush1.bf16.msra.mxu1 %v9634_v53  ;;  %v9704_v50 = vld [vmem:[#allocation2 + $0xd38] ss:$36 sps:$4 sm:$0xff]   ;;  %v9707_v53 = vld [vmem:[#allocation2 + $0x210] ss:$36 sps:$4 sm:$0xff]  }
 0x147   :  { %3446 = vmatprep.subr.bf16.mxu0 %v9639_v55  ;;  %3651 = vmatprep.subr.bf16.mxu1 %v9642_v57  ;;  %v9712_v55 = vld [vmem:[#allocation2 + $0xd84] ss:$36 sps:$4 sm:$0xff]   ;;  %v9715_v57 = vld [vmem:[#allocation2 + $0x25c] ss:$36 sps:$4 sm:$0xff]  }
 0x14a   :  { %3447 = vmatpush1.bf16.msra.mxu0 %v9637_v58  ;;  %3652 = vmatpush1.bf16.msra.mxu1 %v9640_v61  ;;  %v9710_v58 = vld [vmem:[#allocation2 + $0xd80] ss:$36 sps:$4 sm:$0xff]   ;;  %v9713_v61 = vld [vmem:[#allocation2 + $0x258] ss:$36 sps:$4 sm:$0xff]  }
 0x14b   :  { %3448 = vmatprep.subr.bf16.mxu0 %v9645_v0  ;;  %3653 = vmatprep.subr.bf16.mxu1 %v9648_v49  ;;  %v9718_v0 = vld [vmem:[#allocation2 + $0xdcc] ss:$36 sps:$4 sm:$0xff]   ;;  %v9721_v49 = vld [vmem:[#allocation2 + $0x2a4] ss:$36 sps:$4 sm:$0xff]  }
 0x14e   :  { %3449 = vmatpush1.bf16.msra.mxu0 %v9643_v1  ;;  %3654 = vmatpush1.bf16.msra.mxu1 %v9646_v2  ;;  %v9716_v1 = vld [vmem:[#allocation2 + $0xdc8] ss:$36 sps:$4 sm:$0xff]   ;;  %v9719_v2 = vld [vmem:[#allocation2 + $0x2a0] ss:$36 sps:$4 sm:$0xff]  }
 0x14f   :  { %3450 = vmatprep.subr.bf16.mxu0 %v9651_v4  ;;  %3655 = vmatprep.subr.bf16.mxu1 %v9654_v5  ;;  %v9724_v4 = vld [vmem:[#allocation2 + $0xe14] ss:$36 sps:$4 sm:$0xff]   ;;  %v9727_v5 = vld [vmem:[#allocation2 + $0x2ec] ss:$36 sps:$4 sm:$0xff]  }
 0x152   :  { %3451 = vmatpush1.bf16.msra.mxu0 %v9649_v6  ;;  %3656 = vmatpush1.bf16.msra.mxu1 %v9652_v7  ;;  %v9722_v6 = vld [vmem:[#allocation2 + $0xe10] ss:$36 sps:$4 sm:$0xff]   ;;  %v9725_v7 = vld [vmem:[#allocation2 + $0x2e8] ss:$36 sps:$4 sm:$0xff]  }
 0x153   :  { %3452 = vmatprep.subr.bf16.mxu0 %v9657_v8  ;;  %3657 = vmatprep.subr.bf16.mxu1 %v9660_v9  ;;  %v9730_v8 = vld [vmem:[#allocation2 + $0xe5c] ss:$36 sps:$4 sm:$0xff]   ;;  %v9733_v9 = vld [vmem:[#allocation2 + $0x334] ss:$36 sps:$4 sm:$0xff]  }
 0x156   :  { %3453 = vmatpush1.bf16.msra.mxu0 %v9655_v10  ;;  %3658 = vmatpush1.bf16.msra.mxu1 %v9658_v11  ;;  %v9728_v10 = vld [vmem:[#allocation2 + $0xe58] ss:$36 sps:$4 sm:$0xff]   ;;  %v9731_v11 = vld [vmem:[#allocation2 + $0x330] ss:$36 sps:$4 sm:$0xff]  }
 0x157   :  { %3454 = vmatprep.subr.bf16.mxu0 %v9663_v12  ;;  %3848 = vmatprep.subr.bf16.mxu1 %v9666_v13  ;;  %v9736_v12 = vld [vmem:[#allocation2 + $0xea4] ss:$36 sps:$4 sm:$0xff]   ;;  %v9739_v13 = vld [vmem:[#allocation2 + $0x37c] ss:$36 sps:$4 sm:$0xff]  }
 0x159   :  { %3676 = vmatmul.mubr.bf16.vlgmr.msra.gmra.mrb[0].mxu1 %v11781_v14 }
 0x15a   :  { %3455 = vmatpush1.bf16.msra.mxu0 %v9661_v15  ;;  %3849 = vmatpush1.bf16.msra.mxu1 %v9664_v16  ;;  %v9734_v15 = vld [vmem:[#allocation2 + $0xea0] ss:$36 sps:$4 sm:$0xff]   ;;  %v9737_v16 = vld [vmem:[#allocation2 + $0x378] ss:$36 sps:$4 sm:$0xff]  }
 0x15b   :  { %3456 = vmatprep.subr.bf16.mxu0 %v9670_v19  ;;  %3850 = vmatprep.subr.bf16.mxu1 %v9673_v20  ;;  %v9742_v19 = vld [vmem:[#allocation2 + $0xeec] ss:$36 sps:$4 sm:$0xff]   ;;  %v9745_v20 = vld [vmem:[#allocation2 + $0x3c4] ss:$36 sps:$4 sm:$0xff]  }
 0x15c   :  { %3880 = vmatprep.mubr.bf16.mxu1 %v11730_v62 }
 0x15e   :  { %3457 = vmatpush1.bf16.msra.mxu0 %v9668_v21  ;;  %3851 = vmatpush1.bf16.msra.mxu1 %v9671_v22  ;;  %v9740_v21 = vld [vmem:[#allocation2 + $0xee8] ss:$36 sps:$4 sm:$0xff]   ;;  %v9743_v22 = vld [vmem:[#allocation2 + $0x3c0] ss:$36 sps:$4 sm:$0xff]  }
 0x15f   :  { %3458 = vmatprep.subr.bf16.mxu0 %v9676_v23  ;;  %3852 = vmatprep.subr.bf16.mxu1 %v9679_v24  ;;  %v9748_v23 = vld [vmem:[#allocation2 + $0xf34] ss:$36 sps:$4 sm:$0xff]   ;;  %v9751_v24 = vld [vmem:[#allocation2 + $0x40c] ss:$36 sps:$4 sm:$0xff]  }
 0x162   :  { %3459 = vmatpush1.bf16.msra.mxu0 %v9674_v25  ;;  %3853 = vmatpush1.bf16.msra.mxu1 %v9677_v26  ;;  %v9746_v25 = vld [vmem:[#allocation2 + $0xf30] ss:$36 sps:$4 sm:$0xff]   ;;  %v9749_v26 = vld [vmem:[#allocation2 + $0x408] ss:$36 sps:$4 sm:$0xff]  }
 0x163   :  { %3460 = vmatprep.subr.bf16.mxu0 %v9682_v27  ;;  %3854 = vmatprep.subr.bf16.mxu1 %v9685_v28  ;;  %v9754_v27 = vld [vmem:[#allocation2 + $0xf7c] ss:$36 sps:$4 sm:$0xff]   ;;  %v9757_v28 = vld [vmem:[#allocation2 + $0x454] ss:$36 sps:$4 sm:$0xff]  }
 0x166   :  { %3461 = vmatpush1.bf16.msra.mxu0 %v9680_v29  ;;  %3855 = vmatpush1.bf16.msra.mxu1 %v9683_v30  ;;  %v9752_v29 = vld [vmem:[#allocation2 + $0xf78] ss:$36 sps:$4 sm:$0xff]   ;;  %v9755_v30 = vld [vmem:[#allocation2 + $0x450] ss:$36 sps:$4 sm:$0xff]  }
 0x167   :  { %3462 = vmatprep.subr.bf16.mxu0 %v9688_v31  ;;  %3856 = vmatprep.subr.bf16.mxu1 %v9691_v32  ;;  %v9760_v31 = vld [vmem:[#allocation2 + $0xc] ss:$36 sps:$4 sm:$0xff]   ;;  %v9763_v32 = vld [vmem:[#allocation2 + $0x49c] ss:$36 sps:$4 sm:$0xff]  }
 0x16a   :  { %3463 = vmatpush1.bf16.msra.mxu0 %v9686_v34  ;;  %3857 = vmatpush1.bf16.msra.mxu1 %v9689_v35  ;;  %v9758_v34 = vld [vmem:[#allocation2 + $0x8] ss:$36 sps:$4 sm:$0xff]   ;;  %v9761_v35 = vld [vmem:[#allocation2 + $0x498] ss:$36 sps:$4 sm:$0xff]  }
 0x16b   :  { %3464 = vmatprep.subr.bf16.mxu0 %v9694_v36  ;;  %3858 = vmatprep.subr.bf16.mxu1 %v9697_v37  ;;  %v9766_v36 = vld [vmem:[#allocation2 + $0x54] ss:$36 sps:$4 sm:$0xff]   ;;  %v9769_v37 = vld [vmem:[#allocation2 + $0x4e4] ss:$36 sps:$4 sm:$0xff]  }
 0x16e   :  { %3465 = vmatpush1.bf16.msra.mxu0 %v9692_v38  ;;  %3859 = vmatpush1.bf16.msra.mxu1 %v9695_v39  ;;  %v9764_v38 = vld [vmem:[#allocation2 + $0x50] ss:$36 sps:$4 sm:$0xff]   ;;  %v9767_v39 = vld [vmem:[#allocation2 + $0x4e0] ss:$36 sps:$4 sm:$0xff]  }
 0x16f   :  { %3466 = vmatprep.subr.bf16.mxu0 %v9700_v40  ;;  %3860 = vmatprep.subr.bf16.mxu1 %v9703_v41  ;;  %v9772_v40 = vld [vmem:[#allocation2 + $0x9c] ss:$36 sps:$4 sm:$0xff]   ;;  %v9775_v41 = vld [vmem:[#allocation2 + $0x52c] ss:$36 sps:$4 sm:$0xff]  }
 0x172   :  { %3467 = vmatpush1.bf16.msra.mxu0 %v9698_v44  ;;  %3861 = vmatpush1.bf16.msra.mxu1 %v9701_v45  ;;  %v9770_v44 = vld [vmem:[#allocation2 + $0x98] ss:$36 sps:$4 sm:$0xff]   ;;  %v9773_v45 = vld [vmem:[#allocation2 + $0x528] ss:$36 sps:$4 sm:$0xff]  }
 0x173   :  { %3468 = vmatprep.subr.bf16.mxu0 %v9706_v47  ;;  %3862 = vmatprep.subr.bf16.mxu1 %v9709_v48  ;;  %v9778_v47 = vld [vmem:[#allocation2 + $0xe4] ss:$36 sps:$4 sm:$0xff]   ;;  %v9781_v48 = vld [vmem:[#allocation2 + $0x574] ss:$36 sps:$4 sm:$0xff]  }
 0x176   :  { %3469 = vmatpush1.bf16.msra.mxu0 %v9704_v50  ;;  %3863 = vmatpush1.bf16.msra.mxu1 %v9707_v53  ;;  %v9776_v50 = vld [vmem:[#allocation2 + $0xe0] ss:$36 sps:$4 sm:$0xff]   ;;  %v9779_v53 = vld [vmem:[#allocation2 + $0x570] ss:$36 sps:$4 sm:$0xff]  }
 0x177   :  { %3479 = vmatprep.subr.bf16.mxu0 %v9712_v55  ;;  %3864 = vmatprep.subr.bf16.mxu1 %v9715_v57  ;;  %v9784_v55 = vld [vmem:[#allocation2 + $0x12c] ss:$36 sps:$4 sm:$0xff]   ;;  %v9787_v57 = vld [vmem:[#allocation2 + $0x5bc] ss:$36 sps:$4 sm:$0xff]  }
 0x179   :  { %3471 = vmatmul.mubr.bf16.vlgmr.msra.gmra.mrb[0].mxu0 %v11773_v33 }
 0x17a   :  { %3480 = vmatpush1.bf16.msra.mxu0 %v9710_v58  ;;  %3865 = vmatpush1.bf16.msra.mxu1 %v9713_v61  ;;  %v9782_v58 = vld [vmem:[#allocation2 + $0x128] ss:$36 sps:$4 sm:$0xff]   ;;  %v9785_v61 = vld [vmem:[#allocation2 + $0x5b8] ss:$36 sps:$4 sm:$0xff]  }
 0x17b   :  { %3481 = vmatprep.subr.bf16.mxu0 %v9718_v0  ;;  %3866 = vmatprep.subr.bf16.mxu1 %v9721_v49  ;;  %v9790_v0 = vld [vmem:[#allocation2 + $0x174] ss:$36 sps:$4 sm:$0xff]   ;;  %v9793_v49 = vld [vmem:[#allocation2 + $0x604] ss:$36 sps:$4 sm:$0xff]  }
 0x17c   :  { %3511 = vmatprep.mubr.bf16.mxu0 %v13982_v42 }
 0x17e   :  { %3482 = vmatpush1.bf16.msra.mxu0 %v9716_v1  ;;  %3867 = vmatpush1.bf16.msra.mxu1 %v9719_v2  ;;  %v9788_v1 = vld [vmem:[#allocation2 + $0x170] ss:$36 sps:$4 sm:$0xff]   ;;  %v9791_v2 = vld [vmem:[#allocation2 + $0x600] ss:$36 sps:$4 sm:$0xff]  }
 0x17f   :  { %3483 = vmatprep.subr.bf16.mxu0 %v9724_v4  ;;  %3868 = vmatprep.subr.bf16.mxu1 %v9727_v5  ;;  %v9796_v4 = vld [vmem:[#allocation2 + $0x1bc] ss:$36 sps:$4 sm:$0xff]   ;;  %v9799_v5 = vld [vmem:[#allocation2 + $0x64c] ss:$36 sps:$4 sm:$0xff]  }
 0x182   :  { %3484 = vmatpush1.bf16.msra.mxu0 %v9722_v6  ;;  %3869 = vmatpush1.bf16.msra.mxu1 %v9725_v7  ;;  %v9794_v6 = vld [vmem:[#allocation2 + $0x1b8] ss:$36 sps:$4 sm:$0xff]   ;;  %v9797_v7 = vld [vmem:[#allocation2 + $0x648] ss:$36 sps:$4 sm:$0xff]  }
 0x183   :  { %3485 = vmatprep.subr.bf16.mxu0 %v9730_v8  ;;  %3870 = vmatprep.subr.bf16.mxu1 %v9733_v9  ;;  %v9802_v8 = vld [vmem:[#allocation2 + $0x204] ss:$36 sps:$4 sm:$0xff]   ;;  %v9805_v9 = vld [vmem:[#allocation2 + $0x694] ss:$36 sps:$4 sm:$0xff]  }
 0x186   :  { %3486 = vmatpush1.bf16.msra.mxu0 %v9728_v10  ;;  %3871 = vmatpush1.bf16.msra.mxu1 %v9731_v11  ;;  %v9800_v10 = vld [vmem:[#allocation2 + $0x200] ss:$36 sps:$4 sm:$0xff]   ;;  %v9803_v11 = vld [vmem:[#allocation2 + $0x690] ss:$36 sps:$4 sm:$0xff]  }
 0x187   :  { %3487 = vmatprep.subr.bf16.mxu0 %v9736_v12  ;;  %3872 = vmatprep.subr.bf16.mxu1 %v9739_v13  ;;  %v9808_v12 = vld [vmem:[#allocation2 + $0x24c] ss:$36 sps:$4 sm:$0xff]   ;;  %v9811_v13 = vld [vmem:[#allocation2 + $0x6dc] ss:$36 sps:$4 sm:$0xff]  }
 0x18a   :  { %3488 = vmatpush1.bf16.msra.mxu0 %v9734_v15  ;;  %3873 = vmatpush1.bf16.msra.mxu1 %v9737_v16  ;;  %v9806_v15 = vld [vmem:[#allocation2 + $0x248] ss:$36 sps:$4 sm:$0xff]   ;;  %v9809_v16 = vld [vmem:[#allocation2 + $0x6d8] ss:$36 sps:$4 sm:$0xff]  }
 0x18b   :  { %3489 = vmatprep.subr.bf16.mxu0 %v9742_v19  ;;  %3874 = vmatprep.subr.bf16.mxu1 %v9745_v20  ;;  %v9814_v19 = vld [vmem:[#allocation2 + $0x294] ss:$36 sps:$4 sm:$0xff]   ;;  %v9817_v20 = vld [vmem:[#allocation2 + $0x724] ss:$36 sps:$4 sm:$0xff]  }
 0x18e   :  { %3490 = vmatpush1.bf16.msra.mxu0 %v9740_v21  ;;  %3875 = vmatpush1.bf16.msra.mxu1 %v9743_v22  ;;  %v9812_v21 = vld [vmem:[#allocation2 + $0x290] ss:$36 sps:$4 sm:$0xff]   ;;  %v9815_v22 = vld [vmem:[#allocation2 + $0x720] ss:$36 sps:$4 sm:$0xff]  }
 0x18f   :  { %3491 = vmatprep.subr.bf16.mxu0 %v9748_v23  ;;  %3876 = vmatprep.subr.bf16.mxu1 %v9751_v24  ;;  %v9820_v23 = vld [vmem:[#allocation2 + $0x2dc] ss:$36 sps:$4 sm:$0xff]   ;;  %v9823_v24 = vld [vmem:[#allocation2 + $0x76c] ss:$36 sps:$4 sm:$0xff]  }
 0x192   :  { %3492 = vmatpush1.bf16.msra.mxu0 %v9746_v25  ;;  %3877 = vmatpush1.bf16.msra.mxu1 %v9749_v26  ;;  %v9818_v25 = vld [vmem:[#allocation2 + $0x2d8] ss:$36 sps:$4 sm:$0xff]   ;;  %v9821_v26 = vld [vmem:[#allocation2 + $0x768] ss:$36 sps:$4 sm:$0xff]  }
 0x193   :  { %3493 = vmatprep.subr.bf16.mxu0 %v9754_v27  ;;  %3878 = vmatprep.subr.bf16.mxu1 %v9757_v28  ;;  %v9826_v27 = vld [vmem:[#allocation2 + $0x324] ss:$36 sps:$4 sm:$0xff]   ;;  %v9829_v28 = vld [vmem:[#allocation2 + $0x7b4] ss:$36 sps:$4 sm:$0xff]  }
 0x196   :  { %3494 = vmatpush1.bf16.msra.mxu0 %v9752_v29  ;;  %3879 = vmatpush1.bf16.msra.mxu1 %v9755_v30  ;;  %v9824_v29 = vld [vmem:[#allocation2 + $0x320] ss:$36 sps:$4 sm:$0xff]   ;;  %v9827_v30 = vld [vmem:[#allocation2 + $0x7b0] ss:$36 sps:$4 sm:$0xff]  }
 0x197   :  { %3520 = vmatprep.subr.bf16.mxu0 %v9760_v31  ;;  %3889 = vmatprep.subr.bf16.mxu1 %v9763_v32  ;;  %v9832_v31 = vld [vmem:[#allocation2 + $0x36c] ss:$36 sps:$4 sm:$0xff]   ;;  %v9835_v32 = vld [vmem:[#allocation2 + $0x7fc] ss:$36 sps:$4 sm:$0xff]  }
 0x199   :  { %3512 = vmatmul.mubr.bf16.vlgmr.msra.gmra.mrb[0].mxu0 %v11781_v14  ;;  %3881 = vmatmul.mubr.bf16.vlgmr.msra.gmra.mrb[4].mxu1 %v11744_v17 }
 0x19a   :  { %3521 = vmatpush1.bf16.msra.mxu0 %v9758_v34  ;;  %3890 = vmatpush1.bf16.msra.mxu1 %v9761_v35  ;;  %v9830_v34 = vld [vmem:[#allocation2 + $0x368] ss:$36 sps:$4 sm:$0xff]   ;;  %v9833_v35 = vld [vmem:[#allocation2 + $0x7f8] ss:$36 sps:$4 sm:$0xff]  }
 0x19b   :  { %3522 = vmatprep.subr.bf16.mxu0 %v9766_v36  ;;  %3891 = vmatprep.subr.bf16.mxu1 %v9769_v37  ;;  %v9838_v36 = vld [vmem:[#allocation2 + $0x3b4] ss:$36 sps:$4 sm:$0xff]   ;;  %v9841_v37 = vld [vmem:[#allocation2 + $0x844] ss:$36 sps:$4 sm:$0xff]  }
 0x19c   :  { %3552 = vmatprep.mubr.bf16.mxu0 %v11730_v62  ;;  %3921 = vmatprep.mubr.bf16.mxu1 %v11738_v3 }
 0x19e   :  { %3523 = vmatpush1.bf16.msra.mxu0 %v9764_v38  ;;  %3892 = vmatpush1.bf16.msra.mxu1 %v9767_v39  ;;  %v9836_v38 = vld [vmem:[#allocation2 + $0x3b0] ss:$36 sps:$4 sm:$0xff]   ;;  %v9839_v39 = vld [vmem:[#allocation2 + $0x840] ss:$36 sps:$4 sm:$0xff]  }
 0x19f   :  { %3524 = vmatprep.subr.bf16.mxu0 %v9772_v40  ;;  %3893 = vmatprep.subr.bf16.mxu1 %v9775_v41  ;;  %v9844_v40 = vld [vmem:[#allocation2 + $0x3fc] ss:$36 sps:$4 sm:$0xff]   ;;  %v9847_v41 = vld [vmem:[#allocation2 + $0x88c] ss:$36 sps:$4 sm:$0xff]  }
 0x1a2   :  { %3525 = vmatpush1.bf16.msra.mxu0 %v9770_v44  ;;  %3894 = vmatpush1.bf16.msra.mxu1 %v9773_v45  ;;  %v9842_v44 = vld [vmem:[#allocation2 + $0x3f8] ss:$36 sps:$4 sm:$0xff]   ;;  %v9845_v45 = vld [vmem:[#allocation2 + $0x888] ss:$36 sps:$4 sm:$0xff]  }
 0x1a3   :  { %3526 = vmatprep.subr.bf16.mxu0 %v9778_v47  ;;  %3895 = vmatprep.subr.bf16.mxu1 %v9781_v48  ;;  %v9850_v47 = vld [vmem:[#allocation2 + $0x444] ss:$36 sps:$4 sm:$0xff]   ;;  %v9853_v48 = vld [vmem:[#allocation2 + $0x8d4] ss:$36 sps:$4 sm:$0xff]  }
 0x1a6   :  { %3527 = vmatpush1.bf16.msra.mxu0 %v9776_v50  ;;  %3896 = vmatpush1.bf16.msra.mxu1 %v9779_v53  ;;  %v9848_v50 = vld [vmem:[#allocation2 + $0x440] ss:$36 sps:$4 sm:$0xff]   ;;  %v9851_v53 = vld [vmem:[#allocation2 + $0x8d0] ss:$36 sps:$4 sm:$0xff]  }
 0x1a7   :  { %3528 = vmatprep.subr.bf16.mxu0 %v9784_v55  ;;  %3897 = vmatprep.subr.bf16.mxu1 %v9787_v57  ;;  %v9856_v55 = vld [vmem:[#allocation2 + $0x14] ss:$36 sps:$4 sm:$0xff]   ;;  %v9859_v57 = vld [vmem:[#allocation2 + $0x91c] ss:$36 sps:$4 sm:$0xff]  }
 0x1aa   :  { %3529 = vmatpush1.bf16.msra.mxu0 %v9782_v58  ;;  %3898 = vmatpush1.bf16.msra.mxu1 %v9785_v61  ;;  %v9854_v58 = vld [vmem:[#allocation2 + $0x10] ss:$36 sps:$4 sm:$0xff]   ;;  %v9857_v61 = vld [vmem:[#allocation2 + $0x918] ss:$36 sps:$4 sm:$0xff]  }
 0x1ab   :  { %3530 = vmatprep.subr.bf16.mxu0 %v9790_v0  ;;  %3899 = vmatprep.subr.bf16.mxu1 %v9793_v49  ;;  %v9862_v0 = vld [vmem:[#allocation2 + $0x5c] ss:$36 sps:$4 sm:$0xff]   ;;  %v9865_v49 = vld [vmem:[#allocation2 + $0x964] ss:$36 sps:$4 sm:$0xff]  }
 0x1ae   :  { %3531 = vmatpush1.bf16.msra.mxu0 %v9788_v1  ;;  %3900 = vmatpush1.bf16.msra.mxu1 %v9791_v2  ;;  %v9860_v1 = vld [vmem:[#allocation2 + $0x58] ss:$36 sps:$4 sm:$0xff]   ;;  %v9863_v2 = vld [vmem:[#allocation2 + $0x960] ss:$36 sps:$4 sm:$0xff]  }
 0x1af   :  { %3532 = vmatprep.subr.bf16.mxu0 %v9796_v4  ;;  %3901 = vmatprep.subr.bf16.mxu1 %v9799_v5  ;;  %v9868_v4 = vld [vmem:[#allocation2 + $0xa4] ss:$36 sps:$4 sm:$0xff]   ;;  %v9871_v5 = vld [vmem:[#allocation2 + $0x9ac] ss:$36 sps:$4 sm:$0xff]  }
 0x1b2   :  { %3533 = vmatpush1.bf16.msra.mxu0 %v9794_v6  ;;  %3902 = vmatpush1.bf16.msra.mxu1 %v9797_v7  ;;  %v9866_v6 = vld [vmem:[#allocation2 + $0xa0] ss:$36 sps:$4 sm:$0xff]   ;;  %v9869_v7 = vld [vmem:[#allocation2 + $0x9a8] ss:$36 sps:$4 sm:$0xff]  }
 0x1b3   :  { %3534 = vmatprep.subr.bf16.mxu0 %v9802_v8  ;;  %3903 = vmatprep.subr.bf16.mxu1 %v9805_v9  ;;  %v9874_v8 = vld [vmem:[#allocation2 + $0xec] ss:$36 sps:$4 sm:$0xff]   ;;  %v9877_v9 = vld [vmem:[#allocation2 + $0x9f4] ss:$36 sps:$4 sm:$0xff]  }
 0x1b6   :  { %3535 = vmatpush1.bf16.msra.mxu0 %v9800_v10  ;;  %3904 = vmatpush1.bf16.msra.mxu1 %v9803_v11  ;;  %v9872_v10 = vld [vmem:[#allocation2 + $0xe8] ss:$36 sps:$4 sm:$0xff]   ;;  %v9875_v11 = vld [vmem:[#allocation2 + $0x9f0] ss:$36 sps:$4 sm:$0xff]  }
 0x1b7   :  { %3536 = vmatprep.subr.bf16.mxu0 %v9808_v12  ;;  %3905 = vmatprep.subr.bf16.mxu1 %v9811_v13  ;;  %v9880_v12 = vld [vmem:[#allocation2 + $0x134] ss:$36 sps:$4 sm:$0xff]   ;;  %v9883_v13 = vld [vmem:[#allocation2 + $0xa3c] ss:$36 sps:$4 sm:$0xff]  }
 0x1ba   :  { %3537 = vmatpush1.bf16.msra.mxu0 %v9806_v15  ;;  %3906 = vmatpush1.bf16.msra.mxu1 %v9809_v16  ;;  %v9878_v15 = vld [vmem:[#allocation2 + $0x130] ss:$36 sps:$4 sm:$0xff]   ;;  %v9881_v16 = vld [vmem:[#allocation2 + $0xa38] ss:$36 sps:$4 sm:$0xff]  }
 0x1bb   :  { %3538 = vmatprep.subr.bf16.mxu0 %v9814_v19  ;;  %3907 = vmatprep.subr.bf16.mxu1 %v9817_v20  ;;  %v9886_v19 = vld [vmem:[#allocation2 + $0x17c] ss:$36 sps:$4 sm:$0xff]   ;;  %v9889_v20 = vld [vmem:[#allocation2 + $0xa84] ss:$36 sps:$4 sm:$0xff]  }
 0x1be   :  { %3539 = vmatpush1.bf16.msra.mxu0 %v9812_v21  ;;  %3908 = vmatpush1.bf16.msra.mxu1 %v9815_v22  ;;  %v9884_v21 = vld [vmem:[#allocation2 + $0x178] ss:$36 sps:$4 sm:$0xff]   ;;  %v9887_v22 = vld [vmem:[#allocation2 + $0xa80] ss:$36 sps:$4 sm:$0xff]  }
 0x1bf   :  { %3540 = vmatprep.subr.bf16.mxu0 %v9820_v23  ;;  %3909 = vmatprep.subr.bf16.mxu1 %v9823_v24  ;;  %v9892_v23 = vld [vmem:[#allocation2 + $0x1c4] ss:$36 sps:$4 sm:$0xff]   ;;  %v9895_v24 = vld [vmem:[#allocation2 + $0xacc] ss:$36 sps:$4 sm:$0xff]  }
 0x1c2   :  { %3541 = vmatpush1.bf16.msra.mxu0 %v9818_v25  ;;  %3910 = vmatpush1.bf16.msra.mxu1 %v9821_v26  ;;  %v9890_v25 = vld [vmem:[#allocation2 + $0x1c0] ss:$36 sps:$4 sm:$0xff]   ;;  %v9893_v26 = vld [vmem:[#allocation2 + $0xac8] ss:$36 sps:$4 sm:$0xff]  }
 0x1c3   :  { %3542 = vmatprep.subr.bf16.mxu0 %v9826_v27  ;;  %3911 = vmatprep.subr.bf16.mxu1 %v9829_v28  ;;  %v9898_v27 = vld [vmem:[#allocation2 + $0x20c] ss:$36 sps:$4 sm:$0xff]   ;;  %v9901_v28 = vld [vmem:[#allocation2 + $0xb14] ss:$36 sps:$4 sm:$0xff]  }
 0x1c6   :  { %3543 = vmatpush1.bf16.msra.mxu0 %v9824_v29  ;;  %3912 = vmatpush1.bf16.msra.mxu1 %v9827_v30  ;;  %v9896_v29 = vld [vmem:[#allocation2 + $0x208] ss:$36 sps:$4 sm:$0xff]   ;;  %v9899_v30 = vld [vmem:[#allocation2 + $0xb10] ss:$36 sps:$4 sm:$0xff]  }
 0x1c7   :  { %3544 = vmatprep.subr.bf16.mxu0 %v9832_v31  ;;  %3913 = vmatprep.subr.bf16.mxu1 %v9835_v32  ;;  %v9904_v31 = vld [vmem:[#allocation2 + $0x254] ss:$36 sps:$4 sm:$0xff]   ;;  %v9907_v32 = vld [vmem:[#allocation2 + $0xb5c] ss:$36 sps:$4 sm:$0xff]  }
 0x1ca   :  { %3545 = vmatpush1.bf16.msra.mxu0 %v9830_v34  ;;  %3914 = vmatpush1.bf16.msra.mxu1 %v9833_v35  ;;  %v9902_v34 = vld [vmem:[#allocation2 + $0x250] ss:$36 sps:$4 sm:$0xff]   ;;  %v9905_v35 = vld [vmem:[#allocation2 + $0xb58] ss:$36 sps:$4 sm:$0xff]  }
 0x1cb   :  { %3546 = vmatprep.subr.bf16.mxu0 %v9838_v36  ;;  %3915 = vmatprep.subr.bf16.mxu1 %v9841_v37  ;;  %v9910_v36 = vld [vmem:[#allocation2 + $0x29c] ss:$36 sps:$4 sm:$0xff]   ;;  %v9913_v37 = vld [vmem:[#allocation2 + $0xba4] ss:$36 sps:$4 sm:$0xff]  }
 0x1ce   :  { %3547 = vmatpush1.bf16.msra.mxu0 %v9836_v38  ;;  %3916 = vmatpush1.bf16.msra.mxu1 %v9839_v39  ;;  %v9908_v38 = vld [vmem:[#allocation2 + $0x298] ss:$36 sps:$4 sm:$0xff]   ;;  %v9911_v39 = vld [vmem:[#allocation2 + $0xba0] ss:$36 sps:$4 sm:$0xff]  }
 0x1cf   :  { %3548 = vmatprep.subr.bf16.mxu0 %v9844_v40  ;;  %3917 = vmatprep.subr.bf16.mxu1 %v9847_v41  ;;  %v9916_v40 = vld [vmem:[#allocation2 + $0x2e4] ss:$36 sps:$4 sm:$0xff]   ;;  %v9919_v41 = vld [vmem:[#allocation2 + $0xbec] ss:$36 sps:$4 sm:$0xff]  }
 0x1d2   :  { %3549 = vmatpush1.bf16.msra.mxu0 %v9842_v44  ;;  %3918 = vmatpush1.bf16.msra.mxu1 %v9845_v45  ;;  %v9914_v44 = vld [vmem:[#allocation2 + $0x2e0] ss:$36 sps:$4 sm:$0xff]   ;;  %v9917_v45 = vld [vmem:[#allocation2 + $0xbe8] ss:$36 sps:$4 sm:$0xff]  }
 0x1d3   :  { %3550 = vmatprep.subr.bf16.mxu0 %v9850_v47  ;;  %3919 = vmatprep.subr.bf16.mxu1 %v9853_v48  ;;  %v9922_v47 = vld [vmem:[#allocation2 + $0x32c] ss:$36 sps:$4 sm:$0xff]   ;;  %v9925_v48 = vld [vmem:[#allocation2 + $0xc34] ss:$36 sps:$4 sm:$0xff]  }
 0x1d6   :  { %3551 = vmatpush1.bf16.msra.mxu0 %v9848_v50  ;;  %3920 = vmatpush1.bf16.msra.mxu1 %v9851_v53  ;;  %v9920_v50 = vld [vmem:[#allocation2 + $0x328] ss:$36 sps:$4 sm:$0xff]   ;;  %v9923_v53 = vld [vmem:[#allocation2 + $0xc30] ss:$36 sps:$4 sm:$0xff]  }
 0x1d7   :  { %3684 = vmatprep.subr.bf16.mxu0 %v9856_v55  ;;  %3930 = vmatprep.subr.bf16.mxu1 %v9859_v57  ;;  %v9928_v55 = vld [vmem:[#allocation2 + $0x374] ss:$36 sps:$4 sm:$0xff]   ;;  %v9931_v57 = vld [vmem:[#allocation2 + $0xc7c] ss:$36 sps:$4 sm:$0xff]  }
 0x1d9   :  { %3553 = vmatmul.mubr.bf16.vlgmr.msra.gmra.mrb[4].mxu0 %v11744_v17  ;;  %3922 = vmatmul.mubr.bf16.vlgmr.msra.gmra.mrb[4].mxu1 %v11748_v18 }
 0x1da   :  { %3685 = vmatpush1.bf16.msra.mxu0 %v9854_v58  ;;  %3931 = vmatpush1.bf16.msra.mxu1 %v9857_v61  ;;  %v9926_v58 = vld [vmem:[#allocation2 + $0x370] ss:$36 sps:$4 sm:$0xff]   ;;  %v9929_v61 = vld [vmem:[#allocation2 + $0xc78] ss:$36 sps:$4 sm:$0xff]  }
 0x1db   :  { %3686 = vmatprep.subr.bf16.mxu0 %v9862_v0  ;;  %3932 = vmatprep.subr.bf16.mxu1 %v9865_v49  ;;  %v9934_v0 = vld [vmem:[#allocation2 + $0x3bc] ss:$36 sps:$4 sm:$0xff]   ;;  %v9937_v49 = vld [vmem:[#allocation2 + $0xcc4] ss:$36 sps:$4 sm:$0xff]  }
 0x1dc   :  { %3716 = vmatprep.mubr.bf16.mxu0 %v11730_v62  ;;  %3962 = vmatprep.mubr.bf16.mxu1 %v11768_v56 }
 0x1de   :  { %3687 = vmatpush1.bf16.msra.mxu0 %v9860_v1  ;;  %3933 = vmatpush1.bf16.msra.mxu1 %v9863_v2  ;;  %v9932_v1 = vld [vmem:[#allocation2 + $0x3b8] ss:$36 sps:$4 sm:$0xff]   ;;  %v9935_v2 = vld [vmem:[#allocation2 + $0xcc0] ss:$36 sps:$4 sm:$0xff]  }
 0x1df   :  { %3688 = vmatprep.subr.bf16.mxu0 %v9868_v4  ;;  %3934 = vmatprep.subr.bf16.mxu1 %v9871_v5  ;;  %v9940_v4 = vld [vmem:[#allocation2 + $0x404] ss:$36 sps:$4 sm:$0xff]   ;;  %v9943_v5 = vld [vmem:[#allocation2 + $0xd0c] ss:$36 sps:$4 sm:$0xff]  }
 0x1e2   :  { %3689 = vmatpush1.bf16.msra.mxu0 %v9866_v6  ;;  %3935 = vmatpush1.bf16.msra.mxu1 %v9869_v7  ;;  %v9938_v6 = vld [vmem:[#allocation2 + $0x400] ss:$36 sps:$4 sm:$0xff]   ;;  %v9941_v7 = vld [vmem:[#allocation2 + $0xd08] ss:$36 sps:$4 sm:$0xff]  }
 0x1e3   :  { %3690 = vmatprep.subr.bf16.mxu0 %v9874_v8  ;;  %3936 = vmatprep.subr.bf16.mxu1 %v9877_v9  ;;  %v9946_v8 = vld [vmem:[#allocation2 + $0x44c] ss:$36 sps:$4 sm:$0xff]   ;;  %v9949_v9 = vld [vmem:[#allocation2 + $0xd54] ss:$36 sps:$4 sm:$0xff]  }
 0x1e6   :  { %3691 = vmatpush1.bf16.msra.mxu0 %v9872_v10  ;;  %3937 = vmatpush1.bf16.msra.mxu1 %v9875_v11  ;;  %v9944_v10 = vld [vmem:[#allocation2 + $0x448] ss:$36 sps:$4 sm:$0xff]   ;;  %v9947_v11 = vld [vmem:[#allocation2 + $0xd50] ss:$36 sps:$4 sm:$0xff]  }
 0x1e7   :  { %3692 = vmatprep.subr.bf16.mxu0 %v9880_v12  ;;  %3938 = vmatprep.subr.bf16.mxu1 %v9883_v13  ;;  %v9952_v12 = vld [vmem:[#allocation2 + $0x494] ss:$36 sps:$4 sm:$0xff]   ;;  %v9955_v13 = vld [vmem:[#allocation2 + $0xd9c] ss:$36 sps:$4 sm:$0xff]  }
 0x1ea   :  { %3693 = vmatpush1.bf16.msra.mxu0 %v9878_v15  ;;  %3939 = vmatpush1.bf16.msra.mxu1 %v9881_v16  ;;  %v9950_v15 = vld [vmem:[#allocation2 + $0x490] ss:$36 sps:$4 sm:$0xff]   ;;  %v9953_v16 = vld [vmem:[#allocation2 + $0xd98] ss:$36 sps:$4 sm:$0xff]  }
 0x1eb   :  { %3694 = vmatprep.subr.bf16.mxu0 %v9886_v19  ;;  %3940 = vmatprep.subr.bf16.mxu1 %v9889_v20  ;;  %v9958_v19 = vld [vmem:[#allocation2 + $0x4dc] ss:$36 sps:$4 sm:$0xff]   ;;  %v9961_v20 = vld [vmem:[#allocation2 + $0xde4] ss:$36 sps:$4 sm:$0xff]  }
 0x1ee   :  { %3695 = vmatpush1.bf16.msra.mxu0 %v9884_v21  ;;  %3941 = vmatpush1.bf16.msra.mxu1 %v9887_v22  ;;  %v9956_v21 = vld [vmem:[#allocation2 + $0x4d8] ss:$36 sps:$4 sm:$0xff]   ;;  %v9959_v22 = vld [vmem:[#allocation2 + $0xde0] ss:$36 sps:$4 sm:$0xff]  }
 0x1ef   :  { %3696 = vmatprep.subr.bf16.mxu0 %v9892_v23  ;;  %3942 = vmatprep.subr.bf16.mxu1 %v9895_v24  ;;  %v9964_v23 = vld [vmem:[#allocation2 + $0x524] ss:$36 sps:$4 sm:$0xff]   ;;  %v9967_v24 = vld [vmem:[#allocation2 + $0xe2c] ss:$36 sps:$4 sm:$0xff]  }
 0x1f2   :  { %3697 = vmatpush1.bf16.msra.mxu0 %v9890_v25  ;;  %3943 = vmatpush1.bf16.msra.mxu1 %v9893_v26  ;;  %v9962_v25 = vld [vmem:[#allocation2 + $0x520] ss:$36 sps:$4 sm:$0xff]   ;;  %v9965_v26 = vld [vmem:[#allocation2 + $0xe28] ss:$36 sps:$4 sm:$0xff]  }
 0x1f3   :  { %3698 = vmatprep.subr.bf16.mxu0 %v9898_v27  ;;  %3944 = vmatprep.subr.bf16.mxu1 %v9901_v28  ;;  %v9970_v27 = vld [vmem:[#allocation2 + $0x56c] ss:$36 sps:$4 sm:$0xff]   ;;  %v9973_v28 = vld [vmem:[#allocation2 + $0xe74] ss:$36 sps:$4 sm:$0xff]  }
 0x1f6   :  { %3699 = vmatpush1.bf16.msra.mxu0 %v9896_v29  ;;  %3945 = vmatpush1.bf16.msra.mxu1 %v9899_v30  ;;  %v9968_v29 = vld [vmem:[#allocation2 + $0x568] ss:$36 sps:$4 sm:$0xff]   ;;  %v9971_v30 = vld [vmem:[#allocation2 + $0xe70] ss:$36 sps:$4 sm:$0xff]  }
 0x1f7   :  { %3700 = vmatprep.subr.bf16.mxu0 %v9904_v31  ;;  %3946 = vmatprep.subr.bf16.mxu1 %v9907_v32  ;;  %v9976_v31 = vld [vmem:[#allocation2 + $0x5b4] ss:$36 sps:$4 sm:$0xff]   ;;  %v9979_v32 = vld [vmem:[#allocation2 + $0xebc] ss:$36 sps:$4 sm:$0xff]  }
 0x1fa   :  { %3701 = vmatpush1.bf16.msra.mxu0 %v9902_v34  ;;  %3947 = vmatpush1.bf16.msra.mxu1 %v9905_v35  ;;  %v9974_v34 = vld [vmem:[#allocation2 + $0x5b0] ss:$36 sps:$4 sm:$0xff]   ;;  %v9977_v35 = vld [vmem:[#allocation2 + $0xeb8] ss:$36 sps:$4 sm:$0xff]  }
 0x1fb   :  { %3702 = vmatprep.subr.bf16.mxu0 %v9910_v36  ;;  %3948 = vmatprep.subr.bf16.mxu1 %v9913_v37  ;;  %v9982_v36 = vld [vmem:[#allocation2 + $0x5fc] ss:$36 sps:$4 sm:$0xff]   ;;  %v9985_v37 = vld [vmem:[#allocation2 + $0xf04] ss:$36 sps:$4 sm:$0xff]  }
 0x1fe   :  { %3703 = vmatpush1.bf16.msra.mxu0 %v9908_v38  ;;  %3949 = vmatpush1.bf16.msra.mxu1 %v9911_v39  ;;  %v9980_v38 = vld [vmem:[#allocation2 + $0x5f8] ss:$36 sps:$4 sm:$0xff]   ;;  %v9983_v39 = vld [vmem:[#allocation2 + $0xf00] ss:$36 sps:$4 sm:$0xff]  }
 0x1ff   :  { %3704 = vmatprep.subr.bf16.mxu0 %v9916_v40  ;;  %3950 = vmatprep.subr.bf16.mxu1 %v9919_v41  ;;  %v9988_v40 = vld [vmem:[#allocation2 + $0x644] ss:$36 sps:$4 sm:$0xff]   ;;  %v9991_v41 = vld [vmem:[#allocation2 + $0xf4c] ss:$36 sps:$4 sm:$0xff]  }
 0x202   :  { %3705 = vmatpush1.bf16.msra.mxu0 %v9914_v44  ;;  %3951 = vmatpush1.bf16.msra.mxu1 %v9917_v45  ;;  %v9986_v44 = vld [vmem:[#allocation2 + $0x640] ss:$36 sps:$4 sm:$0xff]   ;;  %v9989_v45 = vld [vmem:[#allocation2 + $0xf48] ss:$36 sps:$4 sm:$0xff]  }
 0x203   :  { %3706 = vmatprep.subr.bf16.mxu0 %v9922_v47  ;;  %3952 = vmatprep.subr.bf16.mxu1 %v9925_v48  ;;  %v9994_v48 = vld [vmem:[#allocation2 + $0x68c] ss:$36 sps:$4 sm:$0xff]  }
 0x206   :  { %3707 = vmatpush1.bf16.msra.mxu0 %v9920_v50  ;;  %3953 = vmatpush1.bf16.msra.mxu1 %v9923_v53 }
 0x207   :  { %3708 = vmatprep.subr.bf16.mxu0 %v9928_v55  ;;  %3954 = vmatprep.subr.bf16.mxu1 %v9931_v57  ;;  %v9997_v55 = vld [vmem:[#allocation2 + $0xf94] ss:$36 sps:$4 sm:$0xff]  }
 0x20a   :  { %3709 = vmatpush1.bf16.msra.mxu0 %v9926_v58  ;;  %3955 = vmatpush1.bf16.msra.mxu1 %v9929_v61  ;;  %v9992_v58 = vld [vmem:[#allocation2 + $0x688] ss:$36 sps:$4 sm:$0xff]   ;;  %v9995_v61 = vld [vmem:[#allocation2 + $0xf90] ss:$36 sps:$4 sm:$0xff]  }
 0x20b   :  { %3710 = vmatprep.subr.bf16.mxu0 %v9934_v0  ;;  %3956 = vmatprep.subr.bf16.mxu1 %v9937_v49  ;;  %v10000_v0 = vld [vmem:[#allocation2 + $0x6d4] ss:$36 sps:$4 sm:$0xff]   ;;  %v10001_v49 = vld [vmem:[#allocation2 + $0x6e0] ss:$36 sps:$4 sm:$0xff]  }
 0x20e   :  { %3711 = vmatpush1.bf16.msra.mxu0 %v9932_v1  ;;  %3957 = vmatpush1.bf16.msra.mxu1 %v9935_v2  ;;  %v11803_v1 = vld [vmem:[#allocation2 + $0x6d0] ss:$36 sps:$4 sm:$0xff]   ;;  %v10002_v2 = vld [vmem:[#allocation2 + $0x4a0] ss:$36 sps:$4 sm:$0xff]  }
 0x20f   :  { %3712 = vmatprep.subr.bf16.mxu0 %v9940_v4  ;;  %3958 = vmatprep.subr.bf16.mxu1 %v9943_v5  ;;  %v11805_v4 = vld [vmem:[#allocation2 + $0x71c] ss:$36 sps:$4 sm:$0xff]   ;;  %v10006_v5 = vld [vmem:[#allocation2 + $0x728] ss:$36 sps:$4 sm:$0xff]  }
 0x212   :  { %3713 = vmatpush1.bf16.msra.mxu0 %v9938_v6  ;;  %3959 = vmatpush1.bf16.msra.mxu1 %v9941_v7  ;;  %v11807_v6 = vld [vmem:[#allocation2 + $0x718] ss:$36 sps:$4 sm:$0xff]   ;;  %v10007_v7 = vld [vmem:[#allocation2 + $0x4e8] ss:$36 sps:$4 sm:$0xff]  }
 0x213   :  { %3714 = vmatprep.subr.bf16.mxu0 %v9946_v8  ;;  %3960 = vmatprep.subr.bf16.mxu1 %v9949_v9  ;;  %v11811_v8 = vld [vmem:[#allocation2 + $0x764] ss:$36 sps:$4 sm:$0xff]   ;;  %v10011_v9 = vld [vmem:[#allocation2 + $0x770] ss:$36 sps:$4 sm:$0xff]  }
 0x216   :  { %3715 = vmatpush1.bf16.msra.mxu0 %v9944_v10  ;;  %3961 = vmatpush1.bf16.msra.mxu1 %v9947_v11  ;;  %v11814_v10 = vld [vmem:[#allocation2 + $0x760] ss:$36 sps:$4 sm:$0xff]   ;;  %v10012_v11 = vld [vmem:[#allocation2 + $0x530] ss:$36 sps:$4 sm:$0xff]  }
 0x217   :  { %3725 = vmatprep.subr.bf16.mxu0 %v9952_v12  ;;  %3971 = vmatprep.subr.bf16.mxu1 %v9955_v13  ;;  %v11819_v12 = vld [vmem:[#allocation2 + $0x7ac] ss:$36 sps:$4 sm:$0xff]   ;;  %v10016_v13 = vld [vmem:[#allocation2 + $0x7b8] ss:$36 sps:$4 sm:$0xff]  }
 0x219   :  { %3717 = vmatmul.mubr.bf16.vlgmr.msra.gmra.mrb[8].mxu0 %v11744_v17  ;;  %3963 = vmatmul.mubr.bf16.vlgmr.msra.gmra.mrb[4].mxu1 %v11773_v33 }
 0x21a   :  { %3726 = vmatpush1.bf16.msra.mxu0 %v9950_v15  ;;  %3972 = vmatpush1.bf16.msra.mxu1 %v9953_v16  ;;  %v11822_v15 = vld [vmem:[#allocation2 + $0x7a8] ss:$36 sps:$4 sm:$0xff]   ;;  %v10017_v16 = vld [vmem:[#allocation2 + $0x578] ss:$36 sps:$4 sm:$0xff]  }
 0x21b   :  { %3727 = vmatprep.subr.bf16.mxu0 %v9958_v19  ;;  %3973 = vmatprep.subr.bf16.mxu1 %v9961_v20  ;;  %v11825_v19 = vld [vmem:[#allocation2 + $0x7f4] ss:$36 sps:$4 sm:$0xff]  }
 0x21c   :  { %4003 = vmatprep.mubr.bf16.mxu1 %v13982_v42  ;;  %3757 = vmatprep.mubr.bf16.mxu0 %v11738_v3  ;;  %v11828_v20 = vld [vmem:[#allocation2 + $0x7f0] ss:$36 sps:$4 sm:$0xff]  }
 0x21e   :  { %3728 = vmatpush1.bf16.msra.mxu0 %v9956_v21  ;;  %3974 = vmatpush1.bf16.msra.mxu1 %v9959_v22  ;;  %v10022_v21 = vld [vmem:[#allocation2 + $0x5c0] ss:$36 sps:$4 sm:$0xff]  }
 0x21f   :  { %3729 = vmatprep.subr.bf16.mxu0 %v9964_v23  ;;  %3975 = vmatprep.subr.bf16.mxu1 %v9967_v24  ;;  %v11831_v22 = vld [vmem:[#allocation2 + $0x83c] ss:$36 sps:$4 sm:$0xff]   ;;  %v10026_v23 = vld [vmem:[#allocation2 + $0x848] ss:$36 sps:$4 sm:$0xff]  }
 0x220   :  { %v11834_v24 = vld [vmem:[#allocation2 + $0x838] ss:$36 sps:$4 sm:$0xff]  }
 0x222   :  { %3730 = vmatpush1.bf16.msra.mxu0 %v9962_v25  ;;  %3976 = vmatpush1.bf16.msra.mxu1 %v9965_v26  ;;  %v10027_v25 = vld [vmem:[#allocation2 + $0x608] ss:$36 sps:$4 sm:$0xff]  }
 0x223   :  { %3731 = vmatprep.subr.bf16.mxu0 %v9970_v27  ;;  %3977 = vmatprep.subr.bf16.mxu1 %v9973_v28  ;;  %v11837_v26 = vld [vmem:[#allocation2 + $0x884] ss:$36 sps:$4 sm:$0xff]   ;;  %v10031_v27 = vld [vmem:[#allocation2 + $0x890] ss:$36 sps:$4 sm:$0xff]  }
 0x224   :  { %v11840_v28 = vld [vmem:[#allocation2 + $0x880] ss:$36 sps:$4 sm:$0xff]  }
 0x226   :  { %3732 = vmatpush1.bf16.msra.mxu0 %v9968_v29  ;;  %3978 = vmatpush1.bf16.msra.mxu1 %v9971_v30  ;;  %v10032_v29 = vld [vmem:[#allocation2 + $0x650] ss:$36 sps:$4 sm:$0xff]  }
 0x227   :  { %3733 = vmatprep.subr.bf16.mxu0 %v9976_v31  ;;  %3979 = vmatprep.subr.bf16.mxu1 %v9979_v32  ;;  %v11843_v30 = vld [vmem:[#allocation2 + $0x8cc] ss:$36 sps:$4 sm:$0xff]   ;;  %v10036_v31 = vld [vmem:[#allocation2 + $0x8d8] ss:$36 sps:$4 sm:$0xff]  }
 0x228   :  { %v11846_v32 = vld [vmem:[#allocation2 + $0x8c8] ss:$36 sps:$4 sm:$0xff]  }
 0x22a   :  { %3734 = vmatpush1.bf16.msra.mxu0 %v9974_v34  ;;  %3980 = vmatpush1.bf16.msra.mxu1 %v9977_v35  ;;  %v10037_v34 = vld [vmem:[#allocation2 + $0x698] ss:$36 sps:$4 sm:$0xff]  }
 0x22b   :  { %3735 = vmatprep.subr.bf16.mxu0 %v9982_v36  ;;  %3981 = vmatprep.subr.bf16.mxu1 %v9985_v37  ;;  %v10040_v35 = vld [vmem:[#allocation2 + $0x914] ss:$36 sps:$4 sm:$0xff]   ;;  %v10041_v37 = vld [vmem:[#allocation2 + $0xda0] ss:$36 sps:$4 sm:$0xff]  }
 0x22c   :  { %v11799_v47 = vpop.f32.mrb[0].mxu1  ;;  %v10038_v36 = vld [vmem:[#allocation2 + $0x910] ss:$36 sps:$4 sm:$0xff]  }
 0x22d   :  { %v11801_v50 = vpop.f32.mrb[1].mxu1 }
 0x22e   :  { %3736 = vmatpush1.bf16.msra.mxu0 %v9980_v38  ;;  %3982 = vmatpush1.bf16.msra.mxu1 %v9983_v39  ;;  %v3681_v53 = vpop.f32.mrb[2].mxu1  ;;  %v13984_v38 = vmov 0.0   ;;  %v10044_v39 = vld [vmem:[#allocation2 + $0x95c] ss:$36 sps:$4 sm:$0xff]  }
 0x22f   :  { %3737 = vmatprep.subr.bf16.mxu0 %v9988_v40  ;;  %3983 = vmatprep.subr.bf16.mxu1 %v9991_v41  ;;  %v3682_v57 = vpop.f32.mrb[3].mxu1  ;;  %v10042_v40 = vld [vmem:[#allocation2 + $0x958] ss:$36 sps:$4 sm:$0xff]   ;;  %v10045_v41 = vld [vmem:[#allocation2 + $0xde8] ss:$36 sps:$4 sm:$0xff]  }
 0x230   :  { %v10050_v53 = vld [vmem:[#allocation2 + $0x9e8] ss:$36 sps:$4 sm:$0xff]   ;;  %v10056_v57 = vld [vmem:[#allocation2 + $0xa34] ss:$36 sps:$4 sm:$0xff]  }
 0x232   :  { %3738 = vmatpush1.bf16.msra.mxu0 %v9986_v44  ;;  %3984 = vmatpush1.bf16.msra.mxu1 %v9989_v45  ;;  %v10048_v44 = vld [vmem:[#allocation2 + $0x9a4] ss:$36 sps:$4 sm:$0xff]  }
 0x233   :  { %3739 = vmatprep.subr.bf16.mxu0 %v9994_v48  ;;  %3985 = vmatprep.subr.bf16.mxu1 %v9997_v55  ;;  %v10046_v45 = vld [vmem:[#allocation2 + $0x9a0] ss:$36 sps:$4 sm:$0xff]   ;;  %v10049_v48 = vld [vmem:[#allocation2 + $0xe30] ss:$36 sps:$4 sm:$0xff]   ;;  %v10053_v55 = vld [vmem:[#allocation2 + $0xe78] ss:$36 sps:$4 sm:$0xff]  }
 0x236   :  { %3740 = vmatpush1.bf16.msra.mxu0 %v9992_v58  ;;  %3986 = vmatpush1.bf16.msra.mxu1 %v9995_v61  ;;  %v10054_v58 = vld [vmem:[#allocation2 + $0xa30] ss:$36 sps:$4 sm:$0xff]   ;;  %v10057_v61 = vld [vmem:[#allocation2 + $0xec0] ss:$36 sps:$4 sm:$0xff]  }
 0x237   :  { %3741 = vmatprep.subr.bf16.mxu0 %v10000_v0  ;;  %8721 = vmatprep.subr.bf16.mxu1 %v10001_v49  ;;  %v11860_v0 = vsub.s32 1, %v11710_v43  ;;  %v11863_v49 = vld [vmem:[#allocation7] sm:$0xff] }
 0x239   :  { %4004 = vmatmul.mubr.bf16.vlgmr.msra.gmra.mrb[4].mxu1 %v11781_v14  ;;  %14244 = vst [vmem:[#allocation34_spill] sm:$0xff] %v11860_v0 }
 0x23a   :  { %3742 = vmatpush1.bf16.msra.mxu0 %v11803_v1  ;;  %8722 = vmatpush3.bf16.msra.mxu1 %v10002_v2  ;;  %v10060_v2 = vld [vmem:[#allocation2 + $0xa7c] ss:$36 sps:$4 sm:$0xff]  }
 0x23b   :  { %3743 = vmatprep.subr.bf16.mxu0 %v11805_v4  ;;  %8723 = vmatprep.subr.bf16.mxu1 %v10006_v5  ;;  %v11865_v5 = vld [vmem:[#allocation5] sm:$0xff] }
 0x23c   :  { %4084 = vmatprep.mubr.bf16.mxu1 %v11738_v3  ;;  %v10021_v3 = vld [vmem:[#allocation2 + $0x800] ss:$36 sps:$4 sm:$0xff]  }
 0x23e   :  { %3744 = vmatpush1.bf16.msra.mxu0 %v11807_v6  ;;  %8724 = vmatpush3.bf16.msra.mxu1 %v10007_v7  ;;  %v11869_v7 = vrot.slane %v11863_v49, %v11860_v0 }
 0x23f   :  { %3745 = vmatprep.subr.bf16.mxu0 %v11811_v8  ;;  %8725 = vmatprep.subr.bf16.mxu1 %v10011_v9  ;;  %v10058_v9 = vld [vmem:[#allocation2 + $0xa78] ss:$36 sps:$4 sm:$0xff]  }
 0x240   :  { %14245 = vst [vmem:[#allocation35_spill] sm:$0xff] %v11869_v7 }
 0x242   :  { %3746 = vmatpush1.bf16.msra.mxu0 %v11814_v10  ;;  %8726 = vmatpush3.bf16.msra.mxu1 %v10012_v11  ;;  %v10061_v11 = vld [vmem:[#allocation2 + $0xf08] ss:$36 sps:$4 sm:$0xff]  }
 0x243   :  { %3747 = vmatprep.subr.bf16.mxu0 %v11819_v12  ;;  %8727 = vmatprep.subr.bf16.mxu1 %v10016_v13  ;;  %v10064_v13 = vld [vmem:[#allocation2 + $0xac4] ss:$36 sps:$4 sm:$0xff]  }
 0x246   :  { %3748 = vmatpush1.bf16.msra.mxu0 %v11822_v15  ;;  %8728 = vmatpush3.bf16.msra.mxu1 %v10017_v16 }
 0x247   :  { %3749 = vmatprep.subr.bf16.mxu0 %v11825_v19  ;;  %8729 = vmatprep.subr.bf16.mxu1 %v10021_v3  ;;  %v11876_v3 = vrot.slane %v11865_v5, %v11860_v0  ;;  %v11974_v0 = vld [vmem:[#allocation2 + $0x4] ss:$36 sps:$4 sm:$0xff]  }
 0x249   :  { %14246 = vst [vmem:[#allocation36_spill] sm:$0xff] %v11876_v3 }
 0x24a   :  { %3750 = vmatpush1.bf16.msra.mxu0 %v11828_v20  ;;  %8730 = vmatpush3.bf16.msra.mxu1 %v10022_v21 }
 0x24b   :  { %3751 = vmatprep.subr.bf16.mxu0 %v11831_v22  ;;  %8731 = vmatprep.subr.bf16.mxu1 %v10026_v23 }
 0x24e   :  { %3752 = vmatpush1.bf16.msra.mxu0 %v11834_v24  ;;  %8732 = vmatpush3.bf16.msra.mxu1 %v10027_v25 }
 0x24f   :  { %3753 = vmatprep.subr.bf16.mxu0 %v11837_v26  ;;  %8733 = vmatprep.subr.bf16.mxu1 %v10031_v27  ;;  %v10062_v27 = vld [vmem:[#allocation2 + $0xac0] ss:$36 sps:$4 sm:$0xff]  }
 0x252   :  { %3754 = vmatpush1.bf16.msra.mxu0 %v11840_v28  ;;  %8734 = vmatpush3.bf16.msra.mxu1 %v10032_v29  ;;  %v10065_v29 = vld [vmem:[#allocation2 + $0xf50] ss:$36 sps:$4 sm:$0xff]  }
 0x253   :  { %3755 = vmatprep.subr.bf16.mxu0 %v11843_v30  ;;  %8735 = vmatprep.subr.bf16.mxu1 %v10036_v31 }
 0x256   :  { %3756 = vmatpush1.bf16.msra.mxu0 %v11846_v32  ;;  %8736 = vmatpush3.bf16.msra.mxu1 %v10037_v34  ;;  %v10068_v34 = vld [vmem:[#allocation2 + $0xb0c] ss:$36 sps:$4 sm:$0xff]  }
 0x257   :  { %3766 = vmatprep.subr.bf16.mxu0 %v10040_v35  ;;  %9021 = vmatprep.subr.bf16.mxu1 %v13984_v38 }
 0x259   :  { %3758 = vmatmul.mubr.bf16.vlgmr.msra.gmra.mrb[8].mxu0 %v11748_v18  ;;  %4085 = vmatmul.mubr.bf16.vlgmr.msra.gmra.mrb[8].mxu1 %v11748_v18  ;;  %v10052_v18 = vld [vmem:[#allocation2 + $0x9ec] ss:$36 sps:$4 sm:$0xff]  }
 0x25a   :  { %3767 = vmatpush1.bf16.msra.mxu0 %v10038_v36  ;;  %9022 = vmatpush3.bf16.msra.mxu1 %v10041_v37  ;;  %v10066_v36 = vld [vmem:[#allocation2 + $0xb08] ss:$36 sps:$4 sm:$0xff]   ;;  %v10069_v37 = vld [vmem:[#allocation2 + $0xf98] ss:$36 sps:$4 sm:$0xff]  }
 0x25b   :  { %3768 = vmatprep.subr.bf16.mxu0 %v10044_v39  ;;  %9023 = vmatprep.subr.bf16.mxu1 %v13984_v38  ;;  %v10072_v39 = vld [vmem:[#allocation2 + $0xb54] ss:$36 sps:$4 sm:$0xff]  }
 0x25c   :  { %9037 = vmatprep.mubr.msk.bf16.mxu1 %vm11509_vm0, %v13984_v38  ;;  %3798 = vmatprep.mubr.bf16.mxu0 %v11768_v56 }
 0x25e   :  { %3769 = vmatpush1.bf16.msra.mxu0 %v10042_v40  ;;  %9024 = vmatpush3.bf16.msra.mxu1 %v10045_v41  ;;  %v10070_v41 = vld [vmem:[#allocation2 + $0xb50] ss:$36 sps:$4 sm:$0xff]  }
 0x25f   :  { %3770 = vmatprep.subr.bf16.mxu0 %v10048_v44  ;;  %9025 = vmatprep.subr.bf16.mxu1 %v13984_v38  ;;  %v10075_v44 = vld [vmem:[#allocation2 + $0xb9c] ss:$36 sps:$4 sm:$0xff]  }
 0x262   :  { %3771 = vmatpush1.bf16.msra.mxu0 %v10046_v45  ;;  %9026 = vmatpush3.bf16.msra.mxu1 %v10049_v48  ;;  %v10370_v45 = vld [vmem:[#allocation2 + $0x484] ss:$36 sps:$4 sm:$0xff]  }
 0x263   :  { %3772 = vmatprep.subr.bf16.mxu0 %v10052_v18  ;;  %9027 = vmatprep.subr.bf16.mxu1 %v13984_v38  ;;  %v10073_v18 = vld [vmem:[#allocation2 + $0xb98] ss:$36 sps:$4 sm:$0xff]  }
 0x266   :  { %3773 = vmatpush1.bf16.msra.mxu0 %v10050_v53  ;;  %9028 = vmatpush3.bf16.msra.mxu1 %v10053_v55  ;;  %v10078_v53 = vld [vmem:[#allocation2 + $0xbe4] ss:$36 sps:$4 sm:$0xff]  }
 0x267   :  { %3774 = vmatprep.subr.bf16.mxu0 %v10056_v57  ;;  %9029 = vmatprep.subr.bf16.mxu1 %v13984_v38  ;;  %v10076_v55 = vld [vmem:[#allocation2 + $0xbe0] ss:$36 sps:$4 sm:$0xff]  }
 0x268   :  { %v10371_v57 = vld [vmem:[#allocation2 + $0x480] ss:$36 sps:$4 sm:$0xff]  }
 0x26a   :  { %3775 = vmatpush1.bf16.msra.mxu0 %v10054_v58  ;;  %9030 = vmatpush3.bf16.msra.mxu1 %v10057_v61  ;;  %v10081_v58 = vld [vmem:[#allocation2 + $0xc2c] ss:$36 sps:$4 sm:$0xff]  }
 0x26b   :  { %3776 = vmatprep.subr.bf16.mxu0 %v10060_v2  ;;  %9031 = vmatprep.subr.bf16.mxu1 %v13984_v38  ;;  %v10372_v61 = vld [vmem:[#allocation2 + $0x4cc] ss:$36 sps:$4 sm:$0xff]  }
 0x26c   :  { %v11872_v16 = vpop.f32.mrb[0].mxu0  ;;  %v10079_v2 = vld [vmem:[#allocation2 + $0xc28] ss:$36 sps:$4 sm:$0xff]  }
 0x26d   :  { %v3515_v21 = vpop.f32.mrb[1].mxu0 }
 0x26e   :  { %v4220_v23 = vmul.f32 %v11869_v7, %v3515_v21  ;;  %v3517_v25 = vpop.f32.mrb[2].mxu0  ;;  %3777 = vmatpush1.bf16.msra.mxu0 %v10058_v9  ;;  %9032 = vmatpush3.bf16.msra.mxu1 %v10061_v11  ;;  %v10084_v9 = vld [vmem:[#allocation2 + $0xc74] ss:$36 sps:$4 sm:$0xff]   ;;  %v10087_v21 = vld [vmem:[#allocation2 + $0xcbc] ss:$36 sps:$4 sm:$0xff]  }
 0x26f   :  { %v3518_v31 = vpop.f32.mrb[3].mxu0  ;;  %3778 = vmatprep.subr.bf16.mxu0 %v10064_v13  ;;  %9033 = vmatprep.subr.bf16.mxu1 %v13984_v38  ;;  %v10082_v11 = vld [vmem:[#allocation2 + $0xc70] ss:$36 sps:$4 sm:$0xff]   ;;  %v10373_v13 = vld [vmem:[#allocation2 + $0x4c8] ss:$36 sps:$4 sm:$0xff]  }
 0x270   :  { %v4276_v35 = vadd.f32 %v11876_v3, %v4220_v23  ;;  %v10374_v23 = vld [vmem:[#allocation2 + $0x514] ss:$36 sps:$4 sm:$0xff]   ;;  %v12017_v3 = vld [vmem:[#allocation2 + $0x120] ss:$36 sps:$4 sm:$0xff]  }
 0x271   :  { %v10085_v25 = vld [vmem:[#allocation2 + $0xcb8] ss:$36 sps:$4 sm:$0xff]   ;;  %v10375_v31 = vld [vmem:[#allocation2 + $0x510] ss:$36 sps:$4 sm:$0xff]   ;;  %14258 = vst [vmem:[#allocation48_spill] sm:$0xff] %v12017_v3 }
 0x272   :  { %3779 = vmatpush1.bf16.msra.mxu0 %v10062_v27  ;;  %9034 = vmatpush3.bf16.msra.mxu1 %v10065_v29  ;;  %v11882_v40 = vmax.f32 %v4276_v35, 0.0  ;;  %v10090_v27 = vld [vmem:[#allocation2 + $0xd04] ss:$36 sps:$4 sm:$0xff]   ;;  %v10376_v35 = vld [vmem:[#allocation2 + $0x55c] ss:$36 sps:$4 sm:$0xff]  }
 0x273   :  { %3780 = vmatprep.subr.bf16.mxu0 %v10068_v34  ;;  %9035 = vmatprep.subr.bf16.mxu1 %v13984_v38  ;;  %v10088_v29 = vld [vmem:[#allocation2 + $0xd00] ss:$36 sps:$4 sm:$0xff]   ;;  %v10093_v34 = vld [vmem:[#allocation2 + $0xd4c] ss:$36 sps:$4 sm:$0xff]  }
 0x274   :  { %14247 = vst [vmem:[#allocation37_spill] sm:$0xff] %v11882_v40  ;;  %v11886_v48 = vpack.c.bf16 %v11882_v40, %v11882_v40  ;;  %v12023_v40 = vld [vmem:[#allocation2 + $0x168] ss:$36 sps:$4 sm:$0xff]  }
 0x275   :  { %14260 = vst [vmem:[#allocation50_spill] sm:$0xff] %v12023_v40 }
 0x276   :  { %3781 = vmatpush1.bf16.msra.mxu0 %v10066_v36  ;;  %9036 = vmatpush3.bf16.msra.mxu1 %v10069_v37  ;;  %v10091_v36 = vld [vmem:[#allocation2 + $0xd48] ss:$36 sps:$4 sm:$0xff]   ;;  %v10096_v37 = vld [vmem:[#allocation2 + $0xd94] ss:$36 sps:$4 sm:$0xff]  }
 0x277   :  { %3782 = vmatprep.subr.bf16.mxu0 %v10072_v39  ;;  %4507 = vmatprep.subr.bf16.mxu1 %v10370_v45  ;;  %v10094_v39 = vld [vmem:[#allocation2 + $0xd90] ss:$36 sps:$4 sm:$0xff]   ;;  %v10378_v45 = vld [vmem:[#allocation2 + $0x5a4] ss:$36 sps:$4 sm:$0xff]  }
 0x279   :  { %9038 = vmatmul.mubr.bf16.vlgmr.msra.gmra.mrb[12].mxu1 %v11781_v14 }
 0x27a   :  { %3783 = vmatpush1.bf16.msra.mxu0 %v10070_v41  ;;  %4539 = vmatprep.mubr.bf16.mxu1 %v11886_v48  ;;  %v10377_v41 = vld [vmem:[#allocation2 + $0x558] ss:$36 sps:$4 sm:$0xff]  }
 0x27b   :  { %3784 = vmatprep.subr.bf16.mxu0 %v10075_v44  ;;  %v10099_v44 = vld [vmem:[#allocation2 + $0xddc] ss:$36 sps:$4 sm:$0xff]  }
 0x27e   :  { %3785 = vmatpush1.bf16.msra.mxu0 %v10073_v18  ;;  %v10097_v18 = vld [vmem:[#allocation2 + $0xdd8] ss:$36 sps:$4 sm:$0xff]  }
 0x27f   :  { %4508 = vmatpush1.bf16.xpose.msra.mxu1 %v10371_v57  ;;  %3786 = vmatprep.subr.bf16.mxu0 %v10078_v53  ;;  %v10102_v53 = vld [vmem:[#allocation2 + $0xe24] ss:$36 sps:$4 sm:$0xff]  }
 0x280   :  { %4509 = vmatprep.subr.bf16.mxu1 %v10372_v61  ;;  %v10379_v57 = vld [vmem:[#allocation2 + $0x5a0] ss:$36 sps:$4 sm:$0xff]   ;;  %v10380_v61 = vld [vmem:[#allocation2 + $0x5ec] ss:$36 sps:$4 sm:$0xff]  }
 0x282   :  { %3787 = vmatpush1.bf16.msra.mxu0 %v10076_v55  ;;  %v10100_v55 = vld [vmem:[#allocation2 + $0xe20] ss:$36 sps:$4 sm:$0xff]  }
 0x283   :  { %3788 = vmatprep.subr.bf16.mxu0 %v10081_v58  ;;  %v10105_v58 = vld [vmem:[#allocation2 + $0xe6c] ss:$36 sps:$4 sm:$0xff]  }
 0x286   :  { %3789 = vmatpush1.bf16.msra.mxu0 %v10079_v2  ;;  %v10103_v2 = vld [vmem:[#allocation2 + $0xe68] ss:$36 sps:$4 sm:$0xff]  }
 0x287   :  { %4510 = vmatpush1.bf16.xpose.msra.mxu1 %v10373_v13  ;;  %3790 = vmatprep.subr.bf16.mxu0 %v10084_v9  ;;  %v10108_v9 = vld [vmem:[#allocation2 + $0xeb4] ss:$36 sps:$4 sm:$0xff]   ;;  %v10381_v13 = vld [vmem:[#allocation2 + $0x5e8] ss:$36 sps:$4 sm:$0xff]  }
 0x288   :  { %4511 = vmatprep.subr.bf16.mxu1 %v10374_v23  ;;  %v10382_v23 = vld [vmem:[#allocation2 + $0x634] ss:$36 sps:$4 sm:$0xff]  }
 0x28a   :  { %3791 = vmatpush1.bf16.msra.mxu0 %v10082_v11  ;;  %v10106_v11 = vld [vmem:[#allocation2 + $0xeb0] ss:$36 sps:$4 sm:$0xff]  }
 0x28b   :  { %3792 = vmatprep.subr.bf16.mxu0 %v10087_v21  ;;  %v10111_v21 = vld [vmem:[#allocation2 + $0xefc] ss:$36 sps:$4 sm:$0xff]  }
 0x28e   :  { %3793 = vmatpush1.bf16.msra.mxu0 %v10085_v25  ;;  %v10109_v25 = vld [vmem:[#allocation2 + $0xef8] ss:$36 sps:$4 sm:$0xff]  }
 0x28f   :  { %4512 = vmatpush1.bf16.xpose.msra.mxu1 %v10375_v31  ;;  %3794 = vmatprep.subr.bf16.mxu0 %v10090_v27  ;;  %v10114_v27 = vld [vmem:[#allocation2 + $0xf44] ss:$36 sps:$4 sm:$0xff]  }
 0x290   :  { %4513 = vmatprep.subr.bf16.mxu1 %v10376_v35 }
 0x292   :  { %3795 = vmatpush1.bf16.msra.mxu0 %v10088_v29 }
 0x293   :  { %3796 = vmatprep.subr.bf16.mxu0 %v10093_v34 }
 0x296   :  { %3797 = vmatpush1.bf16.msra.mxu0 %v10091_v36 }
 0x297   :  { %4514 = vmatpush1.bf16.xpose.msra.mxu1 %v10377_v41  ;;  %3807 = vmatprep.subr.bf16.mxu0 %v10096_v37  ;;  %v10112_v37 = vld [vmem:[#allocation2 + $0xf40] ss:$36 sps:$4 sm:$0xff]   ;;  %v10383_v41 = vld [vmem:[#allocation2 + $0x630] ss:$36 sps:$4 sm:$0xff]  }
 0x298   :  { %4515 = vmatprep.subr.bf16.mxu1 %v10378_v45  ;;  %v10384_v45 = vld [vmem:[#allocation2 + $0x67c] ss:$36 sps:$4 sm:$0xff]  }
 0x299   :  { %3799 = vmatmul.mubr.bf16.vlgmr.msra.gmra.mrb[8].mxu0 %v11773_v33 }
 0x29a   :  { %3808 = vmatpush1.bf16.msra.mxu0 %v10094_v39  ;;  %3839 = vmatprep.mubr.bf16.mxu0 %v13982_v42  ;;  %v10396_v42 = vld [vmem:[#allocation2 + $0x82c] ss:$36 sps:$4 sm:$0xff]  }
 0x29b   :  { %3809 = vmatprep.subr.bf16.mxu0 %v10099_v44  ;;  %v10117_v44 = vld [vmem:[#allocation2 + $0xf8c] ss:$36 sps:$4 sm:$0xff]  }
 0x29e   :  { %3810 = vmatpush1.bf16.msra.mxu0 %v10097_v18  ;;  %v10115_v18 = vld [vmem:[#allocation2 + $0xf88] ss:$36 sps:$4 sm:$0xff]  }
 0x29f   :  { %4516 = vmatpush1.bf16.xpose.msra.mxu1 %v10379_v57  ;;  %3811 = vmatprep.subr.bf16.mxu0 %v10102_v53  ;;  %v11898_v53 = vld [vmem:[#allocation2 + $0x260] ss:$36 sps:$4 sm:$0xff]  }
 0x2a0   :  { %4517 = vmatprep.subr.bf16.mxu1 %v10380_v61  ;;  %v10386_v57 = vld [vmem:[#allocation2 + $0x6c4] ss:$36 sps:$4 sm:$0xff]   ;;  %v11911_v61 = vld [vmem:[#allocation2 + $0x2f0] ss:$36 sps:$4 sm:$0xff]  }
 0x2a2   :  { %3812 = vmatpush1.bf16.msra.mxu0 %v10100_v55  ;;  %v11903_v55 = vld [vmem:[#allocation2 + $0x2a8] ss:$36 sps:$4 sm:$0xff]  }
 0x2a3   :  { %3813 = vmatprep.subr.bf16.mxu0 %v10105_v58  ;;  %v11907_v58 = vld [vmem:[#allocation2 + $0x68] ss:$36 sps:$4 sm:$0xff]  }
 0x2a6   :  { %3814 = vmatpush1.bf16.msra.mxu0 %v10103_v2  ;;  %v11914_v2 = vld [vmem:[#allocation2 + $0xb0] ss:$36 sps:$4 sm:$0xff]  }
 0x2a7   :  { %4518 = vmatpush1.bf16.xpose.msra.mxu1 %v10381_v13  ;;  %3815 = vmatprep.subr.bf16.mxu0 %v10108_v9  ;;  %v10387_v9 = vld [vmem:[#allocation2 + $0x6c0] ss:$36 sps:$4 sm:$0xff]   ;;  %v11920_v13 = vld [vmem:[#allocation2 + $0xf8] ss:$36 sps:$4 sm:$0xff]  }
 0x2a8   :  { %4519 = vmatprep.subr.bf16.mxu1 %v10382_v23  ;;  %v10389_v23 = vld [vmem:[#allocation2 + $0x708] ss:$36 sps:$4 sm:$0xff]  }
 0x2aa   :  { %3816 = vmatpush1.bf16.msra.mxu0 %v10106_v11  ;;  %v11917_v11 = vld [vmem:[#allocation2 + $0x338] ss:$36 sps:$4 sm:$0xff]  }
 0x2ab   :  { %3817 = vmatprep.subr.bf16.mxu0 %v10111_v21  ;;  %v11926_v21 = vld [vmem:[#allocation2 + $0x140] ss:$36 sps:$4 sm:$0xff]  }
 0x2ac   :  { %v3554_v29 = vpop.f32.mrb[4].mxu0 }
 0x2ad   :  { %v11893_v31 = vadd.f32 %v11799_v47, %v3554_v29  ;;  %v3556_v34 = vpop.f32.mrb[5].mxu0  ;;  %v11900_v47 = vld [vmem:[#allocation2 + $0x20] ss:$36 sps:$4 sm:$0xff]   ;;  %v11932_v29 = vld [vmem:[#allocation2 + $0x188] ss:$36 sps:$4 sm:$0xff]  }
 0x2ae   :  { %v11896_v35 = vadd.f32 %v11801_v50, %v3556_v34  ;;  %v3558_v36 = vpop.f32.mrb[6].mxu0  ;;  %3818 = vmatpush1.bf16.msra.mxu0 %v10109_v25  ;;  %v10385_v50 = vld [vmem:[#allocation2 + $0x678] ss:$36 sps:$4 sm:$0xff]   ;;  %v11929_v25 = vld [vmem:[#allocation2 + $0x3c8] ss:$36 sps:$4 sm:$0xff]  }
 0x2af   :  { %v3559_v39 = vpop.f32.mrb[7].mxu0  ;;  %4520 = vmatpush1.bf16.xpose.msra.mxu1 %v10383_v41  ;;  %3819 = vmatprep.subr.bf16.mxu0 %v10114_v27  ;;  %v10390_v27 = vld [vmem:[#allocation2 + $0x754] ss:$36 sps:$4 sm:$0xff]   ;;  %v10392_v41 = vld [vmem:[#allocation2 + $0x79c] ss:$36 sps:$4 sm:$0xff]  }
 0x2b0   :  { %4521 = vmatprep.subr.bf16.mxu1 %v10384_v45  ;;  %v11935_v34 = vld [vmem:[#allocation2 + $0x410] ss:$36 sps:$4 sm:$0xff]   ;;  %v11941_v39 = vld [vmem:[#allocation2 + $0x458] ss:$36 sps:$4 sm:$0xff]   ;;  %v10134_v45 = vld [vmem:[#allocation2 + $0xb60] ss:$36 sps:$4 sm:$0xff]  }
 0x2b1   :  { %v11938_v36 = vld [vmem:[#allocation2 + $0x1d0] ss:$36 sps:$4 sm:$0xff]  }
 0x2b2   :  { %3820 = vmatpush1.bf16.msra.mxu0 %v10112_v37  ;;  %v10391_v37 = vld [vmem:[#allocation2 + $0x750] ss:$36 sps:$4 sm:$0xff]  }
 0x2b3   :  { %3821 = vmatprep.subr.bf16.mxu0 %v10117_v44  ;;  %v11944_v44 = vld [vmem:[#allocation2 + $0x218] ss:$36 sps:$4 sm:$0xff]  }
 0x2b6   :  { %3822 = vmatpush1.bf16.msra.mxu0 %v10115_v18  ;;  %v10135_v18 = vld [vmem:[#allocation2 + $0x920] ss:$36 sps:$4 sm:$0xff]  }
 0x2b7   :  { %4522 = vmatpush1.bf16.xpose.msra.mxu1 %v10385_v50  ;;  %8699 = vmatprep.subr.bf16.mxu0 %v11898_v53  ;;  %v10393_v50 = vld [vmem:[#allocation2 + $0x798] ss:$36 sps:$4 sm:$0xff]  }
 0x2b8   :  { %4523 = vmatprep.subr.bf16.mxu1 %v10386_v57  ;;  %v10136_v57 = vld [vmem:[#allocation2 + $0xba8] ss:$36 sps:$4 sm:$0xff]  }
 0x2b9   :  { %3840 = vmatmul.mubr.bf16.vlgmr.msra.gmra.mrb[8].mxu0 %v11781_v14  ;;  %v10388_v14 = vld [vmem:[#allocation2 + $0x70c] ss:$36 sps:$4 sm:$0xff]  }
 0x2ba   :  { %8700 = vmatpush3.bf16.msra.mxu0 %v11900_v47  ;;  %4044 = vmatprep.mubr.bf16.mxu0 %v11730_v62  ;;  %v11923_v62 = vld [vmem:[#allocation2 + $0x380] ss:$36 sps:$4 sm:$0xff]  }
 0x2bb   :  { %8701 = vmatprep.subr.bf16.mxu0 %v11903_v55 }
 0x2be   :  { %8702 = vmatpush3.bf16.msra.mxu0 %v11907_v58 }
 0x2bf   :  { %4524 = vmatpush1.bf16.xpose.msra.mxu1 %v10387_v9  ;;  %8703 = vmatprep.subr.bf16.mxu0 %v11911_v61  ;;  %v10394_v9 = vld [vmem:[#allocation2 + $0x7e4] ss:$36 sps:$4 sm:$0xff]  }
 0x2c0   :  { %4525 = vmatprep.subr.bf16.mxu1 %v10388_v14  ;;  %v10137_v14 = vld [vmem:[#allocation2 + $0x968] ss:$36 sps:$4 sm:$0xff]  }
 0x2c2   :  { %8704 = vmatpush3.bf16.msra.mxu0 %v11914_v2 }
 0x2c3   :  { %8705 = vmatprep.subr.bf16.mxu0 %v11917_v11 }
 0x2c6   :  { %8706 = vmatpush3.bf16.msra.mxu0 %v11920_v13 }
 0x2c7   :  { %4526 = vmatpush1.bf16.xpose.msra.mxu1 %v10389_v23  ;;  %8707 = vmatprep.subr.bf16.mxu0 %v11923_v62  ;;  %v10138_v23 = vld [vmem:[#allocation2 + $0xbf0] ss:$36 sps:$4 sm:$0xff]  }
 0x2c8   :  { %4527 = vmatprep.subr.bf16.mxu1 %v10390_v27  ;;  %v10139_v27 = vld [vmem:[#allocation2 + $0x9b0] ss:$36 sps:$4 sm:$0xff]  }
 0x2ca   :  { %8708 = vmatpush3.bf16.msra.mxu0 %v11926_v21 }
 0x2cb   :  { %8709 = vmatprep.subr.bf16.mxu0 %v11929_v25 }
 0x2ce   :  { %8710 = vmatpush3.bf16.msra.mxu0 %v11932_v29 }
 0x2cf   :  { %4528 = vmatpush1.bf16.xpose.msra.mxu1 %v10391_v37  ;;  %8711 = vmatprep.subr.bf16.mxu0 %v11935_v34  ;;  %v10395_v37 = vld [vmem:[#allocation2 + $0x7e0] ss:$36 sps:$4 sm:$0xff]  }
 0x2d0   :  { %4529 = vmatprep.subr.bf16.mxu1 %v10392_v41  ;;  %v10140_v41 = vld [vmem:[#allocation2 + $0xc38] ss:$36 sps:$4 sm:$0xff]  }
 0x2d2   :  { %8712 = vmatpush3.bf16.msra.mxu0 %v11938_v36 }
 0x2d3   :  { %8713 = vmatprep.subr.bf16.mxu0 %v11941_v39 }
 0x2d6   :  { %8714 = vmatpush3.bf16.msra.mxu0 %v11944_v44 }
 0x2d7   :  { %4530 = vmatpush1.bf16.xpose.msra.mxu1 %v10393_v50  ;;  %8743 = vmatprep.subr.bf16.mxu0 %v10134_v45  ;;  %v10141_v45 = vld [vmem:[#allocation2 + $0x9f8] ss:$36 sps:$4 sm:$0xff]   ;;  %v10142_v50 = vld [vmem:[#allocation2 + $0xc80] ss:$36 sps:$4 sm:$0xff]  }
 0x2d8   :  { %4531 = vmatprep.subr.bf16.mxu1 %v10394_v9  ;;  %v10398_v9 = vld [vmem:[#allocation2 + $0x874] ss:$36 sps:$4 sm:$0xff]  }
 0x2d9   :  { %4045 = vmatmul.mubr.bf16.vlgmr.msra.gmra.mrb[12].mxu0 %v11744_v17  ;;  %v10143_v17 = vld [vmem:[#allocation2 + $0xa40] ss:$36 sps:$4 sm:$0xff]  }
 0x2da   :  { %8744 = vmatpush3.bf16.msra.mxu0 %v10135_v18  ;;  %4124 = vmatprep.mubr.bf16.mxu0 %v11768_v56  ;;  %v10397_v18 = vld [vmem:[#allocation2 + $0x828] ss:$36 sps:$4 sm:$0xff]  }
 0x2db   :  { %8745 = vmatprep.subr.bf16.mxu0 %v10136_v57  ;;  %v10144_v56 = vld [vmem:[#allocation2 + $0xcc8] ss:$36 sps:$4 sm:$0xff]   ;;  %v11951_v57 = vsub.s32 0, %v11710_v43 }
 0x2dd   :  { %14248 = vst [vmem:[#allocation38_spill] sm:$0xff] %v11951_v57 }
 0x2de   :  { %8746 = vmatpush3.bf16.msra.mxu0 %v10137_v14  ;;  %v4188_v14 = vsub.s32 3, %v11710_v43 }
 0x2df   :  { %4532 = vmatpush1.bf16.xpose.msra.mxu1 %v10395_v37  ;;  %8747 = vmatprep.subr.bf16.mxu0 %v10138_v23  ;;  %v10145_v23 = vld [vmem:[#allocation2 + $0xa88] ss:$36 sps:$4 sm:$0xff]  }
 0x2e0   :  { %4533 = vmatprep.subr.bf16.mxu1 %v10396_v42  ;;  %v10146_v42 = vld [vmem:[#allocation2 + $0xd10] ss:$36 sps:$4 sm:$0xff]   ;;  %v11959_v37 = vrot.slane %v11863_v49, %v4188_v14  ;;  %v11970_v38 = vrot.slane %v11865_v5, %v4188_v14 }
 0x2e2   :  { %8748 = vmatpush3.bf16.msra.mxu0 %v10139_v27  ;;  %v11956_v27 = vrot.slane %v11863_v49, %v11951_v57  ;;  %14250 = vst [vmem:[#allocation40_spill] sm:$0xff] %v11959_v37  ;;  %14252 = vst [vmem:[#allocation42_spill] sm:$0xff] %v11970_v38 }
 0x2e3   :  { %8749 = vmatprep.subr.bf16.mxu0 %v10140_v41  ;;  %v10147_v41 = vld [vmem:[#allocation2 + $0xad0] ss:$36 sps:$4 sm:$0xff]  }
 0x2e4   :  { %14249 = vst [vmem:[#allocation39_spill] sm:$0xff] %v11956_v27 }
 0x2e6   :  { %8750 = vmatpush3.bf16.msra.mxu0 %v10141_v45  ;;  %v10399_v45 = vld [vmem:[#allocation2 + $0x870] ss:$36 sps:$4 sm:$0xff]  }
 0x2e7   :  { %4534 = vmatpush1.bf16.xpose.msra.mxu1 %v10397_v18  ;;  %8751 = vmatprep.subr.bf16.mxu0 %v10142_v50  ;;  %v10148_v50 = vld [vmem:[#allocation2 + $0xd58] ss:$36 sps:$4 sm:$0xff]   ;;  %v4219_v18 = vmul.f32 %v11956_v27, %v11872_v16 }
 0x2e8   :  { %4535 = vmatprep.subr.bf16.mxu1 %v10398_v9  ;;  %v4222_v9 = vmul.f32 %v11896_v35, %v11959_v37  ;;  %v10401_v16 = vld [vmem:[#allocation2 + $0x8b8] ss:$36 sps:$4 sm:$0xff]   ;;  %v10403_v35 = vld [vmem:[#allocation2 + $0x48c] ss:$36 sps:$4 sm:$0xff]   ;;  %v12014_v37 = vld [vmem:[#allocation2 + $0x124] ss:$36 sps:$4 sm:$0xff]  }
 0x2e9   :  { %14257 = vst [vmem:[#allocation47_spill] sm:$0xff] %v12014_v37 }
 0x2ea   :  { %8752 = vmatpush3.bf16.msra.mxu0 %v10143_v17  ;;  %v11965_v17 = vrot.slane %v11865_v5, %v11951_v57  ;;  %v10413_v57 = vld [vmem:[#allocation2 + $0x518] ss:$36 sps:$4 sm:$0xff]  }
 0x2eb   :  { %8753 = vmatprep.subr.bf16.mxu0 %v10144_v56  ;;  %v10400_v56 = vld [vmem:[#allocation2 + $0x8bc] ss:$36 sps:$4 sm:$0xff]  }
 0x2ec   :  { %14251 = vst [vmem:[#allocation41_spill] sm:$0xff] %v11965_v17 }
 0x2ee   :  { %8754 = vmatpush3.bf16.msra.mxu0 %v10145_v23  ;;  %v10149_v23 = vld [vmem:[#allocation2 + $0xb18] ss:$36 sps:$4 sm:$0xff]  }
 0x2ef   :  { %4536 = vmatpush1.bf16.xpose.msra.mxu1 %v10399_v45  ;;  %8755 = vmatprep.subr.bf16.mxu0 %v10146_v42  ;;  %v4275_v42 = vadd.f32 %v11965_v17, %v4219_v18  ;;  %v4278_v45 = vadd.f32 %v11970_v38, %v4222_v9  ;;  %v11992_v18 = vld [vmem:[#allocation2] ss:$36 sps:$4 sm:$0xff]   ;;  %v10405_v9 = vld [vmem:[#allocation2 + $0x488] ss:$36 sps:$4 sm:$0xff]  }
 0x2f0   :  { %4537 = vmatprep.subr.bf16.mxu1 %v10400_v56  ;;  %v12008_v38 = vld [vmem:[#allocation2 + $0xdc] ss:$36 sps:$4 sm:$0xff]   ;;  %v12020_v17 = vld [vmem:[#allocation2 + $0x16c] ss:$36 sps:$4 sm:$0xff]  }
 0x2f1   :  { %v11977_v56 = vmax.f32 %v4275_v42, 0.0  ;;  %v11980_v14 = vmax.f32 %v4278_v45, 0.0  ;;  %v11999_v42 = vld [vmem:[#allocation2 + $0x48] ss:$36 sps:$4 sm:$0xff]   ;;  %v10409_v45 = vld [vmem:[#allocation2 + $0x4d0] ss:$36 sps:$4 sm:$0xff]  }
 0x2f2   :  { %8756 = vmatpush3.bf16.msra.mxu0 %v10147_v41  ;;  %14255 = vst [vmem:[#allocation45_spill] sm:$0xff] %v12008_v38  ;;  %14259 = vst [vmem:[#allocation49_spill] sm:$0xff] %v12020_v17 }
 0x2f3   :  { %8757 = vmatprep.subr.bf16.mxu0 %v10148_v50  ;;  %14253 = vst [vmem:[#allocation43_spill] sm:$0xff] %v11977_v56  ;;  %14254 = vst [vmem:[#allocation44_spill] sm:$0xff] %v11980_v14  ;;  %v11985_v41 = vpack.c.bf16 %v11977_v56, %v11977_v56  ;;  %v11989_v50 = vpack.c.bf16 %v11980_v14, %v11980_v14  ;;  %v12011_v14 = vld [vmem:[#allocation2 + $0xd8] ss:$36 sps:$4 sm:$0xff]  }
 0x2f4   :  { %14256 = vst [vmem:[#allocation46_spill] sm:$0xff] %v12011_v14  ;;  %v12026_v56 = vld [vmem:[#allocation2 + $0x1b4] ss:$36 sps:$4 sm:$0xff]  }
 0x2f5   :  { %14261 = vst [vmem:[#allocation51_spill] sm:$0xff] %v12026_v56 }
 0x2f6   :  { %8758 = vmatpush3.bf16.msra.mxu0 %v10149_v23  ;;  %v10407_v23 = vld [vmem:[#allocation2 + $0x4d4] ss:$36 sps:$4 sm:$0xff]  }
 0x2f7   :  { %4538 = vmatpush1.bf16.xpose.msra.mxu1 %v10401_v16  ;;  %4302 = vmatprep.subr.bf16.mxu0 %v11974_v0  ;;  %v12002_v16 = vld [vmem:[#allocation2 + $0x94] ss:$36 sps:$4 sm:$0xff]  }
 0x2f8   :  { %4548 = vmatprep.subr.bf16.mxu1 %v10403_v35  ;;  %v10411_v35 = vld [vmem:[#allocation2 + $0x51c] ss:$36 sps:$4 sm:$0xff]  }
 0x2f9   :  { %4125 = vmatmul.mubr.bf16.vlgmr.msra.gmra.mrb[16].mxu0 %v11773_v33  ;;  %v11996_v33 = vld [vmem:[#allocation2 + $0x4c] ss:$36 sps:$4 sm:$0xff]  }
 0x2fa   :  { %4334 = vmatprep.mubr.bf16.mxu0 %v11886_v48 }
 0x2fe   :  { %4540 = vmatmul.mubr.bf16.vlgmr.msra.gmra.mrb[16].mxu1 %v11985_v41 }
 0x2ff   :  { %4303 = vmatpush1.bf16.xpose.msra.mxu0 %v11992_v18  ;;  %4549 = vmatpush1.bf16.xpose.msra.mxu1 %v10405_v9  ;;  %v12005_v9 = vld [vmem:[#allocation2 + $0x90] ss:$36 sps:$4 sm:$0xff]  }
 0x300   :  { %4580 = vmatprep.mubr.bf16.mxu1 %v11989_v50  ;;  %4304 = vmatprep.subr.bf16.mxu0 %v11996_v33 }
 0x301   :  { %4550 = vmatprep.subr.bf16.mxu1 %v10407_v23  ;;  %v10415_v23 = vld [vmem:[#allocation2 + $0x564] ss:$36 sps:$4 sm:$0xff]  }
 0x307   :  { %4305 = vmatpush1.bf16.xpose.msra.mxu0 %v11999_v42  ;;  %4551 = vmatpush1.bf16.xpose.msra.mxu1 %v10409_v45  ;;  %v10417_v45 = vld [vmem:[#allocation2 + $0x560] ss:$36 sps:$4 sm:$0xff]  }
 0x308   :  { %4306 = vmatprep.subr.bf16.mxu0 %v12002_v16  ;;  %4552 = vmatprep.subr.bf16.mxu1 %v10411_v35  ;;  %v10419_v35 = vld [vmem:[#allocation2 + $0x5ac] ss:$36 sps:$4 sm:$0xff]  }
 0x30c   :  { %v12029_v7 = vpop.f32.mrb[4].mxu1 }
 0x30f   :  { %4307 = vmatpush1.bf16.xpose.msra.mxu0 %v12005_v9  ;;  %4553 = vmatpush1.bf16.xpose.msra.mxu1 %v10413_v57  ;;  %v10421_v57 = vld [vmem:[#allocation2 + $0x5a8] ss:$36 sps:$4 sm:$0xff]  }
 0x310   :  { %4308 = vmatprep.subr.bf16.mxu0 %v12008_v38  ;;  %4554 = vmatprep.subr.bf16.mxu1 %v10415_v23  ;;  %v10423_v23 = vld [vmem:[#allocation2 + $0x5f4] ss:$36 sps:$4 sm:$0xff]  }
 0x311   :  { %v10499_v38 = vld [vmem:[#allocation2 + $0x6d4] ss:$36 sps:$4 sm:$0xff]  }
 0x317   :  { %4309 = vmatpush1.bf16.xpose.msra.mxu0 %v12011_v14  ;;  %4555 = vmatpush1.bf16.xpose.msra.mxu1 %v10417_v45  ;;  %v10425_v45 = vld [vmem:[#allocation2 + $0x5f0] ss:$36 sps:$4 sm:$0xff]  }
 0x318   :  { %4310 = vmatprep.subr.bf16.mxu0 %v12014_v37  ;;  %4556 = vmatprep.subr.bf16.mxu1 %v10419_v35  ;;  %v10427_v35 = vld [vmem:[#allocation2 + $0x63c] ss:$36 sps:$4 sm:$0xff]  }
 0x31f   :  { %4311 = vmatpush1.bf16.xpose.msra.mxu0 %v12017_v3  ;;  %4557 = vmatpush1.bf16.xpose.msra.mxu1 %v10421_v57  ;;  %v12031_v57 = vpop.f32.mrb[5].mxu1  ;;  %v10479_v3 = vld [vmem:[#allocation2 + $0x56c] ss:$36 sps:$4 sm:$0xff]  }
 0x320   :  { %4312 = vmatprep.subr.bf16.mxu0 %v12020_v17  ;;  %4558 = vmatprep.subr.bf16.mxu1 %v10423_v23  ;;  %v4009_v27 = vpop.f32.mrb[6].mxu1 }
 0x321   :  { %v4010_v52 = vpop.f32.mrb[7].mxu1  ;;  %v12041_v27 = vld [vmem:[#allocation2 + $0x1f8] ss:$36 sps:$4 sm:$0xff]  }
 0x322   :  { %14264 = vst [vmem:[#allocation54_spill] sm:$0xff] %v12041_v27  ;;  %v10433_v52 = vld [vmem:[#allocation2 + $0x680] ss:$36 sps:$4 sm:$0xff]  }
 0x327   :  { %4313 = vmatpush1.bf16.xpose.msra.mxu0 %v12023_v40  ;;  %4559 = vmatpush1.bf16.xpose.msra.mxu1 %v10425_v45  ;;  %v12044_v40 = vld [vmem:[#allocation2 + $0x244] ss:$36 sps:$4 sm:$0xff]  }
 0x328   :  { %4314 = vmatprep.subr.bf16.mxu0 %v12026_v56  ;;  %4560 = vmatprep.subr.bf16.mxu1 %v10427_v35  ;;  %v10431_v35 = vld [vmem:[#allocation2 + $0x684] ss:$36 sps:$4 sm:$0xff]   ;;  %14265 = vst [vmem:[#allocation55_spill] sm:$0xff] %v12044_v40 }
 0x32c   :  { %v8737_v51 = vpop.f32.mrb[8].mxu1 }
 0x32d   :  { %v8738_v23 = vpop.f32.mrb[9].mxu1 }
 0x32e   :  { %v12036_v45 = vadd.f32 %v8738_v23, %v8737_v51  ;;  %v8740_v63 = vpop.f32.mrb[10].mxu1  ;;  %v10437_v51 = vld [vmem:[#allocation2 + $0x6c8] ss:$36 sps:$4 sm:$0xff]  }
 0x32f   :  { %4315 = vmatpush1.bf16.xpose.msra.mxu0 %v12033_v46  ;;  %4561 = vmatpush1.bf16.xpose.msra.mxu1 %v10429_v60  ;;  %v8741_v56 = vpop.f32.mrb[11].mxu1  ;;  %v10435_v60 = vld [vmem:[#allocation2 + $0x6cc] ss:$36 sps:$4 sm:$0xff]   ;;  %v12047_v63 = vld [vmem:[#allocation2 + $0x240] ss:$36 sps:$4 sm:$0xff]  }
 0x330   :  { %4316 = vmatprep.subr.bf16.mxu0 %v12038_v54  ;;  %4562 = vmatprep.subr.bf16.mxu1 %v10431_v35  ;;  %14266 = vst [vmem:[#allocation56_spill] sm:$0xff] %v12047_v63  ;;  %v12050_v23 = vld [vmem:[#allocation2 + $0x28c] ss:$36 sps:$4 sm:$0xff]   ;;  %v10439_v56 = vld [vmem:[#allocation2 + $0x714] ss:$36 sps:$4 sm:$0xff]  }
 0x331   :  { %14267 = vst [vmem:[#allocation57_spill] sm:$0xff] %v12050_v23  ;;  %v12053_v35 = vld [vmem:[#allocation2 + $0x288] ss:$36 sps:$4 sm:$0xff]   ;;  %v12101_v46 = vld [vmem:[#allocation2 + $0x438] ss:$36 sps:$4 sm:$0xff]  }
 0x332   :  { %14268 = vst [vmem:[#allocation58_spill] sm:$0xff] %v12053_v35  ;;  %14282 = vst [vmem:[#allocation72_spill] sm:$0xff] %v12101_v46 }
 0x337   :  { %4317 = vmatpush1.bf16.xpose.msra.mxu0 %v12041_v27  ;;  %4563 = vmatpush1.bf16.xpose.msra.mxu1 %v10433_v52  ;;  %v10441_v52 = vld [vmem:[#allocation2 + $0x710] ss:$36 sps:$4 sm:$0xff]  }
 0x338   :  { %4318 = vmatprep.subr.bf16.mxu0 %v12044_v40  ;;  %4564 = vmatprep.subr.bf16.mxu1 %v10435_v60  ;;  %v12056_v40 = vld [vmem:[#allocation2 + $0x2d4] ss:$36 sps:$4 sm:$0xff]   ;;  %v10443_v60 = vld [vmem:[#allocation2 + $0x75c] ss:$36 sps:$4 sm:$0xff]  }
 0x339   :  { %14269 = vst [vmem:[#allocation59_spill] sm:$0xff] %v12056_v40 }
 0x33f   :  { %4319 = vmatpush1.bf16.xpose.msra.mxu0 %v12047_v63  ;;  %4565 = vmatpush1.bf16.xpose.msra.mxu1 %v10437_v51  ;;  %v12059_v63 = vld [vmem:[#allocation2 + $0x2d0] ss:$36 sps:$4 sm:$0xff]   ;;  %v10445_v51 = vld [vmem:[#allocation2 + $0x758] ss:$36 sps:$4 sm:$0xff]  }
 0x340   :  { %4320 = vmatprep.subr.bf16.mxu0 %v12050_v23  ;;  %4566 = vmatprep.subr.bf16.mxu1 %v10439_v56  ;;  %14270 = vst [vmem:[#allocation60_spill] sm:$0xff] %v12059_v63  ;;  %v12062_v23 = vld [vmem:[#allocation2 + $0x31c] ss:$36 sps:$4 sm:$0xff]   ;;  %v10447_v56 = vld [vmem:[#allocation2 + $0x7a4] ss:$36 sps:$4 sm:$0xff]  }
 0x341   :  { %14271 = vst [vmem:[#allocation61_spill] sm:$0xff] %v12062_v23 }
 0x347   :  { %4321 = vmatpush1.bf16.xpose.msra.mxu0 %v12053_v35  ;;  %4567 = vmatpush1.bf16.xpose.msra.mxu1 %v10441_v52 }
 0x348   :  { %4322 = vmatprep.subr.bf16.mxu0 %v12056_v40  ;;  %4568 = vmatprep.subr.bf16.mxu1 %v10443_v60  ;;  %v12067_v40 = vld [vmem:[#allocation2 + $0x318] ss:$36 sps:$4 sm:$0xff]   ;;  %v10449_v60 = vld [vmem:[#allocation2 + $0x7a0] ss:$36 sps:$4 sm:$0xff]  }
 0x349   :  { %14272 = vst [vmem:[#allocation62_spill] sm:$0xff] %v12067_v40 }
 0x34c   :  { %v12065_v35 = vpop.f32.mrb[12].mxu1 }
 0x34d   :  { %v9039_v52 = vpop.f32.mrb[13].mxu1 }
 0x34e   :  { %v4169_v27 = vpop.f32.mrb[14].mxu1  ;;  %v12079_v52 = vld [vmem:[#allocation2 + $0x3a8] ss:$36 sps:$4 sm:$0xff]  }
 0x34f   :  { %4323 = vmatpush1.bf16.xpose.msra.mxu0 %v12059_v63  ;;  %4569 = vmatpush1.bf16.xpose.msra.mxu1 %v10445_v51  ;;  %v9040_v54 = vpop.f32.mrb[15].mxu1  ;;  %v12070_v63 = vld [vmem:[#allocation2 + $0x364] ss:$36 sps:$4 sm:$0xff]   ;;  %v10451_v51 = vld [vmem:[#allocation2 + $0x7ec] ss:$36 sps:$4 sm:$0xff]   ;;  %14276 = vst [vmem:[#allocation66_spill] sm:$0xff] %v12079_v52 }
 0x350   :  { %4324 = vmatprep.subr.bf16.mxu0 %v12062_v23  ;;  %4570 = vmatprep.subr.bf16.mxu1 %v10447_v56  ;;  %14273 = vst [vmem:[#allocation63_spill] sm:$0xff] %v12070_v63  ;;  %v12073_v23 = vld [vmem:[#allocation2 + $0x360] ss:$36 sps:$4 sm:$0xff]   ;;  %v10453_v56 = vld [vmem:[#allocation2 + $0x7e8] ss:$36 sps:$4 sm:$0xff]  }
 0x351   :  { %14274 = vst [vmem:[#allocation64_spill] sm:$0xff] %v12073_v23  ;;  %v12076_v27 = vld [vmem:[#allocation2 + $0x3ac] ss:$36 sps:$4 sm:$0xff]   ;;  %v10455_v54 = vld [vmem:[#allocation2 + $0x834] ss:$36 sps:$4 sm:$0xff]  }
 0x352   :  { %14275 = vst [vmem:[#allocation65_spill] sm:$0xff] %v12076_v27 }
 0x357   :  { %4325 = vmatpush1.bf16.xpose.msra.mxu0 %v12067_v40  ;;  %4571 = vmatpush1.bf16.xpose.msra.mxu1 %v10449_v60  ;;  %v10457_v60 = vld [vmem:[#allocation2 + $0x830] ss:$36 sps:$4 sm:$0xff]   ;;  %v12097_v40 = vld [vmem:[#allocation2 + $0x43c] ss:$36 sps:$4 sm:$0xff]  }
 0x358   :  { %4326 = vmatprep.subr.bf16.mxu0 %v12070_v63  ;;  %4572 = vmatprep.subr.bf16.mxu1 %v10451_v51  ;;  %v4184_v51 = vsub.s32 2, %v11710_v43  ;;  %v12083_v63 = vld [vmem:[#allocation2 + $0x3f4] ss:$36 sps:$4 sm:$0xff]   ;;  %14281 = vst [vmem:[#allocation71_spill] sm:$0xff] %v12097_v40 }
 0x359   :  { %14277 = vst [vmem:[#allocation67_spill] sm:$0xff] %v12083_v63 }
 0x35f   :  { %4327 = vmatpush1.bf16.xpose.msra.mxu0 %v12073_v23  ;;  %4573 = vmatpush1.bf16.xpose.msra.mxu1 %v10453_v56  ;;  %v10459_v23 = vld [vmem:[#allocation2 + $0x87c] ss:$36 sps:$4 sm:$0xff]   ;;  %v12087_v56 = vrot.slane %v11863_v49, %v4184_v51 }
 0x360   :  { %4328 = vmatprep.subr.bf16.mxu0 %v12076_v27  ;;  %4574 = vmatprep.subr.bf16.mxu1 %v10455_v54  ;;  %v12089_v27 = vld [vmem:[#allocation2 + $0x3f0] ss:$36 sps:$4 sm:$0xff]   ;;  %v10461_v54 = vld [vmem:[#allocation2 + $0x878] ss:$36 sps:$4 sm:$0xff]  }
 0x361   :  { %14278 = vst [vmem:[#allocation68_spill] sm:$0xff] %v12087_v56  ;;  %14279 = vst [vmem:[#allocation69_spill] sm:$0xff] %v12089_v27 }
 0x367   :  { %4329 = vmatpush1.bf16.xpose.msra.mxu0 %v12079_v52  ;;  %4575 = vmatpush1.bf16.xpose.msra.mxu1 %v10457_v60  ;;  %v4221_v60 = vmul.f32 %v11893_v31, %v12087_v56  ;;  %v12095_v52 = vrot.slane %v11865_v5, %v4184_v51  ;;  %v10466_v31 = vld [vmem:[#allocation2 + $0xc] ss:$36 sps:$4 sm:$0xff]   ;;  %v10467_v51 = vld [vmem:[#allocation2 + $0x494] ss:$36 sps:$4 sm:$0xff]  }
 0x368   :  { %4330 = vmatprep.subr.bf16.mxu0 %v12083_v63  ;;  %4576 = vmatprep.subr.bf16.mxu1 %v10459_v23  ;;  %v10463_v23 = vld [vmem:[#allocation2 + $0x8c4] ss:$36 sps:$4 sm:$0xff]  }
 0x369   :  { %14280 = vst [vmem:[#allocation70_spill] sm:$0xff] %v12095_v52  ;;  %v4277_v63 = vadd.f32 %v12095_v52, %v4221_v60  ;;  %v10468_v60 = vld [vmem:[#allocation2 + $0x8] ss:$36 sps:$4 sm:$0xff]   ;;  %v10473_v52 = vld [vmem:[#allocation2 + $0x4d8] ss:$36 sps:$4 sm:$0xff]  }
 0x36f   :  { %4331 = vmatpush1.bf16.xpose.msra.mxu0 %v12089_v27  ;;  %4577 = vmatpush1.bf16.xpose.msra.mxu1 %v10461_v54  ;;  %v10465_v27 = vld [vmem:[#allocation2 + $0x8c0] ss:$36 sps:$4 sm:$0xff]   ;;  %v12104_v54 = vmax.f32 %v4277_v63, 0.0  ;;  %v10470_v63 = vld [vmem:[#allocation2 + $0x54] ss:$36 sps:$4 sm:$0xff]  }
 0x370   :  { %4332 = vmatprep.subr.bf16.mxu0 %v12097_v40  ;;  %4578 = vmatprep.subr.bf16.mxu1 %v10463_v23  ;;  %v10469_v23 = vld [vmem:[#allocation2 + $0x490] ss:$36 sps:$4 sm:$0xff]  }
 0x371   :  { %14283 = vst [vmem:[#allocation73_spill] sm:$0xff] %v12104_v54  ;;  %v12108_v56 = vpack.c.bf16 %v12104_v54, %v12104_v54  ;;  %v10474_v54 = vld [vmem:[#allocation2 + $0x9c] ss:$36 sps:$4 sm:$0xff]  }
 0x377   :  { %4333 = vmatpush1.bf16.xpose.msra.mxu0 %v12101_v46  ;;  %4579 = vmatpush1.bf16.xpose.msra.mxu1 %v10465_v27  ;;  %v10471_v27 = vld [vmem:[#allocation2 + $0x4dc] ss:$36 sps:$4 sm:$0xff]   ;;  %v10475_v46 = vld [vmem:[#allocation2 + $0x524] ss:$36 sps:$4 sm:$0xff]  }
 0x378   :  { %4343 = vmatprep.subr.bf16.mxu0 %v10466_v31  ;;  %4589 = vmatprep.subr.bf16.mxu1 %v10467_v51  ;;  %v4196_v31 = vsub.s32 5, %v11710_v43  ;;  %v10472_v51 = vld [vmem:[#allocation2 + $0x50] ss:$36 sps:$4 sm:$0xff]  }
 0x37e   :  { %4335 = vmatmul.mubr.bf16.vlgmr.msra.gmra.mrb[20].mxu0 %v11985_v41  ;;  %4581 = vmatmul.mubr.bf16.vlgmr.msra.gmra.mrb[16].mxu1 %v12108_v56 }
 0x37f   :  { %4344 = vmatpush1.bf16.xpose.msra.mxu0 %v10468_v60  ;;  %4375 = vmatprep.mubr.bf16.mxu0 %v11989_v50  ;;  %v12115_v60 = vrot.slane %v11863_v49, %v4196_v31 }
 0x380   :  { %4590 = vmatpush1.bf16.xpose.msra.mxu1 %v10469_v23  ;;  %4345 = vmatprep.subr.bf16.mxu0 %v10470_v63  ;;  %v12120_v23 = vrot.slane %v11865_v5, %v4196_v31 }
 0x381   :  { %4591 = vmatprep.subr.bf16.mxu1 %v10471_v27  ;;  %14284 = vst [vmem:[#allocation74_spill] sm:$0xff] %v12115_v60 }
 0x382   :  { %14285 = vst [vmem:[#allocation75_spill] sm:$0xff] %v12120_v23 }
 0x387   :  { %4346 = vmatpush1.bf16.xpose.msra.mxu0 %v10472_v51  ;;  %v10476_v51 = vld [vmem:[#allocation2 + $0x98] ss:$36 sps:$4 sm:$0xff]  }
 0x388   :  { %4592 = vmatpush1.bf16.xpose.msra.mxu1 %v10473_v52  ;;  %4347 = vmatprep.subr.bf16.mxu0 %v10474_v54  ;;  %v10477_v54 = vld [vmem:[#allocation2 + $0x520] ss:$36 sps:$4 sm:$0xff]  }
 0x389   :  { %4593 = vmatprep.subr.bf16.mxu1 %v10475_v46  ;;  %v10478_v46 = vld [vmem:[#allocation2 + $0xe4] ss:$36 sps:$4 sm:$0xff]  }
 0x38c   :  { %v12117_v40 = vpop.f32.mrb[8].mxu0 }
 0x38d   :  { %v3843_v63 = vpop.f32.mrb[9].mxu0 }
 0x38e   :  { %v4224_v27 = vmul.f32 %v12115_v60, %v3843_v63  ;;  %v3845_v59 = vpop.f32.mrb[10].mxu0  ;;  %v10482_v63 = vld [vmem:[#allocation2 + $0x12c] ss:$36 sps:$4 sm:$0xff]  }
 0x38f   :  { %v3846_v17 = vpop.f32.mrb[11].mxu0  ;;  %4348 = vmatpush1.bf16.xpose.msra.mxu0 %v10476_v51  ;;  %v10480_v59 = vld [vmem:[#allocation2 + $0xe0] ss:$36 sps:$4 sm:$0xff]   ;;  %v10484_v51 = vld [vmem:[#allocation2 + $0x128] ss:$36 sps:$4 sm:$0xff]  }
 0x390   :  { %v4280_v52 = vadd.f32 %v12120_v23, %v4224_v27  ;;  %4594 = vmatpush1.bf16.xpose.msra.mxu1 %v10477_v54  ;;  %4349 = vmatprep.subr.bf16.mxu0 %v10478_v46  ;;  %v10481_v17 = vld [vmem:[#allocation2 + $0x568] ss:$36 sps:$4 sm:$0xff]   ;;  %v10483_v27 = vld [vmem:[#allocation2 + $0x5b4] ss:$36 sps:$4 sm:$0xff]  }
 0x391   :  { %4595 = vmatprep.subr.bf16.mxu1 %v10479_v3  ;;  %v10485_v54 = vld [vmem:[#allocation2 + $0x5b0] ss:$36 sps:$4 sm:$0xff]   ;;  %v10489_v23 = vld [vmem:[#allocation2 + $0x5f8] ss:$36 sps:$4 sm:$0xff]  }
 0x392   :  { %v12124_v37 = vmax.f32 %v4280_v52, 0.0  ;;  %v10486_v3 = vld [vmem:[#allocation2 + $0x174] ss:$36 sps:$4 sm:$0xff]   ;;  %v10487_v52 = vld [vmem:[#allocation2 + $0x5fc] ss:$36 sps:$4 sm:$0xff]  }
 0x393   :  { %v10488_v46 = vld [vmem:[#allocation2 + $0x170] ss:$36 sps:$4 sm:$0xff]  }
 0x394   :  { %14286 = vst [vmem:[#allocation76_spill] sm:$0xff] %v12124_v37  ;;  %v12128_v31 = vpack.c.bf16 %v12124_v37, %v12124_v37  ;;  %v10490_v37 = vld [vmem:[#allocation2 + $0x1bc] ss:$36 sps:$4 sm:$0xff]  }
 0x396   :  { %4621 = vmatprep.mubr.bf16.mxu1 %v12128_v31 }
 0x397   :  { %4350 = vmatpush1.bf16.xpose.msra.mxu0 %v10480_v59  ;;  %v10491_v59 = vld [vmem:[#allocation2 + $0x644] ss:$36 sps:$4 sm:$0xff]  }
 0x398   :  { %4596 = vmatpush1.bf16.xpose.msra.mxu1 %v10481_v17  ;;  %4351 = vmatprep.subr.bf16.mxu0 %v10482_v63 }
 0x399   :  { %4597 = vmatprep.subr.bf16.mxu1 %v10483_v27 }
 0x39f   :  { %4352 = vmatpush1.bf16.xpose.msra.mxu0 %v10484_v51  ;;  %v10492_v51 = vld [vmem:[#allocation2 + $0x1b8] ss:$36 sps:$4 sm:$0xff]  }
 0x3a0   :  { %4598 = vmatpush1.bf16.xpose.msra.mxu1 %v10485_v54  ;;  %4353 = vmatprep.subr.bf16.mxu0 %v10486_v3  ;;  %v10493_v3 = vld [vmem:[#allocation2 + $0x640] ss:$36 sps:$4 sm:$0xff]  }
 0x3a1   :  { %4599 = vmatprep.subr.bf16.mxu1 %v10487_v52  ;;  %v10494_v52 = vld [vmem:[#allocation2 + $0x204] ss:$36 sps:$4 sm:$0xff]  }
 0x3a7   :  { %4354 = vmatpush1.bf16.xpose.msra.mxu0 %v10488_v46  ;;  %v10495_v46 = vld [vmem:[#allocation2 + $0x68c] ss:$36 sps:$4 sm:$0xff]  }
 0x3a8   :  { %4600 = vmatpush1.bf16.xpose.msra.mxu1 %v10489_v23  ;;  %4355 = vmatprep.subr.bf16.mxu0 %v10490_v37  ;;  %v10496_v23 = vld [vmem:[#allocation2 + $0x200] ss:$36 sps:$4 sm:$0xff]   ;;  %v10497_v37 = vld [vmem:[#allocation2 + $0x688] ss:$36 sps:$4 sm:$0xff]  }
 0x3a9   :  { %4601 = vmatprep.subr.bf16.mxu1 %v10491_v59  ;;  %v10498_v59 = vld [vmem:[#allocation2 + $0x24c] ss:$36 sps:$4 sm:$0xff]  }
 0x3ac   :  { %v8715_v17 = vpop.f32.mrb[12].mxu0 }
 0x3ad   :  { %v8716_v63 = vpop.f32.mrb[13].mxu0 }
 0x3ae   :  { %v8717_v60 = vadd.f32 %v8716_v63, %v8715_v17  ;;  %v8718_v27 = vpop.f32.mrb[14].mxu0  ;;  %v10500_v17 = vld [vmem:[#allocation2 + $0x248] ss:$36 sps:$4 sm:$0xff]  }
 0x3af   :  { %v8719_v14 = vpop.f32.mrb[15].mxu0  ;;  %4356 = vmatpush1.bf16.xpose.msra.mxu0 %v10492_v51 }
 0x3b0   :  { %v4087_v54 = vadd.f32 %v12036_v45, %v8717_v60  ;;  %4602 = vmatpush1.bf16.xpose.msra.mxu1 %v10493_v3  ;;  %4357 = vmatprep.subr.bf16.mxu0 %v10494_v52  ;;  %v10501_v14 = vld [vmem:[#allocation2 + $0x294] ss:$36 sps:$4 sm:$0xff]   ;;  %v10503_v60 = vld [vmem:[#allocation2 + $0x2dc] ss:$36 sps:$4 sm:$0xff]  }
 0x3b1   :  { %4603 = vmatprep.subr.bf16.mxu1 %v10495_v46  ;;  %v10502_v45 = vld [vmem:[#allocation2 + $0x290] ss:$36 sps:$4 sm:$0xff]   ;;  %v10504_v3 = vld [vmem:[#allocation2 + $0x2d8] ss:$36 sps:$4 sm:$0xff]   ;;  %v10505_v46 = vld [vmem:[#allocation2 + $0x324] ss:$36 sps:$4 sm:$0xff]  }
 0x3b7   :  { %4358 = vmatpush1.bf16.xpose.msra.mxu0 %v10496_v23  ;;  %v10508_v23 = vld [vmem:[#allocation2 + $0x368] ss:$36 sps:$4 sm:$0xff]  }
 0x3b8   :  { %4604 = vmatpush1.bf16.xpose.msra.mxu1 %v10497_v37  ;;  %4359 = vmatprep.subr.bf16.mxu0 %v10498_v59  ;;  %v10512_v37 = vld [vmem:[#allocation2 + $0x3f8] ss:$36 sps:$4 sm:$0xff]  }
 0x3b9   :  { %4605 = vmatprep.subr.bf16.mxu1 %v10499_v38 }
 0x3bf   :  { %4360 = vmatpush1.bf16.xpose.msra.mxu0 %v10500_v17 }
 0x3c0   :  { %4606 = vmatpush1.bf16.xpose.msra.mxu1 %v11803_v1  ;;  %4361 = vmatprep.subr.bf16.mxu0 %v10501_v14 }
 0x3c1   :  { %4607 = vmatprep.subr.bf16.mxu1 %v11805_v4 }
 0x3c7   :  { %4362 = vmatpush1.bf16.xpose.msra.mxu0 %v10502_v45  ;;  %v10514_v45 = vld [vmem:[#allocation2 + $0x440] ss:$36 sps:$4 sm:$0xff]  }
 0x3c8   :  { %4608 = vmatpush1.bf16.xpose.msra.mxu1 %v11807_v6  ;;  %4363 = vmatprep.subr.bf16.mxu0 %v10503_v60  ;;  %v10506_v6 = vld [vmem:[#allocation2 + $0x320] ss:$36 sps:$4 sm:$0xff]  }
 0x3c9   :  { %4609 = vmatprep.subr.bf16.mxu1 %v11811_v8  ;;  %v10507_v8 = vld [vmem:[#allocation2 + $0x36c] ss:$36 sps:$4 sm:$0xff]  }
 0x3cc   :  { %v8759_v63 = vpop.f32.mrb[16].mxu0 }
 0x3cd   :  { %v8760_v27 = vpop.f32.mrb[17].mxu0 }
 0x3ce   :  { %v8761_v51 = vadd.f32 %v8760_v27, %v8759_v63  ;;  %v8762_v38 = vpop.f32.mrb[18].mxu0  ;;  %v10516_v63 = vld [vmem:[#allocation2 + $0x49c] ss:$36 sps:$4 sm:$0xff]  }
 0x3cf   :  { %4364 = vmatpush1.bf16.xpose.msra.mxu0 %v10504_v3  ;;  %v8763_v52 = vpop.f32.mrb[19].mxu0  ;;  %v10519_v38 = vld [vmem:[#allocation2 + $0x5c] ss:$36 sps:$4 sm:$0xff]   ;;  %v10520_v3 = vld [vmem:[#allocation2 + $0x4e4] ss:$36 sps:$4 sm:$0xff]  }
 0x3d0   :  { %4610 = vmatpush1.bf16.xpose.msra.mxu1 %v11814_v10  ;;  %v4127_v1 = vadd.f32 %v8761_v51, %v4087_v54  ;;  %4365 = vmatprep.subr.bf16.mxu0 %v10505_v46  ;;  %v10509_v10 = vld [vmem:[#allocation2 + $0x3b4] ss:$36 sps:$4 sm:$0xff]   ;;  %v12186_v46 = vld [vmem:[#allocation2 + $0xa4] ss:$36 sps:$4 sm:$0xff]  }
 0x3d1   :  { %4611 = vmatprep.subr.bf16.mxu1 %v11819_v12  ;;  %v10510_v12 = vld [vmem:[#allocation2 + $0x3b0] ss:$36 sps:$4 sm:$0xff]   ;;  %v10518_v51 = vld [vmem:[#allocation2 + $0x498] ss:$36 sps:$4 sm:$0xff]  }
 0x3d2   :  { %v12139_v4 = vadd.f32 %v12065_v35, %v4127_v1  ;;  %v10511_v35 = vld [vmem:[#allocation2 + $0x3fc] ss:$36 sps:$4 sm:$0xff]  }
 0x3d3   :  { %v10521_v52 = vld [vmem:[#allocation2 + $0x58] ss:$36 sps:$4 sm:$0xff]   ;;  %v10522_v1 = vld [vmem:[#allocation2 + $0x4e0] ss:$36 sps:$4 sm:$0xff]  }
 0x3d7   :  { %4366 = vmatpush1.bf16.xpose.msra.mxu0 %v10506_v6  ;;  %v10524_v6 = vld [vmem:[#allocation2 + $0x52c] ss:$36 sps:$4 sm:$0xff]  }
 0x3d8   :  { %4612 = vmatpush1.bf16.xpose.msra.mxu1 %v11822_v15  ;;  %4367 = vmatprep.subr.bf16.mxu0 %v10507_v8  ;;  %v4192_v15 = vsub.s32 4, %v11710_v43  ;;  %v12189_v8 = vld [vmem:[#allocation2 + $0xa0] ss:$36 sps:$4 sm:$0xff]  }
 0x3d9   :  { %4613 = vmatprep.subr.bf16.mxu1 %v11825_v19  ;;  %v4204_v19 = vsub.s32 7, %v11710_v43 }
 0x3da   :  { %v12150_v54 = vrot.slane %v11863_v49, %v4192_v15  ;;  %v12159_v59 = vrot.slane %v11865_v5, %v4192_v15  ;;  %v10530_v15 = vld [vmem:[#allocation2 + $0x570] ss:$36 sps:$4 sm:$0xff]  }
 0x3db   :  { %v12165_v17 = vrot.slane %v11865_v5, %v4204_v19 }
 0x3dc   :  { %14287 = vst [vmem:[#allocation77_spill] sm:$0xff] %v12150_v54  ;;  %14289 = vst [vmem:[#allocation79_spill] sm:$0xff] %v12159_v59 }
 0x3dd   :  { %14290 = vst [vmem:[#allocation80_spill] sm:$0xff] %v12165_v17 }
 0x3df   :  { %4368 = vmatpush1.bf16.xpose.msra.mxu0 %v10508_v23  ;;  %v10526_v23 = vld [vmem:[#allocation2 + $0x528] ss:$36 sps:$4 sm:$0xff]  }
 0x3e0   :  { %4614 = vmatpush1.bf16.xpose.msra.mxu1 %v11828_v20  ;;  %4369 = vmatprep.subr.bf16.mxu0 %v10509_v10  ;;  %v12153_v20 = vrot.slane %v11863_v49, %v4204_v19  ;;  %v12192_v10 = vld [vmem:[#allocation2 + $0xec] ss:$36 sps:$4 sm:$0xff]   ;;  %v12198_v19 = vld [vmem:[#allocation2 + $0x134] ss:$36 sps:$4 sm:$0xff]  }
 0x3e1   :  { %4615 = vmatprep.subr.bf16.mxu1 %v11831_v22  ;;  %v10513_v22 = vld [vmem:[#allocation2 + $0x444] ss:$36 sps:$4 sm:$0xff]  }
 0x3e2   :  { %14288 = vst [vmem:[#allocation78_spill] sm:$0xff] %v12153_v20 }
 0x3e7   :  { %4370 = vmatpush1.bf16.xpose.msra.mxu0 %v10510_v12  ;;  %v10528_v12 = vld [vmem:[#allocation2 + $0x574] ss:$36 sps:$4 sm:$0xff]  }
 0x3e8   :  { %4616 = vmatpush1.bf16.xpose.msra.mxu1 %v11834_v24  ;;  %4371 = vmatprep.subr.bf16.mxu0 %v10511_v35  ;;  %v4223_v24 = vmul.f32 %v12150_v54, %v12117_v40  ;;  %v10515_v40 = vld [vmem:[#allocation2 + $0x14] ss:$36 sps:$4 sm:$0xff]   ;;  %v12195_v35 = vld [vmem:[#allocation2 + $0xe8] ss:$36 sps:$4 sm:$0xff]  }
 0x3e9   :  { %4617 = vmatprep.subr.bf16.mxu1 %v11837_v26  ;;  %v4226_v26 = vmul.f32 %v12153_v20, %v12031_v57  ;;  %v12252_v20 = vld [vmem:[#allocation2 + $0x3bc] ss:$36 sps:$4 sm:$0xff]   ;;  %v10572_v54 = vld [vmem:[#allocation2 + $0x88c] ss:$36 sps:$4 sm:$0xff]  }
 0x3ea   :  { %v4279_v14 = vadd.f32 %v12159_v59, %v4223_v24  ;;  %v10534_v24 = vld [vmem:[#allocation2 + $0x5b8] ss:$36 sps:$4 sm:$0xff]   ;;  %14306 = vst [vmem:[#allocation96_spill] sm:$0xff] %v12252_v20 }
 0x3eb   :  { %v12255_v59 = vld [vmem:[#allocation2 + $0x3b8] ss:$36 sps:$4 sm:$0xff]  }
 0x3ec   :  { %v12170_v60 = vmax.f32 %v4279_v14, 0.0  ;;  %v10536_v14 = vld [vmem:[#allocation2 + $0x604] ss:$36 sps:$4 sm:$0xff]   ;;  %14307 = vst [vmem:[#allocation97_spill] sm:$0xff] %v12255_v59 }
 0x3ee   :  { %14291 = vst [vmem:[#allocation81_spill] sm:$0xff] %v12170_v60  ;;  %v12176_v57 = vpack.c.bf16 %v12170_v60, %v12170_v60  ;;  %v12258_v60 = vld [vmem:[#allocation2 + $0x404] ss:$36 sps:$4 sm:$0xff]  }
 0x3ef   :  { %4372 = vmatpush1.bf16.xpose.msra.mxu0 %v10512_v37  ;;  %v10532_v37 = vld [vmem:[#allocation2 + $0x5bc] ss:$36 sps:$4 sm:$0xff]   ;;  %14308 = vst [vmem:[#allocation98_spill] sm:$0xff] %v12258_v60 }
 0x3f0   :  { %4618 = vmatpush1.bf16.xpose.msra.mxu1 %v11840_v28  ;;  %4373 = vmatprep.subr.bf16.mxu0 %v10513_v22  ;;  %v4282_v28 = vadd.f32 %v12165_v17, %v4226_v26  ;;  %v12201_v22 = vld [vmem:[#allocation2 + $0x130] ss:$36 sps:$4 sm:$0xff]   ;;  %v12204_v26 = vld [vmem:[#allocation2 + $0x17c] ss:$36 sps:$4 sm:$0xff]  }
 0x3f1   :  { %4619 = vmatprep.subr.bf16.mxu1 %v11843_v30  ;;  %v12246_v17 = vld [vmem:[#allocation2 + $0x374] ss:$36 sps:$4 sm:$0xff]  }
 0x3f2   :  { %v12172_v30 = vmax.f32 %v4282_v28, 0.0  ;;  %v12207_v28 = vld [vmem:[#allocation2 + $0x178] ss:$36 sps:$4 sm:$0xff]   ;;  %14304 = vst [vmem:[#allocation94_spill] sm:$0xff] %v12246_v17 }
 0x3f4   :  { %14292 = vst [vmem:[#allocation82_spill] sm:$0xff] %v12172_v30  ;;  %v12180_v27 = vpack.c.bf16 %v12172_v30, %v12172_v30  ;;  %v12249_v30 = vld [vmem:[#allocation2 + $0x370] ss:$36 sps:$4 sm:$0xff]  }
 0x3f5   :  { %14305 = vst [vmem:[#allocation95_spill] sm:$0xff] %v12249_v30 }
 0x3f7   :  { %4374 = vmatpush1.bf16.xpose.msra.mxu0 %v10514_v45  ;;  %v10538_v45 = vld [vmem:[#allocation2 + $0x600] ss:$36 sps:$4 sm:$0xff]  }
 0x3f8   :  { %4620 = vmatpush1.bf16.xpose.msra.mxu1 %v11846_v32  ;;  %4384 = vmatprep.subr.bf16.mxu0 %v10515_v40  ;;  %v10517_v32 = vld [vmem:[#allocation2 + $0x10] ss:$36 sps:$4 sm:$0xff]   ;;  %v12210_v40 = vld [vmem:[#allocation2 + $0x1c4] ss:$36 sps:$4 sm:$0xff]  }
 0x3f9   :  { %4630 = vmatprep.subr.bf16.mxu1 %v10516_v63  ;;  %v10540_v63 = vld [vmem:[#allocation2 + $0x64c] ss:$36 sps:$4 sm:$0xff]  }
 0x3fe   :  { %4376 = vmatmul.mubr.bf16.vlgmr.msra.gmra.mrb[20].mxu0 %v12108_v56 }
 0x3ff   :  { %4622 = vmatmul.mubr.bf16.vlgmr.msra.gmra.mrb[16].mxu1 %v12176_v57  ;;  %4385 = vmatpush1.bf16.xpose.msra.mxu0 %v10517_v32  ;;  %v12213_v32 = vld [vmem:[#allocation2 + $0x1c0] ss:$36 sps:$4 sm:$0xff]  }
 0x400   :  { %4416 = vmatprep.mubr.bf16.mxu0 %v12128_v31  ;;  %4631 = vmatpush1.bf16.xpose.msra.mxu1 %v10518_v51  ;;  %14293 = vst [vmem:[#allocation83_spill] sm:$0xff] %v12213_v32  ;;  %v10542_v51 = vld [vmem:[#allocation2 + $0x648] ss:$36 sps:$4 sm:$0xff]  }
 0x401   :  { %4386 = vmatprep.subr.bf16.mxu0 %v10519_v38  ;;  %4632 = vmatprep.subr.bf16.mxu1 %v10520_v3  ;;  %v12216_v38 = vld [vmem:[#allocation2 + $0x20c] ss:$36 sps:$4 sm:$0xff]   ;;  %v10544_v3 = vld [vmem:[#allocation2 + $0x694] ss:$36 sps:$4 sm:$0xff]  }
 0x402   :  { %4662 = vmatprep.mubr.bf16.mxu1 %v12180_v27  ;;  %14294 = vst [vmem:[#allocation84_spill] sm:$0xff] %v12216_v38 }
 0x407   :  { %4387 = vmatpush1.bf16.xpose.msra.mxu0 %v10521_v52  ;;  %v12219_v52 = vld [vmem:[#allocation2 + $0x208] ss:$36 sps:$4 sm:$0xff]  }
 0x408   :  { %4633 = vmatpush1.bf16.xpose.msra.mxu1 %v10522_v1  ;;  %4388 = vmatprep.subr.bf16.mxu0 %v12186_v46  ;;  %14295 = vst [vmem:[#allocation85_spill] sm:$0xff] %v12219_v52  ;;  %v10546_v1 = vld [vmem:[#allocation2 + $0x690] ss:$36 sps:$4 sm:$0xff]  }
 0x409   :  { %4634 = vmatprep.subr.bf16.mxu1 %v10524_v6  ;;  %v12222_v6 = vld [vmem:[#allocation2 + $0x254] ss:$36 sps:$4 sm:$0xff]  }
 0x40a   :  { %14296 = vst [vmem:[#allocation86_spill] sm:$0xff] %v12222_v6 }
 0x40f   :  { %4389 = vmatpush1.bf16.xpose.msra.mxu0 %v12189_v8 }
 0x410   :  { %4635 = vmatpush1.bf16.xpose.msra.mxu1 %v10526_v23  ;;  %4390 = vmatprep.subr.bf16.mxu0 %v12192_v10  ;;  %v10548_v23 = vld [vmem:[#allocation2 + $0x6dc] ss:$36 sps:$4 sm:$0xff]  }
 0x411   :  { %4636 = vmatprep.subr.bf16.mxu1 %v10528_v12  ;;  %v12225_v12 = vld [vmem:[#allocation2 + $0x250] ss:$36 sps:$4 sm:$0xff]  }
 0x412   :  { %14297 = vst [vmem:[#allocation87_spill] sm:$0xff] %v12225_v12 }
 0x417   :  { %4391 = vmatpush1.bf16.xpose.msra.mxu0 %v12195_v35 }
 0x418   :  { %4637 = vmatpush1.bf16.xpose.msra.mxu1 %v10530_v15  ;;  %4392 = vmatprep.subr.bf16.mxu0 %v12198_v19  ;;  %v10550_v15 = vld [vmem:[#allocation2 + $0x6d8] ss:$36 sps:$4 sm:$0xff]  }
 0x419   :  { %4638 = vmatprep.subr.bf16.mxu1 %v10532_v37  ;;  %v12228_v37 = vld [vmem:[#allocation2 + $0x29c] ss:$36 sps:$4 sm:$0xff]  }
 0x41a   :  { %14298 = vst [vmem:[#allocation88_spill] sm:$0xff] %v12228_v37 }
 0x41f   :  { %4393 = vmatpush1.bf16.xpose.msra.mxu0 %v12201_v22 }
 0x420   :  { %4639 = vmatpush1.bf16.xpose.msra.mxu1 %v10534_v24  ;;  %4394 = vmatprep.subr.bf16.mxu0 %v12204_v26  ;;  %v10552_v24 = vld [vmem:[#allocation2 + $0x724] ss:$36 sps:$4 sm:$0xff]  }
 0x421   :  { %4640 = vmatprep.subr.bf16.mxu1 %v10536_v14  ;;  %v12231_v14 = vld [vmem:[#allocation2 + $0x298] ss:$36 sps:$4 sm:$0xff]  }
 0x422   :  { %14299 = vst [vmem:[#allocation89_spill] sm:$0xff] %v12231_v14 }
 0x427   :  { %4395 = vmatpush1.bf16.xpose.msra.mxu0 %v12207_v28 }
 0x428   :  { %4641 = vmatpush1.bf16.xpose.msra.mxu1 %v10538_v45  ;;  %4396 = vmatprep.subr.bf16.mxu0 %v12210_v40  ;;  %v10554_v45 = vld [vmem:[#allocation2 + $0x720] ss:$36 sps:$4 sm:$0xff]  }
 0x429   :  { %4642 = vmatprep.subr.bf16.mxu1 %v10540_v63  ;;  %v12234_v63 = vld [vmem:[#allocation2 + $0x2e4] ss:$36 sps:$4 sm:$0xff]  }
 0x42a   :  { %14300 = vst [vmem:[#allocation90_spill] sm:$0xff] %v12234_v63 }
 0x42f   :  { %4397 = vmatpush1.bf16.xpose.msra.mxu0 %v12213_v32  ;;  %v12519_v32 = vld [vmem:[#allocation2 + $0xda0] ss:$36 sps:$4 sm:$0xff]  }
 0x430   :  { %4643 = vmatpush1.bf16.xpose.msra.mxu1 %v10542_v51  ;;  %4398 = vmatprep.subr.bf16.mxu0 %v12216_v38  ;;  %v10556_v51 = vld [vmem:[#allocation2 + $0x76c] ss:$36 sps:$4 sm:$0xff]   ;;  %14346 = vst [vmem:[#allocation135_spill] sm:$0xff] %v12519_v32 }
 0x431   :  { %4644 = vmatprep.subr.bf16.mxu1 %v10544_v3  ;;  %v12237_v3 = vld [vmem:[#allocation2 + $0x2e0] ss:$36 sps:$4 sm:$0xff]   ;;  %v10723_v38 = vld [vmem:[#allocation2 + $0x90c] ss:$36 sps:$4 sm:$0xff]  }
 0x432   :  { %14301 = vst [vmem:[#allocation91_spill] sm:$0xff] %v12237_v3 }
 0x437   :  { %4399 = vmatpush1.bf16.xpose.msra.mxu0 %v12219_v52  ;;  %v12512_v52 = vld [vmem:[#allocation2 + $0xd38] ss:$36 sps:$4 sm:$0xff]  }
 0x438   :  { %4645 = vmatpush1.bf16.xpose.msra.mxu1 %v10546_v1  ;;  %4400 = vmatprep.subr.bf16.mxu0 %v12222_v6  ;;  %v10558_v1 = vld [vmem:[#allocation2 + $0x768] ss:$36 sps:$4 sm:$0xff]   ;;  %v12509_v6 = vld [vmem:[#allocation2 + $0xd3c] ss:$36 sps:$4 sm:$0xff]  }
 0x439   :  { %4646 = vmatprep.subr.bf16.mxu1 %v10548_v23  ;;  %v12240_v23 = vld [vmem:[#allocation2 + $0x32c] ss:$36 sps:$4 sm:$0xff]  }
 0x43a   :  { %14302 = vst [vmem:[#allocation92_spill] sm:$0xff] %v12240_v23 }
 0x43f   :  { %4401 = vmatpush1.bf16.xpose.msra.mxu0 %v12225_v12  ;;  %v12506_v12 = vld [vmem:[#allocation2 + $0xcf0] ss:$36 sps:$4 sm:$0xff]  }
 0x440   :  { %4647 = vmatpush1.bf16.xpose.msra.mxu1 %v10550_v15  ;;  %4402 = vmatprep.subr.bf16.mxu0 %v12228_v37  ;;  %v10560_v15 = vld [vmem:[#allocation2 + $0x7b4] ss:$36 sps:$4 sm:$0xff]  }
 0x441   :  { %4648 = vmatprep.subr.bf16.mxu1 %v10552_v24  ;;  %v12243_v24 = vld [vmem:[#allocation2 + $0x328] ss:$36 sps:$4 sm:$0xff]   ;;  %v12503_v37 = vld [vmem:[#allocation2 + $0xcf4] ss:$36 sps:$4 sm:$0xff]  }
 0x442   :  { %14303 = vst [vmem:[#allocation93_spill] sm:$0xff] %v12243_v24 }
 0x447   :  { %4403 = vmatpush1.bf16.xpose.msra.mxu0 %v12231_v14  ;;  %v12500_v14 = vld [vmem:[#allocation2 + $0xca8] ss:$36 sps:$4 sm:$0xff]  }
 0x448   :  { %4649 = vmatpush1.bf16.xpose.msra.mxu1 %v10554_v45  ;;  %4404 = vmatprep.subr.bf16.mxu0 %v12234_v63  ;;  %v10562_v45 = vld [vmem:[#allocation2 + $0x7b0] ss:$36 sps:$4 sm:$0xff]   ;;  %v12494_v63 = vld [vmem:[#allocation2 + $0xc60] ss:$36 sps:$4 sm:$0xff]  }
 0x449   :  { %4650 = vmatprep.subr.bf16.mxu1 %v10556_v51  ;;  %v10564_v51 = vld [vmem:[#allocation2 + $0x7fc] ss:$36 sps:$4 sm:$0xff]  }
 0x44f   :  { %4405 = vmatpush1.bf16.xpose.msra.mxu0 %v12237_v3  ;;  %v12491_v3 = vld [vmem:[#allocation2 + $0xc64] ss:$36 sps:$4 sm:$0xff]  }
 0x450   :  { %4651 = vmatpush1.bf16.xpose.msra.mxu1 %v10558_v1  ;;  %4406 = vmatprep.subr.bf16.mxu0 %v12240_v23  ;;  %v10566_v1 = vld [vmem:[#allocation2 + $0x7f8] ss:$36 sps:$4 sm:$0xff]  }
 0x451   :  { %4652 = vmatprep.subr.bf16.mxu1 %v10560_v15  ;;  %v10568_v15 = vld [vmem:[#allocation2 + $0x844] ss:$36 sps:$4 sm:$0xff]   ;;  %v12488_v23 = vld [vmem:[#allocation2 + $0xc18] ss:$36 sps:$4 sm:$0xff]  }
 0x457   :  { %4407 = vmatpush1.bf16.xpose.msra.mxu0 %v12243_v24  ;;  %v12278_v24 = vld [vmem:[#allocation2 + $0x448] ss:$36 sps:$4 sm:$0xff]  }
 0x458   :  { %4653 = vmatpush1.bf16.xpose.msra.mxu1 %v10562_v45  ;;  %4408 = vmatprep.subr.bf16.mxu0 %v12246_v17  ;;  %v10570_v45 = vld [vmem:[#allocation2 + $0x840] ss:$36 sps:$4 sm:$0xff]   ;;  %14313 = vst [vmem:[#allocation103_spill] sm:$0xff] %v12278_v24 }
 0x459   :  { %4654 = vmatprep.subr.bf16.mxu1 %v10564_v51  ;;  %v4200_v51 = vsub.s32 6, %v11710_v43 }
 0x45b   :  { %v12274_v43 = vrot.slane %v11865_v5, %v4200_v51  ;;  %v10580_v5 = vld [vmem:[#allocation2 + $0x6e0] ss:$36 sps:$4 sm:$0xff]  }
 0x45d   :  { %14312 = vst [vmem:[#allocation102_spill] sm:$0xff] %v12274_v43 }
 0x45f   :  { %4409 = vmatpush1.bf16.xpose.msra.mxu0 %v12249_v30  ;;  %v10574_v30 = vld [vmem:[#allocation2 + $0x888] ss:$36 sps:$4 sm:$0xff]  }
 0x460   :  { %4655 = vmatpush1.bf16.xpose.msra.mxu1 %v10566_v1  ;;  %4410 = vmatprep.subr.bf16.mxu0 %v12252_v20  ;;  %v12263_v1 = vrot.slane %v11863_v49, %v4200_v51  ;;  %v12265_v20 = vld [vmem:[#allocation2 + $0x400] ss:$36 sps:$4 sm:$0xff]  }
 0x461   :  { %4656 = vmatprep.subr.bf16.mxu1 %v10568_v15  ;;  %14310 = vst [vmem:[#allocation100_spill] sm:$0xff] %v12265_v20  ;;  %v8516_v15 = vld [vmem:[#allocation7 + $0x8] ss:$0 sm:$0xff] }
 0x462   :  { %14309 = vst [vmem:[#allocation99_spill] sm:$0xff] %v12263_v1  ;;  %v4227_v49 = vmul.f32 %v8516_v15, %v12139_v4  ;;  %v10581_v15 = vld [vmem:[#allocation2 + $0x18] ss:$36 sps:$4 sm:$0xff]  }
 0x467   :  { %4411 = vmatpush1.bf16.xpose.msra.mxu0 %v12255_v59  ;;  %v12268_v59 = vld [vmem:[#allocation2 + $0x44c] ss:$36 sps:$4 sm:$0xff]  }
 0x468   :  { %4657 = vmatpush1.bf16.xpose.msra.mxu1 %v10570_v45  ;;  %4412 = vmatprep.subr.bf16.mxu0 %v12258_v60  ;;  %14311 = vst [vmem:[#allocation101_spill] sm:$0xff] %v12268_v59  ;;  %v4225_v45 = vmul.f32 %v12263_v1, %v12029_v7  ;;  %v8517_v60 = vld [vmem:[#allocation5 + $0x8] ss:$0 sm:$0xff] }
 0x469   :  { %4658 = vmatprep.subr.bf16.mxu1 %v10572_v54  ;;  %v10576_v54 = vld [vmem:[#allocation2 + $0x8d4] ss:$36 sps:$4 sm:$0xff]   ;;  %v4283_v17 = vadd.f32 %v8517_v60, %v4227_v49  ;;  %v10587_v49 = vld [vmem:[#allocation2 + $0xac] ss:$36 sps:$4 sm:$0xff]   ;;  %v12323_v1 = vld [vmem:[#allocation2 + $0xea4] ss:$36 sps:$4 sm:$0xff]  }
 0x46a   :  { %14323 = vst [vmem:[#allocation113_spill] sm:$0xff] %v12323_v1 }
 0x46b   :  { %v12283_v51 = vmax.f32 %v4283_v17, 0.0  ;;  %v10584_v17 = vld [vmem:[#allocation2 + $0x728] ss:$36 sps:$4 sm:$0xff]  }
 0x46d   :  { %14315 = vst [vmem:[#allocation105_spill] sm:$0xff] %v12283_v51  ;;  %v12292_v60 = vpack.c.bf16 %v12283_v51, %v12283_v51  ;;  %v10591_v51 = vld [vmem:[#allocation2 + $0xf4] ss:$36 sps:$4 sm:$0xff]  }
 0x46f   :  { %4413 = vmatpush1.bf16.xpose.msra.mxu0 %v12265_v20  ;;  %v4281_v20 = vadd.f32 %v12274_v43, %v4225_v45  ;;  %v10585_v45 = vld [vmem:[#allocation2 + $0x60] ss:$36 sps:$4 sm:$0xff]   ;;  %v10593_v43 = vld [vmem:[#allocation2 + $0xf0] ss:$36 sps:$4 sm:$0xff]  }
 0x470   :  { %4659 = vmatpush1.bf16.xpose.msra.mxu1 %v10574_v30  ;;  %4414 = vmatprep.subr.bf16.mxu0 %v12268_v59  ;;  %v10578_v30 = vld [vmem:[#allocation2 + $0x8d0] ss:$36 sps:$4 sm:$0xff]   ;;  %v10579_v59 = vld [vmem:[#allocation2 + $0x1c] ss:$36 sps:$4 sm:$0xff]  }
 0x471   :  { %4660 = vmatprep.subr.bf16.mxu1 %v10576_v54  ;;  %v12281_v7 = vmax.f32 %v4281_v20, 0.0  ;;  %v10582_v20 = vld [vmem:[#allocation2 + $0x4a0] ss:$36 sps:$4 sm:$0xff]   ;;  %v10586_v54 = vld [vmem:[#allocation2 + $0x4e8] ss:$36 sps:$4 sm:$0xff]  }
 0x473   :  { %14314 = vst [vmem:[#allocation104_spill] sm:$0xff] %v12281_v7  ;;  %v12287_v4 = vpack.c.bf16 %v12281_v7, %v12281_v7  ;;  %v12320_v7 = vld [vmem:[#allocation2 + $0xe58] ss:$36 sps:$4 sm:$0xff]  }
 0x474   :  { %14322 = vst [vmem:[#allocation112_spill] sm:$0xff] %v12320_v7 }
 0x477   :  { %4415 = vmatpush1.bf16.xpose.msra.mxu0 %v12278_v24 }
 0x478   :  { %4661 = vmatpush1.bf16.xpose.msra.mxu1 %v10578_v30  ;;  %4425 = vmatprep.subr.bf16.mxu0 %v10579_v59  ;;  %v10583_v59 = vld [vmem:[#allocation2 + $0x64] ss:$36 sps:$4 sm:$0xff]   ;;  %v10588_v30 = vld [vmem:[#allocation2 + $0x770] ss:$36 sps:$4 sm:$0xff]  }
 0x479   :  { %8792 = vmatprep.subr.bf16.mxu1 %v10580_v5  ;;  %v10589_v5 = vld [vmem:[#allocation2 + $0xa8] ss:$36 sps:$4 sm:$0xff]  }
 0x47e   :  { %4417 = vmatmul.mubr.bf16.vlgmr.msra.gmra.mrb[20].mxu0 %v12176_v57 }
 0x47f   :  { %4663 = vmatmul.mubr.bf16.vlgmr.msra.gmra.mrb[16].mxu1 %v12287_v4  ;;  %4426 = vmatpush1.bf16.xpose.msra.mxu0 %v10581_v15  ;;  %v10590_v15 = vld [vmem:[#allocation2 + $0x530] ss:$36 sps:$4 sm:$0xff]  }
 0x480   :  { %4457 = vmatprep.mubr.bf16.mxu0 %v12180_v27  ;;  %8793 = vmatpush3.bf16.xpose.msra.mxu1 %v10582_v20  ;;  %v10592_v20 = vld [vmem:[#allocation2 + $0x7b8] ss:$36 sps:$4 sm:$0xff]  }
 0x481   :  { %8808 = vmatprep.mubr.bf16.mxu1 %v12292_v60  ;;  %4427 = vmatprep.subr.bf16.mxu0 %v10583_v59  ;;  %v10594_v59 = vld [vmem:[#allocation2 + $0x578] ss:$36 sps:$4 sm:$0xff]  }
 0x482   :  { %8794 = vmatprep.subr.bf16.mxu1 %v10584_v17  ;;  %v10595_v17 = vld [vmem:[#allocation2 + $0x13c] ss:$36 sps:$4 sm:$0xff]  }
 0x487   :  { %4428 = vmatpush1.bf16.xpose.msra.mxu0 %v10585_v45  ;;  %v10596_v45 = vld [vmem:[#allocation2 + $0x800] ss:$36 sps:$4 sm:$0xff]  }
 0x488   :  { %8795 = vmatpush3.bf16.xpose.msra.mxu1 %v10586_v54  ;;  %4429 = vmatprep.subr.bf16.mxu0 %v10587_v49  ;;  %v10597_v54 = vld [vmem:[#allocation2 + $0x138] ss:$36 sps:$4 sm:$0xff]   ;;  %v10598_v49 = vld [vmem:[#allocation2 + $0x5c0] ss:$36 sps:$4 sm:$0xff]  }
 0x489   :  { %8796 = vmatprep.subr.bf16.mxu1 %v10588_v30  ;;  %v10599_v30 = vld [vmem:[#allocation2 + $0x184] ss:$36 sps:$4 sm:$0xff]  }
 0x48f   :  { %4430 = vmatpush1.bf16.xpose.msra.mxu0 %v10589_v5  ;;  %v10600_v5 = vld [vmem:[#allocation2 + $0x848] ss:$36 sps:$4 sm:$0xff]  }
 0x490   :  { %8797 = vmatpush3.bf16.xpose.msra.mxu1 %v10590_v15  ;;  %4431 = vmatprep.subr.bf16.mxu0 %v10591_v51  ;;  %v10601_v15 = vld [vmem:[#allocation2 + $0x180] ss:$36 sps:$4 sm:$0xff]   ;;  %v10602_v51 = vld [vmem:[#allocation2 + $0x608] ss:$36 sps:$4 sm:$0xff]  }
 0x491   :  { %8798 = vmatprep.subr.bf16.mxu1 %v10592_v20  ;;  %v10603_v20 = vld [vmem:[#allocation2 + $0x1cc] ss:$36 sps:$4 sm:$0xff]  }
 0x497   :  { %4432 = vmatpush1.bf16.xpose.msra.mxu0 %v10593_v43  ;;  %v10604_v43 = vld [vmem:[#allocation2 + $0x890] ss:$36 sps:$4 sm:$0xff]  }
 0x498   :  { %8799 = vmatpush3.bf16.xpose.msra.mxu1 %v10594_v59  ;;  %4433 = vmatprep.subr.bf16.mxu0 %v10595_v17  ;;  %v10605_v59 = vld [vmem:[#allocation2 + $0x1c8] ss:$36 sps:$4 sm:$0xff]   ;;  %v10606_v17 = vld [vmem:[#allocation2 + $0x650] ss:$36 sps:$4 sm:$0xff]  }
 0x499   :  { %8800 = vmatprep.subr.bf16.mxu1 %v10596_v45  ;;  %v10607_v45 = vld [vmem:[#allocation2 + $0x214] ss:$36 sps:$4 sm:$0xff]  }
 0x49f   :  { %4434 = vmatpush1.bf16.xpose.msra.mxu0 %v10597_v54  ;;  %v10608_v54 = vld [vmem:[#allocation2 + $0x8d8] ss:$36 sps:$4 sm:$0xff]  }
 0x4a0   :  { %8801 = vmatpush3.bf16.xpose.msra.mxu1 %v10598_v49  ;;  %4435 = vmatprep.subr.bf16.mxu0 %v10599_v30  ;;  %v10609_v49 = vld [vmem:[#allocation2 + $0x210] ss:$36 sps:$4 sm:$0xff]   ;;  %v10610_v30 = vld [vmem:[#allocation2 + $0x698] ss:$36 sps:$4 sm:$0xff]  }
 0x4a1   :  { %8802 = vmatprep.subr.bf16.mxu1 %v10600_v5  ;;  %v10611_v5 = vld [vmem:[#allocation2 + $0x25c] ss:$36 sps:$4 sm:$0xff]  }
 0x4a7   :  { %4436 = vmatpush1.bf16.xpose.msra.mxu0 %v10601_v15  ;;  %v12297_v15 = vld [vmem:[#allocation2 + $0xd84] ss:$36 sps:$4 sm:$0xff]  }
 0x4a8   :  { %8803 = vmatpush3.bf16.xpose.msra.mxu1 %v10602_v51  ;;  %4437 = vmatprep.subr.bf16.mxu0 %v10603_v20  ;;  %v10613_v51 = vld [vmem:[#allocation2 + $0x258] ss:$36 sps:$4 sm:$0xff]   ;;  %v12301_v20 = vld [vmem:[#allocation2 + $0xd80] ss:$36 sps:$4 sm:$0xff]  }
 0x4a9   :  { %8804 = vmatprep.subr.bf16.mxu1 %v10604_v43  ;;  %14316 = vst [vmem:[#allocation106_spill] sm:$0xff] %v12301_v20  ;;  %v10615_v43 = vld [vmem:[#allocation2 + $0x2a4] ss:$36 sps:$4 sm:$0xff]  }
 0x4af   :  { %4438 = vmatpush1.bf16.xpose.msra.mxu0 %v10605_v59  ;;  %v12305_v59 = vld [vmem:[#allocation2 + $0xdcc] ss:$36 sps:$4 sm:$0xff]  }
 0x4b0   :  { %8805 = vmatpush3.bf16.xpose.msra.mxu1 %v10606_v17  ;;  %4439 = vmatprep.subr.bf16.mxu0 %v10607_v45  ;;  %14317 = vst [vmem:[#allocation107_spill] sm:$0xff] %v12305_v59  ;;  %v10617_v17 = vld [vmem:[#allocation2 + $0x2a0] ss:$36 sps:$4 sm:$0xff]   ;;  %v12308_v45 = vld [vmem:[#allocation2 + $0xdc8] ss:$36 sps:$4 sm:$0xff]  }
 0x4b1   :  { %8806 = vmatprep.subr.bf16.mxu1 %v10608_v54  ;;  %14318 = vst [vmem:[#allocation108_spill] sm:$0xff] %v12308_v45  ;;  %v10619_v54 = vld [vmem:[#allocation2 + $0x2ec] ss:$36 sps:$4 sm:$0xff]  }
 0x4b7   :  { %4440 = vmatpush1.bf16.xpose.msra.mxu0 %v10609_v49  ;;  %v12311_v49 = vld [vmem:[#allocation2 + $0xe14] ss:$36 sps:$4 sm:$0xff]  }
 0x4b8   :  { %8807 = vmatpush3.bf16.xpose.msra.mxu1 %v10610_v30  ;;  %4441 = vmatprep.subr.bf16.mxu0 %v10611_v5  ;;  %14319 = vst [vmem:[#allocation109_spill] sm:$0xff] %v12311_v49  ;;  %v10621_v30 = vld [vmem:[#allocation2 + $0x2e8] ss:$36 sps:$4 sm:$0xff]   ;;  %v12314_v5 = vld [vmem:[#allocation2 + $0xe10] ss:$36 sps:$4 sm:$0xff]  }
 0x4b9   :  { %4917 = vmatprep.subr.bf16.mxu1 %v12297_v15  ;;  %14320 = vst [vmem:[#allocation110_spill] sm:$0xff] %v12314_v5 }
 0x4bf   :  { %8809 = vmatmul.mubr.bf16.vlgmr.msra.gmra.mrb[16].mxu1 %v12292_v60  ;;  %4442 = vmatpush1.bf16.xpose.msra.mxu0 %v10613_v51  ;;  %v10623_v51 = vld [vmem:[#allocation2 + $0x334] ss:$36 sps:$4 sm:$0xff]  }
 0x4c0   :  { %4918 = vmatpush1.bf16.xpose.msra.mxu1 %v12301_v20  ;;  %4949 = vmatprep.mubr.bf16.mxu1 %v11886_v48 }
 0x4c1   :  { %4443 = vmatprep.subr.bf16.mxu0 %v10615_v43  ;;  %4919 = vmatprep.subr.bf16.mxu1 %v12305_v59  ;;  %v12317_v43 = vld [vmem:[#allocation2 + $0xe5c] ss:$36 sps:$4 sm:$0xff]   ;;  %v10702_v59 = vld [vmem:[#allocation2 + $0xe28] ss:$36 sps:$4 sm:$0xff]  }
 0x4c2   :  { %14321 = vst [vmem:[#allocation111_spill] sm:$0xff] %v12317_v43 }
 0x4c7   :  { %4444 = vmatpush1.bf16.xpose.msra.mxu0 %v10617_v17  ;;  %v10625_v17 = vld [vmem:[#allocation2 + $0x330] ss:$36 sps:$4 sm:$0xff]  }
 0x4c8   :  { %4920 = vmatpush1.bf16.xpose.msra.mxu1 %v12308_v45  ;;  %4445 = vmatprep.subr.bf16.mxu0 %v10619_v54  ;;  %v10627_v54 = vld [vmem:[#allocation2 + $0x37c] ss:$36 sps:$4 sm:$0xff]   ;;  %v12475_v45 = vld [vmem:[#allocation2 + $0xbd4] ss:$36 sps:$4 sm:$0xff]  }
 0x4c9   :  { %4921 = vmatprep.subr.bf16.mxu1 %v12311_v49  ;;  %v10642_v49 = vld [vmem:[#allocation2 + $0xf78] ss:$36 sps:$4 sm:$0xff]  }
 0x4cf   :  { %4446 = vmatpush1.bf16.xpose.msra.mxu0 %v10621_v30  ;;  %v10629_v30 = vld [vmem:[#allocation2 + $0x378] ss:$36 sps:$4 sm:$0xff]  }
 0x4d0   :  { %4922 = vmatpush1.bf16.xpose.msra.mxu1 %v12314_v5  ;;  %4447 = vmatprep.subr.bf16.mxu0 %v10623_v51  ;;  %v12326_v5 = vld [vmem:[#allocation2 + $0xea0] ss:$36 sps:$4 sm:$0xff]  }
 0x4d1   :  { %4923 = vmatprep.subr.bf16.mxu1 %v12317_v43  ;;  %14324 = vst [vmem:[#allocation114_spill] sm:$0xff] %v12326_v5  ;;  %v10631_v51 = vld [vmem:[#allocation2 + $0x3c4] ss:$36 sps:$4 sm:$0xff]   ;;  %v12329_v43 = vld [vmem:[#allocation2 + $0xeec] ss:$36 sps:$4 sm:$0xff]  }
 0x4d2   :  { %14325 = vst [vmem:[#allocation115_spill] sm:$0xff] %v12329_v43 }
 0x4d7   :  { %4448 = vmatpush1.bf16.xpose.msra.mxu0 %v10625_v17  ;;  %v10633_v17 = vld [vmem:[#allocation2 + $0x3c0] ss:$36 sps:$4 sm:$0xff]  }
 0x4d8   :  { %4924 = vmatpush1.bf16.xpose.msra.mxu1 %v12320_v7  ;;  %4449 = vmatprep.subr.bf16.mxu0 %v10627_v54  ;;  %v12332_v7 = vld [vmem:[#allocation2 + $0xee8] ss:$36 sps:$4 sm:$0xff]  }
 0x4d9   :  { %4925 = vmatprep.subr.bf16.mxu1 %v12323_v1  ;;  %14326 = vst [vmem:[#allocation116_spill] sm:$0xff] %v12332_v7  ;;  %v10635_v54 = vld [vmem:[#allocation2 + $0x40c] ss:$36 sps:$4 sm:$0xff]   ;;  %v12335_v1 = vld [vmem:[#allocation2 + $0xf34] ss:$36 sps:$4 sm:$0xff]  }
 0x4da   :  { %14327 = vst [vmem:[#allocation117_spill] sm:$0xff] %v12335_v1 }
 0x4df   :  { %4450 = vmatpush1.bf16.xpose.msra.mxu0 %v10629_v30  ;;  %v10637_v30 = vld [vmem:[#allocation2 + $0x408] ss:$36 sps:$4 sm:$0xff]  }
 0x4e0   :  { %4926 = vmatpush1.bf16.xpose.msra.mxu1 %v12326_v5  ;;  %4451 = vmatprep.subr.bf16.mxu0 %v10631_v51  ;;  %v12338_v5 = vld [vmem:[#allocation2 + $0xf30] ss:$36 sps:$4 sm:$0xff]  }
 0x4e1   :  { %4927 = vmatprep.subr.bf16.mxu1 %v12329_v43  ;;  %14328 = vst [vmem:[#allocation118_spill] sm:$0xff] %v12338_v5  ;;  %v10639_v51 = vld [vmem:[#allocation2 + $0x454] ss:$36 sps:$4 sm:$0xff]   ;;  %v10640_v43 = vld [vmem:[#allocation2 + $0xf7c] ss:$36 sps:$4 sm:$0xff]  }
 0x4e7   :  { %4452 = vmatpush1.bf16.xpose.msra.mxu0 %v10633_v17  ;;  %v10641_v17 = vld [vmem:[#allocation2 + $0x450] ss:$36 sps:$4 sm:$0xff]  }
 0x4e8   :  { %4928 = vmatpush1.bf16.xpose.msra.mxu1 %v12332_v7  ;;  %4453 = vmatprep.subr.bf16.mxu0 %v10635_v54  ;;  %v10643_v54 = vld [vmem:[#allocation2 + $0xd8c] ss:$36 sps:$4 sm:$0xff]   ;;  %v12440_v7 = vld [vmem:[#allocation2 + $0xf44] ss:$36 sps:$4 sm:$0xff]  }
 0x4e9   :  { %4929 = vmatprep.subr.bf16.mxu1 %v12335_v1  ;;  %v12437_v1 = vld [vmem:[#allocation2 + $0xab4] ss:$36 sps:$4 sm:$0xff]   ;;  %14341 = vst [vmem:[#allocation131_spill] sm:$0xff] %v12440_v7 }
 0x4ef   :  { %4454 = vmatpush1.bf16.xpose.msra.mxu0 %v10637_v30  ;;  %v10644_v30 = vld [vmem:[#allocation2 + $0xd88] ss:$36 sps:$4 sm:$0xff]  }
 0x4f0   :  { %4930 = vmatpush1.bf16.xpose.msra.mxu1 %v12338_v5  ;;  %4455 = vmatprep.subr.bf16.mxu0 %v10639_v51  ;;  %v10649_v51 = vld [vmem:[#allocation2 + $0xe64] ss:$36 sps:$4 sm:$0xff]   ;;  %v12434_v5 = vld [vmem:[#allocation2 + $0xef8] ss:$36 sps:$4 sm:$0xff]  }
 0x4f1   :  { %4931 = vmatprep.subr.bf16.mxu1 %v10640_v43  ;;  %v10645_v43 = vld [vmem:[#allocation2 + $0xdd4] ss:$36 sps:$4 sm:$0xff]   ;;  %14340 = vst [vmem:[#allocation130_spill] sm:$0xff] %v12434_v5 }
 0x4f7   :  { %4456 = vmatpush1.bf16.xpose.msra.mxu0 %v10641_v17  ;;  %v12361_v17 = vld [vmem:[#allocation2 + $0x904] ss:$36 sps:$4 sm:$0xff]  }
 0x4f8   :  { %4932 = vmatpush1.bf16.xpose.msra.mxu1 %v10642_v49  ;;  %8774 = vmatprep.subr.bf16.mxu0 %v11898_v53  ;;  %v10646_v53 = vld [vmem:[#allocation2 + $0xdd0] ss:$36 sps:$4 sm:$0xff]   ;;  %v10647_v49 = vld [vmem:[#allocation2 + $0xe1c] ss:$36 sps:$4 sm:$0xff]  }
 0x4f9   :  { %4957 = vmatprep.subr.bf16.mxu1 %v10643_v54  ;;  %v12383_v54 = vld [vmem:[#allocation2 + $0x948] ss:$36 sps:$4 sm:$0xff]  }
 0x4fe   :  { %4458 = vmatmul.mubr.bf16.vlgmr.msra.gmra.mrb[20].mxu0 %v12287_v4 }
 0x4ff   :  { %4950 = vmatmul.mubr.bf16.vlgmr.msra.gmra.mrb[20].mxu1 %v11985_v41  ;;  %8775 = vmatpush3.bf16.xpose.msra.mxu0 %v11900_v47  ;;  %v10648_v47 = vld [vmem:[#allocation2 + $0xe18] ss:$36 sps:$4 sm:$0xff]  }
 0x500   :  { %8790 = vmatprep.mubr.bf16.mxu0 %v12292_v60  ;;  %4958 = vmatpush1.bf16.xpose.msra.mxu1 %v10644_v30  ;;  %v12386_v30 = vld [vmem:[#allocation2 + $0xdd8] ss:$36 sps:$4 sm:$0xff]  }
 0x501   :  { %4989 = vmatprep.mubr.bf16.mxu1 %v11989_v50  ;;  %8776 = vmatprep.subr.bf16.mxu0 %v11903_v55  ;;  %v10650_v55 = vld [vmem:[#allocation2 + $0xe60] ss:$36 sps:$4 sm:$0xff]   ;;  %14332 = vst [vmem:[#allocation122_spill] sm:$0xff] %v12386_v30 }
 0x502   :  { %4959 = vmatprep.subr.bf16.mxu1 %v10645_v43  ;;  %v12392_v43 = vld [vmem:[#allocation2 + $0xe24] ss:$36 sps:$4 sm:$0xff]  }
 0x503   :  { %14333 = vst [vmem:[#allocation123_spill] sm:$0xff] %v12392_v43 }
 0x507   :  { %8777 = vmatpush3.bf16.xpose.msra.mxu0 %v11907_v58  ;;  %v10651_v58 = vld [vmem:[#allocation2 + $0xeac] ss:$36 sps:$4 sm:$0xff]  }
 0x508   :  { %4960 = vmatpush1.bf16.xpose.msra.mxu1 %v10646_v53  ;;  %8778 = vmatprep.subr.bf16.mxu0 %v11911_v61  ;;  %v10652_v61 = vld [vmem:[#allocation2 + $0xea8] ss:$36 sps:$4 sm:$0xff]   ;;  %v12395_v53 = vld [vmem:[#allocation2 + $0x990] ss:$36 sps:$4 sm:$0xff]  }
 0x509   :  { %4961 = vmatprep.subr.bf16.mxu1 %v10647_v49  ;;  %v12398_v49 = vld [vmem:[#allocation2 + $0xe20] ss:$36 sps:$4 sm:$0xff]  }
 0x50a   :  { %14334 = vst [vmem:[#allocation124_spill] sm:$0xff] %v12398_v49 }
 0x50f   :  { %8779 = vmatpush3.bf16.xpose.msra.mxu0 %v11914_v2  ;;  %v10653_v2 = vld [vmem:[#allocation2 + $0xef4] ss:$36 sps:$4 sm:$0xff]  }
 0x510   :  { %4962 = vmatpush1.bf16.xpose.msra.mxu1 %v10648_v47  ;;  %8780 = vmatprep.subr.bf16.mxu0 %v11917_v11  ;;  %v10654_v11 = vld [vmem:[#allocation2 + $0xef0] ss:$36 sps:$4 sm:$0xff]   ;;  %v12401_v47 = vld [vmem:[#allocation2 + $0x9dc] ss:$36 sps:$4 sm:$0xff]  }
 0x511   :  { %4963 = vmatprep.subr.bf16.mxu1 %v10649_v51  ;;  %v12404_v51 = vld [vmem:[#allocation2 + $0xe6c] ss:$36 sps:$4 sm:$0xff]  }
 0x512   :  { %14335 = vst [vmem:[#allocation125_spill] sm:$0xff] %v12404_v51 }
 0x517   :  { %8781 = vmatpush3.bf16.xpose.msra.mxu0 %v11920_v13  ;;  %v10655_v13 = vld [vmem:[#allocation2 + $0xf3c] ss:$36 sps:$4 sm:$0xff]  }
 0x518   :  { %4964 = vmatpush1.bf16.xpose.msra.mxu1 %v10650_v55  ;;  %8782 = vmatprep.subr.bf16.mxu0 %v11923_v62  ;;  %v10656_v62 = vld [vmem:[#allocation2 + $0xf38] ss:$36 sps:$4 sm:$0xff]  }
 0x519   :  { %4965 = vmatprep.subr.bf16.mxu1 %v10651_v58  ;;  %v12407_v55 = vld [vmem:[#allocation2 + $0x9d8] ss:$36 sps:$4 sm:$0xff]   ;;  %v12410_v58 = vld [vmem:[#allocation2 + $0xe68] ss:$36 sps:$4 sm:$0xff]  }
 0x51a   :  { %14336 = vst [vmem:[#allocation126_spill] sm:$0xff] %v12410_v58 }
 0x51f   :  { %8783 = vmatpush3.bf16.xpose.msra.mxu0 %v11926_v21  ;;  %v10657_v21 = vld [vmem:[#allocation2 + $0xf84] ss:$36 sps:$4 sm:$0xff]  }
 0x520   :  { %4966 = vmatpush1.bf16.xpose.msra.mxu1 %v10652_v61  ;;  %8784 = vmatprep.subr.bf16.mxu0 %v11929_v25  ;;  %v10658_v25 = vld [vmem:[#allocation2 + $0xf80] ss:$36 sps:$4 sm:$0xff]  }
 0x521   :  { %4967 = vmatprep.subr.bf16.mxu1 %v10653_v2  ;;  %v12413_v61 = vld [vmem:[#allocation2 + $0xa24] ss:$36 sps:$4 sm:$0xff]   ;;  %v12416_v2 = vld [vmem:[#allocation2 + $0xeb4] ss:$36 sps:$4 sm:$0xff]  }
 0x522   :  { %14337 = vst [vmem:[#allocation127_spill] sm:$0xff] %v12416_v2 }
 0x527   :  { %8785 = vmatpush3.bf16.xpose.msra.mxu0 %v11932_v29  ;;  %v12364_v29 = vld [vmem:[#allocation2 + $0xd94] ss:$36 sps:$4 sm:$0xff]  }
 0x528   :  { %4968 = vmatpush1.bf16.xpose.msra.mxu1 %v10654_v11  ;;  %8786 = vmatprep.subr.bf16.mxu0 %v11935_v34  ;;  %14329 = vst [vmem:[#allocation119_spill] sm:$0xff] %v12364_v29  ;;  %v12369_v34 = vld [vmem:[#allocation2 + $0x900] ss:$36 sps:$4 sm:$0xff]  }
 0x529   :  { %4969 = vmatprep.subr.bf16.mxu1 %v10655_v13  ;;  %v12419_v11 = vld [vmem:[#allocation2 + $0xa20] ss:$36 sps:$4 sm:$0xff]   ;;  %v12422_v13 = vld [vmem:[#allocation2 + $0xeb0] ss:$36 sps:$4 sm:$0xff]  }
 0x52a   :  { %14338 = vst [vmem:[#allocation128_spill] sm:$0xff] %v12422_v13 }
 0x52f   :  { %8787 = vmatpush3.bf16.xpose.msra.mxu0 %v11938_v36  ;;  %v12373_v36 = vld [vmem:[#allocation2 + $0xd90] ss:$36 sps:$4 sm:$0xff]  }
 0x530   :  { %4970 = vmatpush1.bf16.xpose.msra.mxu1 %v10656_v62  ;;  %8788 = vmatprep.subr.bf16.mxu0 %v11941_v39  ;;  %14330 = vst [vmem:[#allocation120_spill] sm:$0xff] %v12373_v36  ;;  %v12377_v39 = vld [vmem:[#allocation2 + $0x94c] ss:$36 sps:$4 sm:$0xff]  }
 0x531   :  { %4971 = vmatprep.subr.bf16.mxu1 %v10657_v21  ;;  %v12425_v62 = vld [vmem:[#allocation2 + $0xa6c] ss:$36 sps:$4 sm:$0xff]   ;;  %v12428_v21 = vld [vmem:[#allocation2 + $0xefc] ss:$36 sps:$4 sm:$0xff]  }
 0x532   :  { %14339 = vst [vmem:[#allocation129_spill] sm:$0xff] %v12428_v21 }
 0x537   :  { %8789 = vmatpush3.bf16.xpose.msra.mxu0 %v11944_v44  ;;  %v12380_v44 = vld [vmem:[#allocation2 + $0xddc] ss:$36 sps:$4 sm:$0xff]  }
 0x538   :  { %4972 = vmatpush1.bf16.xpose.msra.mxu1 %v10658_v25  ;;  %4712 = vmatprep.subr.bf16.mxu0 %v12361_v17  ;;  %14331 = vst [vmem:[#allocation121_spill] sm:$0xff] %v12380_v44  ;;  %v12431_v25 = vld [vmem:[#allocation2 + $0xa68] ss:$36 sps:$4 sm:$0xff]  }
 0x539   :  { %4997 = vmatprep.subr.bf16.mxu1 %v12364_v29 }
 0x53e   :  { %8791 = vmatmul.mubr.bf16.vlgmr.msra.gmra.mrb[20].mxu0 %v12292_v60 }
 0x53f   :  { %4990 = vmatmul.mubr.bf16.vlgmr.msra.gmra.mrb[20].mxu1 %v12108_v56  ;;  %4713 = vmatpush1.bf16.xpose.msra.mxu0 %v12369_v34 }
 0x540   :  { %4744 = vmatprep.mubr.bf16.mxu0 %v11886_v48  ;;  %4998 = vmatpush1.bf16.xpose.msra.mxu1 %v12373_v36  ;;  %v12389_v48 = vld [vmem:[#allocation2 + $0x994] ss:$36 sps:$4 sm:$0xff]   ;;  %v12481_v36 = vld [vmem:[#allocation2 + $0xc1c] ss:$36 sps:$4 sm:$0xff]  }
 0x541   :  { %5029 = vmatprep.mubr.bf16.mxu1 %v12128_v31  ;;  %4714 = vmatprep.subr.bf16.mxu0 %v12377_v39 }
 0x542   :  { %4999 = vmatprep.subr.bf16.mxu1 %v12380_v44  ;;  %v10700_v44 = vld [vmem:[#allocation2 + $0xe2c] ss:$36 sps:$4 sm:$0xff]  }
 0x547   :  { %4715 = vmatpush1.bf16.xpose.msra.mxu0 %v12383_v54 }
 0x548   :  { %5000 = vmatpush1.bf16.xpose.msra.mxu1 %v12386_v30  ;;  %4716 = vmatprep.subr.bf16.mxu0 %v12389_v48  ;;  %v12472_v30 = vld [vmem:[#allocation2 + $0xb88] ss:$36 sps:$4 sm:$0xff]  }
 0x549   :  { %5001 = vmatprep.subr.bf16.mxu1 %v12392_v43  ;;  %v12469_v43 = vld [vmem:[#allocation2 + $0xb8c] ss:$36 sps:$4 sm:$0xff]  }
 0x54f   :  { %4717 = vmatpush1.bf16.xpose.msra.mxu0 %v12395_v53 }
 0x550   :  { %5002 = vmatpush1.bf16.xpose.msra.mxu1 %v12398_v49  ;;  %4718 = vmatprep.subr.bf16.mxu0 %v12401_v47  ;;  %v12465_v49 = vld [vmem:[#allocation2 + $0xb40] ss:$36 sps:$4 sm:$0xff]  }
 0x551   :  { %5003 = vmatprep.subr.bf16.mxu1 %v12404_v51  ;;  %v12461_v51 = vld [vmem:[#allocation2 + $0xb44] ss:$36 sps:$4 sm:$0xff]  }
 0x557   :  { %4719 = vmatpush1.bf16.xpose.msra.mxu0 %v12407_v55 }
 0x558   :  { %5004 = vmatpush1.bf16.xpose.msra.mxu1 %v12410_v58  ;;  %4720 = vmatprep.subr.bf16.mxu0 %v12413_v61  ;;  %v12455_v58 = vld [vmem:[#allocation2 + $0xaf8] ss:$36 sps:$4 sm:$0xff]  }
 0x559   :  { %5005 = vmatprep.subr.bf16.mxu1 %v12416_v2  ;;  %v12449_v2 = vld [vmem:[#allocation2 + $0xafc] ss:$36 sps:$4 sm:$0xff]  }
 0x55f   :  { %4721 = vmatpush1.bf16.xpose.msra.mxu0 %v12419_v11 }
 0x560   :  { %5006 = vmatpush1.bf16.xpose.msra.mxu1 %v12422_v13  ;;  %4722 = vmatprep.subr.bf16.mxu0 %v12425_v62  ;;  %v12443_v13 = vld [vmem:[#allocation2 + $0xab0] ss:$36 sps:$4 sm:$0xff]  }
 0x561   :  { %5007 = vmatprep.subr.bf16.mxu1 %v12428_v21  ;;  %v12446_v21 = vld [vmem:[#allocation2 + $0xf40] ss:$36 sps:$4 sm:$0xff]  }
 0x562   :  { %14342 = vst [vmem:[#allocation132_spill] sm:$0xff] %v12446_v21 }
 0x567   :  { %4723 = vmatpush1.bf16.xpose.msra.mxu0 %v12431_v25 }
 0x568   :  { %5008 = vmatpush1.bf16.xpose.msra.mxu1 %v12434_v5  ;;  %4724 = vmatprep.subr.bf16.mxu0 %v12437_v1  ;;  %v12452_v5 = vld [vmem:[#allocation2 + $0xf8c] ss:$36 sps:$4 sm:$0xff]  }
 0x569   :  { %5009 = vmatprep.subr.bf16.mxu1 %v12440_v7  ;;  %14343 = vst [vmem:[#allocation133_spill] sm:$0xff] %v12452_v5  ;;  %v12458_v7 = vld [vmem:[#allocation2 + $0xf88] ss:$36 sps:$4 sm:$0xff]  }
 0x56a   :  { %14344 = vst [vmem:[#allocation134_spill] sm:$0xff] %v12458_v7 }
 0x56f   :  { %4725 = vmatpush1.bf16.xpose.msra.mxu0 %v12443_v13 }
 0x570   :  { %5010 = vmatpush1.bf16.xpose.msra.mxu1 %v12446_v21  ;;  %4726 = vmatprep.subr.bf16.mxu0 %v12449_v2  ;;  %v10692_v21 = vld [vmem:[#allocation2 + $0xd9c] ss:$36 sps:$4 sm:$0xff]  }
 0x571   :  { %5011 = vmatprep.subr.bf16.mxu1 %v12452_v5  ;;  %v10694_v5 = vld [vmem:[#allocation2 + $0xd98] ss:$36 sps:$4 sm:$0xff]  }
 0x577   :  { %4727 = vmatpush1.bf16.xpose.msra.mxu0 %v12455_v58 }
 0x578   :  { %5012 = vmatpush1.bf16.xpose.msra.mxu1 %v12458_v7  ;;  %4728 = vmatprep.subr.bf16.mxu0 %v12461_v51  ;;  %v10696_v7 = vld [vmem:[#allocation2 + $0xde4] ss:$36 sps:$4 sm:$0xff]  }
 0x579   :  { %5037 = vmatprep.subr.bf16.mxu1 %v10692_v21  ;;  %v10698_v21 = vld [vmem:[#allocation2 + $0xde0] ss:$36 sps:$4 sm:$0xff]  }
 0x57f   :  { %5030 = vmatmul.mubr.bf16.vlgmr.msra.gmra.mrb[20].mxu1 %v12176_v57  ;;  %4729 = vmatpush1.bf16.xpose.msra.mxu0 %v12465_v49 }
 0x580   :  { %5038 = vmatpush1.bf16.xpose.msra.mxu1 %v10694_v5  ;;  %5069 = vmatprep.mubr.bf16.mxu1 %v12180_v27  ;;  %v12478_v5 = vld [vmem:[#allocation2 + $0xbd0] ss:$36 sps:$4 sm:$0xff]  }
 0x581   :  { %4730 = vmatprep.subr.bf16.mxu0 %v12469_v43  ;;  %5039 = vmatprep.subr.bf16.mxu1 %v10696_v7  ;;  %v10704_v7 = vld [vmem:[#allocation2 + $0xe74] ss:$36 sps:$4 sm:$0xff]  }
 0x587   :  { %4731 = vmatpush1.bf16.xpose.msra.mxu0 %v12472_v30 }
 0x588   :  { %5040 = vmatpush1.bf16.xpose.msra.mxu1 %v10698_v21  ;;  %4732 = vmatprep.subr.bf16.mxu0 %v12475_v45 }
 0x589   :  { %5041 = vmatprep.subr.bf16.mxu1 %v10700_v44  ;;  %v10706_v44 = vld [vmem:[#allocation2 + $0xe70] ss:$36 sps:$4 sm:$0xff]  }
 0x58f   :  { %4733 = vmatpush1.bf16.xpose.msra.mxu0 %v12478_v5 }
 0x590   :  { %5042 = vmatpush1.bf16.xpose.msra.mxu1 %v10702_v59  ;;  %4734 = vmatprep.subr.bf16.mxu0 %v12481_v36  ;;  %v10708_v59 = vld [vmem:[#allocation2 + $0xebc] ss:$36 sps:$4 sm:$0xff]  }
 0x591   :  { %5043 = vmatprep.subr.bf16.mxu1 %v10704_v7  ;;  %v10710_v7 = vld [vmem:[#allocation2 + $0xeb8] ss:$36 sps:$4 sm:$0xff]  }
 0x592   :  { %v12484_v20 = vpop.f32.mrb[16].mxu1 }
 0x593   :  { %v12486_v21 = vpop.f32.mrb[17].mxu1 }
 0x594   :  { %v4709_v29 = vpop.f32.mrb[18].mxu1 }
 0x595   :  { %v4710_v24 = vpop.f32.mrb[19].mxu1  ;;  %v12497_v29 = vld [vmem:[#allocation2 + $0xcac] ss:$36 sps:$4 sm:$0xff]  }
 0x596   :  { %v10712_v24 = vld [vmem:[#allocation2 + $0xf04] ss:$36 sps:$4 sm:$0xff]  }
 0x597   :  { %4735 = vmatpush1.bf16.xpose.msra.mxu0 %v12488_v23 }
 0x598   :  { %5044 = vmatpush1.bf16.xpose.msra.mxu1 %v10706_v44  ;;  %4736 = vmatprep.subr.bf16.mxu0 %v12491_v3  ;;  %v10714_v44 = vld [vmem:[#allocation2 + $0xf00] ss:$36 sps:$4 sm:$0xff]  }
 0x599   :  { %5045 = vmatprep.subr.bf16.mxu1 %v10708_v59  ;;  %v10716_v59 = vld [vmem:[#allocation2 + $0xf4c] ss:$36 sps:$4 sm:$0xff]  }
 0x59f   :  { %4737 = vmatpush1.bf16.xpose.msra.mxu0 %v12494_v63 }
 0x5a0   :  { %5046 = vmatpush1.bf16.xpose.msra.mxu1 %v10710_v7  ;;  %4738 = vmatprep.subr.bf16.mxu0 %v12497_v29  ;;  %v10718_v7 = vld [vmem:[#allocation2 + $0xf48] ss:$36 sps:$4 sm:$0xff]  }
 0x5a1   :  { %5047 = vmatprep.subr.bf16.mxu1 %v10712_v24  ;;  %v10720_v24 = vld [vmem:[#allocation2 + $0xf94] ss:$36 sps:$4 sm:$0xff]  }
 0x5a7   :  { %4739 = vmatpush1.bf16.xpose.msra.mxu0 %v12500_v14 }
 0x5a8   :  { %5048 = vmatpush1.bf16.xpose.msra.mxu1 %v10714_v44  ;;  %4740 = vmatprep.subr.bf16.mxu0 %v12503_v37  ;;  %v10722_v44 = vld [vmem:[#allocation2 + $0xf90] ss:$36 sps:$4 sm:$0xff]  }
 0x5a9   :  { %5049 = vmatprep.subr.bf16.mxu1 %v10716_v59  ;;  %v14345_v59 = vmov 0.0  }
 0x5af   :  { %4741 = vmatpush1.bf16.xpose.msra.mxu0 %v12506_v12 }
 0x5b0   :  { %5050 = vmatpush1.bf16.xpose.msra.mxu1 %v10718_v7  ;;  %4742 = vmatprep.subr.bf16.mxu0 %v12509_v6  ;;  %v10724_v7 = vld [vmem:[#allocation2 + $0x908] ss:$36 sps:$4 sm:$0xff]  }
 0x5b1   :  { %5051 = vmatprep.subr.bf16.mxu1 %v10720_v24  ;;  %v10726_v24 = vld [vmem:[#allocation2 + $0x954] ss:$36 sps:$4 sm:$0xff]  }
 0x5b7   :  { %4743 = vmatpush1.bf16.xpose.msra.mxu0 %v12512_v52 }
 0x5b8   :  { %5052 = vmatpush1.bf16.xpose.msra.mxu1 %v10722_v44  ;;  %4753 = vmatprep.subr.bf16.mxu0 %v10723_v38  ;;  %v10727_v38 = vld [vmem:[#allocation2 + $0x950] ss:$36 sps:$4 sm:$0xff]   ;;  %v10729_v44 = vld [vmem:[#allocation2 + $0x99c] ss:$36 sps:$4 sm:$0xff]  }
 0x5b9   :  { %9041 = vmatprep.subr.bf16.mxu1 %v14345_v59 }
 0x5be   :  { %4745 = vmatmul.mubr.bf16.vlgmr.msra.gmra.mrb[24].mxu0 %v11985_v41  ;;  %v12525_v41 = vld [vmem:[#allocation2 + $0xde8] ss:$36 sps:$4 sm:$0xff]  }
 0x5bf   :  { %5070 = vmatmul.mubr.bf16.vlgmr.msra.gmra.mrb[20].mxu1 %v12287_v4  ;;  %4754 = vmatpush1.bf16.xpose.msra.mxu0 %v10724_v7  ;;  %14347 = vst [vmem:[#allocation136_spill] sm:$0xff] %v12525_v41  ;;  %v12529_v7 = vld [vmem:[#allocation2 + $0xe30] ss:$36 sps:$4 sm:$0xff]  }
 0x5c0   :  { %4785 = vmatprep.mubr.bf16.mxu0 %v11989_v50  ;;  %9042 = vmatpush3.bf16.xpose.msra.mxu1 %v12519_v32  ;;  %v10730_v50 = vld [vmem:[#allocation2 + $0x998] ss:$36 sps:$4 sm:$0xff]   ;;  %14348 = vst [vmem:[#allocation137_spill] sm:$0xff] %v12529_v7  ;;  %v10733_v32 = vld [vmem:[#allocation2 + $0x9e0] ss:$36 sps:$4 sm:$0xff]  }
 0x5c1   :  { %4755 = vmatprep.subr.bf16.mxu0 %v10726_v24  ;;  %9043 = vmatprep.subr.bf16.mxu1 %v14345_v59  ;;  %v10732_v24 = vld [vmem:[#allocation2 + $0x9e4] ss:$36 sps:$4 sm:$0xff]  }
 0x5c2   :  { %9057 = vmatprep.mubr.msk.bf16.mxu1 %vm11509_vm0, %v14345_v59 }
 0x5c7   :  { %4756 = vmatpush1.bf16.xpose.msra.mxu0 %v10727_v38  ;;  %v12533_v38 = vld [vmem:[#allocation2 + $0xe78] ss:$36 sps:$4 sm:$0xff]  }
 0x5c8   :  { %9044 = vmatpush3.bf16.xpose.msra.mxu1 %v12525_v41  ;;  %4757 = vmatprep.subr.bf16.mxu0 %v10729_v44  ;;  %14349 = vst [vmem:[#allocation138_spill] sm:$0xff] %v12533_v38  ;;  %v10735_v41 = vld [vmem:[#allocation2 + $0xa2c] ss:$36 sps:$4 sm:$0xff]  }
 0x5c9   :  { %9045 = vmatprep.subr.bf16.mxu1 %v14345_v59  ;;  %v10736_v44 = vld [vmem:[#allocation2 + $0xa28] ss:$36 sps:$4 sm:$0xff]  }
 0x5cf   :  { %4758 = vmatpush1.bf16.xpose.msra.mxu0 %v10730_v50  ;;  %v12537_v50 = vld [vmem:[#allocation2 + $0xec0] ss:$36 sps:$4 sm:$0xff]  }
 0x5d0   :  { %9046 = vmatpush3.bf16.xpose.msra.mxu1 %v12529_v7  ;;  %4759 = vmatprep.subr.bf16.mxu0 %v10732_v24  ;;  %14350 = vst [vmem:[#allocation139_spill] sm:$0xff] %v12537_v50  ;;  %v10738_v7 = vld [vmem:[#allocation2 + $0xa74] ss:$36 sps:$4 sm:$0xff]  }
 0x5d1   :  { %9047 = vmatprep.subr.bf16.mxu1 %v14345_v59  ;;  %v10739_v24 = vld [vmem:[#allocation2 + $0xa70] ss:$36 sps:$4 sm:$0xff]  }
 0x5d7   :  { %4760 = vmatpush1.bf16.xpose.msra.mxu0 %v10733_v32  ;;  %v12541_v32 = vld [vmem:[#allocation2 + $0xf08] ss:$36 sps:$4 sm:$0xff]  }
 0x5d8   :  { %9048 = vmatpush3.bf16.xpose.msra.mxu1 %v12533_v38  ;;  %4761 = vmatprep.subr.bf16.mxu0 %v10735_v41  ;;  %14351 = vst [vmem:[#allocation140_spill] sm:$0xff] %v12541_v32  ;;  %v10741_v38 = vld [vmem:[#allocation2 + $0xabc] ss:$36 sps:$4 sm:$0xff]  }
 0x5d9   :  { %9049 = vmatprep.subr.bf16.mxu1 %v14345_v59  ;;  %v10742_v41 = vld [vmem:[#allocation2 + $0xab8] ss:$36 sps:$4 sm:$0xff]  }
 0x5df   :  { %4762 = vmatpush1.bf16.xpose.msra.mxu0 %v10736_v44  ;;  %v12545_v44 = vld [vmem:[#allocation2 + $0xf50] ss:$36 sps:$4 sm:$0xff]  }
 0x5e0   :  { %9050 = vmatpush3.bf16.xpose.msra.mxu1 %v12537_v50  ;;  %4763 = vmatprep.subr.bf16.mxu0 %v10738_v7  ;;  %14352 = vst [vmem:[#allocation141_spill] sm:$0xff] %v12545_v44  ;;  %v10744_v50 = vld [vmem:[#allocation2 + $0xb04] ss:$36 sps:$4 sm:$0xff]  }
 0x5e1   :  { %9051 = vmatprep.subr.bf16.mxu1 %v14345_v59  ;;  %v10745_v7 = vld [vmem:[#allocation2 + $0xb00] ss:$36 sps:$4 sm:$0xff]  }
 0x5e7   :  { %4764 = vmatpush1.bf16.xpose.msra.mxu0 %v10739_v24  ;;  %v12549_v24 = vld [vmem:[#allocation2 + $0xf98] ss:$36 sps:$4 sm:$0xff]  }
 0x5e8   :  { %9052 = vmatpush3.bf16.xpose.msra.mxu1 %v12541_v32  ;;  %4765 = vmatprep.subr.bf16.mxu0 %v10741_v38  ;;  %14353 = vst [vmem:[#allocation142_spill] sm:$0xff] %v12549_v24  ;;  %v10747_v32 = vld [vmem:[#allocation2 + $0xb4c] ss:$36 sps:$4 sm:$0xff]  }
 0x5e9   :  { %9053 = vmatprep.subr.bf16.mxu1 %v14345_v59  ;;  %v10748_v38 = vld [vmem:[#allocation2 + $0xb48] ss:$36 sps:$4 sm:$0xff]  }
 0x5ef   :  { %4766 = vmatpush1.bf16.xpose.msra.mxu0 %v10742_v41  ;;  %v10749_v41 = vld [vmem:[#allocation2 + $0xb94] ss:$36 sps:$4 sm:$0xff]  }
 0x5f0   :  { %9054 = vmatpush3.bf16.xpose.msra.mxu1 %v12545_v44  ;;  %4767 = vmatprep.subr.bf16.mxu0 %v10744_v50  ;;  %v10750_v50 = vld [vmem:[#allocation2 + $0xb90] ss:$36 sps:$4 sm:$0xff]  }
 0x5f1   :  { %9055 = vmatprep.subr.bf16.mxu1 %v14345_v59 }
 0x5f7   :  { %4768 = vmatpush1.bf16.xpose.msra.mxu0 %v10745_v7  ;;  %v14355_v7 = vld [vmem:[#allocation46_spill] sm:$0xff] }
 0x5f8   :  { %9056 = vmatpush3.bf16.xpose.msra.mxu1 %v12549_v24  ;;  %4769 = vmatprep.subr.bf16.mxu0 %v10747_v32  ;;  %v10751_v32 = vld [vmem:[#allocation2 + $0xbdc] ss:$36 sps:$4 sm:$0xff]   ;;  %v14359_v24 = vld [vmem:[#allocation28_spill] sm:$0xff] }
 0x5f9   :  { %5131 = vmatprep.subr.bf16.mxu1 %v11974_v0  ;;  %v14354_v0 = vld [vmem:[#allocation45_spill] sm:$0xff] }
 0x5ff   :  { %9058 = vmatmul.mubr.bf16.vlgmr.msra.gmra.mrb[20].mxu1 %v12292_v60  ;;  %4770 = vmatpush1.bf16.xpose.msra.mxu0 %v10748_v38  ;;  %v14356_v38 = vld [vmem:[#allocation47_spill] sm:$0xff] }
 0x600   :  { %5132 = vmatpush1.bf16.msra.mxu1 %v11992_v18  ;;  %4771 = vmatprep.subr.bf16.mxu0 %v10749_v41  ;;  %v10752_v18 = vld [vmem:[#allocation2 + $0xbd8] ss:$36 sps:$4 sm:$0xff]   ;;  %v14357_v41 = vld [vmem:[#allocation48_spill] sm:$0xff] }
 0x601   :  { %5133 = vmatprep.subr.bf16.mxu1 %v11996_v33  ;;  %v10753_v33 = vld [vmem:[#allocation2 + $0xc24] ss:$36 sps:$4 sm:$0xff]  }
 0x604   :  { %5134 = vmatpush1.bf16.msra.mxu1 %v11999_v42 }
 0x605   :  { %5135 = vmatprep.subr.bf16.mxu1 %v12002_v16  ;;  %v14358_v16 = vld [vmem:[#allocation49_spill] sm:$0xff] }
 0x607   :  { %4772 = vmatpush1.bf16.xpose.msra.mxu0 %v10750_v50 }
 0x608   :  { %5136 = vmatpush1.bf16.msra.mxu1 %v12005_v9  ;;  %4773 = vmatprep.subr.bf16.mxu0 %v10751_v32  ;;  %v14360_v32 = vld [vmem:[#allocation50_spill] sm:$0xff] }
 0x609   :  { %5137 = vmatprep.subr.bf16.mxu1 %v14354_v0 }
 0x60c   :  { %5138 = vmatpush1.bf16.msra.mxu1 %v14355_v7  ;;  %v14361_v7 = vld [vmem:[#allocation51_spill] sm:$0xff] }
 0x60d   :  { %5139 = vmatprep.subr.bf16.mxu1 %v14356_v38  ;;  %v10754_v38 = vld [vmem:[#allocation2 + $0xc20] ss:$36 sps:$4 sm:$0xff]  }
 0x60f   :  { %4774 = vmatpush1.bf16.xpose.msra.mxu0 %v10752_v18  ;;  %v14362_v18 = vld [vmem:[#allocation52_spill] sm:$0xff] }
 0x610   :  { %5140 = vmatpush1.bf16.msra.mxu1 %v14357_v41  ;;  %4775 = vmatprep.subr.bf16.mxu0 %v10753_v33  ;;  %v10755_v41 = vld [vmem:[#allocation2 + $0xc6c] ss:$36 sps:$4 sm:$0xff]  }
 0x611   :  { %v4500_v42 = vpop.f32.mrb[20].mxu0  ;;  %5141 = vmatprep.subr.bf16.mxu1 %v14358_v16  ;;  %v14363_v33 = vld [vmem:[#allocation53_spill] sm:$0xff]  ;;  %v14364_v16 = vld [vmem:[#allocation54_spill] sm:$0xff] }
 0x612   :  { %v4502_v50 = vpop.f32.mrb[21].mxu0 }
 0x613   :  { %v5118_v9 = vsub.f32 %v4502_v50, %v14359_v24  ;;  %v4504_v44 = vpop.f32.mrb[22].mxu0  ;;  %v10756_v24 = vld [vmem:[#allocation2 + $0xc68] ss:$36 sps:$4 sm:$0xff]  }
 0x614   :  { %5142 = vmatpush1.bf16.msra.mxu1 %v14360_v32  ;;  %v4505_v0 = vpop.f32.mrb[23].mxu0  ;;  %v14365_v44 = vld [vmem:[#allocation55_spill] sm:$0xff]  ;;  %v14366_v50 = vld [vmem:[#allocation56_spill] sm:$0xff]  ;;  %v14367_v32 = vld [vmem:[#allocation57_spill] sm:$0xff] }
 0x615   :  { %v12566_v59 = vpack.c.bf16 %v5118_v9, %v5118_v9  ;;  %5143 = vmatprep.subr.bf16.mxu1 %v14361_v7  ;;  %v10757_v9 = vld [vmem:[#allocation2 + $0xcb4] ss:$36 sps:$4 sm:$0xff]   ;;  %v14369_v7 = vld [vmem:[#allocation59_spill] sm:$0xff] }
 0x616   :  { %v14368_v0 = vld [vmem:[#allocation58_spill] sm:$0xff] }
 0x617   :  { %4776 = vmatpush1.bf16.xpose.msra.mxu0 %v10754_v38  ;;  %5163 = vmatprep.mubr.bf16.mxu1 %v12566_v59  ;;  %v10758_v38 = vld [vmem:[#allocation2 + $0xcb0] ss:$36 sps:$4 sm:$0xff]  }
 0x618   :  { %5144 = vmatpush1.bf16.msra.mxu1 %v14362_v18  ;;  %4777 = vmatprep.subr.bf16.mxu0 %v10755_v41  ;;  %v14370_v18 = vld [vmem:[#allocation60_spill] sm:$0xff]  ;;  %v10759_v41 = vld [vmem:[#allocation2 + $0xcfc] ss:$36 sps:$4 sm:$0xff]  }
 0x619   :  { %5145 = vmatprep.subr.bf16.mxu1 %v14363_v33  ;;  %v14371_v33 = vld [vmem:[#allocation61_spill] sm:$0xff] }
 0x61c   :  { %5146 = vmatpush1.bf16.msra.mxu1 %v14364_v16  ;;  %v14372_v16 = vld [vmem:[#allocation62_spill] sm:$0xff] }
 0x61d   :  { %5147 = vmatprep.subr.bf16.mxu1 %v14365_v44  ;;  %v14373_v44 = vld [vmem:[#allocation63_spill] sm:$0xff] }
 0x61f   :  { %4778 = vmatpush1.bf16.xpose.msra.mxu0 %v10756_v24  ;;  %v10760_v24 = vld [vmem:[#allocation2 + $0xcf8] ss:$36 sps:$4 sm:$0xff]  }
 0x620   :  { %5148 = vmatpush1.bf16.msra.mxu1 %v14366_v50  ;;  %4779 = vmatprep.subr.bf16.mxu0 %v10757_v9  ;;  %v14374_v50 = vld [vmem:[#allocation64_spill] sm:$0xff] }
 0x621   :  { %5149 = vmatprep.subr.bf16.mxu1 %v14367_v32  ;;  %v10761_v9 = vld [vmem:[#allocation2 + $0xd44] ss:$36 sps:$4 sm:$0xff]   ;;  %v14375_v32 = vld [vmem:[#allocation65_spill] sm:$0xff] }
 0x624   :  { %5150 = vmatpush1.bf16.msra.mxu1 %v14368_v0  ;;  %v14376_v0 = vld [vmem:[#allocation66_spill] sm:$0xff] }
 0x625   :  { %5151 = vmatprep.subr.bf16.mxu1 %v14369_v7  ;;  %v14377_v7 = vld [vmem:[#allocation67_spill] sm:$0xff] }
 0x627   :  { %4780 = vmatpush1.bf16.xpose.msra.mxu0 %v10758_v38  ;;  %v10762_v38 = vld [vmem:[#allocation2 + $0xd40] ss:$36 sps:$4 sm:$0xff]  }
 0x628   :  { %5152 = vmatpush1.bf16.msra.mxu1 %v14370_v18  ;;  %4781 = vmatprep.subr.bf16.mxu0 %v10759_v41  ;;  %v14378_v18 = vld [vmem:[#allocation69_spill] sm:$0xff] }
 0x629   :  { %5153 = vmatprep.subr.bf16.mxu1 %v14371_v33  ;;  %v12587_v41 = vld [vmem:[#allocation2 + $0x914] ss:$36 sps:$4 sm:$0xff]   ;;  %v14379_v33 = vld [vmem:[#allocation27_spill] sm:$0xff] }
 0x62c   :  { %5154 = vmatpush1.bf16.msra.mxu1 %v14372_v16  ;;  %v5117_v16 = vsub.f32 %v4500_v42, %v14379_v33  ;;  %v10766_v42 = vld [vmem:[#allocation2 + $0x480] ss:$36 sps:$4 sm:$0xff]   ;;  %v10770_v33 = vld [vmem:[#allocation2 + $0x514] ss:$36 sps:$4 sm:$0xff]  }
 0x62d   :  { %5155 = vmatprep.subr.bf16.mxu1 %v14373_v44  ;;  %v14380_v44 = vld [vmem:[#allocation71_spill] sm:$0xff] }
 0x62f   :  { %4782 = vmatpush1.bf16.xpose.msra.mxu0 %v10760_v24  ;;  %v14381_v24 = vld [vmem:[#allocation30_spill] sm:$0xff] }
 0x630   :  { %5156 = vmatpush1.bf16.msra.mxu1 %v14374_v50  ;;  %4783 = vmatprep.subr.bf16.mxu0 %v10761_v9  ;;  %v5120_v50 = vsub.f32 %v12486_v21, %v14381_v24  ;;  %v14382_v9 = vld [vmem:[#allocation72_spill] sm:$0xff]  ;;  %v10774_v24 = vld [vmem:[#allocation2 + $0x55c] ss:$36 sps:$4 sm:$0xff]  }
 0x631   :  { %5157 = vmatprep.subr.bf16.mxu1 %v14375_v32  ;;  %v12595_v32 = vpack.c.bf16 %v5117_v16, %v5117_v16  ;;  %v10767_v21 = vld [vmem:[#allocation2 + $0x4cc] ss:$36 sps:$4 sm:$0xff]   ;;  %v12609_v16 = vld [vmem:[#allocation2 + $0x958] ss:$36 sps:$4 sm:$0xff]  }
 0x634   :  { %5158 = vmatpush1.bf16.msra.mxu1 %v14376_v0  ;;  %v10764_v0 = vld [vmem:[#allocation2 + $0x484] ss:$36 sps:$4 sm:$0xff]  }
 0x635   :  { %5159 = vmatprep.subr.bf16.mxu1 %v14377_v7  ;;  %v12598_v7 = vpack.c.bf16 %v5120_v50, %v5120_v50  ;;  %v10775_v50 = vld [vmem:[#allocation2 + $0x558] ss:$36 sps:$4 sm:$0xff]  }
 0x637   :  { %4784 = vmatpush1.bf16.xpose.msra.mxu0 %v10762_v38  ;;  %v12601_v38 = vld [vmem:[#allocation2 + $0x910] ss:$36 sps:$4 sm:$0xff]  }
 0x638   :  { %5160 = vmatpush1.bf16.msra.mxu1 %v14378_v18  ;;  %4794 = vmatprep.subr.bf16.mxu0 %v12587_v41  ;;  %v12606_v18 = vld [vmem:[#allocation2 + $0x95c] ss:$36 sps:$4 sm:$0xff]  }
 0x639   :  { %5161 = vmatprep.subr.bf16.mxu1 %v14380_v44  ;;  %v10772_v44 = vld [vmem:[#allocation2 + $0x510] ss:$36 sps:$4 sm:$0xff]  }
 0x63c   :  { %5162 = vmatpush1.bf16.msra.mxu1 %v14382_v9  ;;  %v10776_v9 = vld [vmem:[#allocation2 + $0x5a4] ss:$36 sps:$4 sm:$0xff]  }
 0x63d   :  { %5172 = vmatprep.subr.bf16.mxu1 %v10764_v0  ;;  %v12615_v0 = vld [vmem:[#allocation2 + $0x9a0] ss:$36 sps:$4 sm:$0xff]  }
 0x63e   :  { %4786 = vmatmul.mubr.bf16.vlgmr.msra.gmra.mrb[24].mxu0 %v12108_v56  ;;  %v10769_v56 = vld [vmem:[#allocation2 + $0x4c8] ss:$36 sps:$4 sm:$0xff]   ;;  %14383 = vst [vmem:[#allocation45_spill] sm:$0xff] %v12615_v0 }
 0x63f   :  { %5164 = vmatmul.mubr.bf16.vlgmr.msra.gmra.mrb[24].mxu1 %v12595_v32  ;;  %4795 = vmatpush1.bf16.xpose.msra.mxu0 %v12601_v38 }
 0x640   :  { %4826 = vmatprep.mubr.bf16.mxu0 %v12128_v31  ;;  %5173 = vmatpush1.bf16.msra.mxu1 %v10766_v42  ;;  %v12612_v31 = vld [vmem:[#allocation2 + $0x9a4] ss:$36 sps:$4 sm:$0xff]  }
 0x641   :  { %5204 = vmatprep.mubr.bf16.mxu1 %v12598_v7  ;;  %5174 = vmatprep.subr.bf16.mxu1 %v10767_v21  ;;  %v10778_v42 = vld [vmem:[#allocation2 + $0x5a0] ss:$36 sps:$4 sm:$0xff]   ;;  %v12618_v21 = vld [vmem:[#allocation2 + $0x9ec] ss:$36 sps:$4 sm:$0xff]  }
 0x642   :  { %4796 = vmatprep.subr.bf16.mxu0 %v12606_v18  ;;  %14384 = vst [vmem:[#allocation46_spill] sm:$0xff] %v12618_v21 }
 0x644   :  { %5175 = vmatpush1.bf16.msra.mxu1 %v10769_v56  ;;  %v10780_v56 = vld [vmem:[#allocation2 + $0x5ec] ss:$36 sps:$4 sm:$0xff]  }
 0x645   :  { %5176 = vmatprep.subr.bf16.mxu1 %v10770_v33  ;;  %v10781_v33 = vld [vmem:[#allocation2 + $0x5e8] ss:$36 sps:$4 sm:$0xff]  }
 0x647   :  { %4797 = vmatpush1.bf16.xpose.msra.mxu0 %v12609_v16 }
 0x648   :  { %5177 = vmatpush1.bf16.msra.mxu1 %v10772_v44  ;;  %4798 = vmatprep.subr.bf16.mxu0 %v12612_v31  ;;  %v10782_v44 = vld [vmem:[#allocation2 + $0x634] ss:$36 sps:$4 sm:$0xff]  }
 0x649   :  { %5178 = vmatprep.subr.bf16.mxu1 %v10774_v24  ;;  %v12621_v24 = vld [vmem:[#allocation2 + $0x9e8] ss:$36 sps:$4 sm:$0xff]  }
 0x64a   :  { %14385 = vst [vmem:[#allocation47_spill] sm:$0xff] %v12621_v24 }
 0x64c   :  { %5179 = vmatpush1.bf16.msra.mxu1 %v10775_v50  ;;  %v10784_v50 = vld [vmem:[#allocation2 + $0x630] ss:$36 sps:$4 sm:$0xff]  }
 0x64d   :  { %5180 = vmatprep.subr.bf16.mxu1 %v10776_v9  ;;  %v12624_v9 = vld [vmem:[#allocation2 + $0xa34] ss:$36 sps:$4 sm:$0xff]  }
 0x64e   :  { %14386 = vst [vmem:[#allocation48_spill] sm:$0xff] %v12624_v9 }
 0x64f   :  { %4799 = vmatpush1.bf16.xpose.msra.mxu0 %v12615_v0  ;;  %v10787_v0 = vld [vmem:[#allocation2 + $0x678] ss:$36 sps:$4 sm:$0xff]  }
 0x650   :  { %5181 = vmatpush1.bf16.msra.mxu1 %v10778_v42  ;;  %4800 = vmatprep.subr.bf16.mxu0 %v12618_v21  ;;  %v10786_v42 = vld [vmem:[#allocation2 + $0x67c] ss:$36 sps:$4 sm:$0xff]   ;;  %v10788_v21 = vld [vmem:[#allocation2 + $0x6c4] ss:$36 sps:$4 sm:$0xff]  }
 0x651   :  { %5182 = vmatprep.subr.bf16.mxu1 %v10780_v56  ;;  %v12627_v56 = vld [vmem:[#allocation2 + $0xa30] ss:$36 sps:$4 sm:$0xff]  }
 0x652   :  { %14387 = vst [vmem:[#allocation49_spill] sm:$0xff] %v12627_v56 }
 0x654   :  { %5183 = vmatpush1.bf16.msra.mxu1 %v10781_v33  ;;  %v10790_v33 = vld [vmem:[#allocation2 + $0x6c0] ss:$36 sps:$4 sm:$0xff]  }
 0x655   :  { %5184 = vmatprep.subr.bf16.mxu1 %v10782_v44  ;;  %v12630_v44 = vld [vmem:[#allocation2 + $0xa7c] ss:$36 sps:$4 sm:$0xff]  }
 0x656   :  { %14388 = vst [vmem:[#allocation28_spill] sm:$0xff] %v12630_v44 }
 0x657   :  { %4801 = vmatpush1.bf16.xpose.msra.mxu0 %v12621_v24  ;;  %v10793_v24 = vld [vmem:[#allocation2 + $0x708] ss:$36 sps:$4 sm:$0xff]  }
 0x658   :  { %5185 = vmatpush1.bf16.msra.mxu1 %v10784_v50  ;;  %4802 = vmatprep.subr.bf16.mxu0 %v12624_v9  ;;  %v10792_v50 = vld [vmem:[#allocation2 + $0x70c] ss:$36 sps:$4 sm:$0xff]   ;;  %v10794_v9 = vld [vmem:[#allocation2 + $0x754] ss:$36 sps:$4 sm:$0xff]  }
 0x659   :  { %5186 = vmatprep.subr.bf16.mxu1 %v10786_v42  ;;  %v12633_v42 = vld [vmem:[#allocation2 + $0xa78] ss:$36 sps:$4 sm:$0xff]  }
 0x65a   :  { %14389 = vst [vmem:[#allocation50_spill] sm:$0xff] %v12633_v42 }
 0x65c   :  { %5187 = vmatpush1.bf16.msra.mxu1 %v10787_v0  ;;  %v10796_v0 = vld [vmem:[#allocation2 + $0x750] ss:$36 sps:$4 sm:$0xff]  }
 0x65d   :  { %5188 = vmatprep.subr.bf16.mxu1 %v10788_v21  ;;  %v12636_v21 = vld [vmem:[#allocation2 + $0xac4] ss:$36 sps:$4 sm:$0xff]  }
 0x65e   :  { %14390 = vst [vmem:[#allocation51_spill] sm:$0xff] %v12636_v21 }
 0x65f   :  { %4803 = vmatpush1.bf16.xpose.msra.mxu0 %v12627_v56  ;;  %v10799_v56 = vld [vmem:[#allocation2 + $0x798] ss:$36 sps:$4 sm:$0xff]  }
 0x660   :  { %5189 = vmatpush1.bf16.msra.mxu1 %v10790_v33  ;;  %4804 = vmatprep.subr.bf16.mxu0 %v12630_v44  ;;  %v10798_v33 = vld [vmem:[#allocation2 + $0x79c] ss:$36 sps:$4 sm:$0xff]   ;;  %v10800_v44 = vld [vmem:[#allocation2 + $0x7e4] ss:$36 sps:$4 sm:$0xff]  }
 0x661   :  { %5190 = vmatprep.subr.bf16.mxu1 %v10792_v50  ;;  %v12639_v50 = vld [vmem:[#allocation2 + $0xac0] ss:$36 sps:$4 sm:$0xff]  }
 0x662   :  { %14391 = vst [vmem:[#allocation52_spill] sm:$0xff] %v12639_v50 }
 0x664   :  { %5191 = vmatpush1.bf16.msra.mxu1 %v10793_v24  ;;  %v10802_v24 = vld [vmem:[#allocation2 + $0x7e0] ss:$36 sps:$4 sm:$0xff]  }
 0x665   :  { %5192 = vmatprep.subr.bf16.mxu1 %v10794_v9  ;;  %v12642_v9 = vld [vmem:[#allocation2 + $0xb0c] ss:$36 sps:$4 sm:$0xff]  }
 0x666   :  { %14392 = vst [vmem:[#allocation53_spill] sm:$0xff] %v12642_v9 }
 0x667   :  { %4805 = vmatpush1.bf16.xpose.msra.mxu0 %v12633_v42  ;;  %v10805_v42 = vld [vmem:[#allocation2 + $0x828] ss:$36 sps:$4 sm:$0xff]  }
 0x668   :  { %5193 = vmatpush1.bf16.msra.mxu1 %v10796_v0  ;;  %4806 = vmatprep.subr.bf16.mxu0 %v12636_v21  ;;  %v10804_v0 = vld [vmem:[#allocation2 + $0x82c] ss:$36 sps:$4 sm:$0xff]   ;;  %v10806_v21 = vld [vmem:[#allocation2 + $0x874] ss:$36 sps:$4 sm:$0xff]  }
 0x669   :  { %5194 = vmatprep.subr.bf16.mxu1 %v10798_v33  ;;  %v12645_v33 = vld [vmem:[#allocation2 + $0xb08] ss:$36 sps:$4 sm:$0xff]  }
 0x66c   :  { %5195 = vmatpush1.bf16.msra.mxu1 %v10799_v56  ;;  %v10808_v56 = vld [vmem:[#allocation2 + $0x870] ss:$36 sps:$4 sm:$0xff]  }
 0x66d   :  { %5196 = vmatprep.subr.bf16.mxu1 %v10800_v44  ;;  %v12648_v44 = vld [vmem:[#allocation2 + $0xb54] ss:$36 sps:$4 sm:$0xff]  }
 0x66f   :  { %4807 = vmatpush1.bf16.xpose.msra.mxu0 %v12639_v50 }
 0x670   :  { %5197 = vmatpush1.bf16.msra.mxu1 %v10802_v24  ;;  %4808 = vmatprep.subr.bf16.mxu0 %v12642_v9  ;;  %v14393_v24 = vld [vmem:[#allocation29_spill] sm:$0xff]  ;;  %v10810_v9 = vld [vmem:[#allocation2 + $0x8bc] ss:$36 sps:$4 sm:$0xff]  }
 0x671   :  { %5198 = vmatprep.subr.bf16.mxu1 %v10804_v0  ;;  %v5119_v50 = vsub.f32 %v12484_v20, %v14393_v24  ;;  %v10811_v0 = vld [vmem:[#allocation2 + $0x8b8] ss:$36 sps:$4 sm:$0xff]   ;;  %v10848_v24 = vld [vmem:[#allocation2 + $0xbe8] ss:$36 sps:$4 sm:$0xff]  }
 0x672   :  { %v12667_v20 = vld [vmem:[#allocation2 + $0xb98] ss:$36 sps:$4 sm:$0xff]  }
 0x674   :  { %5199 = vmatpush1.bf16.msra.mxu1 %v10805_v42  ;;  %v12653_v42 = vpack.c.bf16 %v5119_v50, %v5119_v50  ;;  %v10846_v50 = vld [vmem:[#allocation2 + $0xba0] ss:$36 sps:$4 sm:$0xff]  }
 0x675   :  { %5200 = vmatprep.subr.bf16.mxu1 %v10806_v21  ;;  %v12657_v21 = vld [vmem:[#allocation2 + $0xb50] ss:$36 sps:$4 sm:$0xff]  }
 0x677   :  { %4809 = vmatpush1.bf16.xpose.msra.mxu0 %v12645_v33 }
 0x678   :  { %5201 = vmatpush1.bf16.msra.mxu1 %v10808_v56  ;;  %4810 = vmatprep.subr.bf16.mxu0 %v12648_v44  ;;  %v12660_v56 = vld [vmem:[#allocation2 + $0xb9c] ss:$36 sps:$4 sm:$0xff]  }
 0x679   :  { %5202 = vmatprep.subr.bf16.mxu1 %v10810_v9  ;;  %v10847_v9 = vld [vmem:[#allocation2 + $0xbec] ss:$36 sps:$4 sm:$0xff]  }
 0x67c   :  { %5203 = vmatpush1.bf16.msra.mxu1 %v10811_v0  ;;  %v10849_v0 = vld [vmem:[#allocation2 + $0xc34] ss:$36 sps:$4 sm:$0xff]  }
 0x67d   :  { %5213 = vmatprep.subr.bf16.mxu1 %v12361_v17  ;;  %v12670_v17 = vld [vmem:[#allocation2 + $0xbe4] ss:$36 sps:$4 sm:$0xff]  }
 0x67f   :  { %5205 = vmatmul.mubr.bf16.vlgmr.msra.gmra.mrb[24].mxu1 %v12653_v42  ;;  %4811 = vmatpush1.bf16.xpose.msra.mxu0 %v12657_v21 }
 0x680   :  { %4812 = vmatprep.subr.bf16.mxu0 %v12660_v56  ;;  %5214 = vmatpush1.bf16.msra.mxu1 %v12369_v34  ;;  %v12677_v34 = vld [vmem:[#allocation2 + $0xbe0] ss:$36 sps:$4 sm:$0xff]  }
 0x681   :  { %5215 = vmatprep.subr.bf16.mxu1 %v12377_v39  ;;  %v12680_v39 = vld [vmem:[#allocation2 + $0xc2c] ss:$36 sps:$4 sm:$0xff]  }
 0x684   :  { %5216 = vmatpush1.bf16.msra.mxu1 %v12383_v54  ;;  %v12687_v54 = vld [vmem:[#allocation2 + $0xc28] ss:$36 sps:$4 sm:$0xff]  }
 0x685   :  { %5217 = vmatprep.subr.bf16.mxu1 %v12389_v48  ;;  %v12690_v48 = vld [vmem:[#allocation2 + $0xc74] ss:$36 sps:$4 sm:$0xff]  }
 0x687   :  { %4813 = vmatpush1.bf16.xpose.msra.mxu0 %v12667_v20 }
 0x688   :  { %4814 = vmatprep.subr.bf16.mxu0 %v12670_v17  ;;  %5218 = vmatpush1.bf16.msra.mxu1 %v12395_v53  ;;  %v12697_v53 = vld [vmem:[#allocation2 + $0xc70] ss:$36 sps:$4 sm:$0xff]  }
 0x689   :  { %5219 = vmatprep.subr.bf16.mxu1 %v12401_v47  ;;  %v12707_v47 = vld [vmem:[#allocation2 + $0xcb8] ss:$36 sps:$4 sm:$0xff]  }
 0x68c   :  { %5220 = vmatpush1.bf16.msra.mxu1 %v12407_v55  ;;  %v10835_v55 = vld [vmem:[#allocation2 + $0xa3c] ss:$36 sps:$4 sm:$0xff]  }
 0x68d   :  { %5221 = vmatprep.subr.bf16.mxu1 %v12413_v61  ;;  %v10838_v61 = vld [vmem:[#allocation2 + $0xa80] ss:$36 sps:$4 sm:$0xff]  }
 0x68f   :  { %4815 = vmatpush1.bf16.xpose.msra.mxu0 %v12677_v34 }
 0x690   :  { %4816 = vmatprep.subr.bf16.mxu0 %v12680_v39  ;;  %5222 = vmatpush1.bf16.msra.mxu1 %v12419_v11  ;;  %v10840_v11 = vld [vmem:[#allocation2 + $0xac8] ss:$36 sps:$4 sm:$0xff]  }
 0x691   :  { %5223 = vmatprep.subr.bf16.mxu1 %v12425_v62  ;;  %v10842_v62 = vld [vmem:[#allocation2 + $0xb10] ss:$36 sps:$4 sm:$0xff]  }
 0x694   :  { %5224 = vmatpush1.bf16.msra.mxu1 %v12431_v25  ;;  %v10843_v25 = vld [vmem:[#allocation2 + $0xb5c] ss:$36 sps:$4 sm:$0xff]  }
 0x695   :  { %5225 = vmatprep.subr.bf16.mxu1 %v12437_v1  ;;  %v12700_v1 = vld [vmem:[#allocation2 + $0xcbc] ss:$36 sps:$4 sm:$0xff]  }
 0x697   :  { %4817 = vmatpush1.bf16.xpose.msra.mxu0 %v12687_v54 }
 0x698   :  { %4818 = vmatprep.subr.bf16.mxu0 %v12690_v48  ;;  %5226 = vmatpush1.bf16.msra.mxu1 %v12443_v13  ;;  %v10841_v13 = vld [vmem:[#allocation2 + $0xb14] ss:$36 sps:$4 sm:$0xff]  }
 0x699   :  { %5227 = vmatprep.subr.bf16.mxu1 %v12449_v2  ;;  %v10839_v2 = vld [vmem:[#allocation2 + $0xacc] ss:$36 sps:$4 sm:$0xff]  }
 0x69c   :  { %5228 = vmatpush1.bf16.msra.mxu1 %v12455_v58  ;;  %v10837_v58 = vld [vmem:[#allocation2 + $0xa84] ss:$36 sps:$4 sm:$0xff]  }
 0x69d   :  { %5229 = vmatprep.subr.bf16.mxu1 %v12461_v51  ;;  %v12710_v51 = vld [vmem:[#allocation2 + $0xd04] ss:$36 sps:$4 sm:$0xff]  }
 0x69f   :  { %4819 = vmatpush1.bf16.xpose.msra.mxu0 %v12697_v53 }
 0x6a0   :  { %4820 = vmatprep.subr.bf16.mxu0 %v12700_v1  ;;  %5230 = vmatpush1.bf16.msra.mxu1 %v12465_v49 }
 0x6a1   :  { %5231 = vmatprep.subr.bf16.mxu1 %v12469_v43  ;;  %v12717_v43 = vld [vmem:[#allocation2 + $0xd00] ss:$36 sps:$4 sm:$0xff]  }
 0x6a4   :  { %5232 = vmatpush1.bf16.msra.mxu1 %v12472_v30  ;;  %v10832_v30 = vld [vmem:[#allocation2 + $0x9a8] ss:$36 sps:$4 sm:$0xff]  }
 0x6a5   :  { %5233 = vmatprep.subr.bf16.mxu1 %v12475_v45  ;;  %v12720_v45 = vld [vmem:[#allocation2 + $0xd4c] ss:$36 sps:$4 sm:$0xff]  }
 0x6a7   :  { %4821 = vmatpush1.bf16.xpose.msra.mxu0 %v12707_v47 }
 0x6a8   :  { %4822 = vmatprep.subr.bf16.mxu0 %v12710_v51  ;;  %5234 = vmatpush1.bf16.msra.mxu1 %v12478_v5  ;;  %v10844_v5 = vld [vmem:[#allocation2 + $0xb58] ss:$36 sps:$4 sm:$0xff]  }
 0x6a9   :  { %5235 = vmatprep.subr.bf16.mxu1 %v12481_v36  ;;  %v12727_v36 = vld [vmem:[#allocation2 + $0xd48] ss:$36 sps:$4 sm:$0xff]  }
 0x6ac   :  { %5236 = vmatpush1.bf16.msra.mxu1 %v12488_v23  ;;  %v10831_v23 = vld [vmem:[#allocation2 + $0x9ac] ss:$36 sps:$4 sm:$0xff]  }
 0x6ad   :  { %5237 = vmatprep.subr.bf16.mxu1 %v12491_v3  ;;  %v10827_v3 = vld [vmem:[#allocation2 + $0x91c] ss:$36 sps:$4 sm:$0xff]  }
 0x6af   :  { %4823 = vmatpush1.bf16.xpose.msra.mxu0 %v12717_v43 }
 0x6b0   :  { %4824 = vmatprep.subr.bf16.mxu0 %v12720_v45  ;;  %5238 = vmatpush1.bf16.msra.mxu1 %v12494_v63  ;;  %v10828_v63 = vld [vmem:[#allocation2 + $0x918] ss:$36 sps:$4 sm:$0xff]  }
 0x6b1   :  { %5239 = vmatprep.subr.bf16.mxu1 %v12497_v29  ;;  %v10845_v29 = vld [vmem:[#allocation2 + $0xba4] ss:$36 sps:$4 sm:$0xff]  }
 0x6b4   :  { %5240 = vmatpush1.bf16.msra.mxu1 %v12500_v14  ;;  %v10830_v14 = vld [vmem:[#allocation2 + $0x960] ss:$36 sps:$4 sm:$0xff]  }
 0x6b5   :  { %5241 = vmatprep.subr.bf16.mxu1 %v12503_v37  ;;  %v10829_v37 = vld [vmem:[#allocation2 + $0x964] ss:$36 sps:$4 sm:$0xff]  }
 0x6b7   :  { %4825 = vmatpush1.bf16.xpose.msra.mxu0 %v12727_v36 }
 0x6b8   :  { %4835 = vmatprep.subr.bf16.mxu0 %v10827_v3  ;;  %5242 = vmatpush1.bf16.msra.mxu1 %v12506_v12  ;;  %v10833_v12 = vld [vmem:[#allocation2 + $0x9f4] ss:$36 sps:$4 sm:$0xff]  }
 0x6b9   :  { %5243 = vmatprep.subr.bf16.mxu1 %v12509_v6  ;;  %v10850_v3 = vld [vmem:[#allocation2 + $0xc30] ss:$36 sps:$4 sm:$0xff]  }
 0x6bc   :  { %5244 = vmatpush1.bf16.msra.mxu1 %v12512_v52 }
 0x6bd   :  { %5254 = vmatprep.subr.bf16.mxu1 %v12297_v15 }
 0x6be   :  { %4827 = vmatmul.mubr.bf16.vlgmr.msra.gmra.mrb[24].mxu0 %v12176_v57  ;;  %v10834_v57 = vld [vmem:[#allocation2 + $0x9f0] ss:$36 sps:$4 sm:$0xff]  }
 0x6bf   :  { %4836 = vmatpush1.bf16.xpose.msra.mxu0 %v10828_v63  ;;  %4867 = vmatprep.mubr.bf16.mxu0 %v12180_v27  ;;  %v10836_v27 = vld [vmem:[#allocation2 + $0xa38] ss:$36 sps:$4 sm:$0xff]  }
 0x6c0   :  { %4837 = vmatprep.subr.bf16.mxu0 %v10829_v37  ;;  %v10851_v63 = vld [vmem:[#allocation2 + $0xc7c] ss:$36 sps:$4 sm:$0xff]  }
 0x6c1   :  { %v10852_v37 = vld [vmem:[#allocation2 + $0xc78] ss:$36 sps:$4 sm:$0xff]  }
 0x6c7   :  { %4838 = vmatpush1.bf16.xpose.msra.mxu0 %v10830_v14  ;;  %v10853_v14 = vld [vmem:[#allocation2 + $0xcc4] ss:$36 sps:$4 sm:$0xff]  }
 0x6c8   :  { %4839 = vmatprep.subr.bf16.mxu0 %v10831_v23  ;;  %v10854_v23 = vld [vmem:[#allocation2 + $0xcc0] ss:$36 sps:$4 sm:$0xff]  }
 0x6cf   :  { %4840 = vmatpush1.bf16.xpose.msra.mxu0 %v10832_v30  ;;  %v10855_v30 = vld [vmem:[#allocation2 + $0xd0c] ss:$36 sps:$4 sm:$0xff]  }
 0x6d0   :  { %4841 = vmatprep.subr.bf16.mxu0 %v10833_v12  ;;  %v10856_v12 = vld [vmem:[#allocation2 + $0xd08] ss:$36 sps:$4 sm:$0xff]  }
 0x6d2   :  { %v12736_v6 = vpop.f32.mrb[20].mxu1 }
 0x6d3   :  { %v9059_v52 = vpop.f32.mrb[21].mxu1 }
 0x6d4   :  { %v5114_v15 = vpop.f32.mrb[22].mxu1  ;;  %v10857_v52 = vld [vmem:[#allocation2 + $0xd54] ss:$36 sps:$4 sm:$0xff]  }
 0x6d5   :  { %v9060_v49 = vpop.f32.mrb[23].mxu1  ;;  %v10858_v15 = vld [vmem:[#allocation2 + $0xd50] ss:$36 sps:$4 sm:$0xff]  }
 0x6d6   :  { %v12738_v49 = vld [vmem:[#allocation2 + $0xb60] ss:$36 sps:$4 sm:$0xff]  }
 0x6d7   :  { %4842 = vmatpush1.bf16.xpose.msra.mxu0 %v10834_v57  ;;  %v12742_v57 = vld [vmem:[#allocation2 + $0x920] ss:$36 sps:$4 sm:$0xff]  }
 0x6d8   :  { %4843 = vmatprep.subr.bf16.mxu0 %v10835_v55  ;;  %v12746_v55 = vld [vmem:[#allocation2 + $0xba8] ss:$36 sps:$4 sm:$0xff]  }
 0x6df   :  { %4844 = vmatpush1.bf16.xpose.msra.mxu0 %v10836_v27  ;;  %v12749_v27 = vld [vmem:[#allocation2 + $0x968] ss:$36 sps:$4 sm:$0xff]  }
 0x6e0   :  { %4845 = vmatprep.subr.bf16.mxu0 %v10837_v58  ;;  %v12752_v58 = vld [vmem:[#allocation2 + $0xbf0] ss:$36 sps:$4 sm:$0xff]  }
 0x6e7   :  { %4846 = vmatpush1.bf16.xpose.msra.mxu0 %v10838_v61  ;;  %v12755_v61 = vld [vmem:[#allocation2 + $0x9b0] ss:$36 sps:$4 sm:$0xff]  }
 0x6e8   :  { %4847 = vmatprep.subr.bf16.mxu0 %v10839_v2  ;;  %v12761_v2 = vld [vmem:[#allocation2 + $0x9f8] ss:$36 sps:$4 sm:$0xff]  }
 0x6ef   :  { %4848 = vmatpush1.bf16.xpose.msra.mxu0 %v10840_v11  ;;  %v12764_v11 = vld [vmem:[#allocation2 + $0xc80] ss:$36 sps:$4 sm:$0xff]  }
 0x6f0   :  { %4849 = vmatprep.subr.bf16.mxu0 %v10841_v13  ;;  %v12767_v13 = vld [vmem:[#allocation2 + $0xa40] ss:$36 sps:$4 sm:$0xff]  }
 0x6f7   :  { %4850 = vmatpush1.bf16.xpose.msra.mxu0 %v10842_v62  ;;  %v12770_v62 = vld [vmem:[#allocation2 + $0xcc8] ss:$36 sps:$4 sm:$0xff]  }
 0x6f8   :  { %4851 = vmatprep.subr.bf16.mxu0 %v10843_v25  ;;  %v12773_v25 = vld [vmem:[#allocation2 + $0xa88] ss:$36 sps:$4 sm:$0xff]  }
 0x6ff   :  { %4852 = vmatpush1.bf16.xpose.msra.mxu0 %v10844_v5  ;;  %v12776_v5 = vld [vmem:[#allocation2 + $0xd10] ss:$36 sps:$4 sm:$0xff]  }
 0x700   :  { %4853 = vmatprep.subr.bf16.mxu0 %v10845_v29  ;;  %v12779_v29 = vld [vmem:[#allocation2 + $0xad0] ss:$36 sps:$4 sm:$0xff]  }
 0x707   :  { %4854 = vmatpush1.bf16.xpose.msra.mxu0 %v10846_v50  ;;  %v12782_v50 = vld [vmem:[#allocation2 + $0xd58] ss:$36 sps:$4 sm:$0xff]  }
 0x708   :  { %4855 = vmatprep.subr.bf16.mxu0 %v10847_v9  ;;  %v12785_v9 = vld [vmem:[#allocation2 + $0xb18] ss:$36 sps:$4 sm:$0xff]  }
 0x70f   :  { %4856 = vmatpush1.bf16.xpose.msra.mxu0 %v10848_v24  ;;  %v10875_v24 = vld [vmem:[#allocation2 + $0x14] ss:$36 sps:$4 sm:$0xff]  }
 0x710   :  { %4857 = vmatprep.subr.bf16.mxu0 %v10849_v0  ;;  %v10876_v0 = vld [vmem:[#allocation2 + $0x10] ss:$36 sps:$4 sm:$0xff]  }
 0x717   :  { %4858 = vmatpush1.bf16.xpose.msra.mxu0 %v10850_v3  ;;  %v10877_v3 = vld [vmem:[#allocation2 + $0x5c] ss:$36 sps:$4 sm:$0xff]  }
 0x718   :  { %4859 = vmatprep.subr.bf16.mxu0 %v10851_v63  ;;  %v10878_v63 = vld [vmem:[#allocation2 + $0x58] ss:$36 sps:$4 sm:$0xff]  }
 0x71f   :  { %4860 = vmatpush1.bf16.xpose.msra.mxu0 %v10852_v37  ;;  %v14395_v37 = vld [vmem:[#allocation84_spill] sm:$0xff] }
 0x720   :  { %4861 = vmatprep.subr.bf16.mxu0 %v10853_v14  ;;  %v14405_v14 = vld [vmem:[#allocation94_spill] sm:$0xff] }
 0x727   :  { %4862 = vmatpush1.bf16.xpose.msra.mxu0 %v10854_v23  ;;  %v14406_v23 = vld [vmem:[#allocation95_spill] sm:$0xff] }
 0x728   :  { %4863 = vmatprep.subr.bf16.mxu0 %v10855_v30  ;;  %v14407_v30 = vld [vmem:[#allocation96_spill] sm:$0xff] }
 0x72f   :  { %4864 = vmatpush1.bf16.xpose.msra.mxu0 %v10856_v12  ;;  %v14408_v12 = vld [vmem:[#allocation97_spill] sm:$0xff] }
 0x730   :  { %4865 = vmatprep.subr.bf16.mxu0 %v10857_v52  ;;  %v14409_v52 = vld [vmem:[#allocation98_spill] sm:$0xff] }
 0x737   :  { %4866 = vmatpush1.bf16.xpose.msra.mxu0 %v10858_v15  ;;  %v14410_v15 = vld [vmem:[#allocation100_spill] sm:$0xff] }
 0x738   :  { %8810 = vmatprep.subr.bf16.mxu0 %v12738_v49 }
 0x73e   :  { %4868 = vmatmul.mubr.bf16.vlgmr.msra.gmra.mrb[24].mxu0 %v12287_v4  ;;  %v12758_v4 = vld [vmem:[#allocation2 + $0xc38] ss:$36 sps:$4 sm:$0xff]  }
 0x73f   :  { %8811 = vmatpush3.bf16.xpose.msra.mxu0 %v12742_v57  ;;  %8826 = vmatprep.mubr.bf16.mxu0 %v12292_v60 }
 0x740   :  { %8812 = vmatprep.subr.bf16.mxu0 %v12746_v55 }
 0x747   :  { %8813 = vmatpush3.bf16.xpose.msra.mxu0 %v12749_v27 }
 0x748   :  { %8814 = vmatprep.subr.bf16.mxu0 %v12752_v58 }
 0x74f   :  { %8815 = vmatpush3.bf16.xpose.msra.mxu0 %v12755_v61 }
 0x750   :  { %8816 = vmatprep.subr.bf16.mxu0 %v12758_v4 }
 0x757   :  { %8817 = vmatpush3.bf16.xpose.msra.mxu0 %v12761_v2 }
 0x758   :  { %8818 = vmatprep.subr.bf16.mxu0 %v12764_v11 }
 0x75f   :  { %8819 = vmatpush3.bf16.xpose.msra.mxu0 %v12767_v13 }
 0x760   :  { %8820 = vmatprep.subr.bf16.mxu0 %v12770_v62 }
 0x767   :  { %8821 = vmatpush3.bf16.xpose.msra.mxu0 %v12773_v25 }
 0x768   :  { %8822 = vmatprep.subr.bf16.mxu0 %v12776_v5 }
 0x76f   :  { %8823 = vmatpush3.bf16.xpose.msra.mxu0 %v12779_v29 }
 0x770   :  { %8824 = vmatprep.subr.bf16.mxu0 %v12782_v50 }
 0x777   :  { %8825 = vmatpush3.bf16.xpose.msra.mxu0 %v12785_v9 }
 0x778   :  { %5459 = vmatprep.subr.bf16.mxu0 %v10875_v24  ;;  %v14411_v24 = vld [vmem:[#allocation101_spill] sm:$0xff] }
 0x77e   :  { %8827 = vmatmul.mubr.bf16.vlgmr.msra.gmra.mrb[24].mxu0 %v12292_v60  ;;  %v14394_v60 = vld [vmem:[#allocation83_spill] sm:$0xff] }
 0x77f   :  { %5460 = vmatpush1.bf16.msra.mxu0 %v10876_v0  ;;  %5491 = vmatprep.mubr.bf16.mxu0 %v12566_v59  ;;  %v14412_v0 = vld [vmem:[#allocation103_spill] sm:$0xff] }
 0x780   :  { %5461 = vmatprep.subr.bf16.mxu0 %v10877_v3  ;;  %v10879_v3 = vld [vmem:[#allocation2 + $0x494] ss:$36 sps:$4 sm:$0xff]  }
 0x783   :  { %5462 = vmatpush1.bf16.msra.mxu0 %v10878_v63  ;;  %v10880_v63 = vld [vmem:[#allocation2 + $0x490] ss:$36 sps:$4 sm:$0xff]  }
 0x784   :  { %5463 = vmatprep.subr.bf16.mxu0 %v12186_v46  ;;  %v14396_v46 = vld [vmem:[#allocation85_spill] sm:$0xff] }
 0x787   :  { %5464 = vmatpush1.bf16.msra.mxu0 %v12189_v8  ;;  %v14397_v8 = vld [vmem:[#allocation86_spill] sm:$0xff] }
 0x788   :  { %5465 = vmatprep.subr.bf16.mxu0 %v12192_v10  ;;  %v14398_v10 = vld [vmem:[#allocation87_spill] sm:$0xff] }
 0x78b   :  { %5466 = vmatpush1.bf16.msra.mxu0 %v12195_v35  ;;  %v14399_v35 = vld [vmem:[#allocation88_spill] sm:$0xff] }
 0x78c   :  { %5467 = vmatprep.subr.bf16.mxu0 %v12198_v19  ;;  %v14400_v19 = vld [vmem:[#allocation89_spill] sm:$0xff] }
 0x78f   :  { %5468 = vmatpush1.bf16.msra.mxu0 %v12201_v22  ;;  %v14401_v22 = vld [vmem:[#allocation90_spill] sm:$0xff] }
 0x790   :  { %5469 = vmatprep.subr.bf16.mxu0 %v12204_v26  ;;  %v14402_v26 = vld [vmem:[#allocation91_spill] sm:$0xff] }
 0x793   :  { %5470 = vmatpush1.bf16.msra.mxu0 %v12207_v28  ;;  %v14403_v28 = vld [vmem:[#allocation92_spill] sm:$0xff] }
 0x794   :  { %5471 = vmatprep.subr.bf16.mxu0 %v12210_v40  ;;  %v14404_v40 = vld [vmem:[#allocation93_spill] sm:$0xff] }
 0x797   :  { %5472 = vmatpush1.bf16.msra.mxu0 %v14394_v60  ;;  %v10881_v60 = vld [vmem:[#allocation2 + $0x4dc] ss:$36 sps:$4 sm:$0xff]  }
 0x798   :  { %5473 = vmatprep.subr.bf16.mxu0 %v14395_v37  ;;  %v10882_v37 = vld [vmem:[#allocation2 + $0x4d8] ss:$36 sps:$4 sm:$0xff]  }
 0x79b   :  { %5474 = vmatpush1.bf16.msra.mxu0 %v14396_v46  ;;  %v10883_v46 = vld [vmem:[#allocation2 + $0x524] ss:$36 sps:$4 sm:$0xff]  }
 0x79c   :  { %5475 = vmatprep.subr.bf16.mxu0 %v14397_v8  ;;  %v10884_v8 = vld [vmem:[#allocation2 + $0x520] ss:$36 sps:$4 sm:$0xff]  }
 0x79f   :  { %5476 = vmatpush1.bf16.msra.mxu0 %v14398_v10  ;;  %v10885_v10 = vld [vmem:[#allocation2 + $0x56c] ss:$36 sps:$4 sm:$0xff]  }
 0x7a0   :  { %5477 = vmatprep.subr.bf16.mxu0 %v14399_v35  ;;  %v10886_v35 = vld [vmem:[#allocation2 + $0x568] ss:$36 sps:$4 sm:$0xff]  }
 0x7a3   :  { %5478 = vmatpush1.bf16.msra.mxu0 %v14400_v19  ;;  %v10887_v19 = vld [vmem:[#allocation2 + $0x5b4] ss:$36 sps:$4 sm:$0xff]  }
 0x7a4   :  { %5479 = vmatprep.subr.bf16.mxu0 %v14401_v22  ;;  %v10888_v22 = vld [vmem:[#allocation2 + $0x5b0] ss:$36 sps:$4 sm:$0xff]  }
 0x7a7   :  { %5480 = vmatpush1.bf16.msra.mxu0 %v14402_v26  ;;  %v10889_v26 = vld [vmem:[#allocation2 + $0x5fc] ss:$36 sps:$4 sm:$0xff]  }
 0x7a8   :  { %5481 = vmatprep.subr.bf16.mxu0 %v14403_v28  ;;  %v10890_v28 = vld [vmem:[#allocation2 + $0x5f8] ss:$36 sps:$4 sm:$0xff]  }
 0x7ab   :  { %5482 = vmatpush1.bf16.msra.mxu0 %v14404_v40  ;;  %v10891_v40 = vld [vmem:[#allocation2 + $0x644] ss:$36 sps:$4 sm:$0xff]  }
 0x7ac   :  { %5483 = vmatprep.subr.bf16.mxu0 %v14405_v14  ;;  %v10892_v14 = vld [vmem:[#allocation2 + $0x640] ss:$36 sps:$4 sm:$0xff]  }
 0x7af   :  { %5484 = vmatpush1.bf16.msra.mxu0 %v14406_v23  ;;  %v10893_v23 = vld [vmem:[#allocation2 + $0x68c] ss:$36 sps:$4 sm:$0xff]  }
 0x7b0   :  { %5485 = vmatprep.subr.bf16.mxu0 %v14407_v30  ;;  %v10894_v30 = vld [vmem:[#allocation2 + $0x688] ss:$36 sps:$4 sm:$0xff]  }
 0x7b3   :  { %5486 = vmatpush1.bf16.msra.mxu0 %v14408_v12  ;;  %v10895_v12 = vld [vmem:[#allocation2 + $0x6d4] ss:$36 sps:$4 sm:$0xff]  }
 0x7b4   :  { %5487 = vmatprep.subr.bf16.mxu0 %v14409_v52  ;;  %v10896_v52 = vld [vmem:[#allocation2 + $0x6d0] ss:$36 sps:$4 sm:$0xff]  }
 0x7b7   :  { %5488 = vmatpush1.bf16.msra.mxu0 %v14410_v15  ;;  %v10897_v15 = vld [vmem:[#allocation2 + $0x71c] ss:$36 sps:$4 sm:$0xff]  }
 0x7b8   :  { %5489 = vmatprep.subr.bf16.mxu0 %v14411_v24  ;;  %v10898_v24 = vld [vmem:[#allocation2 + $0x718] ss:$36 sps:$4 sm:$0xff]  }
 0x7bb   :  { %5490 = vmatpush1.bf16.msra.mxu0 %v14412_v0  ;;  %v10899_v0 = vld [vmem:[#allocation2 + $0x764] ss:$36 sps:$4 sm:$0xff]  }
 0x7bc   :  { %5500 = vmatprep.subr.bf16.mxu0 %v10879_v3  ;;  %v10900_v3 = vld [vmem:[#allocation2 + $0x760] ss:$36 sps:$4 sm:$0xff]  }
 0x7be   :  { %5492 = vmatmul.mubr.bf16.vlgmr.msra.gmra.mrb[28].mxu0 %v12595_v32 }
 0x7bf   :  { %5501 = vmatpush1.bf16.msra.mxu0 %v10880_v63  ;;  %5532 = vmatprep.mubr.bf16.mxu0 %v12598_v7  ;;  %v10901_v63 = vld [vmem:[#allocation2 + $0x7ac] ss:$36 sps:$4 sm:$0xff]  }
 0x7c0   :  { %5502 = vmatprep.subr.bf16.mxu0 %v10881_v60  ;;  %v10902_v60 = vld [vmem:[#allocation2 + $0x7a8] ss:$36 sps:$4 sm:$0xff]  }
 0x7c3   :  { %5503 = vmatpush1.bf16.msra.mxu0 %v10882_v37  ;;  %v10903_v37 = vld [vmem:[#allocation2 + $0x7f4] ss:$36 sps:$4 sm:$0xff]  }
 0x7c4   :  { %5504 = vmatprep.subr.bf16.mxu0 %v10883_v46  ;;  %v10904_v46 = vld [vmem:[#allocation2 + $0x7f0] ss:$36 sps:$4 sm:$0xff]  }
 0x7c7   :  { %5505 = vmatpush1.bf16.msra.mxu0 %v10884_v8  ;;  %v10905_v8 = vld [vmem:[#allocation2 + $0x83c] ss:$36 sps:$4 sm:$0xff]  }
 0x7c8   :  { %5506 = vmatprep.subr.bf16.mxu0 %v10885_v10  ;;  %v10906_v10 = vld [vmem:[#allocation2 + $0x838] ss:$36 sps:$4 sm:$0xff]  }
 0x7cb   :  { %5507 = vmatpush1.bf16.msra.mxu0 %v10886_v35  ;;  %v10907_v35 = vld [vmem:[#allocation2 + $0x884] ss:$36 sps:$4 sm:$0xff]  }
 0x7cc   :  { %5508 = vmatprep.subr.bf16.mxu0 %v10887_v19  ;;  %v10908_v19 = vld [vmem:[#allocation2 + $0x880] ss:$36 sps:$4 sm:$0xff]  }
 0x7cf   :  { %5509 = vmatpush1.bf16.msra.mxu0 %v10888_v22  ;;  %v10909_v22 = vld [vmem:[#allocation2 + $0x8cc] ss:$36 sps:$4 sm:$0xff]  }
 0x7d0   :  { %5510 = vmatprep.subr.bf16.mxu0 %v10889_v26  ;;  %v10910_v26 = vld [vmem:[#allocation2 + $0x8c8] ss:$36 sps:$4 sm:$0xff]  }
 0x7d3   :  { %5511 = vmatpush1.bf16.msra.mxu0 %v10890_v28  ;;  %v14413_v28 = vld [vmem:[#allocation45_spill] sm:$0xff] }
 0x7d4   :  { %5512 = vmatprep.subr.bf16.mxu0 %v10891_v40  ;;  %v14414_v40 = vld [vmem:[#allocation46_spill] sm:$0xff] }
 0x7d7   :  { %5513 = vmatpush1.bf16.msra.mxu0 %v10892_v14  ;;  %v14415_v14 = vld [vmem:[#allocation47_spill] sm:$0xff] }
 0x7d8   :  { %5514 = vmatprep.subr.bf16.mxu0 %v10893_v23  ;;  %v14416_v23 = vld [vmem:[#allocation48_spill] sm:$0xff] }
 0x7db   :  { %5515 = vmatpush1.bf16.msra.mxu0 %v10894_v30  ;;  %v14417_v30 = vld [vmem:[#allocation49_spill] sm:$0xff] }
 0x7dc   :  { %5516 = vmatprep.subr.bf16.mxu0 %v10895_v12  ;;  %v14419_v12 = vld [vmem:[#allocation50_spill] sm:$0xff] }
 0x7df   :  { %5517 = vmatpush1.bf16.msra.mxu0 %v10896_v52  ;;  %v14433_v52 = vld [vmem:[#allocation109_spill] sm:$0xff] }
 0x7e0   :  { %5518 = vmatprep.subr.bf16.mxu0 %v10897_v15  ;;  %v14434_v15 = vld [vmem:[#allocation123_spill] sm:$0xff] }
 0x7e3   :  { %5519 = vmatpush1.bf16.msra.mxu0 %v10898_v24  ;;  %v14435_v24 = vld [vmem:[#allocation110_spill] sm:$0xff] }
 0x7e4   :  { %5520 = vmatprep.subr.bf16.mxu0 %v10899_v0  ;;  %v14436_v0 = vld [vmem:[#allocation124_spill] sm:$0xff] }
 0x7e7   :  { %5521 = vmatpush1.bf16.msra.mxu0 %v10900_v3  ;;  %v14437_v3 = vld [vmem:[#allocation111_spill] sm:$0xff] }
 0x7e8   :  { %5522 = vmatprep.subr.bf16.mxu0 %v10901_v63  ;;  %v14438_v63 = vld [vmem:[#allocation125_spill] sm:$0xff] }
 0x7eb   :  { %5523 = vmatpush1.bf16.msra.mxu0 %v10902_v60  ;;  %v14439_v60 = vld [vmem:[#allocation112_spill] sm:$0xff] }
 0x7ec   :  { %5524 = vmatprep.subr.bf16.mxu0 %v10903_v37  ;;  %v14440_v37 = vld [vmem:[#allocation126_spill] sm:$0xff] }
 0x7ef   :  { %5525 = vmatpush1.bf16.msra.mxu0 %v10904_v46  ;;  %v14441_v46 = vld [vmem:[#allocation113_spill] sm:$0xff] }
 0x7f0   :  { %5526 = vmatprep.subr.bf16.mxu0 %v10905_v8  ;;  %v14442_v8 = vld [vmem:[#allocation127_spill] sm:$0xff] }
 0x7f3   :  { %5527 = vmatpush1.bf16.msra.mxu0 %v10906_v10  ;;  %v14443_v10 = vld [vmem:[#allocation114_spill] sm:$0xff] }
 0x7f4   :  { %5528 = vmatprep.subr.bf16.mxu0 %v10907_v35  ;;  %v14444_v35 = vld [vmem:[#allocation128_spill] sm:$0xff] }
 0x7f7   :  { %5529 = vmatpush1.bf16.msra.mxu0 %v10908_v19  ;;  %v14445_v19 = vld [vmem:[#allocation115_spill] sm:$0xff] }
 0x7f8   :  { %5530 = vmatprep.subr.bf16.mxu0 %v10909_v22  ;;  %v14446_v22 = vld [vmem:[#allocation129_spill] sm:$0xff] }
 0x7fb   :  { %5531 = vmatpush1.bf16.msra.mxu0 %v10910_v26  ;;  %v14447_v26 = vld [vmem:[#allocation116_spill] sm:$0xff] }
 0x7fc   :  { %5541 = vmatprep.subr.bf16.mxu0 %v12587_v41  ;;  %v14418_v41 = vld [vmem:[#allocation28_spill] sm:$0xff] }
 0x7fe   :  { %5533 = vmatmul.mubr.bf16.vlgmr.msra.gmra.mrb[28].mxu0 %v12653_v42 }
 0x7ff   :  { %5542 = vmatpush1.bf16.msra.mxu0 %v12601_v38  ;;  %v14420_v38 = vld [vmem:[#allocation51_spill] sm:$0xff] }
 0x800   :  { %5543 = vmatprep.subr.bf16.mxu0 %v12606_v18  ;;  %v14421_v18 = vld [vmem:[#allocation52_spill] sm:$0xff] }
 0x803   :  { %5544 = vmatpush1.bf16.msra.mxu0 %v12609_v16  ;;  %v14422_v16 = vld [vmem:[#allocation53_spill] sm:$0xff] }
 0x804   :  { %5545 = vmatprep.subr.bf16.mxu0 %v12612_v31  ;;  %v14423_v31 = vld [vmem:[#allocation119_spill] sm:$0xff] }
 0x807   :  { %5546 = vmatpush1.bf16.msra.mxu0 %v14413_v28  ;;  %v14448_v28 = vld [vmem:[#allocation130_spill] sm:$0xff] }
 0x808   :  { %5547 = vmatprep.subr.bf16.mxu0 %v14414_v40  ;;  %v14449_v40 = vld [vmem:[#allocation117_spill] sm:$0xff] }
 0x80b   :  { %5548 = vmatpush1.bf16.msra.mxu0 %v14415_v14  ;;  %v14450_v14 = vld [vmem:[#allocation131_spill] sm:$0xff] }
 0x80c   :  { %5549 = vmatprep.subr.bf16.mxu0 %v14416_v23  ;;  %v14451_v23 = vld [vmem:[#allocation118_spill] sm:$0xff] }
 0x80f   :  { %5550 = vmatpush1.bf16.msra.mxu0 %v14417_v30  ;;  %v14452_v30 = vld [vmem:[#allocation132_spill] sm:$0xff] }
 0x810   :  { %5551 = vmatprep.subr.bf16.mxu0 %v14418_v41  ;;  %v14453_v41 = vld [vmem:[#allocation33_spill] sm:$0xff] }
 0x813   :  { %5552 = vmatpush1.bf16.msra.mxu0 %v14419_v12  ;;  %v5123_v12 = vsub.f32 %v12736_v6, %v14453_v41  ;;  %v10916_v6 = vld [vmem:[#allocation2 + $0x20] ss:$36 sps:$4 sm:$0xff]   ;;  %v10947_v41 = vld [vmem:[#allocation2 + $0x248] ss:$36 sps:$4 sm:$0xff]  }
 0x814   :  { %5553 = vmatprep.subr.bf16.mxu0 %v14420_v38  ;;  %v10911_v38 = vld [vmem:[#allocation2 + $0xf7c] ss:$36 sps:$4 sm:$0xff]  }
 0x817   :  { %5554 = vmatpush1.bf16.msra.mxu0 %v14421_v18  ;;  %v14454_v18 = vld [vmem:[#allocation133_spill] sm:$0xff] }
 0x818   :  { %5555 = vmatprep.subr.bf16.mxu0 %v14422_v16  ;;  %v10912_v16 = vld [vmem:[#allocation2 + $0xf78] ss:$36 sps:$4 sm:$0xff]  }
 0x81b   :  { %5556 = vmatpush1.bf16.msra.mxu0 %v12645_v33 }
 0x81c   :  { %5557 = vmatprep.subr.bf16.mxu0 %v12648_v44  ;;  %v14424_v44 = vld [vmem:[#allocation31_spill] sm:$0xff] }
 0x81f   :  { %5558 = vmatpush1.bf16.msra.mxu0 %v12657_v21 }
 0x820   :  { %5559 = vmatprep.subr.bf16.mxu0 %v12660_v56 }
 0x823   :  { %5560 = vmatpush1.bf16.msra.mxu0 %v12667_v20  ;;  %v14425_v20 = vld [vmem:[#allocation32_spill] sm:$0xff] }
 0x824   :  { %5561 = vmatprep.subr.bf16.mxu0 %v12670_v17 }
 0x827   :  { %5562 = vmatpush1.bf16.msra.mxu0 %v12677_v34 }
 0x828   :  { %5563 = vmatprep.subr.bf16.mxu0 %v12680_v39 }
 0x82b   :  { %5564 = vmatpush1.bf16.msra.mxu0 %v12687_v54 }
 0x82c   :  { %5565 = vmatprep.subr.bf16.mxu0 %v12690_v48 }
 0x82f   :  { %5566 = vmatpush1.bf16.msra.mxu0 %v12697_v53  ;;  %v14426_v53 = vld [vmem:[#allocation106_spill] sm:$0xff] }
 0x830   :  { %5567 = vmatprep.subr.bf16.mxu0 %v12700_v1  ;;  %v14427_v1 = vld [vmem:[#allocation120_spill] sm:$0xff] }
 0x833   :  { %5568 = vmatpush1.bf16.msra.mxu0 %v12707_v47  ;;  %v14428_v47 = vld [vmem:[#allocation107_spill] sm:$0xff] }
 0x834   :  { %5569 = vmatprep.subr.bf16.mxu0 %v12710_v51  ;;  %v14429_v51 = vld [vmem:[#allocation121_spill] sm:$0xff] }
 0x837   :  { %5570 = vmatpush1.bf16.msra.mxu0 %v12717_v43  ;;  %v14430_v43 = vmov 0  }
 0x838   :  { %5571 = vmatprep.subr.bf16.mxu0 %v12720_v45  ;;  %v14431_v45 = vld [vmem:[#allocation108_spill] sm:$0xff] }
 0x83b   :  { %5572 = vmatpush1.bf16.msra.mxu0 %v12727_v36  ;;  %v14432_v36 = vld [vmem:[#allocation122_spill] sm:$0xff] }
 0x83c   :  { %5582 = vmatprep.subr.bf16.mxu0 %v14423_v31  ;;  %v14455_v31 = vld [vmem:[#allocation134_spill] sm:$0xff] }
 0x851   :  { %v4910_v33 = vpop.f32.mrb[24].mxu0 }
 0x852   :  { %v5121_v21 = vsub.f32 %v4910_v33, %v14424_v44  ;;  %v4912_v56 = vpop.f32.mrb[25].mxu0  ;;  %v12896_v33 = vpack.c.bf16 %v5123_v12, %v5123_v12  ;;  %v10913_v44 = vld [vmem:[#allocation2 + $0xc] ss:$36 sps:$4 sm:$0xff]   ;;  %v10948_v12 = vld [vmem:[#allocation2 + $0x4a0] ss:$36 sps:$4 sm:$0xff]  }
 0x853   :  { %v5122_v17 = vsub.f32 %v4912_v56, %v14425_v20  ;;  %v4914_v34 = vpop.f32.mrb[26].mxu0  ;;  %v10915_v56 = vld [vmem:[#allocation2 + $0x8] ss:$36 sps:$4 sm:$0xff]   ;;  %v10917_v20 = vld [vmem:[#allocation2 + $0x54] ss:$36 sps:$4 sm:$0xff]  }
 0x854   :  { %v4915_v39 = vpop.f32.mrb[27].mxu0  ;;  %v12858_v48 = vpack.c.bf16 %v5121_v21, %v5121_v21  ;;  %v10914_v21 = vld [vmem:[#allocation2 + $0x260] ss:$36 sps:$4 sm:$0xff]   ;;  %v10919_v34 = vld [vmem:[#allocation2 + $0x50] ss:$36 sps:$4 sm:$0xff]  }
 0x855   :  { %v12856_v54 = vpack.c.bf16 %v5122_v17, %v5122_v17  ;;  %v10918_v17 = vld [vmem:[#allocation2 + $0x2a8] ss:$36 sps:$4 sm:$0xff]  }
 0x856   :  { %v10920_v39 = vld [vmem:[#allocation2 + $0x68] ss:$36 sps:$4 sm:$0xff]  }
 0x857   :  { %5245 = vmatprep.mubr.bf16.mxu1 %v12856_v54  ;;  %5573 = vmatprep.mubr.bf16.mxu0 %v12856_v54 }
 0x858   :  { %5246 = vmatmul.mubr.bf16.vlgmr.msra.gmra.mrb[24].mxu1 %v12858_v48  ;;  %5574 = vmatmul.mubr.bf16.vlgmr.msra.gmra.mrb[28].mxu0 %v12858_v48 }
 0x859   :  { %5255 = vmatpush1.bf16.msra.mxu1 %v14426_v53  ;;  %5583 = vmatpush1.bf16.msra.mxu0 %v14427_v1  ;;  %v10921_v53 = vld [vmem:[#allocation2 + $0x9c] ss:$36 sps:$4 sm:$0xff]   ;;  %v10922_v1 = vld [vmem:[#allocation2 + $0x2f0] ss:$36 sps:$4 sm:$0xff]  }
 0x85a   :  { %5256 = vmatprep.subr.bf16.mxu1 %v14428_v47  ;;  %5584 = vmatprep.subr.bf16.mxu0 %v14429_v51  ;;  %v10923_v47 = vld [vmem:[#allocation2 + $0x98] ss:$36 sps:$4 sm:$0xff]   ;;  %v10924_v51 = vld [vmem:[#allocation2 + $0xb0] ss:$36 sps:$4 sm:$0xff]  }
 0x85b   :  { %5286 = vmatprep.mubr.bf16.mxu1 %v14430_v43  ;;  %5614 = vmatprep.mubr.bf16.mxu0 %v14430_v43 }
 0x85d   :  { %5257 = vmatpush1.bf16.msra.mxu1 %v14431_v45  ;;  %5585 = vmatpush1.bf16.msra.mxu0 %v14432_v36  ;;  %v10925_v45 = vld [vmem:[#allocation2 + $0xe4] ss:$36 sps:$4 sm:$0xff]   ;;  %v10926_v36 = vld [vmem:[#allocation2 + $0x338] ss:$36 sps:$4 sm:$0xff]  }
 0x85e   :  { %5258 = vmatprep.subr.bf16.mxu1 %v14433_v52  ;;  %5586 = vmatprep.subr.bf16.mxu0 %v14434_v15  ;;  %v10927_v52 = vld [vmem:[#allocation2 + $0xe0] ss:$36 sps:$4 sm:$0xff]   ;;  %v10928_v15 = vld [vmem:[#allocation2 + $0xf8] ss:$36 sps:$4 sm:$0xff]  }
 0x861   :  { %5259 = vmatpush1.bf16.msra.mxu1 %v14435_v24  ;;  %5587 = vmatpush1.bf16.msra.mxu0 %v14436_v0  ;;  %v10929_v24 = vld [vmem:[#allocation2 + $0x12c] ss:$36 sps:$4 sm:$0xff]   ;;  %v10930_v0 = vld [vmem:[#allocation2 + $0x380] ss:$36 sps:$4 sm:$0xff]  }
 0x862   :  { %5260 = vmatprep.subr.bf16.mxu1 %v14437_v3  ;;  %5588 = vmatprep.subr.bf16.mxu0 %v14438_v63  ;;  %v10931_v3 = vld [vmem:[#allocation2 + $0x128] ss:$36 sps:$4 sm:$0xff]   ;;  %v10932_v63 = vld [vmem:[#allocation2 + $0x140] ss:$36 sps:$4 sm:$0xff]  }
 0x865   :  { %5261 = vmatpush1.bf16.msra.mxu1 %v14439_v60  ;;  %5589 = vmatpush1.bf16.msra.mxu0 %v14440_v37  ;;  %v10933_v60 = vld [vmem:[#allocation2 + $0x174] ss:$36 sps:$4 sm:$0xff]   ;;  %v10934_v37 = vld [vmem:[#allocation2 + $0x3c8] ss:$36 sps:$4 sm:$0xff]  }
 0x866   :  { %5262 = vmatprep.subr.bf16.mxu1 %v14441_v46  ;;  %5590 = vmatprep.subr.bf16.mxu0 %v14442_v8  ;;  %v10935_v46 = vld [vmem:[#allocation2 + $0x170] ss:$36 sps:$4 sm:$0xff]   ;;  %v10936_v8 = vld [vmem:[#allocation2 + $0x188] ss:$36 sps:$4 sm:$0xff]  }
 0x869   :  { %5263 = vmatpush1.bf16.msra.mxu1 %v14443_v10  ;;  %5591 = vmatpush1.bf16.msra.mxu0 %v14444_v35  ;;  %v10937_v10 = vld [vmem:[#allocation2 + $0x1bc] ss:$36 sps:$4 sm:$0xff]   ;;  %v10938_v35 = vld [vmem:[#allocation2 + $0x410] ss:$36 sps:$4 sm:$0xff]  }
 0x86a   :  { %5264 = vmatprep.subr.bf16.mxu1 %v14445_v19  ;;  %5592 = vmatprep.subr.bf16.mxu0 %v14446_v22  ;;  %v10939_v19 = vld [vmem:[#allocation2 + $0x1b8] ss:$36 sps:$4 sm:$0xff]   ;;  %v10940_v22 = vld [vmem:[#allocation2 + $0x1d0] ss:$36 sps:$4 sm:$0xff]  }
 0x86d   :  { %5265 = vmatpush1.bf16.msra.mxu1 %v14447_v26  ;;  %5593 = vmatpush1.bf16.msra.mxu0 %v14448_v28  ;;  %v10941_v26 = vld [vmem:[#allocation2 + $0x204] ss:$36 sps:$4 sm:$0xff]   ;;  %v10942_v28 = vld [vmem:[#allocation2 + $0x458] ss:$36 sps:$4 sm:$0xff]  }
 0x86e   :  { %5266 = vmatprep.subr.bf16.mxu1 %v14449_v40  ;;  %5594 = vmatprep.subr.bf16.mxu0 %v14450_v14  ;;  %v10943_v40 = vld [vmem:[#allocation2 + $0x200] ss:$36 sps:$4 sm:$0xff]   ;;  %v10944_v14 = vld [vmem:[#allocation2 + $0x218] ss:$36 sps:$4 sm:$0xff]  }
 0x871   :  { %5267 = vmatpush1.bf16.msra.mxu1 %v14451_v23  ;;  %5595 = vmatpush1.bf16.msra.mxu0 %v14452_v30  ;;  %v10945_v23 = vld [vmem:[#allocation2 + $0x24c] ss:$36 sps:$4 sm:$0xff]   ;;  %v10946_v30 = vld [vmem:[#allocation2 + $0x6e0] ss:$36 sps:$4 sm:$0xff]  }
 0x872   :  { %5268 = vmatprep.subr.bf16.mxu1 %v10911_v38  ;;  %5596 = vmatprep.subr.bf16.mxu0 %v14454_v18  ;;  %v10949_v38 = vld [vmem:[#allocation2 + $0x294] ss:$36 sps:$4 sm:$0xff]   ;;  %v10950_v18 = vld [vmem:[#allocation2 + $0x728] ss:$36 sps:$4 sm:$0xff]  }
 0x875   :  { %5269 = vmatpush1.bf16.msra.mxu1 %v10912_v16  ;;  %5597 = vmatpush1.bf16.msra.mxu0 %v14455_v31  ;;  %v10951_v16 = vld [vmem:[#allocation2 + $0x290] ss:$36 sps:$4 sm:$0xff]   ;;  %v10952_v31 = vld [vmem:[#allocation2 + $0x4e8] ss:$36 sps:$4 sm:$0xff]  }
 0x876   :  { %5295 = vmatprep.subr.bf16.mxu1 %v10913_v44  ;;  %8837 = vmatprep.subr.bf16.mxu0 %v10914_v21  ;;  %v10953_v44 = vld [vmem:[#allocation2 + $0x2dc] ss:$36 sps:$4 sm:$0xff]   ;;  %v10954_v21 = vld [vmem:[#allocation2 + $0x770] ss:$36 sps:$4 sm:$0xff]  }
 0x878   :  { %5287 = vmatmul.mubr.bf16.vlgmr.msra.gmra.mrb[24].mxu1 %v12896_v33  ;;  %5615 = vmatmul.mubr.bf16.vlgmr.msra.gmra.mrb[28].mxu0 %v12896_v33 }
 0x879   :  { %5296 = vmatpush1.bf16.msra.mxu1 %v10915_v56  ;;  %5327 = vmatprep.mubr.bf16.mxu1 %v12566_v59  ;;  %v10955_v56 = vld [vmem:[#allocation2 + $0x2d8] ss:$36 sps:$4 sm:$0xff]  }
 0x87a   :  { %8838 = vmatpush3.bf16.msra.mxu0 %v10916_v6  ;;  %5819 = vmatprep.mubr.bf16.mxu0 %v12566_v59  ;;  %v10956_v6 = vld [vmem:[#allocation2 + $0x530] ss:$36 sps:$4 sm:$0xff]  }
 0x87b   :  { %5297 = vmatprep.subr.bf16.mxu1 %v10917_v20  ;;  %8839 = vmatprep.subr.bf16.mxu0 %v10918_v17  ;;  %v10957_v20 = vld [vmem:[#allocation2 + $0x324] ss:$36 sps:$4 sm:$0xff]   ;;  %v10958_v17 = vld [vmem:[#allocation2 + $0x7b8] ss:$36 sps:$4 sm:$0xff]  }
 0x87d   :  { %5298 = vmatpush1.bf16.msra.mxu1 %v10919_v34  ;;  %v10959_v34 = vld [vmem:[#allocation2 + $0x320] ss:$36 sps:$4 sm:$0xff]  }
 0x87e   :  { %8840 = vmatpush3.bf16.msra.mxu0 %v10920_v39  ;;  %5299 = vmatprep.subr.bf16.mxu1 %v10921_v53  ;;  %v10960_v39 = vld [vmem:[#allocation2 + $0x578] ss:$36 sps:$4 sm:$0xff]   ;;  %v10961_v53 = vld [vmem:[#allocation2 + $0x36c] ss:$36 sps:$4 sm:$0xff]  }
 0x87f   :  { %8841 = vmatprep.subr.bf16.mxu0 %v10922_v1  ;;  %v10962_v1 = vld [vmem:[#allocation2 + $0x800] ss:$36 sps:$4 sm:$0xff]  }
 0x881   :  { %5300 = vmatpush1.bf16.msra.mxu1 %v10923_v47  ;;  %v10963_v47 = vld [vmem:[#allocation2 + $0x368] ss:$36 sps:$4 sm:$0xff]  }
 0x882   :  { %8842 = vmatpush3.bf16.msra.mxu0 %v10924_v51  ;;  %5301 = vmatprep.subr.bf16.mxu1 %v10925_v45  ;;  %v10964_v51 = vld [vmem:[#allocation2 + $0x5c0] ss:$36 sps:$4 sm:$0xff]   ;;  %v10965_v45 = vld [vmem:[#allocation2 + $0x3b4] ss:$36 sps:$4 sm:$0xff]  }
 0x883   :  { %8843 = vmatprep.subr.bf16.mxu0 %v10926_v36  ;;  %v10966_v36 = vld [vmem:[#allocation2 + $0x848] ss:$36 sps:$4 sm:$0xff]  }
 0x885   :  { %5302 = vmatpush1.bf16.msra.mxu1 %v10927_v52  ;;  %v10967_v52 = vld [vmem:[#allocation2 + $0x3b0] ss:$36 sps:$4 sm:$0xff]  }
 0x886   :  { %8844 = vmatpush3.bf16.msra.mxu0 %v10928_v15  ;;  %5303 = vmatprep.subr.bf16.mxu1 %v10929_v24  ;;  %v10968_v15 = vld [vmem:[#allocation2 + $0x608] ss:$36 sps:$4 sm:$0xff]   ;;  %v10969_v24 = vld [vmem:[#allocation2 + $0x3fc] ss:$36 sps:$4 sm:$0xff]  }
 0x887   :  { %8845 = vmatprep.subr.bf16.mxu0 %v10930_v0  ;;  %v10970_v0 = vld [vmem:[#allocation2 + $0x890] ss:$36 sps:$4 sm:$0xff]  }
 0x889   :  { %5304 = vmatpush1.bf16.msra.mxu1 %v10931_v3  ;;  %v10971_v3 = vld [vmem:[#allocation2 + $0x3f8] ss:$36 sps:$4 sm:$0xff]  }
 0x88a   :  { %8846 = vmatpush3.bf16.msra.mxu0 %v10932_v63  ;;  %5305 = vmatprep.subr.bf16.mxu1 %v10933_v60  ;;  %v10972_v63 = vld [vmem:[#allocation2 + $0x650] ss:$36 sps:$4 sm:$0xff]   ;;  %v10973_v60 = vld [vmem:[#allocation2 + $0x444] ss:$36 sps:$4 sm:$0xff]  }
 0x88b   :  { %8847 = vmatprep.subr.bf16.mxu0 %v10934_v37  ;;  %v10974_v37 = vld [vmem:[#allocation2 + $0x8d8] ss:$36 sps:$4 sm:$0xff]  }
 0x88d   :  { %5306 = vmatpush1.bf16.msra.mxu1 %v10935_v46  ;;  %v10975_v46 = vld [vmem:[#allocation2 + $0x440] ss:$36 sps:$4 sm:$0xff]  }
 0x88e   :  { %8848 = vmatpush3.bf16.msra.mxu0 %v10936_v8  ;;  %5307 = vmatprep.subr.bf16.mxu1 %v10937_v10  ;;  %v10976_v8 = vld [vmem:[#allocation2 + $0x698] ss:$36 sps:$4 sm:$0xff]   ;;  %v10977_v10 = vld [vmem:[#allocation2 + $0x48c] ss:$36 sps:$4 sm:$0xff]  }
 0x88f   :  { %8849 = vmatprep.subr.bf16.mxu0 %v10938_v35  ;;  %v10978_v35 = vld [vmem:[#allocation2 + $0x488] ss:$36 sps:$4 sm:$0xff]  }
 0x891   :  { %5308 = vmatpush1.bf16.msra.mxu1 %v10939_v19  ;;  %v10979_v19 = vld [vmem:[#allocation2 + $0x4d4] ss:$36 sps:$4 sm:$0xff]  }
 0x892   :  { %8850 = vmatpush3.bf16.msra.mxu0 %v10940_v22  ;;  %5309 = vmatprep.subr.bf16.mxu1 %v10941_v26  ;;  %v10980_v22 = vld [vmem:[#allocation2 + $0x4d0] ss:$36 sps:$4 sm:$0xff]   ;;  %v10982_v26 = vld [vmem:[#allocation2 + $0x518] ss:$36 sps:$4 sm:$0xff]  }
 0x893   :  { %8851 = vmatprep.subr.bf16.mxu0 %v10942_v28  ;;  %v10983_v28 = vld [vmem:[#allocation2 + $0x564] ss:$36 sps:$4 sm:$0xff]  }
 0x895   :  { %5310 = vmatpush1.bf16.msra.mxu1 %v10943_v40  ;;  %v14456_v40 = vmov 0.0  }
 0x896   :  { %8852 = vmatpush3.bf16.msra.mxu0 %v10944_v14  ;;  %5311 = vmatprep.subr.bf16.mxu1 %v10945_v23  ;;  %v10995_v14 = vld [vmem:[#allocation2 + $0x714] ss:$36 sps:$4 sm:$0xff]  }
 0x897   :  { %8859 = vmatprep.subr.bf16.mxu0 %v10946_v30  ;;  %v10998_v23 = vld [vmem:[#allocation2 + $0x758] ss:$36 sps:$4 sm:$0xff]   ;;  %v14459_v30 = vld [vmem:[#allocation137_spill] sm:$0xff] }
 0x899   :  { %5820 = vmatmul.mubr.bf16.vlgmr.msra.gmra.mrb[32].mxu0 %v12595_v32  ;;  %5312 = vmatpush1.bf16.msra.mxu1 %v10947_v41  ;;  %v10999_v41 = vld [vmem:[#allocation2 + $0x7a4] ss:$36 sps:$4 sm:$0xff]  }
 0x89a   :  { %8860 = vmatpush3.bf16.msra.mxu0 %v10948_v12  ;;  %5859 = vmatprep.mubr.bf16.mxu0 %v12598_v7  ;;  %v11000_v12 = vld [vmem:[#allocation2 + $0x7a0] ss:$36 sps:$4 sm:$0xff]  }
 0x89b   :  { %5313 = vmatprep.subr.bf16.mxu1 %v10949_v38  ;;  %8861 = vmatprep.subr.bf16.mxu0 %v10950_v18  ;;  %v14460_v38 = vld [vmem:[#allocation138_spill] sm:$0xff]  ;;  %v11001_v18 = vld [vmem:[#allocation2 + $0x7ec] ss:$36 sps:$4 sm:$0xff]  }
 0x89d   :  { %5314 = vmatpush1.bf16.msra.mxu1 %v10951_v16  ;;  %v11002_v16 = vld [vmem:[#allocation2 + $0x7e8] ss:$36 sps:$4 sm:$0xff]  }
 0x89e   :  { %8862 = vmatpush3.bf16.msra.mxu0 %v10952_v31  ;;  %5315 = vmatprep.subr.bf16.mxu1 %v10953_v44  ;;  %v14461_v31 = vld [vmem:[#allocation139_spill] sm:$0xff]  ;;  %v11003_v44 = vld [vmem:[#allocation2 + $0x834] ss:$36 sps:$4 sm:$0xff]  }
 0x89f   :  { %8863 = vmatprep.subr.bf16.mxu0 %v10954_v21  ;;  %v11004_v21 = vld [vmem:[#allocation2 + $0x830] ss:$36 sps:$4 sm:$0xff]  }
 0x8a1   :  { %5316 = vmatpush1.bf16.msra.mxu1 %v10955_v56  ;;  %v14462_v56 = vld [vmem:[#allocation140_spill] sm:$0xff] }
 0x8a2   :  { %8864 = vmatpush3.bf16.msra.mxu0 %v10956_v6  ;;  %5317 = vmatprep.subr.bf16.mxu1 %v10957_v20  ;;  %v11005_v6 = vld [vmem:[#allocation2 + $0x87c] ss:$36 sps:$4 sm:$0xff]  }
 0x8a3   :  { %8865 = vmatprep.subr.bf16.mxu0 %v10958_v17  ;;  %v11006_v20 = vld [vmem:[#allocation2 + $0x878] ss:$36 sps:$4 sm:$0xff]   ;;  %v14463_v17 = vld [vmem:[#allocation141_spill] sm:$0xff] }
 0x8a5   :  { %5318 = vmatpush1.bf16.msra.mxu1 %v10959_v34  ;;  %v11007_v34 = vld [vmem:[#allocation2 + $0x8c4] ss:$36 sps:$4 sm:$0xff]  }
 0x8a6   :  { %8866 = vmatpush3.bf16.msra.mxu0 %v10960_v39  ;;  %5319 = vmatprep.subr.bf16.mxu1 %v10961_v53  ;;  %v12942_v39 = vld [vmem:[#allocation8 + $0x4] ss:$8 sps:$4 sm:$0xff]  }
 0x8a7   :  { %8867 = vmatprep.subr.bf16.mxu0 %v10962_v1  ;;  %v11008_v53 = vld [vmem:[#allocation2 + $0x8c0] ss:$36 sps:$4 sm:$0xff]   ;;  %v14464_v1 = vld [vmem:[#allocation142_spill] sm:$0xff] }
 0x8a9   :  { %5320 = vmatpush1.bf16.msra.mxu1 %v10963_v47  ;;  %v11009_v47 = vld [vmem:[#allocation2 + $0x90c] ss:$36 sps:$4 sm:$0xff]  }
 0x8aa   :  { %8868 = vmatpush3.bf16.msra.mxu0 %v10964_v51  ;;  %5321 = vmatprep.subr.bf16.mxu1 %v10965_v45  ;;  %v12945_v51 = vld [vmem:[#allocation8] ss:$8 sps:$4 sm:$0xff]   ;;  %v12949_v45 = vld [vmem:[#allocation8 + $0x14] ss:$8 sps:$4 sm:$0xff]  }
 0x8ab   :  { %8869 = vmatprep.subr.bf16.mxu0 %v10966_v36  ;;  %v11010_v36 = vld [vmem:[#allocation2 + $0x908] ss:$36 sps:$4 sm:$0xff]  }
 0x8ad   :  { %5322 = vmatpush1.bf16.msra.mxu1 %v10967_v52  ;;  %v11011_v52 = vld [vmem:[#allocation2 + $0x954] ss:$36 sps:$4 sm:$0xff]  }
 0x8ae   :  { %8870 = vmatpush3.bf16.msra.mxu0 %v10968_v15  ;;  %5323 = vmatprep.subr.bf16.mxu1 %v10969_v24  ;;  %v12954_v15 = vld [vmem:[#allocation8 + $0x10] ss:$8 sps:$4 sm:$0xff]   ;;  %v12957_v24 = vld [vmem:[#allocation8 + $0x24] ss:$8 sps:$4 sm:$0xff]  }
 0x8af   :  { %8871 = vmatprep.subr.bf16.mxu0 %v10970_v0  ;;  %v11012_v0 = vld [vmem:[#allocation2 + $0x950] ss:$36 sps:$4 sm:$0xff]  }
 0x8b1   :  { %5324 = vmatpush1.bf16.msra.mxu1 %v10971_v3  ;;  %v11013_v3 = vld [vmem:[#allocation2 + $0x99c] ss:$36 sps:$4 sm:$0xff]  }
 0x8b2   :  { %8872 = vmatpush3.bf16.msra.mxu0 %v10972_v63  ;;  %5325 = vmatprep.subr.bf16.mxu1 %v10973_v60  ;;  %v12960_v63 = vld [vmem:[#allocation8 + $0x20] ss:$8 sps:$4 sm:$0xff]   ;;  %v12963_v60 = vld [vmem:[#allocation8 + $0x34] ss:$8 sps:$4 sm:$0xff]  }
 0x8b3   :  { %8873 = vmatprep.subr.bf16.mxu0 %v10974_v37  ;;  %v11014_v37 = vld [vmem:[#allocation2 + $0x998] ss:$36 sps:$4 sm:$0xff]  }
 0x8b5   :  { %5326 = vmatpush1.bf16.msra.mxu1 %v10975_v46  ;;  %v11015_v46 = vld [vmem:[#allocation2 + $0x9e4] ss:$36 sps:$4 sm:$0xff]  }
 0x8b6   :  { %8874 = vmatpush3.bf16.msra.mxu0 %v10976_v8  ;;  %5336 = vmatprep.subr.bf16.mxu1 %v10977_v10  ;;  %v12966_v8 = vld [vmem:[#allocation8 + $0x30] ss:$8 sps:$4 sm:$0xff]   ;;  %v12969_v10 = vld [vmem:[#allocation8 + $0x44] ss:$8 sps:$4 sm:$0xff]  }
 0x8b7   :  { %8881 = vmatprep.subr.bf16.mxu0 %v12738_v49  ;;  %v10981_v49 = vld [vmem:[#allocation2 + $0x51c] ss:$36 sps:$4 sm:$0xff]  }
 0x8b8   :  { %5328 = vmatmul.mubr.bf16.vlgmr.msra.gmra.mrb[28].mxu1 %v12595_v32 }
 0x8b9   :  { %5860 = vmatmul.mubr.bf16.vlgmr.msra.gmra.mrb[36].mxu0 %v12653_v42  ;;  %5337 = vmatpush1.bf16.msra.mxu1 %v10978_v35  ;;  %v11016_v35 = vld [vmem:[#allocation2 + $0x9e0] ss:$36 sps:$4 sm:$0xff]  }
 0x8ba   :  { %5368 = vmatprep.mubr.bf16.mxu1 %v12598_v7  ;;  %8882 = vmatpush3.bf16.msra.mxu0 %v12742_v57  ;;  %v10984_v57 = vld [vmem:[#allocation2 + $0x560] ss:$36 sps:$4 sm:$0xff]  }
 0x8bb   :  { %5899 = vmatprep.mubr.bf16.mxu0 %v12856_v54  ;;  %5338 = vmatprep.subr.bf16.mxu1 %v10979_v19  ;;  %v11017_v19 = vld [vmem:[#allocation2 + $0xa2c] ss:$36 sps:$4 sm:$0xff]  }
 0x8bc   :  { %8883 = vmatprep.subr.bf16.mxu0 %v12746_v55  ;;  %v10985_v55 = vld [vmem:[#allocation2 + $0x5ac] ss:$36 sps:$4 sm:$0xff]  }
 0x8bd   :  { %5339 = vmatpush1.bf16.msra.mxu1 %v10980_v22  ;;  %v12972_v22 = vld [vmem:[#allocation8 + $0x40] ss:$8 sps:$4 sm:$0xff]  }
 0x8be   :  { %8884 = vmatpush3.bf16.msra.mxu0 %v12749_v27  ;;  %5340 = vmatprep.subr.bf16.mxu1 %v10981_v49  ;;  %v10986_v27 = vld [vmem:[#allocation2 + $0x5a8] ss:$36 sps:$4 sm:$0xff]  }
 0x8bf   :  { %8885 = vmatprep.subr.bf16.mxu0 %v12752_v58  ;;  %v10987_v58 = vld [vmem:[#allocation2 + $0x5f4] ss:$36 sps:$4 sm:$0xff]   ;;  %v12975_v49 = vld [vmem:[#allocation8 + $0x54] ss:$8 sps:$4 sm:$0xff]  }
 0x8c1   :  { %5341 = vmatpush1.bf16.msra.mxu1 %v10982_v26  ;;  %v11018_v26 = vld [vmem:[#allocation2 + $0xa28] ss:$36 sps:$4 sm:$0xff]  }
 0x8c2   :  { %8886 = vmatpush3.bf16.msra.mxu0 %v12755_v61  ;;  %5342 = vmatprep.subr.bf16.mxu1 %v10983_v28  ;;  %v10988_v61 = vld [vmem:[#allocation2 + $0x5f0] ss:$36 sps:$4 sm:$0xff]  }
 0x8c3   :  { %8887 = vmatprep.subr.bf16.mxu0 %v12758_v4  ;;  %v10989_v4 = vld [vmem:[#allocation2 + $0x63c] ss:$36 sps:$4 sm:$0xff]   ;;  %v11019_v28 = vld [vmem:[#allocation2 + $0xa74] ss:$36 sps:$4 sm:$0xff]  }
 0x8c5   :  { %5343 = vmatpush1.bf16.msra.mxu1 %v10984_v57  ;;  %v12978_v57 = vld [vmem:[#allocation8 + $0x50] ss:$8 sps:$4 sm:$0xff]  }
 0x8c6   :  { %8888 = vmatpush3.bf16.msra.mxu0 %v12761_v2  ;;  %5344 = vmatprep.subr.bf16.mxu1 %v10985_v55  ;;  %v10990_v2 = vld [vmem:[#allocation2 + $0x638] ss:$36 sps:$4 sm:$0xff]  }
 0x8c7   :  { %8889 = vmatprep.subr.bf16.mxu0 %v12764_v11  ;;  %v10991_v11 = vld [vmem:[#allocation2 + $0x684] ss:$36 sps:$4 sm:$0xff]   ;;  %v12981_v55 = vld [vmem:[#allocation8 + $0x64] ss:$8 sps:$4 sm:$0xff]  }
 0x8c9   :  { %5345 = vmatpush1.bf16.msra.mxu1 %v10986_v27  ;;  %v11020_v27 = vld [vmem:[#allocation2 + $0xa70] ss:$36 sps:$4 sm:$0xff]  }
 0x8ca   :  { %8890 = vmatpush3.bf16.msra.mxu0 %v12767_v13  ;;  %5346 = vmatprep.subr.bf16.mxu1 %v10987_v58  ;;  %v10992_v13 = vld [vmem:[#allocation2 + $0x680] ss:$36 sps:$4 sm:$0xff]  }
 0x8cb   :  { %8891 = vmatprep.subr.bf16.mxu0 %v12770_v62  ;;  %v10993_v62 = vld [vmem:[#allocation2 + $0x6cc] ss:$36 sps:$4 sm:$0xff]   ;;  %v11021_v58 = vld [vmem:[#allocation2 + $0xabc] ss:$36 sps:$4 sm:$0xff]  }
 0x8cd   :  { %5347 = vmatpush1.bf16.msra.mxu1 %v10988_v61  ;;  %v12984_v61 = vld [vmem:[#allocation8 + $0x60] ss:$8 sps:$4 sm:$0xff]  }
 0x8ce   :  { %8892 = vmatpush3.bf16.msra.mxu0 %v12773_v25  ;;  %5348 = vmatprep.subr.bf16.mxu1 %v10989_v4  ;;  %v10994_v25 = vld [vmem:[#allocation2 + $0x6c8] ss:$36 sps:$4 sm:$0xff]  }
 0x8cf   :  { %8893 = vmatprep.subr.bf16.mxu0 %v12776_v5  ;;  %v14457_v5 = vld [vmem:[#allocation135_spill] sm:$0xff]  ;;  %v12987_v4 = vld [vmem:[#allocation8 + $0x74] ss:$8 sps:$4 sm:$0xff]  }
 0x8d1   :  { %5349 = vmatpush1.bf16.msra.mxu1 %v10990_v2  ;;  %v11022_v2 = vld [vmem:[#allocation2 + $0xab8] ss:$36 sps:$4 sm:$0xff]  }
 0x8d2   :  { %8894 = vmatpush3.bf16.msra.mxu0 %v12779_v29  ;;  %5350 = vmatprep.subr.bf16.mxu1 %v10991_v11  ;;  %v10996_v29 = vld [vmem:[#allocation2 + $0x710] ss:$36 sps:$4 sm:$0xff]   ;;  %v11023_v11 = vld [vmem:[#allocation2 + $0xb04] ss:$36 sps:$4 sm:$0xff]  }
 0x8d3   :  { %8895 = vmatprep.subr.bf16.mxu0 %v12782_v50  ;;  %v14458_v50 = vld [vmem:[#allocation136_spill] sm:$0xff] }
 0x8d5   :  { %5351 = vmatpush1.bf16.msra.mxu1 %v10992_v13  ;;  %v12990_v13 = vld [vmem:[#allocation8 + $0x70] ss:$8 sps:$4 sm:$0xff]  }
 0x8d6   :  { %8896 = vmatpush3.bf16.msra.mxu0 %v12785_v9  ;;  %5352 = vmatprep.subr.bf16.mxu1 %v10993_v62  ;;  %v10997_v9 = vld [vmem:[#allocation2 + $0x75c] ss:$36 sps:$4 sm:$0xff]  }
 0x8d7   :  { %9061 = vmatprep.subr.bf16.mxu0 %v14456_v40  ;;  %v12993_v62 = vld [vmem:[#allocation8 + $0x84] ss:$8 sps:$4 sm:$0xff]  }
 0x8d9   :  { %5900 = vmatmul.mubr.bf16.vlgmr.msra.gmra.mrb[40].mxu0 %v12858_v48  ;;  %5353 = vmatpush1.bf16.msra.mxu1 %v10994_v25  ;;  %v11024_v25 = vld [vmem:[#allocation2 + $0xb00] ss:$36 sps:$4 sm:$0xff]  }
 0x8da   :  { %9062 = vmatpush3.bf16.msra.mxu0 %v14457_v5  ;;  %5354 = vmatprep.subr.bf16.mxu1 %v10995_v14  ;;  %v11025_v5 = vld [vmem:[#allocation2 + $0xb4c] ss:$36 sps:$4 sm:$0xff]   ;;  %v12996_v14 = vld [vmem:[#allocation8 + $0x80] ss:$8 sps:$4 sm:$0xff]  }
 0x8db   :  { %9063 = vmatprep.subr.bf16.mxu0 %v14456_v40  ;;  %9077 = vmatprep.mubr.msk.bf16.mxu0 %vm11509_vm0, %v14456_v40 }
 0x8dd   :  { %5355 = vmatpush1.bf16.msra.mxu1 %v10996_v29  ;;  %v12999_v29 = vld [vmem:[#allocation8 + $0x94] ss:$8 sps:$4 sm:$0xff]  }
 0x8de   :  { %9064 = vmatpush3.bf16.msra.mxu0 %v14458_v50  ;;  %5356 = vmatprep.subr.bf16.mxu1 %v10997_v9  ;;  %v11026_v50 = vld [vmem:[#allocation2 + $0xb48] ss:$36 sps:$4 sm:$0xff]   ;;  %v11027_v9 = vld [vmem:[#allocation2 + $0xb94] ss:$36 sps:$4 sm:$0xff]  }
 0x8df   :  { %9065 = vmatprep.subr.bf16.mxu0 %v14456_v40 }
 0x8e1   :  { %5357 = vmatpush1.bf16.msra.mxu1 %v10998_v23  ;;  %v13002_v23 = vld [vmem:[#allocation8 + $0x90] ss:$8 sps:$4 sm:$0xff]  }
 0x8e2   :  { %9066 = vmatpush3.bf16.msra.mxu0 %v14459_v30  ;;  %5358 = vmatprep.subr.bf16.mxu1 %v10999_v41  ;;  %v13005_v30 = vld [vmem:[#allocation8 + $0xa4] ss:$8 sps:$4 sm:$0xff]   ;;  %v11028_v41 = vld [vmem:[#allocation2 + $0xb90] ss:$36 sps:$4 sm:$0xff]  }
 0x8e3   :  { %9067 = vmatprep.subr.bf16.mxu0 %v14456_v40 }
 0x8e5   :  { %5359 = vmatpush1.bf16.msra.mxu1 %v11000_v12  ;;  %v11029_v12 = vld [vmem:[#allocation2 + $0xbdc] ss:$36 sps:$4 sm:$0xff]  }
 0x8e6   :  { %9068 = vmatpush3.bf16.msra.mxu0 %v14460_v38  ;;  %5360 = vmatprep.subr.bf16.mxu1 %v11001_v18  ;;  %v13008_v38 = vld [vmem:[#allocation8 + $0xa0] ss:$8 sps:$4 sm:$0xff]   ;;  %v13011_v18 = vld [vmem:[#allocation8 + $0xb4] ss:$8 sps:$4 sm:$0xff]  }
 0x8e7   :  { %9069 = vmatprep.subr.bf16.mxu0 %v14456_v40 }
 0x8e9   :  { %5361 = vmatpush1.bf16.msra.mxu1 %v11002_v16  ;;  %v11030_v16 = vld [vmem:[#allocation2 + $0xbd8] ss:$36 sps:$4 sm:$0xff]  }
 0x8ea   :  { %9070 = vmatpush3.bf16.msra.mxu0 %v14461_v31  ;;  %5362 = vmatprep.subr.bf16.mxu1 %v11003_v44  ;;  %v11031_v31 = vld [vmem:[#allocation2 + $0xc24] ss:$36 sps:$4 sm:$0xff]  }
 0x8eb   :  { %9071 = vmatprep.subr.bf16.mxu0 %v14456_v40  ;;  %v13014_v44 = vld [vmem:[#allocation8 + $0xb0] ss:$8 sps:$4 sm:$0xff]  }
 0x8ed   :  { %5363 = vmatpush1.bf16.msra.mxu1 %v11004_v21  ;;  %v13017_v21 = vld [vmem:[#allocation8 + $0xc4] ss:$8 sps:$4 sm:$0xff]  }
 0x8ee   :  { %9072 = vmatpush3.bf16.msra.mxu0 %v14462_v56  ;;  %5364 = vmatprep.subr.bf16.mxu1 %v11005_v6  ;;  %v11032_v56 = vld [vmem:[#allocation2 + $0xc20] ss:$36 sps:$4 sm:$0xff]   ;;  %v11033_v6 = vld [vmem:[#allocation2 + $0xc6c] ss:$36 sps:$4 sm:$0xff]  }
 0x8ef   :  { %9073 = vmatprep.subr.bf16.mxu0 %v14456_v40 }
 0x8f1   :  { %5365 = vmatpush1.bf16.msra.mxu1 %v11006_v20  ;;  %v13020_v20 = vld [vmem:[#allocation8 + $0xc0] ss:$8 sps:$4 sm:$0xff]  }
 0x8f2   :  { %9074 = vmatpush3.bf16.msra.mxu0 %v14463_v17  ;;  %5366 = vmatprep.subr.bf16.mxu1 %v11007_v34  ;;  %v13023_v17 = vld [vmem:[#allocation8 + $0xd4] ss:$8 sps:$4 sm:$0xff]  }
 0x8f3   :  { %9075 = vmatprep.subr.bf16.mxu0 %v14456_v40  ;;  %v11034_v34 = vld [vmem:[#allocation2 + $0xc68] ss:$36 sps:$4 sm:$0xff]  }
 0x8f5   :  { %5367 = vmatpush1.bf16.msra.mxu1 %v11008_v53  ;;  %v11035_v53 = vld [vmem:[#allocation2 + $0xcb4] ss:$36 sps:$4 sm:$0xff]  }
 0x8f6   :  { %9076 = vmatpush3.bf16.msra.mxu0 %v14464_v1  ;;  %5377 = vmatprep.subr.bf16.mxu1 %v11009_v47  ;;  %v13026_v1 = vld [vmem:[#allocation8 + $0xd0] ss:$8 sps:$4 sm:$0xff]   ;;  %v13029_v47 = vld [vmem:[#allocation8 + $0xe4] ss:$8 sps:$4 sm:$0xff]  }
 0x8f7   :  { %6858 = vmatprep.subr.bf16.mxu0 %v12942_v39 }
 0x8f8   :  { %5369 = vmatmul.mubr.bf16.vlgmr.msra.gmra.mrb[28].mxu1 %v12653_v42 }
 0x8f9   :  { %9078 = vmatmul.mubr.bf16.vlgmr.msra.gmra.mrb[44].mxu0 %v12896_v33  ;;  %5378 = vmatpush1.bf16.msra.mxu1 %v11010_v36  ;;  %v11036_v36 = vld [vmem:[#allocation2 + $0xcb0] ss:$36 sps:$4 sm:$0xff]  }
 0x8fa   :  { %5409 = vmatprep.mubr.bf16.mxu1 %v12856_v54  ;;  %5379 = vmatprep.subr.bf16.mxu1 %v11011_v52  ;;  %v11037_v52 = vld [vmem:[#allocation2 + $0xcfc] ss:$36 sps:$4 sm:$0xff]  }
 0x8fb   :  { %6859 = vmatpush1.bf16.msra.mxu0 %v12945_v51 }
 0x8fc   :  { %6860 = vmatprep.subr.bf16.mxu0 %v12949_v45 }
 0x8fd   :  { %5380 = vmatpush1.bf16.msra.mxu1 %v11012_v0  ;;  %v13032_v0 = vld [vmem:[#allocation8 + $0xe0] ss:$8 sps:$4 sm:$0xff]  }
 0x8fe   :  { %5381 = vmatprep.subr.bf16.mxu1 %v11013_v3  ;;  %v13035_v3 = vld [vmem:[#allocation8 + $0xf4] ss:$8 sps:$4 sm:$0xff]  }
 0x8ff   :  { %6861 = vmatpush1.bf16.msra.mxu0 %v12954_v15 }
 0x900   :  { %6862 = vmatprep.subr.bf16.mxu0 %v12957_v24 }
 0x901   :  { %5382 = vmatpush1.bf16.msra.mxu1 %v11014_v37  ;;  %v11038_v37 = vld [vmem:[#allocation2 + $0xcf8] ss:$36 sps:$4 sm:$0xff]  }
 0x902   :  { %5383 = vmatprep.subr.bf16.mxu1 %v11015_v46  ;;  %v11039_v46 = vld [vmem:[#allocation2 + $0xd44] ss:$36 sps:$4 sm:$0xff]  }
 0x903   :  { %6863 = vmatpush1.bf16.msra.mxu0 %v12960_v63 }
 0x904   :  { %6864 = vmatprep.subr.bf16.mxu0 %v12963_v60 }
 0x905   :  { %5384 = vmatpush1.bf16.msra.mxu1 %v11016_v35  ;;  %v13038_v35 = vld [vmem:[#allocation8 + $0xf0] ss:$8 sps:$4 sm:$0xff]  }
 0x906   :  { %5385 = vmatprep.subr.bf16.mxu1 %v11017_v19  ;;  %v11040_v19 = vld [vmem:[#allocation2 + $0xd40] ss:$36 sps:$4 sm:$0xff]  }
 0x907   :  { %6865 = vmatpush1.bf16.msra.mxu0 %v12966_v8 }
 0x908   :  { %6866 = vmatprep.subr.bf16.mxu0 %v12969_v10 }
 0x909   :  { %5386 = vmatpush1.bf16.msra.mxu1 %v11018_v26  ;;  %v11041_v26 = vld [vmem:[#allocation2 + $0xd8c] ss:$36 sps:$4 sm:$0xff]  }
 0x90a   :  { %5387 = vmatprep.subr.bf16.mxu1 %v11019_v28  ;;  %v11042_v28 = vld [vmem:[#allocation2 + $0xd88] ss:$36 sps:$4 sm:$0xff]  }
 0x90b   :  { %6867 = vmatpush1.bf16.msra.mxu0 %v12972_v22 }
 0x90c   :  { %6868 = vmatprep.subr.bf16.mxu0 %v12975_v49 }
 0x90d   :  { %5388 = vmatpush1.bf16.msra.mxu1 %v11020_v27  ;;  %v11043_v27 = vld [vmem:[#allocation2 + $0xdd4] ss:$36 sps:$4 sm:$0xff]  }
 0x90e   :  { %5389 = vmatprep.subr.bf16.mxu1 %v11021_v58  ;;  %v11044_v58 = vld [vmem:[#allocation2 + $0xdd0] ss:$36 sps:$4 sm:$0xff]  }
 0x90f   :  { %6869 = vmatpush1.bf16.msra.mxu0 %v12978_v57 }
 0x910   :  { %6870 = vmatprep.subr.bf16.mxu0 %v12981_v55 }
 0x911   :  { %5390 = vmatpush1.bf16.msra.mxu1 %v11022_v2  ;;  %v11045_v2 = vld [vmem:[#allocation2 + $0xe1c] ss:$36 sps:$4 sm:$0xff]  }
 0x912   :  { %5391 = vmatprep.subr.bf16.mxu1 %v11023_v11  ;;  %v11046_v11 = vld [vmem:[#allocation2 + $0xe18] ss:$36 sps:$4 sm:$0xff]  }
 0x913   :  { %6871 = vmatpush1.bf16.msra.mxu0 %v12984_v61 }
 0x914   :  { %6872 = vmatprep.subr.bf16.mxu0 %v12987_v4 }
 0x915   :  { %5392 = vmatpush1.bf16.msra.mxu1 %v11024_v25  ;;  %v11047_v25 = vld [vmem:[#allocation2 + $0xe64] ss:$36 sps:$4 sm:$0xff]  }
 0x916   :  { %5393 = vmatprep.subr.bf16.mxu1 %v11025_v5  ;;  %v11048_v5 = vld [vmem:[#allocation2 + $0xe60] ss:$36 sps:$4 sm:$0xff]  }
 0x917   :  { %6873 = vmatpush1.bf16.msra.mxu0 %v12990_v13 }
 0x918   :  { %6874 = vmatprep.subr.bf16.mxu0 %v12993_v62 }
 0x919   :  { %5394 = vmatpush1.bf16.msra.mxu1 %v11026_v50  ;;  %v11049_v50 = vld [vmem:[#allocation2 + $0xeac] ss:$36 sps:$4 sm:$0xff]  }
 0x91a   :  { %5395 = vmatprep.subr.bf16.mxu1 %v11027_v9  ;;  %v11050_v9 = vld [vmem:[#allocation2 + $0xea8] ss:$36 sps:$4 sm:$0xff]  }
 0x91b   :  { %6875 = vmatpush1.bf16.msra.mxu0 %v12996_v14 }
 0x91c   :  { %6876 = vmatprep.subr.bf16.mxu0 %v12999_v29 }
 0x91d   :  { %5396 = vmatpush1.bf16.msra.mxu1 %v11028_v41  ;;  %v11051_v41 = vld [vmem:[#allocation2 + $0xef4] ss:$36 sps:$4 sm:$0xff]  }
 0x91e   :  { %5397 = vmatprep.subr.bf16.mxu1 %v11029_v12 }
 0x91f   :  { %6877 = vmatpush1.bf16.msra.mxu0 %v13002_v23 }
 0x920   :  { %6878 = vmatprep.subr.bf16.mxu0 %v13005_v30 }
 0x921   :  { %5398 = vmatpush1.bf16.msra.mxu1 %v11030_v16 }
 0x922   :  { %5399 = vmatprep.subr.bf16.mxu1 %v11031_v31  ;;  %v14465_v31 = vld [vmem:[#allocation39_spill] sm:$0xff] }
 0x923   :  { %6879 = vmatpush1.bf16.msra.mxu0 %v13008_v38 }
 0x924   :  { %6880 = vmatprep.subr.bf16.mxu0 %v13011_v18 }
 0x925   :  { %5400 = vmatpush1.bf16.msra.mxu1 %v11032_v56 }
 0x926   :  { %5401 = vmatprep.subr.bf16.mxu1 %v11033_v6 }
 0x927   :  { %6881 = vmatpush1.bf16.msra.mxu0 %v13014_v44 }
 0x928   :  { %6882 = vmatprep.subr.bf16.mxu0 %v13017_v21 }
 0x929   :  { %5402 = vmatpush1.bf16.msra.mxu1 %v11034_v34 }
 0x92a   :  { %5403 = vmatprep.subr.bf16.mxu1 %v11035_v53  ;;  %v14466_v53 = vld [vmem:[#allocation35_spill] sm:$0xff] }
 0x92b   :  { %6883 = vmatpush1.bf16.msra.mxu0 %v13020_v20 }
 0x92c   :  { %6884 = vmatprep.subr.bf16.mxu0 %v13023_v17 }
 0x92d   :  { %5404 = vmatpush1.bf16.msra.mxu1 %v11036_v36 }
 0x92e   :  { %5405 = vmatprep.subr.bf16.mxu1 %v11037_v52 }
 0x92f   :  { %6885 = vmatpush1.bf16.msra.mxu0 %v13026_v1 }
 0x930   :  { %6886 = vmatprep.subr.bf16.mxu0 %v13029_v47 }
 0x931   :  { %5406 = vmatpush1.bf16.msra.mxu1 %v11038_v37  ;;  %v11052_v37 = vld [vmem:[#allocation2 + $0xef0] ss:$36 sps:$4 sm:$0xff]  }
 0x932   :  { %5407 = vmatprep.subr.bf16.mxu1 %v11039_v46 }
 0x933   :  { %6887 = vmatpush1.bf16.msra.mxu0 %v13032_v0 }
 0x934   :  { %6888 = vmatprep.subr.bf16.mxu0 %v13035_v3 }
 0x935   :  { %5408 = vmatpush1.bf16.msra.mxu1 %v11040_v19  ;;  %v14467_v19 = vld [vmem:[#allocation43_spill] sm:$0xff] }
 0x936   :  { %5418 = vmatprep.subr.bf16.mxu1 %v11041_v26 }
 0x937   :  { %6889 = vmatpush1.bf16.msra.mxu0 %v13038_v35 }
 0x938   :  { %5410 = vmatmul.mubr.bf16.vlgmr.msra.gmra.mrb[28].mxu1 %v12858_v48 }
 0x939   :  { %5419 = vmatpush1.bf16.msra.mxu1 %v11042_v28  ;;  %5450 = vmatprep.mubr.bf16.mxu1 %v14430_v43 }
 0x93a   :  { %5420 = vmatprep.subr.bf16.mxu1 %v11043_v27 }
 0x93d   :  { %5421 = vmatpush1.bf16.msra.mxu1 %v11044_v58  ;;  %v11053_v58 = vld [vmem:[#allocation2 + $0xf3c] ss:$36 sps:$4 sm:$0xff]  }
 0x93e   :  { %5422 = vmatprep.subr.bf16.mxu1 %v11045_v2  ;;  %v14468_v2 = vld [vmem:[#allocation37_spill] sm:$0xff] }
 0x941   :  { %5423 = vmatpush1.bf16.msra.mxu1 %v11046_v11 }
 0x942   :  { %5424 = vmatprep.subr.bf16.mxu1 %v11047_v25  ;;  %v14469_v25 = vld [vmem:[#allocation41_spill] sm:$0xff] }
 0x945   :  { %5425 = vmatpush1.bf16.msra.mxu1 %v11048_v5 }
 0x946   :  { %5426 = vmatprep.subr.bf16.mxu1 %v11049_v50  ;;  %v14470_v50 = vld [vmem:[#allocation36_spill] sm:$0xff] }
 0x949   :  { %5427 = vmatpush1.bf16.msra.mxu1 %v11050_v9 }
 0x94a   :  { %5428 = vmatprep.subr.bf16.mxu1 %v11051_v41  ;;  %v11054_v41 = vld [vmem:[#allocation2 + $0xf38] ss:$36 sps:$4 sm:$0xff]  }
 0x94b   :  { %v5288_v12 = vpop.f32.mrb[24].mxu1  ;;  %v13044_v16 = vpop.f32.mrb[28].mxu0 }
 0x94c   :  { %v5947_v56 = vmul.f32 %v5288_v12, %v14465_v31  ;;  %v5290_v6 = vpop.f32.mrb[25].mxu1  ;;  %v13047_v34 = vpop.f32.mrb[29].mxu0  ;;  %v11055_v31 = vld [vmem:[#allocation2 + $0xf84] ss:$36 sps:$4 sm:$0xff]  }
 0x94d   :  { %v5948_v36 = vmul.f32 %v5290_v6, %v14466_v53  ;;  %v5292_v52 = vpop.f32.mrb[26].mxu1  ;;  %5429 = vmatpush1.bf16.msra.mxu1 %v11052_v37  ;;  %v5620_v46 = vpop.f32.mrb[30].mxu0  ;;  %v11056_v53 = vld [vmem:[#allocation2 + $0xf80] ss:$36 sps:$4 sm:$0xff]   ;;  %v11058_v37 = vld [vmem:[#allocation2 + $0x18] ss:$36 sps:$4 sm:$0xff]  }
 0x94e   :  { %v5956_v26 = vsub.f32 %v14467_v19, %v5947_v56  ;;  %v5293_v28 = vpop.f32.mrb[27].mxu1  ;;  %v5621_v27 = vpop.f32.mrb[31].mxu0  ;;  %5430 = vmatprep.subr.bf16.mxu1 %v11053_v58  ;;  %v11057_v52 = vld [vmem:[#allocation2 + $0x1c] ss:$36 sps:$4 sm:$0xff]   ;;  %v11059_v46 = vld [vmem:[#allocation2 + $0x64] ss:$36 sps:$4 sm:$0xff]  }
 0x94f   :  { %v5957_v11 = vsub.f32 %v14468_v2, %v5948_v36  ;;  %v11060_v19 = vld [vmem:[#allocation2 + $0x60] ss:$36 sps:$4 sm:$0xff]   ;;  %v11062_v28 = vld [vmem:[#allocation2 + $0xa8] ss:$36 sps:$4 sm:$0xff]   ;;  %v11063_v27 = vld [vmem:[#allocation2 + $0xf4] ss:$36 sps:$4 sm:$0xff]  }
 0x950   :  { %v5965_v5 = vadd.f32 %v5956_v26, %v14469_v25  ;;  %v11061_v26 = vld [vmem:[#allocation2 + $0xac] ss:$36 sps:$4 sm:$0xff]   ;;  %v11065_v2 = vld [vmem:[#allocation2 + $0x13c] ss:$36 sps:$4 sm:$0xff]   ;;  %v11067_v25 = vld [vmem:[#allocation2 + $0x184] ss:$36 sps:$4 sm:$0xff]  }
 0x951   :  { %v5966_v9 = vadd.f32 %v5957_v11, %v14470_v50  ;;  %5431 = vmatpush1.bf16.msra.mxu1 %v11054_v41  ;;  %v11064_v58 = vld [vmem:[#allocation2 + $0xf0] ss:$36 sps:$4 sm:$0xff]   ;;  %v11066_v11 = vld [vmem:[#allocation2 + $0x138] ss:$36 sps:$4 sm:$0xff]   ;;  %v11068_v50 = vld [vmem:[#allocation2 + $0x180] ss:$36 sps:$4 sm:$0xff]  }
 0x952   :  { %v13054_v12 = vmax.f32 %v5965_v5, 0.0  ;;  %5432 = vmatprep.subr.bf16.mxu1 %v11055_v31  ;;  %v11069_v31 = vld [vmem:[#allocation2 + $0x1cc] ss:$36 sps:$4 sm:$0xff]  }
 0x953   :  { %v13056_v6 = vmax.f32 %v5966_v9, 0.0 }
 0x954   :  { %14471 = vst [vmem:[#allocation54_spill] sm:$0xff] %v13054_v12  ;;  %v6129_v36 = vpack.c.bf16 %v13054_v12, %v13054_v12  ;;  %v11085_v12 = vld [vmem:[#allocation2 + $0x40c] ss:$36 sps:$4 sm:$0xff]  }
 0x955   :  { %14472 = vst [vmem:[#allocation55_spill] sm:$0xff] %v13056_v6  ;;  %5433 = vmatpush1.bf16.msra.mxu1 %v11056_v53  ;;  %v6130_v56 = vpack.c.bf16 %v13056_v6, %v13056_v6 }
 0x956   :  { %5623 = vmatprep.subr.bf16.mxu1 %v11057_v52  ;;  %v11072_v52 = vld [vmem:[#allocation2 + $0x210] ss:$36 sps:$4 sm:$0xff]  }
 0x957   :  { %6890 = vmatprep.mubr.bf16.mxu0 %v6130_v56  ;;  %v11070_v56 = vld [vmem:[#allocation2 + $0x1c8] ss:$36 sps:$4 sm:$0xff]  }
 0x958   :  { %5451 = vmatmul.mubr.bf16.vlgmr.msra.gmra.mrb[28].mxu1 %v12896_v33  ;;  %6891 = vmatmul.mubr.bf16.vlgmr.msra.gmra.mrb[48].mxu0 %v6129_v36  ;;  %v11071_v36 = vld [vmem:[#allocation2 + $0x214] ss:$36 sps:$4 sm:$0xff]  }
 0x959   :  { %5624 = vmatpush1.bf16.msra.mxu1 %v11058_v37  ;;  %5655 = vmatprep.mubr.bf16.mxu1 %v12566_v59  ;;  %v13066_v37 = vld [vmem:[#allocation8 + $0x100] ss:$8 sps:$4 sm:$0xff]  }
 0x95a   :  { %5625 = vmatprep.subr.bf16.mxu1 %v11059_v46  ;;  %v13068_v46 = vld [vmem:[#allocation8 + $0x104] ss:$8 sps:$4 sm:$0xff]  }
 0x95b   :  { %6899 = vmatprep.subr.bf16.mxu0 %v13068_v46 }
 0x95c   :  { %6900 = vmatpush1.bf16.msra.mxu0 %v13066_v37 }
 0x95d   :  { %5626 = vmatpush1.bf16.msra.mxu1 %v11060_v19  ;;  %v11073_v19 = vld [vmem:[#allocation2 + $0x25c] ss:$36 sps:$4 sm:$0xff]  }
 0x95e   :  { %5627 = vmatprep.subr.bf16.mxu1 %v11061_v26  ;;  %v11074_v26 = vld [vmem:[#allocation2 + $0x258] ss:$36 sps:$4 sm:$0xff]  }
 0x961   :  { %5628 = vmatpush1.bf16.msra.mxu1 %v11062_v28  ;;  %v13072_v28 = vld [vmem:[#allocation8 + $0x110] ss:$8 sps:$4 sm:$0xff]  }
 0x962   :  { %5629 = vmatprep.subr.bf16.mxu1 %v11063_v27  ;;  %v13074_v27 = vld [vmem:[#allocation8 + $0x114] ss:$8 sps:$4 sm:$0xff]  }
 0x963   :  { %6901 = vmatprep.subr.bf16.mxu0 %v13074_v27 }
 0x964   :  { %6902 = vmatpush1.bf16.msra.mxu0 %v13072_v28 }
 0x965   :  { %5630 = vmatpush1.bf16.msra.mxu1 %v11064_v58  ;;  %v11075_v58 = vld [vmem:[#allocation2 + $0x2a4] ss:$36 sps:$4 sm:$0xff]  }
 0x966   :  { %5631 = vmatprep.subr.bf16.mxu1 %v11065_v2  ;;  %v11076_v2 = vld [vmem:[#allocation2 + $0x2a0] ss:$36 sps:$4 sm:$0xff]  }
 0x969   :  { %5632 = vmatpush1.bf16.msra.mxu1 %v11066_v11  ;;  %v13078_v11 = vld [vmem:[#allocation8 + $0x120] ss:$8 sps:$4 sm:$0xff]  }
 0x96a   :  { %5633 = vmatprep.subr.bf16.mxu1 %v11067_v25  ;;  %v13080_v25 = vld [vmem:[#allocation8 + $0x124] ss:$8 sps:$4 sm:$0xff]  }
 0x96b   :  { %6903 = vmatprep.subr.bf16.mxu0 %v13080_v25 }
 0x96c   :  { %v8853_v5 = vpop.f32.mrb[32].mxu0  ;;  %6904 = vmatpush1.bf16.msra.mxu0 %v13078_v11 }
 0x96d   :  { %v8854_v59 = vpop.f32.mrb[33].mxu0  ;;  %5634 = vmatpush1.bf16.msra.mxu1 %v11068_v50  ;;  %v13084_v50 = vld [vmem:[#allocation8 + $0x130] ss:$8 sps:$4 sm:$0xff]  }
 0x96e   :  { %v13064_v9 = vadd.f32 %v8854_v59, %v8853_v5  ;;  %v8856_v41 = vpop.f32.mrb[34].mxu0  ;;  %5635 = vmatprep.subr.bf16.mxu1 %v11069_v31  ;;  %v11077_v5 = vld [vmem:[#allocation2 + $0x2ec] ss:$36 sps:$4 sm:$0xff]   ;;  %14473 = vst [vmem:[#allocation56_spill] sm:$0xff] %v13084_v50  ;;  %v11079_v31 = vld [vmem:[#allocation2 + $0x334] ss:$36 sps:$4 sm:$0xff]  }
 0x96f   :  { %v8857_v53 = vpop.f32.mrb[35].mxu0  ;;  %v11078_v59 = vld [vmem:[#allocation2 + $0x2e8] ss:$36 sps:$4 sm:$0xff]  }
 0x970   :  { %v13086_v41 = vld [vmem:[#allocation8 + $0x134] ss:$8 sps:$4 sm:$0xff]  }
 0x971   :  { %5636 = vmatpush1.bf16.msra.mxu1 %v11070_v56  ;;  %14474 = vst [vmem:[#allocation57_spill] sm:$0xff] %v13086_v41  ;;  %6905 = vmatprep.subr.bf16.mxu0 %v13086_v41  ;;  %v11080_v53 = vld [vmem:[#allocation2 + $0x330] ss:$36 sps:$4 sm:$0xff]  }
 0x972   :  { %5637 = vmatprep.subr.bf16.mxu1 %v11071_v36  ;;  %6906 = vmatpush1.bf16.msra.mxu0 %v13084_v50  ;;  %v13090_v56 = vld [vmem:[#allocation8 + $0x140] ss:$8 sps:$4 sm:$0xff]   ;;  %v13092_v36 = vld [vmem:[#allocation8 + $0x144] ss:$8 sps:$4 sm:$0xff]  }
 0x973   :  { %14475 = vst [vmem:[#allocation58_spill] sm:$0xff] %v13090_v56  ;;  %14476 = vst [vmem:[#allocation59_spill] sm:$0xff] %v13092_v36  ;;  %6907 = vmatprep.subr.bf16.mxu0 %v13092_v36  ;;  %v11165_v36 = vld [vmem:[#allocation2 + $0xf4c] ss:$36 sps:$4 sm:$0xff]   ;;  %v14506_v50 = vld [vmem:[#allocation70_spill] sm:$0xff] }
 0x975   :  { %5638 = vmatpush1.bf16.msra.mxu1 %v11072_v52  ;;  %v11081_v52 = vld [vmem:[#allocation2 + $0x37c] ss:$36 sps:$4 sm:$0xff]  }
 0x976   :  { %5639 = vmatprep.subr.bf16.mxu1 %v11073_v19  ;;  %6908 = vmatpush1.bf16.msra.mxu0 %v13090_v56  ;;  %v11082_v19 = vld [vmem:[#allocation2 + $0x378] ss:$36 sps:$4 sm:$0xff]  }
 0x977   :  { %v11087_v56 = vld [vmem:[#allocation2 + $0x454] ss:$36 sps:$4 sm:$0xff]  }
 0x979   :  { %5640 = vmatpush1.bf16.msra.mxu1 %v11074_v26  ;;  %v13096_v26 = vld [vmem:[#allocation8 + $0x150] ss:$8 sps:$4 sm:$0xff]  }
 0x97a   :  { %5641 = vmatprep.subr.bf16.mxu1 %v11075_v58  ;;  %14477 = vst [vmem:[#allocation60_spill] sm:$0xff] %v13096_v26  ;;  %v13098_v58 = vld [vmem:[#allocation8 + $0x154] ss:$8 sps:$4 sm:$0xff]  }
 0x97b   :  { %14478 = vst [vmem:[#allocation61_spill] sm:$0xff] %v13098_v58  ;;  %6909 = vmatprep.subr.bf16.mxu0 %v13098_v58  ;;  %v13111_v58 = vld [vmem:[#allocation8 + $0x170] ss:$8 sps:$4 sm:$0xff]  }
 0x97c   :  { %6910 = vmatpush1.bf16.msra.mxu0 %v13096_v26  ;;  %v11086_v26 = vld [vmem:[#allocation2 + $0x408] ss:$36 sps:$4 sm:$0xff]   ;;  %14481 = vst [vmem:[#allocation64_spill] sm:$0xff] %v13111_v58 }
 0x97d   :  { %5642 = vmatpush1.bf16.msra.mxu1 %v11076_v2  ;;  %v11083_v2 = vld [vmem:[#allocation2 + $0x3c4] ss:$36 sps:$4 sm:$0xff]  }
 0x97e   :  { %5643 = vmatprep.subr.bf16.mxu1 %v11077_v5 }
 0x981   :  { %5644 = vmatpush1.bf16.msra.mxu1 %v11078_v59 }
 0x982   :  { %5645 = vmatprep.subr.bf16.mxu1 %v11079_v31  ;;  %v11084_v31 = vld [vmem:[#allocation2 + $0x3c0] ss:$36 sps:$4 sm:$0xff]  }
 0x985   :  { %5646 = vmatpush1.bf16.msra.mxu1 %v11080_v53  ;;  %v13102_v53 = vld [vmem:[#allocation8 + $0x160] ss:$8 sps:$4 sm:$0xff]  }
 0x986   :  { %5647 = vmatprep.subr.bf16.mxu1 %v11081_v52  ;;  %14479 = vst [vmem:[#allocation62_spill] sm:$0xff] %v13102_v53  ;;  %v13104_v52 = vld [vmem:[#allocation8 + $0x164] ss:$8 sps:$4 sm:$0xff]  }
 0x987   :  { %14480 = vst [vmem:[#allocation63_spill] sm:$0xff] %v13104_v52  ;;  %6911 = vmatprep.subr.bf16.mxu0 %v13104_v52 }
 0x988   :  { %6912 = vmatpush1.bf16.msra.mxu0 %v13102_v53  ;;  %v11118_v53 = vld [vmem:[#allocation2 + $0x888] ss:$36 sps:$4 sm:$0xff]  }
 0x989   :  { %5648 = vmatpush1.bf16.msra.mxu1 %v11082_v19 }
 0x98a   :  { %5649 = vmatprep.subr.bf16.mxu1 %v11083_v2 }
 0x98c   :  { %v8875_v5 = vpop.f32.mrb[36].mxu0 }
 0x98d   :  { %v8876_v59 = vpop.f32.mrb[37].mxu0  ;;  %5650 = vmatpush1.bf16.msra.mxu1 %v11084_v31  ;;  %v13113_v31 = vld [vmem:[#allocation8 + $0x174] ss:$8 sps:$4 sm:$0xff]  }
 0x98e   :  { %v8877_v40 = vadd.f32 %v8876_v59, %v8875_v5  ;;  %v8878_v19 = vpop.f32.mrb[38].mxu0  ;;  %5651 = vmatprep.subr.bf16.mxu1 %v11085_v12  ;;  %14482 = vst [vmem:[#allocation65_spill] sm:$0xff] %v13113_v31  ;;  %6913 = vmatprep.subr.bf16.mxu0 %v13113_v31  ;;  %v11088_v12 = vld [vmem:[#allocation2 + $0x450] ss:$36 sps:$4 sm:$0xff]   ;;  %v11091_v59 = vld [vmem:[#allocation2 + $0x4e4] ss:$36 sps:$4 sm:$0xff]  }
 0x98f   :  { %v8879_v6 = vpop.f32.mrb[39].mxu0  ;;  %6914 = vmatpush1.bf16.msra.mxu0 %v13111_v58  ;;  %v13127_v5 = vld [vmem:[#allocation8 + $0x194] ss:$8 sps:$4 sm:$0xff]   ;;  %v11092_v19 = vld [vmem:[#allocation2 + $0x4e0] ss:$36 sps:$4 sm:$0xff]  }
 0x990   :  { %v13108_v2 = vadd.f32 %v8877_v40, %v13064_v9  ;;  %v13117_v6 = vld [vmem:[#allocation8 + $0x180] ss:$8 sps:$4 sm:$0xff]   ;;  %v13119_v40 = vld [vmem:[#allocation8 + $0x184] ss:$8 sps:$4 sm:$0xff]   ;;  %14486 = vst [vmem:[#allocation27_spill] sm:$0xff] %v13127_v5 }
 0x991   :  { %5652 = vmatpush1.bf16.msra.mxu1 %v11086_v26  ;;  %14483 = vst [vmem:[#allocation66_spill] sm:$0xff] %v13117_v6  ;;  %14484 = vst [vmem:[#allocation67_spill] sm:$0xff] %v13119_v40  ;;  %v11089_v9 = vld [vmem:[#allocation2 + $0x49c] ss:$36 sps:$4 sm:$0xff]   ;;  %6915 = vmatprep.subr.bf16.mxu0 %v13119_v40  ;;  %v11101_v58 = vld [vmem:[#allocation2 + $0x64c] ss:$36 sps:$4 sm:$0xff]  }
 0x992   :  { %5653 = vmatprep.subr.bf16.mxu1 %v11087_v56  ;;  %v11090_v26 = vld [vmem:[#allocation2 + $0x498] ss:$36 sps:$4 sm:$0xff]   ;;  %v13125_v56 = vld [vmem:[#allocation8 + $0x190] ss:$8 sps:$4 sm:$0xff]  }
 0x993   :  { %6916 = vmatpush1.bf16.msra.mxu0 %v13117_v6  ;;  %14485 = vst [vmem:[#allocation69_spill] sm:$0xff] %v13125_v56  ;;  %v11100_v6 = vld [vmem:[#allocation2 + $0x600] ss:$36 sps:$4 sm:$0xff]   ;;  %v11102_v31 = vld [vmem:[#allocation2 + $0x648] ss:$36 sps:$4 sm:$0xff]  }
 0x994   :  { %6917 = vmatprep.subr.bf16.mxu0 %v13127_v5  ;;  %v11095_v5 = vld [vmem:[#allocation2 + $0x574] ss:$36 sps:$4 sm:$0xff]  }
 0x995   :  { %5654 = vmatpush1.bf16.msra.mxu1 %v11088_v12  ;;  %v13131_v12 = vld [vmem:[#allocation8 + $0x1a0] ss:$8 sps:$4 sm:$0xff]  }
 0x996   :  { %5664 = vmatprep.subr.bf16.mxu1 %v11089_v9  ;;  %14487 = vst [vmem:[#allocation71_spill] sm:$0xff] %v13131_v12  ;;  %v11093_v9 = vld [vmem:[#allocation2 + $0x52c] ss:$36 sps:$4 sm:$0xff]  }
 0x997   :  { %6918 = vmatpush1.bf16.msra.mxu0 %v13125_v56  ;;  %v13143_v56 = vld [vmem:[#allocation8 + $0x1c0] ss:$8 sps:$4 sm:$0xff]  }
 0x998   :  { %5656 = vmatmul.mubr.bf16.vlgmr.msra.gmra.mrb[32].mxu1 %v12595_v32  ;;  %v13133_v32 = vld [vmem:[#allocation8 + $0x1a4] ss:$8 sps:$4 sm:$0xff]   ;;  %14491 = vst [vmem:[#allocation83_spill] sm:$0xff] %v13143_v56 }
 0x999   :  { %5665 = vmatpush1.bf16.msra.mxu1 %v11090_v26  ;;  %5696 = vmatprep.mubr.bf16.mxu1 %v12598_v7  ;;  %14488 = vst [vmem:[#allocation30_spill] sm:$0xff] %v13133_v32  ;;  %v11094_v7 = vld [vmem:[#allocation2 + $0x528] ss:$36 sps:$4 sm:$0xff]  }
 0x99a   :  { %5666 = vmatprep.subr.bf16.mxu1 %v11091_v59  ;;  %6919 = vmatprep.subr.bf16.mxu0 %v13133_v32  ;;  %v13137_v26 = vld [vmem:[#allocation8 + $0x1b0] ss:$8 sps:$4 sm:$0xff]   ;;  %v13139_v59 = vld [vmem:[#allocation8 + $0x1b4] ss:$8 sps:$4 sm:$0xff]   ;;  %v11097_v32 = vld [vmem:[#allocation2 + $0x5bc] ss:$36 sps:$4 sm:$0xff]  }
 0x99b   :  { %6920 = vmatpush1.bf16.msra.mxu0 %v13131_v12  ;;  %14489 = vst [vmem:[#allocation72_spill] sm:$0xff] %v13137_v26  ;;  %14490 = vst [vmem:[#allocation29_spill] sm:$0xff] %v13139_v59  ;;  %v11099_v12 = vld [vmem:[#allocation2 + $0x604] ss:$36 sps:$4 sm:$0xff]  }
 0x99c   :  { %6921 = vmatprep.subr.bf16.mxu0 %v13139_v59 }
 0x99d   :  { %5667 = vmatpush1.bf16.msra.mxu1 %v11092_v19  ;;  %v11096_v19 = vld [vmem:[#allocation2 + $0x570] ss:$36 sps:$4 sm:$0xff]  }
 0x99e   :  { %5668 = vmatprep.subr.bf16.mxu1 %v11093_v9  ;;  %v13145_v9 = vld [vmem:[#allocation8 + $0x1c4] ss:$8 sps:$4 sm:$0xff]  }
 0x99f   :  { %6922 = vmatpush1.bf16.msra.mxu0 %v13137_v26  ;;  %14492 = vst [vmem:[#allocation84_spill] sm:$0xff] %v13145_v9  ;;  %v13151_v26 = vld [vmem:[#allocation8 + $0x1d0] ss:$8 sps:$4 sm:$0xff]  }
 0x9a0   :  { %6923 = vmatprep.subr.bf16.mxu0 %v13145_v9  ;;  %14494 = vst [vmem:[#allocation86_spill] sm:$0xff] %v13151_v26  ;;  %v13158_v9 = vld [vmem:[#allocation8 + $0x1e0] ss:$8 sps:$4 sm:$0xff]  }
 0x9a1   :  { %5669 = vmatpush1.bf16.msra.mxu1 %v11094_v7  ;;  %v11098_v7 = vld [vmem:[#allocation2 + $0x5b8] ss:$36 sps:$4 sm:$0xff]   ;;  %14496 = vst [vmem:[#allocation88_spill] sm:$0xff] %v13158_v9 }
 0x9a2   :  { %5670 = vmatprep.subr.bf16.mxu1 %v11095_v5  ;;  %v13149_v5 = vld [vmem:[#allocation8 + $0x1d4] ss:$8 sps:$4 sm:$0xff]  }
 0x9a3   :  { %6924 = vmatpush1.bf16.msra.mxu0 %v13143_v56  ;;  %14493 = vst [vmem:[#allocation85_spill] sm:$0xff] %v13149_v5 }
 0x9a4   :  { %6925 = vmatprep.subr.bf16.mxu0 %v13149_v5  ;;  %v11116_v5 = vld [vmem:[#allocation2 + $0x840] ss:$36 sps:$4 sm:$0xff]  }
 0x9a5   :  { %5671 = vmatpush1.bf16.msra.mxu1 %v11096_v19 }
 0x9a6   :  { %5672 = vmatprep.subr.bf16.mxu1 %v11097_v32 }
 0x9a7   :  { %6926 = vmatpush1.bf16.msra.mxu0 %v13151_v26 }
 0x9a9   :  { %5673 = vmatpush1.bf16.msra.mxu1 %v11098_v7  ;;  %v13155_v7 = vld [vmem:[#allocation8 + $0x1e4] ss:$8 sps:$4 sm:$0xff]  }
 0x9aa   :  { %5674 = vmatprep.subr.bf16.mxu1 %v11099_v12  ;;  %14495 = vst [vmem:[#allocation87_spill] sm:$0xff] %v13155_v7  ;;  %6927 = vmatprep.subr.bf16.mxu0 %v13155_v7  ;;  %v11115_v7 = vld [vmem:[#allocation2 + $0x844] ss:$36 sps:$4 sm:$0xff]  }
 0x9ab   :  { %6928 = vmatpush1.bf16.msra.mxu0 %v13158_v9  ;;  %v11110_v9 = vld [vmem:[#allocation2 + $0x768] ss:$36 sps:$4 sm:$0xff]  }
 0x9ac   :  { %v8897_v59 = vpop.f32.mrb[40].mxu0 }
 0x9ad   :  { %v8898_v19 = vpop.f32.mrb[41].mxu0  ;;  %5675 = vmatpush1.bf16.msra.mxu1 %v11100_v6  ;;  %v11103_v6 = vld [vmem:[#allocation2 + $0x694] ss:$36 sps:$4 sm:$0xff]  }
 0x9ae   :  { %v8899_v40 = vadd.f32 %v8898_v19, %v8897_v59  ;;  %v8900_v32 = vpop.f32.mrb[42].mxu0  ;;  %5676 = vmatprep.subr.bf16.mxu1 %v11101_v58  ;;  %v13162_v59 = vld [vmem:[#allocation8 + $0x1f4] ss:$8 sps:$4 sm:$0xff]   ;;  %v13164_v58 = vld [vmem:[#allocation8 + $0x1f0] ss:$8 sps:$4 sm:$0xff]  }
 0x9af   :  { %v8901_v56 = vpop.f32.mrb[43].mxu0  ;;  %14497 = vst [vmem:[#allocation89_spill] sm:$0xff] %v13162_v59  ;;  %14498 = vst [vmem:[#allocation90_spill] sm:$0xff] %v13164_v58  ;;  %v11104_v19 = vld [vmem:[#allocation2 + $0x690] ss:$36 sps:$4 sm:$0xff]   ;;  %6929 = vmatprep.subr.bf16.mxu0 %v13162_v59 }
 0x9b0   :  { %v5902_v12 = vadd.f32 %v8899_v40, %v13108_v2  ;;  %v11105_v56 = vld [vmem:[#allocation2 + $0x6dc] ss:$36 sps:$4 sm:$0xff]   ;;  %6930 = vmatpush1.bf16.msra.mxu0 %v13164_v58  ;;  %v11107_v40 = vld [vmem:[#allocation2 + $0x724] ss:$36 sps:$4 sm:$0xff]   ;;  %v11112_v59 = vld [vmem:[#allocation2 + $0x7b0] ss:$36 sps:$4 sm:$0xff]  }
 0x9b1   :  { %5677 = vmatpush1.bf16.msra.mxu1 %v11102_v31  ;;  %v13168_v2 = vld [vmem:[#allocation8 + $0x204] ss:$8 sps:$4 sm:$0xff]  }
 0x9b2   :  { %5678 = vmatprep.subr.bf16.mxu1 %v11103_v6  ;;  %v11106_v31 = vld [vmem:[#allocation2 + $0x6d8] ss:$36 sps:$4 sm:$0xff]   ;;  %6940 = vmatprep.subr.bf16.mxu0 %v13168_v2  ;;  %v11108_v32 = vld [vmem:[#allocation2 + $0x720] ss:$36 sps:$4 sm:$0xff]   ;;  %v11109_v6 = vld [vmem:[#allocation2 + $0x76c] ss:$36 sps:$4 sm:$0xff]  }
 0x9b3   :  { %v11114_v58 = vld [vmem:[#allocation2 + $0x7f8] ss:$36 sps:$4 sm:$0xff]  }
 0x9b5   :  { %5679 = vmatpush1.bf16.msra.mxu1 %v11104_v19  ;;  %v11111_v19 = vld [vmem:[#allocation2 + $0x7b4] ss:$36 sps:$4 sm:$0xff]  }
 0x9b6   :  { %5680 = vmatprep.subr.bf16.mxu1 %v11105_v56  ;;  %v11113_v56 = vld [vmem:[#allocation2 + $0x7fc] ss:$36 sps:$4 sm:$0xff]  }
 0x9b9   :  { %5681 = vmatpush1.bf16.msra.mxu1 %v11106_v31 }
 0x9ba   :  { %5682 = vmatprep.subr.bf16.mxu1 %v11107_v40 }
 0x9bd   :  { %5683 = vmatpush1.bf16.msra.mxu1 %v11108_v32 }
 0x9be   :  { %5684 = vmatprep.subr.bf16.mxu1 %v11109_v6  ;;  %v11117_v6 = vld [vmem:[#allocation2 + $0x88c] ss:$36 sps:$4 sm:$0xff]  }
 0x9c1   :  { %5685 = vmatpush1.bf16.msra.mxu1 %v11110_v9 }
 0x9c2   :  { %5686 = vmatprep.subr.bf16.mxu1 %v11111_v19  ;;  %v11119_v19 = vld [vmem:[#allocation2 + $0x8d4] ss:$36 sps:$4 sm:$0xff]  }
 0x9c5   :  { %5687 = vmatpush1.bf16.msra.mxu1 %v11112_v59  ;;  %v11120_v59 = vld [vmem:[#allocation2 + $0x8d0] ss:$36 sps:$4 sm:$0xff]  }
 0x9c6   :  { %5688 = vmatprep.subr.bf16.mxu1 %v11113_v56  ;;  %v11121_v56 = vld [vmem:[#allocation2 + $0x91c] ss:$36 sps:$4 sm:$0xff]  }
 0x9c9   :  { %5689 = vmatpush1.bf16.msra.mxu1 %v11114_v58  ;;  %v11125_v58 = vld [vmem:[#allocation2 + $0x9ac] ss:$36 sps:$4 sm:$0xff]  }
 0x9ca   :  { %5690 = vmatprep.subr.bf16.mxu1 %v11115_v7  ;;  %v11122_v7 = vld [vmem:[#allocation2 + $0x918] ss:$36 sps:$4 sm:$0xff]  }
 0x9cc   :  { %v5941_v31 = vpop.f32.mrb[44].mxu0 }
 0x9cd   :  { %v13171_v26 = vadd.f32 %v5941_v31, %v5902_v12  ;;  %v9079_v40 = vpop.f32.mrb[45].mxu0  ;;  %5691 = vmatpush1.bf16.msra.mxu1 %v11116_v5  ;;  %v11123_v12 = vld [vmem:[#allocation2 + $0x964] ss:$36 sps:$4 sm:$0xff]  }
 0x9ce   :  { %v5944_v32 = vpop.f32.mrb[46].mxu0  ;;  %5692 = vmatprep.subr.bf16.mxu1 %v11117_v6  ;;  %v11124_v5 = vld [vmem:[#allocation2 + $0x960] ss:$36 sps:$4 sm:$0xff]   ;;  %v11126_v31 = vld [vmem:[#allocation2 + $0x9a8] ss:$36 sps:$4 sm:$0xff]  }
 0x9cf   :  { %v9080_v9 = vpop.f32.mrb[47].mxu0  ;;  %v11128_v40 = vld [vmem:[#allocation2 + $0x9f0] ss:$36 sps:$4 sm:$0xff]   ;;  %v11129_v32 = vld [vmem:[#allocation2 + $0xa3c] ss:$36 sps:$4 sm:$0xff]  }
 0x9d0   :  { %v11130_v6 = vld [vmem:[#allocation2 + $0xa38] ss:$36 sps:$4 sm:$0xff]   ;;  %v11132_v9 = vld [vmem:[#allocation2 + $0xa80] ss:$36 sps:$4 sm:$0xff]  }
 0x9d1   :  { %5693 = vmatpush1.bf16.msra.mxu1 %v11118_v53  ;;  %v11127_v53 = vld [vmem:[#allocation2 + $0x9f4] ss:$36 sps:$4 sm:$0xff]  }
 0x9d2   :  { %5694 = vmatprep.subr.bf16.mxu1 %v11119_v19  ;;  %v11134_v19 = vld [vmem:[#allocation2 + $0xac8] ss:$36 sps:$4 sm:$0xff]  }
 0x9d5   :  { %5695 = vmatpush1.bf16.msra.mxu1 %v11120_v59  ;;  %v11135_v59 = vld [vmem:[#allocation2 + $0xb14] ss:$36 sps:$4 sm:$0xff]  }
 0x9d6   :  { %5705 = vmatprep.subr.bf16.mxu1 %v11121_v56  ;;  %v11136_v56 = vld [vmem:[#allocation2 + $0xb10] ss:$36 sps:$4 sm:$0xff]  }
 0x9d8   :  { %5697 = vmatmul.mubr.bf16.vlgmr.msra.gmra.mrb[32].mxu1 %v12653_v42  ;;  %v11131_v42 = vld [vmem:[#allocation2 + $0xa84] ss:$36 sps:$4 sm:$0xff]  }
 0x9d9   :  { %5706 = vmatpush1.bf16.msra.mxu1 %v11122_v7  ;;  %5737 = vmatprep.mubr.bf16.mxu1 %v12856_v54  ;;  %v11133_v54 = vld [vmem:[#allocation2 + $0xacc] ss:$36 sps:$4 sm:$0xff]   ;;  %v11137_v7 = vld [vmem:[#allocation2 + $0xb5c] ss:$36 sps:$4 sm:$0xff]  }
 0x9da   :  { %5707 = vmatprep.subr.bf16.mxu1 %v11123_v12  ;;  %v11138_v12 = vld [vmem:[#allocation2 + $0xb58] ss:$36 sps:$4 sm:$0xff]  }
 0x9dd   :  { %5708 = vmatpush1.bf16.msra.mxu1 %v11124_v5  ;;  %v11139_v5 = vld [vmem:[#allocation2 + $0xba4] ss:$36 sps:$4 sm:$0xff]  }
 0x9de   :  { %5709 = vmatprep.subr.bf16.mxu1 %v11125_v58  ;;  %v11140_v58 = vld [vmem:[#allocation2 + $0xba0] ss:$36 sps:$4 sm:$0xff]  }
 0x9e1   :  { %5710 = vmatpush1.bf16.msra.mxu1 %v11126_v31  ;;  %v11141_v31 = vld [vmem:[#allocation2 + $0xbec] ss:$36 sps:$4 sm:$0xff]  }
 0x9e2   :  { %5711 = vmatprep.subr.bf16.mxu1 %v11127_v53  ;;  %v11142_v53 = vld [vmem:[#allocation2 + $0xbe8] ss:$36 sps:$4 sm:$0xff]  }
 0x9e5   :  { %5712 = vmatpush1.bf16.msra.mxu1 %v11128_v40  ;;  %v11143_v40 = vld [vmem:[#allocation2 + $0xc34] ss:$36 sps:$4 sm:$0xff]  }
 0x9e6   :  { %5713 = vmatprep.subr.bf16.mxu1 %v11129_v32  ;;  %v11144_v32 = vld [vmem:[#allocation2 + $0xc30] ss:$36 sps:$4 sm:$0xff]  }
 0x9e9   :  { %5714 = vmatpush1.bf16.msra.mxu1 %v11130_v6  ;;  %v11145_v6 = vld [vmem:[#allocation2 + $0xc7c] ss:$36 sps:$4 sm:$0xff]  }
 0x9ea   :  { %5715 = vmatprep.subr.bf16.mxu1 %v11131_v42  ;;  %v11146_v42 = vld [vmem:[#allocation2 + $0xc78] ss:$36 sps:$4 sm:$0xff]  }
 0x9ed   :  { %5716 = vmatpush1.bf16.msra.mxu1 %v11132_v9  ;;  %v11147_v9 = vld [vmem:[#allocation2 + $0xcc4] ss:$36 sps:$4 sm:$0xff]  }
 0x9ee   :  { %5717 = vmatprep.subr.bf16.mxu1 %v11133_v54  ;;  %v11148_v54 = vld [vmem:[#allocation2 + $0xcc0] ss:$36 sps:$4 sm:$0xff]  }
 0x9f1   :  { %5718 = vmatpush1.bf16.msra.mxu1 %v11134_v19  ;;  %v11149_v19 = vld [vmem:[#allocation2 + $0xd0c] ss:$36 sps:$4 sm:$0xff]  }
 0x9f2   :  { %5719 = vmatprep.subr.bf16.mxu1 %v11135_v59  ;;  %v11150_v59 = vld [vmem:[#allocation2 + $0xd08] ss:$36 sps:$4 sm:$0xff]  }
 0x9f5   :  { %5720 = vmatpush1.bf16.msra.mxu1 %v11136_v56  ;;  %v11151_v56 = vld [vmem:[#allocation2 + $0xd54] ss:$36 sps:$4 sm:$0xff]  }
 0x9f6   :  { %5721 = vmatprep.subr.bf16.mxu1 %v11137_v7  ;;  %v11152_v7 = vld [vmem:[#allocation2 + $0xd50] ss:$36 sps:$4 sm:$0xff]  }
 0x9f9   :  { %5722 = vmatpush1.bf16.msra.mxu1 %v11138_v12  ;;  %v11153_v12 = vld [vmem:[#allocation2 + $0xd9c] ss:$36 sps:$4 sm:$0xff]  }
 0x9fa   :  { %5723 = vmatprep.subr.bf16.mxu1 %v11139_v5  ;;  %v11154_v5 = vld [vmem:[#allocation2 + $0xd98] ss:$36 sps:$4 sm:$0xff]  }
 0x9fd   :  { %5724 = vmatpush1.bf16.msra.mxu1 %v11140_v58  ;;  %v11155_v58 = vld [vmem:[#allocation2 + $0xde4] ss:$36 sps:$4 sm:$0xff]  }
 0x9fe   :  { %5725 = vmatprep.subr.bf16.mxu1 %v11141_v31  ;;  %v11156_v31 = vld [vmem:[#allocation2 + $0xde0] ss:$36 sps:$4 sm:$0xff]  }
 0xa01   :  { %5726 = vmatpush1.bf16.msra.mxu1 %v11142_v53  ;;  %v11157_v53 = vld [vmem:[#allocation2 + $0xe2c] ss:$36 sps:$4 sm:$0xff]  }
 0xa02   :  { %5727 = vmatprep.subr.bf16.mxu1 %v11143_v40  ;;  %v11158_v40 = vld [vmem:[#allocation2 + $0xe28] ss:$36 sps:$4 sm:$0xff]  }
 0xa05   :  { %5728 = vmatpush1.bf16.msra.mxu1 %v11144_v32  ;;  %v11159_v32 = vld [vmem:[#allocation2 + $0xe74] ss:$36 sps:$4 sm:$0xff]  }
 0xa06   :  { %5729 = vmatprep.subr.bf16.mxu1 %v11145_v6  ;;  %v11160_v6 = vld [vmem:[#allocation2 + $0xe70] ss:$36 sps:$4 sm:$0xff]  }
 0xa09   :  { %5730 = vmatpush1.bf16.msra.mxu1 %v11146_v42  ;;  %v11161_v42 = vld [vmem:[#allocation2 + $0xebc] ss:$36 sps:$4 sm:$0xff]  }
 0xa0a   :  { %5731 = vmatprep.subr.bf16.mxu1 %v11147_v9  ;;  %v14499_v9 = vld [vmem:[#allocation74_spill] sm:$0xff] }
 0xa0d   :  { %5732 = vmatpush1.bf16.msra.mxu1 %v11148_v54  ;;  %v11162_v54 = vld [vmem:[#allocation2 + $0xeb8] ss:$36 sps:$4 sm:$0xff]  }
 0xa0e   :  { %5733 = vmatprep.subr.bf16.mxu1 %v11149_v19  ;;  %v11163_v19 = vld [vmem:[#allocation2 + $0xf04] ss:$36 sps:$4 sm:$0xff]  }
 0xa11   :  { %5734 = vmatpush1.bf16.msra.mxu1 %v11150_v59  ;;  %v14500_v59 = vld [vmem:[#allocation76_spill] sm:$0xff] }
 0xa12   :  { %5735 = vmatprep.subr.bf16.mxu1 %v11151_v56 }
 0xa15   :  { %5736 = vmatpush1.bf16.msra.mxu1 %v11152_v7 }
 0xa16   :  { %5746 = vmatprep.subr.bf16.mxu1 %v11153_v12  ;;  %v14501_v12 = vld [vmem:[#allocation68_spill] sm:$0xff] }
 0xa18   :  { %5738 = vmatmul.mubr.bf16.vlgmr.msra.gmra.mrb[32].mxu1 %v12858_v48  ;;  %v5952_v48 = vmul.f32 %v13047_v34, %v14499_v9  ;;  %v14504_v34 = vld [vmem:[#allocation75_spill] sm:$0xff] }
 0xa19   :  { %5747 = vmatpush1.bf16.msra.mxu1 %v11154_v5  ;;  %5778 = vmatprep.mubr.bf16.mxu1 %v14430_v43 }
 0xa1a   :  { %5748 = vmatprep.subr.bf16.mxu1 %v11155_v58  ;;  %v5961_v56 = vsub.f32 %v14500_v59, %v5952_v48  ;;  %v14507_v59 = vld [vmem:[#allocation42_spill] sm:$0xff] }
 0xa1c   :  { %v5970_v9 = vadd.f32 %v5961_v56, %v14504_v34  ;;  %v13195_v56 = vld [vmem:[#allocation8 + $0x200] ss:$8 sps:$4 sm:$0xff]  }
 0xa1d   :  { %5749 = vmatpush1.bf16.msra.mxu1 %v11156_v31  ;;  %v14502_v31 = vld [vmem:[#allocation40_spill] sm:$0xff]  ;;  %v13226_v34 = vld [vmem:[#allocation8 + $0x240] ss:$8 sps:$4 sm:$0xff]  }
 0xa1e   :  { %5750 = vmatprep.subr.bf16.mxu1 %v11157_v53 }
 0xa21   :  { %5751 = vmatpush1.bf16.msra.mxu1 %v11158_v40 }
 0xa22   :  { %5752 = vmatprep.subr.bf16.mxu1 %v11159_v32  ;;  %v11164_v32 = vld [vmem:[#allocation2 + $0xf00] ss:$36 sps:$4 sm:$0xff]  }
 0xa25   :  { %5753 = vmatpush1.bf16.msra.mxu1 %v11160_v6  ;;  %v14503_v6 = vld [vmem:[#allocation73_spill] sm:$0xff] }
 0xa26   :  { %5754 = vmatprep.subr.bf16.mxu1 %v11161_v42 }
 0xa29   :  { %5755 = vmatpush1.bf16.msra.mxu1 %v11162_v54  ;;  %v14505_v54 = vld [vmem:[#allocation44_spill] sm:$0xff] }
 0xa2a   :  { %5756 = vmatprep.subr.bf16.mxu1 %v11163_v19 }
 0xa2b   :  { %v5452_v7 = vpop.f32.mrb[28].mxu1 }
 0xa2c   :  { %v5949_v5 = vmul.f32 %v5452_v7, %v14501_v12  ;;  %v5454_v58 = vpop.f32.mrb[29].mxu1  ;;  %v11166_v7 = vld [vmem:[#allocation2 + $0xf48] ss:$36 sps:$4 sm:$0xff]  }
 0xa2d   :  { %v5950_v53 = vmul.f32 %v5454_v58, %v14502_v31  ;;  %v5456_v40 = vpop.f32.mrb[30].mxu1  ;;  %5757 = vmatpush1.bf16.msra.mxu1 %v11164_v32  ;;  %v11167_v58 = vld [vmem:[#allocation2 + $0xf94] ss:$36 sps:$4 sm:$0xff]   ;;  %v13189_v31 = vmax.f32 %v5970_v9, 0.0  ;;  %v13229_v9 = vld [vmem:[#allocation8 + $0x254] ss:$8 sps:$4 sm:$0xff]  }
 0xa2e   :  { %v5958_v42 = vsub.f32 %v14503_v6, %v5949_v5  ;;  %v5457_v52 = vpop.f32.mrb[31].mxu1  ;;  %5758 = vmatprep.subr.bf16.mxu1 %v11165_v36  ;;  %v13209_v32 = vld [vmem:[#allocation8 + $0x224] ss:$8 sps:$4 sm:$0xff]   ;;  %v13212_v6 = vld [vmem:[#allocation8 + $0x220] ss:$8 sps:$4 sm:$0xff]  }
 0xa2f   :  { %v5959_v19 = vsub.f32 %v14505_v54, %v5950_v53  ;;  %14509 = vst [vmem:[#allocation92_spill] sm:$0xff] %v13189_v31  ;;  %v11168_v52 = vld [vmem:[#allocation2 + $0xf90] ss:$36 sps:$4 sm:$0xff]   ;;  %v6134_v40 = vpack.c.bf16 %v13189_v31, %v13189_v31 }
 0xa30   :  { %v5967_v48 = vadd.f32 %v5958_v42, %v14506_v50  ;;  %v13199_v53 = vld [vmem:[#allocation8 + $0x214] ss:$8 sps:$4 sm:$0xff]   ;;  %v13223_v42 = vld [vmem:[#allocation8 + $0x244] ss:$8 sps:$4 sm:$0xff]   ;;  %v13240_v54 = vld [vmem:[#allocation8 + $0x260] ss:$8 sps:$4 sm:$0xff]  }
 0xa31   :  { %v5968_v41 = vadd.f32 %v5959_v19, %v14507_v59  ;;  %5759 = vmatpush1.bf16.msra.mxu1 %v11166_v7  ;;  %v13243_v19 = vld [vmem:[#allocation8 + $0x274] ss:$8 sps:$4 sm:$0xff]   ;;  %v13268_v7 = vld [vmem:[#allocation8 + $0x2a0] ss:$8 sps:$4 sm:$0xff]  }
 0xa32   :  { %v13187_v12 = vmax.f32 %v5967_v48, 0.0  ;;  %5760 = vmatprep.subr.bf16.mxu1 %v11167_v58  ;;  %v13254_v48 = vld [vmem:[#allocation8 + $0x280] ss:$8 sps:$4 sm:$0xff]   ;;  %v13257_v59 = vld [vmem:[#allocation8 + $0x294] ss:$8 sps:$4 sm:$0xff]  }
 0xa33   :  { %v13191_v5 = vmax.f32 %v5968_v41, 0.0  ;;  %v13206_v41 = vld [vmem:[#allocation8 + $0x210] ss:$8 sps:$4 sm:$0xff]   ;;  %v13271_v58 = vld [vmem:[#allocation8 + $0x2b4] ss:$8 sps:$4 sm:$0xff]  }
 0xa34   :  { %14508 = vst [vmem:[#allocation91_spill] sm:$0xff] %v13187_v12  ;;  %v6131_v50 = vpack.c.bf16 %v13187_v12, %v13187_v12  ;;  %v13296_v12 = vld [vmem:[#allocation8 + $0x2e4] ss:$8 sps:$4 sm:$0xff]  }
 0xa35   :  { %14510 = vst [vmem:[#allocation93_spill] sm:$0xff] %v13191_v5  ;;  %5761 = vmatpush1.bf16.msra.mxu1 %v11168_v52  ;;  %v6132_v36 = vpack.c.bf16 %v13191_v5, %v13191_v5  ;;  %v13282_v52 = vld [vmem:[#allocation8 + $0x2c0] ss:$8 sps:$4 sm:$0xff]   ;;  %14518 = vst [vmem:[#allocation100_spill] sm:$0xff] %v13296_v12 }
 0xa36   :  { %7093 = vmatprep.subr.bf16.mxu1 %v12942_v39  ;;  %v13215_v39 = vld [vmem:[#allocation8 + $0x234] ss:$8 sps:$4 sm:$0xff]   ;;  %14513 = vst [vmem:[#allocation96_spill] sm:$0xff] %v13282_v52 }
 0xa37   :  { %6931 = vmatprep.mubr.bf16.mxu0 %v6132_v36  ;;  %v14514_v36 = vld [vmem:[#allocation77_spill] sm:$0xff] }
 0xa38   :  { %5779 = vmatmul.mubr.bf16.vlgmr.msra.gmra.mrb[32].mxu1 %v12896_v33  ;;  %6932 = vmatmul.mubr.bf16.vlgmr.msra.gmra.mrb[48].mxu0 %v6131_v50  ;;  %v13220_v33 = vld [vmem:[#allocation8 + $0x230] ss:$8 sps:$4 sm:$0xff]   ;;  %v5951_v50 = vmul.f32 %v13044_v16, %v14514_v36  ;;  %v13299_v16 = vld [vmem:[#allocation8 + $0x2e0] ss:$8 sps:$4 sm:$0xff]  }
 0xa39   :  { %6941 = vmatpush1.bf16.msra.mxu0 %v13195_v56  ;;  %6972 = vmatprep.mubr.bf16.mxu0 %v6134_v40  ;;  %v14517_v40 = vld [vmem:[#allocation81_spill] sm:$0xff]  ;;  %14519 = vst [vmem:[#allocation101_spill] sm:$0xff] %v13299_v16  ;;  %v14520_v36 = vld [vmem:[#allocation79_spill] sm:$0xff] }
 0xa3a   :  { %6942 = vmatprep.subr.bf16.mxu0 %v13199_v53  ;;  %v5960_v31 = vsub.f32 %v14517_v40, %v5951_v50  ;;  %v13313_v40 = vld [vmem:[#allocation8 + $0x304] ss:$8 sps:$4 sm:$0xff]  }
 0xa3b   :  { %14524 = vst [vmem:[#allocation47_spill] sm:$0xff] %v13313_v40 }
 0xa3c   :  { %v5969_v5 = vadd.f32 %v5960_v31, %v14520_v36  ;;  %v13316_v31 = vld [vmem:[#allocation8 + $0x300] ss:$8 sps:$4 sm:$0xff]  }
 0xa3d   :  { %6943 = vmatpush1.bf16.msra.mxu0 %v13206_v41 }
 0xa3e   :  { %6944 = vmatprep.subr.bf16.mxu0 %v13209_v32  ;;  %7094 = vmatpush1.bf16.xpose.msra.mxu1 %v12945_v51  ;;  %v13234_v51 = vld [vmem:[#allocation8 + $0x250] ss:$8 sps:$4 sm:$0xff]   ;;  %v13310_v50 = vmax.f32 %v5969_v5, 0.0  ;;  %v13329_v5 = vld [vmem:[#allocation8 + $0x324] ss:$8 sps:$4 sm:$0xff]  }
 0xa3f   :  { %7095 = vmatprep.subr.bf16.mxu1 %v12949_v45  ;;  %v13237_v45 = vld [vmem:[#allocation8 + $0x264] ss:$8 sps:$4 sm:$0xff]   ;;  %14525 = vst [vmem:[#allocation48_spill] sm:$0xff] %v13329_v5 }
 0xa40   :  { %14523 = vst [vmem:[#allocation46_spill] sm:$0xff] %v13310_v50  ;;  %v6133_v36 = vpack.c.bf16 %v13310_v50, %v13310_v50  ;;  %v13332_v50 = vld [vmem:[#allocation8 + $0x320] ss:$8 sps:$4 sm:$0xff]  }
 0xa41   :  { %6945 = vmatpush1.bf16.msra.mxu0 %v13212_v6 }
 0xa42   :  { %6946 = vmatprep.subr.bf16.mxu0 %v13215_v39 }
 0xa45   :  { %6947 = vmatpush1.bf16.msra.mxu0 %v13220_v33 }
 0xa46   :  { %6948 = vmatprep.subr.bf16.mxu0 %v13223_v42  ;;  %7096 = vmatpush1.bf16.xpose.msra.mxu1 %v12954_v15  ;;  %v13248_v15 = vld [vmem:[#allocation8 + $0x270] ss:$8 sps:$4 sm:$0xff]  }
 0xa47   :  { %7097 = vmatprep.subr.bf16.mxu1 %v12957_v24  ;;  %v13251_v24 = vld [vmem:[#allocation8 + $0x284] ss:$8 sps:$4 sm:$0xff]  }
 0xa49   :  { %6949 = vmatpush1.bf16.msra.mxu0 %v13226_v34 }
 0xa4a   :  { %6950 = vmatprep.subr.bf16.mxu0 %v13229_v9 }
 0xa4d   :  { %6951 = vmatpush1.bf16.msra.mxu0 %v13234_v51 }
 0xa4e   :  { %6952 = vmatprep.subr.bf16.mxu0 %v13237_v45  ;;  %7098 = vmatpush1.bf16.xpose.msra.mxu1 %v12960_v63  ;;  %v13262_v63 = vld [vmem:[#allocation8 + $0x290] ss:$8 sps:$4 sm:$0xff]  }
 0xa4f   :  { %7099 = vmatprep.subr.bf16.mxu1 %v12963_v60  ;;  %v13265_v60 = vld [vmem:[#allocation8 + $0x2a4] ss:$8 sps:$4 sm:$0xff]  }
 0xa51   :  { %6953 = vmatpush1.bf16.msra.mxu0 %v13240_v54 }
 0xa52   :  { %6954 = vmatprep.subr.bf16.mxu0 %v13243_v19 }
 0xa55   :  { %6955 = vmatpush1.bf16.msra.mxu0 %v13248_v15 }
 0xa56   :  { %6956 = vmatprep.subr.bf16.mxu0 %v13251_v24  ;;  %7100 = vmatpush1.bf16.xpose.msra.mxu1 %v12966_v8  ;;  %v13276_v8 = vld [vmem:[#allocation8 + $0x2b0] ss:$8 sps:$4 sm:$0xff]  }
 0xa57   :  { %7101 = vmatprep.subr.bf16.mxu1 %v12969_v10  ;;  %14511 = vst [vmem:[#allocation94_spill] sm:$0xff] %v13276_v8  ;;  %v13279_v10 = vld [vmem:[#allocation8 + $0x2c4] ss:$8 sps:$4 sm:$0xff]  }
 0xa58   :  { %14512 = vst [vmem:[#allocation95_spill] sm:$0xff] %v13279_v10 }
 0xa59   :  { %6957 = vmatpush1.bf16.msra.mxu0 %v13254_v48 }
 0xa5a   :  { %6958 = vmatprep.subr.bf16.mxu0 %v13257_v59 }
 0xa5d   :  { %6959 = vmatpush1.bf16.msra.mxu0 %v13262_v63 }
 0xa5e   :  { %6960 = vmatprep.subr.bf16.mxu0 %v13265_v60  ;;  %7102 = vmatpush1.bf16.xpose.msra.mxu1 %v12972_v22  ;;  %v13287_v22 = vld [vmem:[#allocation8 + $0x2d4] ss:$8 sps:$4 sm:$0xff]  }
 0xa5f   :  { %7103 = vmatprep.subr.bf16.mxu1 %v12975_v49  ;;  %14515 = vst [vmem:[#allocation97_spill] sm:$0xff] %v13287_v22  ;;  %v13292_v49 = vld [vmem:[#allocation8 + $0x2d0] ss:$8 sps:$4 sm:$0xff]  }
 0xa60   :  { %14516 = vst [vmem:[#allocation98_spill] sm:$0xff] %v13292_v49 }
 0xa61   :  { %6961 = vmatpush1.bf16.msra.mxu0 %v13268_v7 }
 0xa62   :  { %6962 = vmatprep.subr.bf16.mxu0 %v13271_v58 }
 0xa65   :  { %6963 = vmatpush1.bf16.msra.mxu0 %v13276_v8 }
 0xa66   :  { %6964 = vmatprep.subr.bf16.mxu0 %v13279_v10  ;;  %7104 = vmatpush1.bf16.xpose.msra.mxu1 %v12978_v57  ;;  %v13303_v57 = vld [vmem:[#allocation8 + $0x2f4] ss:$8 sps:$4 sm:$0xff]  }
 0xa67   :  { %7105 = vmatprep.subr.bf16.mxu1 %v12981_v55  ;;  %14521 = vst [vmem:[#allocation103_spill] sm:$0xff] %v13303_v57  ;;  %v13308_v55 = vld [vmem:[#allocation8 + $0x2f0] ss:$8 sps:$4 sm:$0xff]  }
 0xa68   :  { %14522 = vst [vmem:[#allocation45_spill] sm:$0xff] %v13308_v55 }
 0xa69   :  { %6965 = vmatpush1.bf16.msra.mxu0 %v13282_v52 }
 0xa6a   :  { %6966 = vmatprep.subr.bf16.mxu0 %v13287_v22 }
 0xa6d   :  { %6967 = vmatpush1.bf16.msra.mxu0 %v13292_v49 }
 0xa6e   :  { %6968 = vmatprep.subr.bf16.mxu0 %v13296_v12  ;;  %7106 = vmatpush1.bf16.xpose.msra.mxu1 %v12984_v61  ;;  %v13321_v61 = vld [vmem:[#allocation8 + $0x314] ss:$8 sps:$4 sm:$0xff]  }
 0xa6f   :  { %7107 = vmatprep.subr.bf16.mxu1 %v12987_v4  ;;  %v13326_v4 = vld [vmem:[#allocation8 + $0x310] ss:$8 sps:$4 sm:$0xff]  }
 0xa71   :  { %6969 = vmatpush1.bf16.msra.mxu0 %v13299_v16 }
 0xa72   :  { %6970 = vmatprep.subr.bf16.mxu0 %v13303_v57 }
 0xa75   :  { %6971 = vmatpush1.bf16.msra.mxu0 %v13308_v55 }
 0xa76   :  { %6981 = vmatprep.subr.bf16.mxu0 %v13313_v40  ;;  %7108 = vmatpush1.bf16.xpose.msra.mxu1 %v12990_v13  ;;  %v13335_v40 = vld [vmem:[#allocation8 + $0x334] ss:$8 sps:$4 sm:$0xff]   ;;  %v13340_v13 = vld [vmem:[#allocation8 + $0x330] ss:$8 sps:$4 sm:$0xff]  }
 0xa77   :  { %7109 = vmatprep.subr.bf16.mxu1 %v12993_v62  ;;  %14526 = vst [vmem:[#allocation49_spill] sm:$0xff] %v13340_v13  ;;  %v13343_v62 = vld [vmem:[#allocation8 + $0x344] ss:$8 sps:$4 sm:$0xff]  }
 0xa78   :  { %6973 = vmatmul.mubr.bf16.vlgmr.msra.gmra.mrb[48].mxu0 %v6133_v36  ;;  %14527 = vst [vmem:[#allocation28_spill] sm:$0xff] %v13343_v62  ;;  %v13346_v36 = vld [vmem:[#allocation8 + $0x340] ss:$8 sps:$4 sm:$0xff]  }
 0xa79   :  { %6982 = vmatpush1.bf16.msra.mxu0 %v13316_v31  ;;  %14528 = vst [vmem:[#allocation50_spill] sm:$0xff] %v13346_v36 }
 0xa7a   :  { %6983 = vmatprep.subr.bf16.mxu0 %v13321_v61 }
 0xa7d   :  { %6984 = vmatpush1.bf16.msra.mxu0 %v13326_v4 }
 0xa7e   :  { %6985 = vmatprep.subr.bf16.mxu0 %v13329_v5  ;;  %7110 = vmatpush1.bf16.xpose.msra.mxu1 %v12996_v14  ;;  %v13349_v5 = vld [vmem:[#allocation8 + $0x354] ss:$8 sps:$4 sm:$0xff]   ;;  %v13354_v14 = vld [vmem:[#allocation8 + $0x350] ss:$8 sps:$4 sm:$0xff]  }
 0xa7f   :  { %7111 = vmatprep.subr.bf16.mxu1 %v12999_v29  ;;  %14529 = vst [vmem:[#allocation51_spill] sm:$0xff] %v13349_v5  ;;  %14530 = vst [vmem:[#allocation52_spill] sm:$0xff] %v13354_v14  ;;  %v13357_v29 = vld [vmem:[#allocation8 + $0x364] ss:$8 sps:$4 sm:$0xff]  }
 0xa80   :  { %14531 = vst [vmem:[#allocation53_spill] sm:$0xff] %v13357_v29 }
 0xa81   :  { %6986 = vmatpush1.bf16.msra.mxu0 %v13332_v50 }
 0xa82   :  { %6987 = vmatprep.subr.bf16.mxu0 %v13335_v40 }
 0xa85   :  { %6988 = vmatpush1.bf16.msra.mxu0 %v13340_v13  ;;  %v13360_v13 = vld [vmem:[#allocation8 + $0x360] ss:$8 sps:$4 sm:$0xff]  }
 0xa86   :  { %6989 = vmatprep.subr.bf16.mxu0 %v13343_v62  ;;  %7112 = vmatpush1.bf16.xpose.msra.mxu1 %v13002_v23  ;;  %14532 = vst [vmem:[#allocation119_spill] sm:$0xff] %v13360_v13  ;;  %v13363_v62 = vld [vmem:[#allocation8 + $0x374] ss:$8 sps:$4 sm:$0xff]   ;;  %v13368_v23 = vld [vmem:[#allocation8 + $0x370] ss:$8 sps:$4 sm:$0xff]  }
 0xa87   :  { %7113 = vmatprep.subr.bf16.mxu1 %v13005_v30  ;;  %14533 = vst [vmem:[#allocation31_spill] sm:$0xff] %v13363_v62  ;;  %14534 = vst [vmem:[#allocation32_spill] sm:$0xff] %v13368_v23  ;;  %v13371_v30 = vld [vmem:[#allocation8 + $0x384] ss:$8 sps:$4 sm:$0xff]  }
 0xa88   :  { %14535 = vst [vmem:[#allocation106_spill] sm:$0xff] %v13371_v30 }
 0xa89   :  { %6990 = vmatpush1.bf16.msra.mxu0 %v13346_v36 }
 0xa8a   :  { %6991 = vmatprep.subr.bf16.mxu0 %v13349_v5 }
 0xa8d   :  { %6992 = vmatpush1.bf16.msra.mxu0 %v13354_v14  ;;  %v13374_v14 = vld [vmem:[#allocation8 + $0x380] ss:$8 sps:$4 sm:$0xff]  }
 0xa8e   :  { %6993 = vmatprep.subr.bf16.mxu0 %v13357_v29  ;;  %7114 = vmatpush1.bf16.xpose.msra.mxu1 %v13008_v38  ;;  %14536 = vst [vmem:[#allocation120_spill] sm:$0xff] %v13374_v14  ;;  %v13377_v29 = vld [vmem:[#allocation8 + $0x394] ss:$8 sps:$4 sm:$0xff]   ;;  %v13382_v38 = vld [vmem:[#allocation8 + $0x390] ss:$8 sps:$4 sm:$0xff]  }
 0xa8f   :  { %7115 = vmatprep.subr.bf16.mxu1 %v13011_v18  ;;  %14537 = vst [vmem:[#allocation107_spill] sm:$0xff] %v13377_v29  ;;  %14538 = vst [vmem:[#allocation121_spill] sm:$0xff] %v13382_v38  ;;  %v13385_v18 = vld [vmem:[#allocation8 + $0x3a4] ss:$8 sps:$4 sm:$0xff]  }
 0xa90   :  { %14539 = vst [vmem:[#allocation108_spill] sm:$0xff] %v13385_v18 }
 0xa91   :  { %6994 = vmatpush1.bf16.msra.mxu0 %v13360_v13  ;;  %v14557_v13 = vld [vmem:[#allocation80_spill] sm:$0xff] }
 0xa92   :  { %6995 = vmatprep.subr.bf16.mxu0 %v13363_v62  ;;  %v14556_v62 = vld [vmem:[#allocation102_spill] sm:$0xff] }
 0xa95   :  { %6996 = vmatpush1.bf16.msra.mxu0 %v13368_v23  ;;  %v13388_v23 = vld [vmem:[#allocation8 + $0x3a0] ss:$8 sps:$4 sm:$0xff]  }
 0xa96   :  { %6997 = vmatprep.subr.bf16.mxu0 %v13371_v30  ;;  %7116 = vmatpush1.bf16.xpose.msra.mxu1 %v13014_v44  ;;  %14540 = vst [vmem:[#allocation122_spill] sm:$0xff] %v13388_v23  ;;  %v13391_v30 = vld [vmem:[#allocation8 + $0x3b4] ss:$8 sps:$4 sm:$0xff]   ;;  %v13396_v44 = vld [vmem:[#allocation8 + $0x3b0] ss:$8 sps:$4 sm:$0xff]  }
 0xa97   :  { %7117 = vmatprep.subr.bf16.mxu1 %v13017_v21  ;;  %14541 = vst [vmem:[#allocation109_spill] sm:$0xff] %v13391_v30  ;;  %14542 = vst [vmem:[#allocation123_spill] sm:$0xff] %v13396_v44  ;;  %v13399_v21 = vld [vmem:[#allocation8 + $0x3c4] ss:$8 sps:$4 sm:$0xff]  }
 0xa98   :  { %14543 = vst [vmem:[#allocation110_spill] sm:$0xff] %v13399_v21 }
 0xa99   :  { %6998 = vmatpush1.bf16.msra.mxu0 %v13374_v14 }
 0xa9a   :  { %6999 = vmatprep.subr.bf16.mxu0 %v13377_v29  ;;  %v14555_v29 = vld [vmem:[#allocation82_spill] sm:$0xff] }
 0xa9d   :  { %7000 = vmatpush1.bf16.msra.mxu0 %v13382_v38  ;;  %v13402_v38 = vld [vmem:[#allocation8 + $0x3c0] ss:$8 sps:$4 sm:$0xff]  }
 0xa9e   :  { %7001 = vmatprep.subr.bf16.mxu0 %v13385_v18  ;;  %7118 = vmatpush1.bf16.xpose.msra.mxu1 %v13020_v20  ;;  %14544 = vst [vmem:[#allocation124_spill] sm:$0xff] %v13402_v38  ;;  %v13405_v18 = vld [vmem:[#allocation8 + $0x3d4] ss:$8 sps:$4 sm:$0xff]   ;;  %v13410_v20 = vld [vmem:[#allocation8 + $0x3d0] ss:$8 sps:$4 sm:$0xff]  }
 0xa9f   :  { %7119 = vmatprep.subr.bf16.mxu1 %v13023_v17  ;;  %14545 = vst [vmem:[#allocation111_spill] sm:$0xff] %v13405_v18  ;;  %14546 = vst [vmem:[#allocation125_spill] sm:$0xff] %v13410_v20  ;;  %v13413_v17 = vld [vmem:[#allocation8 + $0x3e4] ss:$8 sps:$4 sm:$0xff]  }
 0xaa0   :  { %14547 = vst [vmem:[#allocation112_spill] sm:$0xff] %v13413_v17 }
 0xaa1   :  { %7002 = vmatpush1.bf16.msra.mxu0 %v13388_v23 }
 0xaa2   :  { %7003 = vmatprep.subr.bf16.mxu0 %v13391_v30  ;;  %v14554_v30 = vld [vmem:[#allocation104_spill] sm:$0xff] }
 0xaa5   :  { %7004 = vmatpush1.bf16.msra.mxu0 %v13396_v44  ;;  %v13416_v44 = vld [vmem:[#allocation8 + $0x3e0] ss:$8 sps:$4 sm:$0xff]  }
 0xaa6   :  { %7005 = vmatprep.subr.bf16.mxu0 %v13399_v21  ;;  %7120 = vmatpush1.bf16.xpose.msra.mxu1 %v13026_v1  ;;  %14548 = vst [vmem:[#allocation126_spill] sm:$0xff] %v13416_v44  ;;  %v13419_v21 = vld [vmem:[#allocation8 + $0x3f4] ss:$8 sps:$4 sm:$0xff]   ;;  %v13424_v1 = vld [vmem:[#allocation8 + $0x3f0] ss:$8 sps:$4 sm:$0xff]  }
 0xaa7   :  { %7121 = vmatprep.subr.bf16.mxu1 %v13029_v47  ;;  %14549 = vst [vmem:[#allocation113_spill] sm:$0xff] %v13419_v21  ;;  %14550 = vst [vmem:[#allocation127_spill] sm:$0xff] %v13424_v1  ;;  %v13427_v47 = vld [vmem:[#allocation8 + $0x404] ss:$8 sps:$4 sm:$0xff]  }
 0xaa8   :  { %14551 = vst [vmem:[#allocation114_spill] sm:$0xff] %v13427_v47 }
 0xaa9   :  { %7006 = vmatpush1.bf16.msra.mxu0 %v13402_v38 }
 0xaaa   :  { %7007 = vmatprep.subr.bf16.mxu0 %v13405_v18  ;;  %v14553_v18 = vld [vmem:[#allocation78_spill] sm:$0xff] }
 0xaad   :  { %7008 = vmatpush1.bf16.msra.mxu0 %v13410_v20 }
 0xaae   :  { %7009 = vmatprep.subr.bf16.mxu0 %v13413_v17  ;;  %7122 = vmatpush1.bf16.xpose.msra.mxu1 %v13032_v0  ;;  %v14552_v0 = vld [vmem:[#allocation99_spill] sm:$0xff] }
 0xaaf   :  { %7123 = vmatprep.subr.bf16.mxu1 %v13035_v3 }
 0xab1   :  { %7010 = vmatpush1.bf16.msra.mxu0 %v13416_v44 }
 0xab2   :  { %7011 = vmatprep.subr.bf16.mxu0 %v13419_v21 }
 0xab5   :  { %7012 = vmatpush1.bf16.msra.mxu0 %v13424_v1 }
 0xab6   :  { %7022 = vmatprep.subr.bf16.mxu0 %v13427_v47  ;;  %7124 = vmatpush1.bf16.xpose.msra.mxu1 %v13038_v35 }
 0xab7   :  { %7134 = vmatprep.subr.bf16.mxu1 %v13068_v46 }
 0xb0b   :  { %v5780_v17 = vpop.f32.mrb[32].mxu1 }
 0xb0c   :  { %v5953_v20 = vmul.f32 %v5780_v17, %v14552_v0  ;;  %v5782_v3 = vpop.f32.mrb[33].mxu1  ;;  %v13445_v17 = vld [vmem:[#allocation8 + $0x400] ss:$8 sps:$4 sm:$0xff]  }
 0xb0d   :  { %v5954_v44 = vmul.f32 %v5782_v3, %v14553_v18  ;;  %v5784_v38 = vpop.f32.mrb[34].mxu1  ;;  %14560 = vst [vmem:[#allocation129_spill] sm:$0xff] %v13445_v17  ;;  %v13471_v18 = vld [vmem:[#allocation8 + $0x440] ss:$8 sps:$4 sm:$0xff]  }
 0xb0e   :  { %v5962_v23 = vsub.f32 %v14554_v30, %v5953_v20  ;;  %v5785_v21 = vpop.f32.mrb[35].mxu1  ;;  %v13449_v30 = vld [vmem:[#allocation8 + $0x414] ss:$8 sps:$4 sm:$0xff]   ;;  %14568 = vst [vmem:[#allocation133_spill] sm:$0xff] %v13471_v18 }
 0xb0f   :  { %v5963_v14 = vsub.f32 %v14555_v29, %v5954_v44  ;;  %14561 = vst [vmem:[#allocation116_spill] sm:$0xff] %v13449_v30  ;;  %v13465_v29 = vld [vmem:[#allocation8 + $0x430] ss:$8 sps:$4 sm:$0xff]   ;;  %v11169_v44 = vld [vmem:[#allocation7 + $0x8] ss:$0 sm:$0xff] }
 0xb10   :  { %v5971_v1 = vadd.f32 %v5962_v23, %v14556_v62  ;;  %v13452_v62 = vld [vmem:[#allocation8 + $0x410] ss:$8 sps:$4 sm:$0xff]   ;;  %14566 = vst [vmem:[#allocation132_spill] sm:$0xff] %v13465_v29  ;;  %v13468_v23 = vld [vmem:[#allocation8 + $0x444] ss:$8 sps:$4 sm:$0xff]   ;;  %v5955_v21 = vmul.f32 %v11169_v44, %v13171_v26  ;;  %v14571_v0 = vld [vmem:[#allocation105_spill] sm:$0xff] }
 0xb11   :  { %v5972_v5 = vadd.f32 %v5963_v14, %v14557_v13  ;;  %14562 = vst [vmem:[#allocation130_spill] sm:$0xff] %v13452_v62  ;;  %v13459_v13 = vld [vmem:[#allocation8 + $0x420] ss:$8 sps:$4 sm:$0xff]   ;;  %v13462_v14 = vld [vmem:[#allocation8 + $0x434] ss:$8 sps:$4 sm:$0xff]   ;;  %14567 = vst [vmem:[#allocation33_spill] sm:$0xff] %v13468_v23 }
 0xb12   :  { %v13439_v36 = vmax.f32 %v5971_v1, 0.0  ;;  %14564 = vst [vmem:[#allocation131_spill] sm:$0xff] %v13459_v13  ;;  %14565 = vst [vmem:[#allocation118_spill] sm:$0xff] %v13462_v14  ;;  %v13475_v20 = vld [vmem:[#allocation8 + $0x454] ss:$8 sps:$4 sm:$0xff]   ;;  %v5964_v3 = vsub.f32 %v14571_v0, %v5955_v21  ;;  %v14577_v0 = vld [vmem:[#allocation38_spill] sm:$0xff] }
 0xb13   :  { %v13441_v35 = vmax.f32 %v5972_v5, 0.0  ;;  %v13456_v5 = vld [vmem:[#allocation8 + $0x424] ss:$8 sps:$4 sm:$0xff]   ;;  %14569 = vst [vmem:[#allocation134_spill] sm:$0xff] %v13475_v20  ;;  %v13478_v1 = vld [vmem:[#allocation8 + $0x450] ss:$8 sps:$4 sm:$0xff]  }
 0xb14   :  { %14558 = vst [vmem:[#allocation128_spill] sm:$0xff] %v13439_v36  ;;  %v6135_v38 = vpack.c.bf16 %v13439_v36, %v13439_v36  ;;  %14563 = vst [vmem:[#allocation117_spill] sm:$0xff] %v13456_v5  ;;  %v13488_v44 = vld [vmem:[#allocation8 + $0x474] ss:$8 sps:$4 sm:$0xff]   ;;  %v13491_v36 = vld [vmem:[#allocation8 + $0x470] ss:$8 sps:$4 sm:$0xff]  }
 0xb15   :  { %14559 = vst [vmem:[#allocation115_spill] sm:$0xff] %v13441_v35  ;;  %v6136_v46 = vpack.c.bf16 %v13441_v35, %v13441_v35  ;;  %14570 = vst [vmem:[#allocation135_spill] sm:$0xff] %v13478_v1 }
 0xb16   :  { %14574 = vst [vmem:[#allocation138_spill] sm:$0xff] %v13488_v44  ;;  %14575 = vst [vmem:[#allocation139_spill] sm:$0xff] %v13491_v36 }
 0xb17   :  { %7013 = vmatprep.mubr.bf16.mxu0 %v6136_v46  ;;  %v13482_v46 = vld [vmem:[#allocation8 + $0x464] ss:$8 sps:$4 sm:$0xff]  }
 0xb18   :  { %7014 = vmatmul.mubr.bf16.vlgmr.msra.gmra.mrb[48].mxu0 %v6135_v38  ;;  %14572 = vst [vmem:[#allocation136_spill] sm:$0xff] %v13482_v46  ;;  %v13485_v38 = vld [vmem:[#allocation8 + $0x460] ss:$8 sps:$4 sm:$0xff]  }
 0xb19   :  { %7023 = vmatpush1.bf16.msra.mxu0 %v13445_v17  ;;  %7054 = vmatprep.mubr.bf16.mxu0 %v14430_v43  ;;  %14573 = vst [vmem:[#allocation137_spill] sm:$0xff] %v13485_v38  ;;  %v11170_v43 = vld [vmem:[#allocation5 + $0x8] ss:$0 sm:$0xff] }
 0xb1a   :  { %7024 = vmatprep.subr.bf16.mxu0 %v13449_v30  ;;  %v5973_v26 = vadd.f32 %v11170_v43, %v5964_v3  ;;  %v6128_v43 = vld [vmem:[#allocation11] sm:$0x3] }
 0xb1b   :  { %v13533_v3 = vrot.slane %v6128_v43, %v14577_v0 }
 0xb1c   :  { %v13493_v35 = vmax.f32 %v5973_v26, 0.0  ;;  %v14579_v26 = vld [vmem:[#allocation34_spill] sm:$0xff] }
 0xb1d   :  { %7025 = vmatpush1.bf16.msra.mxu0 %v13452_v62  ;;  %14578 = vst [vmem:[#allocation141_spill] sm:$0xff] %v13533_v3 }
 0xb1e   :  { %7026 = vmatprep.subr.bf16.mxu0 %v13456_v5  ;;  %14576 = vst [vmem:[#allocation140_spill] sm:$0xff] %v13493_v35  ;;  %v6137_v21 = vpack.c.bf16 %v13493_v35, %v13493_v35 }
 0xb21   :  { %7027 = vmatpush1.bf16.msra.mxu0 %v13459_v13 }
 0xb22   :  { %7028 = vmatprep.subr.bf16.mxu0 %v13462_v14 }
 0xb25   :  { %7029 = vmatpush1.bf16.msra.mxu0 %v13465_v29 }
 0xb26   :  { %7030 = vmatprep.subr.bf16.mxu0 %v13468_v23 }
 0xb29   :  { %7031 = vmatpush1.bf16.msra.mxu0 %v13471_v18 }
 0xb2a   :  { %7032 = vmatprep.subr.bf16.mxu0 %v13475_v20 }
 0xb2d   :  { %7033 = vmatpush1.bf16.msra.mxu0 %v13478_v1 }
 0xb2e   :  { %7034 = vmatprep.subr.bf16.mxu0 %v13482_v46 }
 0xb31   :  { %7035 = vmatpush1.bf16.msra.mxu0 %v13485_v38 }
 0xb32   :  { %7036 = vmatprep.subr.bf16.mxu0 %v13488_v44 }
 0xb35   :  { %7037 = vmatpush1.bf16.msra.mxu0 %v13491_v36 }
 0xb36   :  { %7175 = vmatprep.subr.bf16.mxu0 %v13168_v2  ;;  %v6127_v2 = vld [vmem:[#allocation10] sm:$0x3] }
 0xb37   :  { %v13539_v35 = vrot.slane %v6127_v2, %v14577_v0 }
 0xb38   :  { %7055 = vmatmul.mubr.bf16.vlgmr.msra.gmra.mrb[48].mxu0 %v6137_v21  ;;  %v13536_v21 = vrot.slane %v6128_v43, %v14579_v26 }
 0xb39   :  { %14581 = vst [vmem:[#allocation39_spill] sm:$0xff] %v13539_v35 }
 0xb3a   :  { %14580 = vst [vmem:[#allocation142_spill] sm:$0xff] %v13536_v21 }
 0xb3e   :  { %7176 = vmatpush1.bf16.xpose.msra.mxu0 %v13195_v56 }
 0xb3f   :  { %7177 = vmatprep.subr.bf16.mxu0 %v13199_v53 }
 0xb46   :  { %7178 = vmatpush1.bf16.xpose.msra.mxu0 %v13206_v41 }
 0xb47   :  { %7179 = vmatprep.subr.bf16.mxu0 %v13209_v32 }
 0xb4e   :  { %7180 = vmatpush1.bf16.xpose.msra.mxu0 %v13212_v6 }
 0xb4f   :  { %7181 = vmatprep.subr.bf16.mxu0 %v13215_v39 }
 0xb56   :  { %7182 = vmatpush1.bf16.xpose.msra.mxu0 %v13220_v33 }
 0xb57   :  { %7183 = vmatprep.subr.bf16.mxu0 %v13223_v42 }
 0xb5e   :  { %7184 = vmatpush1.bf16.xpose.msra.mxu0 %v13226_v34 }
 0xb5f   :  { %7185 = vmatprep.subr.bf16.mxu0 %v13229_v9 }
 0xb66   :  { %7186 = vmatpush1.bf16.xpose.msra.mxu0 %v13234_v51 }
 0xb67   :  { %7187 = vmatprep.subr.bf16.mxu0 %v13237_v45 }
 0xb6e   :  { %7188 = vmatpush1.bf16.xpose.msra.mxu0 %v13240_v54 }
 0xb6f   :  { %7189 = vmatprep.subr.bf16.mxu0 %v13243_v19 }
 0xb76   :  { %7190 = vmatpush1.bf16.xpose.msra.mxu0 %v13248_v15 }
 0xb77   :  { %7191 = vmatprep.subr.bf16.mxu0 %v13251_v24 }
 0xb7e   :  { %7192 = vmatpush1.bf16.xpose.msra.mxu0 %v13254_v48 }
 0xb7f   :  { %7193 = vmatprep.subr.bf16.mxu0 %v13257_v59 }
 0xb86   :  { %7194 = vmatpush1.bf16.xpose.msra.mxu0 %v13262_v63 }
 0xb87   :  { %7195 = vmatprep.subr.bf16.mxu0 %v13265_v60 }
 0xb8e   :  { %7196 = vmatpush1.bf16.xpose.msra.mxu0 %v13268_v7 }
 0xb8f   :  { %7197 = vmatprep.subr.bf16.mxu0 %v13271_v58 }
 0xb96   :  { %7198 = vmatpush1.bf16.xpose.msra.mxu0 %v13276_v8 }
 0xb97   :  { %7199 = vmatprep.subr.bf16.mxu0 %v13279_v10 }
 0xb9e   :  { %7200 = vmatpush1.bf16.xpose.msra.mxu0 %v13282_v52 }
 0xb9f   :  { %7201 = vmatprep.subr.bf16.mxu0 %v13287_v22 }
 0xba6   :  { %7202 = vmatpush1.bf16.xpose.msra.mxu0 %v13292_v49 }
 0xba7   :  { %7203 = vmatprep.subr.bf16.mxu0 %v13296_v12 }
 0xbae   :  { %7204 = vmatpush1.bf16.xpose.msra.mxu0 %v13299_v16  ;;  %v13542_v16 = vrot.slane %v6127_v2, %v14579_v26  ;;  %v14598_v26 = vld [vmem:[#allocation69_spill] sm:$0xff] }
 0xbaf   :  { %7205 = vmatprep.subr.bf16.mxu0 %v13303_v57 }
 0xbb0   :  { %14582 = vst [vmem:[#allocation35_spill] sm:$0xff] %v13542_v16 }
 0xbb6   :  { %7206 = vmatpush1.bf16.xpose.msra.mxu0 %v13308_v55 }
 0xbb7   :  { %7257 = vmatprep.subr.bf16.mxu0 %v13427_v47 }
 0xc0b   :  { %v7056_v12 = vpop.f32.mrb[48].mxu0 }
 0xc0c   :  { %v7074_v57 = vmul.f32 %v13533_v3, %v7056_v12  ;;  %v7058_v55 = vpop.f32.mrb[49].mxu0  ;;  %v14586_v12 = vld [vmem:[#allocation56_spill] sm:$0xff] }
 0xc0d   :  { %v7075_v47 = vmul.f32 %v13536_v21, %v7058_v55  ;;  %v7060_v49 = vpop.f32.mrb[50].mxu0  ;;  %v14596_v55 = vld [vmem:[#allocation66_spill] sm:$0xff] }
 0xc0e   :  { %v7087_v22 = vadd.f32 %v13539_v35, %v7074_v57  ;;  %v7061_v52 = vpop.f32.mrb[51].mxu0  ;;  %v14594_v49 = vld [vmem:[#allocation64_spill] sm:$0xff]  ;;  %v14595_v57 = vld [vmem:[#allocation67_spill] sm:$0xff]  ;;  %v14627_v35 = vld [vmem:[#allocation122_spill] sm:$0xff] }
 0xc0f   :  { %v7088_v10 = vadd.f32 %v13542_v16, %v7075_v47  ;;  %v14592_v52 = vld [vmem:[#allocation62_spill] sm:$0xff]  ;;  %v14597_v47 = vld [vmem:[#allocation27_spill] sm:$0xff]  ;;  %v14626_v16 = vld [vmem:[#allocation108_spill] sm:$0xff] }
 0xc10   :  { %v13548_v43 = vmax.f32 %v7087_v22, 0.0  ;;  %v14593_v22 = vld [vmem:[#allocation65_spill] sm:$0xff] }
 0xc11   :  { %v13550_v8 = vmax.f32 %v7088_v10, 0.0  ;;  %v14591_v10 = vld [vmem:[#allocation63_spill] sm:$0xff] }
 0xc12   :  { %14583 = vst [vmem:[#allocation43_spill] sm:$0xff] %v13548_v43  ;;  %v13556_v2 = vpack.c.bf16 %v13548_v43, %v13548_v43 }
 0xc13   :  { %14584 = vst [vmem:[#allocation37_spill] sm:$0xff] %v13550_v8  ;;  %v7092_v0 = vpack.c.bf16 %v13550_v8, %v13550_v8  ;;  %v14628_v8 = vld [vmem:[#allocation109_spill] sm:$0xff] }
 0xc15   :  { %7125 = vmatprep.mubr.bf16.mxu1 %v7092_v0  ;;  %7207 = vmatprep.mubr.bf16.mxu0 %v7092_v0 }
 0xc16   :  { %7126 = vmatmul.mubr.bf16.vlgmr.msra.gmra.mrb[36].mxu1 %v13556_v2  ;;  %7208 = vmatmul.mubr.bf16.vlgmr.msra.gmra.mrb[52].mxu0 %v13556_v2 }
 0xc17   :  { %7135 = vmatpush1.bf16.xpose.msra.mxu1 %v13066_v37  ;;  %7258 = vmatpush1.bf16.xpose.msra.mxu0 %v13445_v17  ;;  %v14585_v37 = vld [vmem:[#allocation57_spill] sm:$0xff] }
 0xc18   :  { %7166 = vmatprep.mubr.bf16.mxu1 %v7092_v0  ;;  %7289 = vmatprep.mubr.bf16.mxu0 %v7092_v0  ;;  %v11172_v17 = vld [vmem:[#allocation8] ss:$8 sps:$4 sm:$0xff]  }
 0xc19   :  { %7136 = vmatprep.subr.bf16.mxu1 %v13074_v27  ;;  %7259 = vmatprep.subr.bf16.mxu0 %v13449_v30  ;;  %v14587_v27 = vld [vmem:[#allocation59_spill] sm:$0xff] }
 0xc1f   :  { %7137 = vmatpush1.bf16.xpose.msra.mxu1 %v13072_v28  ;;  %7260 = vmatpush1.bf16.xpose.msra.mxu0 %v13452_v62  ;;  %v14588_v28 = vld [vmem:[#allocation58_spill] sm:$0xff]  ;;  %v14636_v62 = vld [vmem:[#allocation113_spill] sm:$0xff] }
 0xc20   :  { %7138 = vmatprep.subr.bf16.mxu1 %v13080_v25  ;;  %7261 = vmatprep.subr.bf16.mxu0 %v13456_v5  ;;  %v14589_v25 = vld [vmem:[#allocation61_spill] sm:$0xff]  ;;  %v14635_v5 = vld [vmem:[#allocation126_spill] sm:$0xff] }
 0xc27   :  { %7139 = vmatpush1.bf16.xpose.msra.mxu1 %v13078_v11  ;;  %7262 = vmatpush1.bf16.xpose.msra.mxu0 %v13459_v13  ;;  %v14590_v11 = vld [vmem:[#allocation60_spill] sm:$0xff] }
 0xc28   :  { %7140 = vmatprep.subr.bf16.mxu1 %v14585_v37  ;;  %7263 = vmatprep.subr.bf16.mxu0 %v13462_v14  ;;  %v14599_v37 = vld [vmem:[#allocation30_spill] sm:$0xff]  ;;  %v14633_v14 = vld [vmem:[#allocation125_spill] sm:$0xff]  ;;  %v14634_v13 = vld [vmem:[#allocation112_spill] sm:$0xff] }
 0xc2f   :  { %7141 = vmatpush1.bf16.xpose.msra.mxu1 %v14586_v12  ;;  %7264 = vmatpush1.bf16.xpose.msra.mxu0 %v13465_v29  ;;  %v14600_v12 = vld [vmem:[#allocation71_spill] sm:$0xff] }
 0xc30   :  { %7142 = vmatprep.subr.bf16.mxu1 %v14587_v27  ;;  %7265 = vmatprep.subr.bf16.mxu0 %v13468_v23  ;;  %v14601_v27 = vld [vmem:[#allocation29_spill] sm:$0xff]  ;;  %v14631_v23 = vld [vmem:[#allocation124_spill] sm:$0xff]  ;;  %v14632_v29 = vld [vmem:[#allocation111_spill] sm:$0xff] }
 0xc37   :  { %7143 = vmatpush1.bf16.xpose.msra.mxu1 %v14588_v28  ;;  %7266 = vmatpush1.bf16.xpose.msra.mxu0 %v13471_v18  ;;  %v14602_v28 = vld [vmem:[#allocation72_spill] sm:$0xff]  ;;  %v14630_v18 = vld [vmem:[#allocation110_spill] sm:$0xff] }
 0xc38   :  { %7144 = vmatprep.subr.bf16.mxu1 %v14589_v25  ;;  %7267 = vmatprep.subr.bf16.mxu0 %v13475_v20  ;;  %v14603_v25 = vld [vmem:[#allocation84_spill] sm:$0xff]  ;;  %v14629_v20 = vld [vmem:[#allocation123_spill] sm:$0xff] }
 0xc3f   :  { %7145 = vmatpush1.bf16.xpose.msra.mxu1 %v14590_v11  ;;  %7268 = vmatpush1.bf16.xpose.msra.mxu0 %v13478_v1  ;;  %v14604_v11 = vld [vmem:[#allocation83_spill] sm:$0xff] }
 0xc40   :  { %7146 = vmatprep.subr.bf16.mxu1 %v14591_v10  ;;  %7269 = vmatprep.subr.bf16.mxu0 %v13482_v46  ;;  %v14605_v10 = vld [vmem:[#allocation85_spill] sm:$0xff] }
 0xc47   :  { %7147 = vmatpush1.bf16.xpose.msra.mxu1 %v14592_v52  ;;  %7270 = vmatpush1.bf16.xpose.msra.mxu0 %v13485_v38  ;;  %v14606_v52 = vld [vmem:[#allocation86_spill] sm:$0xff] }
 0xc48   :  { %7148 = vmatprep.subr.bf16.mxu1 %v14593_v22  ;;  %7271 = vmatprep.subr.bf16.mxu0 %v13488_v44  ;;  %v14607_v22 = vld [vmem:[#allocation87_spill] sm:$0xff] }
 0xc4f   :  { %7149 = vmatpush1.bf16.xpose.msra.mxu1 %v14594_v49  ;;  %7272 = vmatpush1.bf16.xpose.msra.mxu0 %v13491_v36  ;;  %v14608_v49 = vld [vmem:[#allocation88_spill] sm:$0xff] }
 0xc50   :  { %7150 = vmatprep.subr.bf16.mxu1 %v14595_v57  ;;  %v14609_v57 = vld [vmem:[#allocation89_spill] sm:$0xff] }
 0xc56   :  { %7290 = vmatmul.mubr.bf16.vlgmr.msra.gmra.mrb[56].mxu0 %v13556_v2 }
 0xc57   :  { %7151 = vmatpush1.bf16.xpose.msra.mxu1 %v14596_v55  ;;  %v14610_v55 = vld [vmem:[#allocation90_spill] sm:$0xff] }
 0xc58   :  { %7152 = vmatprep.subr.bf16.mxu1 %v14597_v47  ;;  %v14611_v47 = vld [vmem:[#allocation47_spill] sm:$0xff] }
 0xc5f   :  { %7153 = vmatpush1.bf16.xpose.msra.mxu1 %v14598_v26  ;;  %v14612_v26 = vld [vmem:[#allocation48_spill] sm:$0xff] }
 0xc60   :  { %7154 = vmatprep.subr.bf16.mxu1 %v14599_v37  ;;  %v14613_v37 = vld [vmem:[#allocation49_spill] sm:$0xff] }
 0xc67   :  { %7155 = vmatpush1.bf16.xpose.msra.mxu1 %v14600_v12  ;;  %v14614_v12 = vld [vmem:[#allocation28_spill] sm:$0xff] }
 0xc68   :  { %7156 = vmatprep.subr.bf16.mxu1 %v14601_v27  ;;  %v14615_v27 = vld [vmem:[#allocation50_spill] sm:$0xff] }
 0xc6f   :  { %7157 = vmatpush1.bf16.xpose.msra.mxu1 %v14602_v28  ;;  %v14616_v28 = vld [vmem:[#allocation51_spill] sm:$0xff] }
 0xc70   :  { %7158 = vmatprep.subr.bf16.mxu1 %v14603_v25  ;;  %v14617_v25 = vld [vmem:[#allocation52_spill] sm:$0xff] }
 0xc77   :  { %7159 = vmatpush1.bf16.xpose.msra.mxu1 %v14604_v11  ;;  %v14619_v11 = vld [vmem:[#allocation119_spill] sm:$0xff] }
 0xc78   :  { %7160 = vmatprep.subr.bf16.mxu1 %v14605_v10  ;;  %v14620_v10 = vld [vmem:[#allocation31_spill] sm:$0xff] }
 0xc7f   :  { %7161 = vmatpush1.bf16.xpose.msra.mxu1 %v14606_v52  ;;  %v14621_v52 = vld [vmem:[#allocation32_spill] sm:$0xff] }
 0xc80   :  { %7162 = vmatprep.subr.bf16.mxu1 %v14607_v22  ;;  %v14622_v22 = vld [vmem:[#allocation106_spill] sm:$0xff] }
 0xc87   :  { %7163 = vmatpush1.bf16.xpose.msra.mxu1 %v14608_v49  ;;  %v14623_v49 = vld [vmem:[#allocation120_spill] sm:$0xff] }
 0xc88   :  { %7164 = vmatprep.subr.bf16.mxu1 %v14609_v57  ;;  %v14624_v57 = vld [vmem:[#allocation107_spill] sm:$0xff] }
 0xc8f   :  { %7165 = vmatpush1.bf16.xpose.msra.mxu1 %v14610_v55  ;;  %v14625_v55 = vld [vmem:[#allocation121_spill] sm:$0xff] }
 0xc90   :  { %7216 = vmatprep.subr.bf16.mxu1 %v14611_v47 }
 0xc96   :  { %7167 = vmatmul.mubr.bf16.vlgmr.msra.gmra.mrb[40].mxu1 %v13556_v2 }
 0xc97   :  { %7217 = vmatpush1.bf16.xpose.msra.mxu1 %v13316_v31  ;;  %7248 = vmatprep.mubr.bf16.mxu1 %v7092_v0  ;;  %v14618_v0 = vld [vmem:[#allocation53_spill] sm:$0xff] }
 0xc98   :  { %7218 = vmatprep.subr.bf16.mxu1 %v13321_v61 }
 0xc9f   :  { %7219 = vmatpush1.bf16.xpose.msra.mxu1 %v13326_v4 }
 0xca0   :  { %7220 = vmatprep.subr.bf16.mxu1 %v14612_v26 }
 0xca7   :  { %7221 = vmatpush1.bf16.xpose.msra.mxu1 %v13332_v50 }
 0xca8   :  { %7222 = vmatprep.subr.bf16.mxu1 %v13335_v40 }
 0xcaf   :  { %7223 = vmatpush1.bf16.xpose.msra.mxu1 %v14613_v37 }
 0xcb0   :  { %7224 = vmatprep.subr.bf16.mxu1 %v14614_v12 }
 0xcb7   :  { %7225 = vmatpush1.bf16.xpose.msra.mxu1 %v14615_v27 }
 0xcb8   :  { %7226 = vmatprep.subr.bf16.mxu1 %v14616_v28 }
 0xcbf   :  { %7227 = vmatpush1.bf16.xpose.msra.mxu1 %v14617_v25 }
 0xcc0   :  { %7228 = vmatprep.subr.bf16.mxu1 %v14618_v0 }
 0xcc7   :  { %7229 = vmatpush1.bf16.xpose.msra.mxu1 %v14619_v11 }
 0xcc8   :  { %7230 = vmatprep.subr.bf16.mxu1 %v14620_v10 }
 0xccf   :  { %7231 = vmatpush1.bf16.xpose.msra.mxu1 %v14621_v52 }
 0xcd0   :  { %7232 = vmatprep.subr.bf16.mxu1 %v14622_v22 }
 0xcd7   :  { %7233 = vmatpush1.bf16.xpose.msra.mxu1 %v14623_v49 }
 0xcd8   :  { %7234 = vmatprep.subr.bf16.mxu1 %v14624_v57 }
 0xcdf   :  { %7235 = vmatpush1.bf16.xpose.msra.mxu1 %v14625_v55 }
 0xce0   :  { %7236 = vmatprep.subr.bf16.mxu1 %v14626_v16 }
 0xce7   :  { %7237 = vmatpush1.bf16.xpose.msra.mxu1 %v14627_v35 }
 0xce8   :  { %7238 = vmatprep.subr.bf16.mxu1 %v14628_v8 }
 0xce9   :  { %v13631_v43 = vpop.f32.mrb[36].mxu1  ;;  %v13633_v21 = vpop.f32.mrb[52].mxu0 }
 0xcea   :  { %v7129_v3 = vpop.f32.mrb[37].mxu1  ;;  %v13635_v36 = vpop.f32.mrb[53].mxu0 }
 0xceb   :  { %v7131_v44 = vpop.f32.mrb[38].mxu1  ;;  %v7213_v38 = vpop.f32.mrb[54].mxu0 }
 0xcec   :  { %v7132_v46 = vpop.f32.mrb[39].mxu1  ;;  %v7214_v1 = vpop.f32.mrb[55].mxu0  ;;  %v14637_v44 = vld [vmem:[#allocation127_spill] sm:$0xff] }
 0xced   :  { %v11171_v46 = vld [vmem:[#allocation8 + $0x4] ss:$8 sps:$4 sm:$0xff]  }
 0xcee   :  { %v14638_v1 = vld [vmem:[#allocation55_spill] sm:$0xff] }
 0xcef   :  { %7239 = vmatpush1.bf16.xpose.msra.mxu1 %v14629_v20  ;;  %v7298_v38 = vsub.f32 %v7129_v3, %v14638_v1  ;;  %v11180_v3 = vld [vmem:[#allocation8 + $0x40] ss:$8 sps:$4 sm:$0xff]   ;;  %v11182_v1 = vld [vmem:[#allocation8 + $0x50] ss:$8 sps:$4 sm:$0xff]  }
 0xcf0   :  { %7240 = vmatprep.subr.bf16.mxu1 %v14630_v18 }
 0xcf1   :  { %v7307_v30 = vpack.c.bf16 %v7298_v38, %v7298_v38  ;;  %v11187_v38 = vld [vmem:[#allocation8 + $0x84] ss:$8 sps:$4 sm:$0xff]  }
 0xcf7   :  { %7241 = vmatpush1.bf16.xpose.msra.mxu1 %v14631_v23  ;;  %v11221_v23 = vld [vmem:[#allocation8 + $0x194] ss:$8 sps:$4 sm:$0xff]  }
 0xcf8   :  { %7242 = vmatprep.subr.bf16.mxu1 %v14632_v29  ;;  %v11173_v29 = vld [vmem:[#allocation8 + $0x14] ss:$8 sps:$4 sm:$0xff]  }
 0xcff   :  { %7243 = vmatpush1.bf16.xpose.msra.mxu1 %v14633_v14  ;;  %v11174_v14 = vld [vmem:[#allocation8 + $0x10] ss:$8 sps:$4 sm:$0xff]  }
 0xd00   :  { %7244 = vmatprep.subr.bf16.mxu1 %v14634_v13  ;;  %v11175_v13 = vld [vmem:[#allocation8 + $0x24] ss:$8 sps:$4 sm:$0xff]  }
 0xd07   :  { %7245 = vmatpush1.bf16.xpose.msra.mxu1 %v14635_v5  ;;  %v11176_v5 = vld [vmem:[#allocation8 + $0x20] ss:$8 sps:$4 sm:$0xff]  }
 0xd08   :  { %7246 = vmatprep.subr.bf16.mxu1 %v14636_v62  ;;  %v11177_v62 = vld [vmem:[#allocation8 + $0x34] ss:$8 sps:$4 sm:$0xff]  }
 0xd0f   :  { %7247 = vmatpush1.bf16.xpose.msra.mxu1 %v14637_v44  ;;  %v11178_v44 = vld [vmem:[#allocation8 + $0x30] ss:$8 sps:$4 sm:$0xff]  }
 0xd10   :  { %7315 = vmatprep.subr.bf16.mxu1 %v11171_v46  ;;  %v11179_v46 = vld [vmem:[#allocation8 + $0x44] ss:$8 sps:$4 sm:$0xff]  }
 0xd16   :  { %7249 = vmatmul.mubr.bf16.vlgmr.msra.gmra.mrb[44].mxu1 %v13556_v2  ;;  %v11181_v2 = vld [vmem:[#allocation8 + $0x54] ss:$8 sps:$4 sm:$0xff]  }
 0xd17   :  { %7316 = vmatpush1.bf16.msra.mxu1 %v11172_v17  ;;  %7347 = vmatprep.mubr.bf16.mxu1 %v7307_v30 }
 0xd18   :  { %7317 = vmatprep.subr.bf16.mxu1 %v11173_v29 }
 0xd1b   :  { %7318 = vmatpush1.bf16.msra.mxu1 %v11174_v14 }
 0xd1c   :  { %7319 = vmatprep.subr.bf16.mxu1 %v11175_v13  ;;  %v11183_v13 = vld [vmem:[#allocation8 + $0x64] ss:$8 sps:$4 sm:$0xff]  }
 0xd1f   :  { %7320 = vmatpush1.bf16.msra.mxu1 %v11176_v5  ;;  %v11184_v5 = vld [vmem:[#allocation8 + $0x60] ss:$8 sps:$4 sm:$0xff]  }
 0xd20   :  { %7321 = vmatprep.subr.bf16.mxu1 %v11177_v62  ;;  %v11185_v62 = vld [vmem:[#allocation8 + $0x74] ss:$8 sps:$4 sm:$0xff]  }
 0xd23   :  { %7322 = vmatpush1.bf16.msra.mxu1 %v11178_v44  ;;  %v11186_v44 = vld [vmem:[#allocation8 + $0x70] ss:$8 sps:$4 sm:$0xff]  }
 0xd24   :  { %7323 = vmatprep.subr.bf16.mxu1 %v11179_v46  ;;  %v11188_v46 = vld [vmem:[#allocation8 + $0x80] ss:$8 sps:$4 sm:$0xff]  }
 0xd27   :  { %7324 = vmatpush1.bf16.msra.mxu1 %v11180_v3  ;;  %v11189_v3 = vld [vmem:[#allocation8 + $0x94] ss:$8 sps:$4 sm:$0xff]  }
 0xd28   :  { %7325 = vmatprep.subr.bf16.mxu1 %v11181_v2  ;;  %v11190_v2 = vld [vmem:[#allocation8 + $0x90] ss:$8 sps:$4 sm:$0xff]  }
 0xd29   :  { %v13648_v17 = vpop.f32.mrb[56].mxu0 }
 0xd2a   :  { %14639 = vst [vmem:[#allocation41_spill] sm:$0xff] %v13648_v17  ;;  %v7293_v30 = vpop.f32.mrb[57].mxu0  ;;  %v11215_v17 = vld [vmem:[#allocation8 + $0x164] ss:$8 sps:$4 sm:$0xff]  }
 0xd2b   :  { %v7294_v29 = vpop.f32.mrb[58].mxu0  ;;  %7326 = vmatpush1.bf16.msra.mxu1 %v11182_v1  ;;  %v11191_v30 = vld [vmem:[#allocation8 + $0xa4] ss:$8 sps:$4 sm:$0xff]   ;;  %v11193_v1 = vld [vmem:[#allocation8 + $0xb4] ss:$8 sps:$4 sm:$0xff]  }
 0xd2c   :  { %v7295_v14 = vpop.f32.mrb[59].mxu0  ;;  %7327 = vmatprep.subr.bf16.mxu1 %v11183_v13  ;;  %v11192_v29 = vld [vmem:[#allocation8 + $0xa0] ss:$8 sps:$4 sm:$0xff]   ;;  %v11195_v13 = vld [vmem:[#allocation8 + $0xc4] ss:$8 sps:$4 sm:$0xff]  }
 0xd2d   :  { %v11194_v14 = vld [vmem:[#allocation8 + $0xb0] ss:$8 sps:$4 sm:$0xff]  }
 0xd2f   :  { %7328 = vmatpush1.bf16.msra.mxu1 %v11184_v5  ;;  %v11196_v5 = vld [vmem:[#allocation8 + $0xc0] ss:$8 sps:$4 sm:$0xff]  }
 0xd30   :  { %7329 = vmatprep.subr.bf16.mxu1 %v11185_v62  ;;  %v11197_v62 = vld [vmem:[#allocation8 + $0xd4] ss:$8 sps:$4 sm:$0xff]  }
 0xd33   :  { %7330 = vmatpush1.bf16.msra.mxu1 %v11186_v44  ;;  %v11198_v44 = vld [vmem:[#allocation8 + $0xd0] ss:$8 sps:$4 sm:$0xff]  }
 0xd34   :  { %7331 = vmatprep.subr.bf16.mxu1 %v11187_v38  ;;  %v11199_v38 = vld [vmem:[#allocation8 + $0xe4] ss:$8 sps:$4 sm:$0xff]  }
 0xd37   :  { %7332 = vmatpush1.bf16.msra.mxu1 %v11188_v46  ;;  %v11200_v46 = vld [vmem:[#allocation8 + $0xe0] ss:$8 sps:$4 sm:$0xff]  }
 0xd38   :  { %7333 = vmatprep.subr.bf16.mxu1 %v11189_v3  ;;  %v14640_v3 = vld [vmem:[#allocation54_spill] sm:$0xff] }
 0xd3b   :  { %7334 = vmatpush1.bf16.msra.mxu1 %v11190_v2  ;;  %v7297_v2 = vsub.f32 %v13631_v43, %v14640_v3  ;;  %v11210_v43 = vld [vmem:[#allocation8 + $0x130] ss:$8 sps:$4 sm:$0xff]   ;;  %v11211_v3 = vld [vmem:[#allocation8 + $0x144] ss:$8 sps:$4 sm:$0xff]  }
 0xd3c   :  { %7335 = vmatprep.subr.bf16.mxu1 %v11191_v30  ;;  %v11201_v30 = vld [vmem:[#allocation8 + $0xf4] ss:$8 sps:$4 sm:$0xff]  }
 0xd3f   :  { %7336 = vmatpush1.bf16.msra.mxu1 %v11192_v29  ;;  %v11202_v29 = vld [vmem:[#allocation8 + $0xf0] ss:$8 sps:$4 sm:$0xff]  }
 0xd40   :  { %7337 = vmatprep.subr.bf16.mxu1 %v11193_v1  ;;  %v7306_v1 = vpack.c.bf16 %v7297_v2, %v7297_v2  ;;  %v11212_v2 = vld [vmem:[#allocation8 + $0x140] ss:$8 sps:$4 sm:$0xff]  }
 0xd43   :  { %7338 = vmatpush1.bf16.msra.mxu1 %v11194_v14  ;;  %v11203_v14 = vld [vmem:[#allocation8 + $0x104] ss:$8 sps:$4 sm:$0xff]  }
 0xd44   :  { %7339 = vmatprep.subr.bf16.mxu1 %v11195_v13  ;;  %v11204_v13 = vld [vmem:[#allocation8 + $0x100] ss:$8 sps:$4 sm:$0xff]  }
 0xd47   :  { %7340 = vmatpush1.bf16.msra.mxu1 %v11196_v5  ;;  %v11205_v5 = vld [vmem:[#allocation8 + $0x114] ss:$8 sps:$4 sm:$0xff]  }
 0xd48   :  { %7341 = vmatprep.subr.bf16.mxu1 %v11197_v62  ;;  %v11206_v62 = vld [vmem:[#allocation8 + $0x110] ss:$8 sps:$4 sm:$0xff]  }
 0xd4b   :  { %7342 = vmatpush1.bf16.msra.mxu1 %v11198_v44  ;;  %v11207_v44 = vld [vmem:[#allocation8 + $0x124] ss:$8 sps:$4 sm:$0xff]  }
 0xd4c   :  { %7343 = vmatprep.subr.bf16.mxu1 %v11199_v38  ;;  %v11208_v38 = vld [vmem:[#allocation8 + $0x120] ss:$8 sps:$4 sm:$0xff]  }
 0xd4f   :  { %7344 = vmatpush1.bf16.msra.mxu1 %v11200_v46  ;;  %v11209_v46 = vld [vmem:[#allocation8 + $0x134] ss:$8 sps:$4 sm:$0xff]  }
 0xd50   :  { %7345 = vmatprep.subr.bf16.mxu1 %v11201_v30  ;;  %v11213_v30 = vld [vmem:[#allocation8 + $0x154] ss:$8 sps:$4 sm:$0xff]  }
 0xd53   :  { %7346 = vmatpush1.bf16.msra.mxu1 %v11202_v29 }
 0xd54   :  { %7356 = vmatprep.subr.bf16.mxu1 %v11203_v14  ;;  %v14641_v14 = vld [vmem:[#allocation93_spill] sm:$0xff] }
 0xd56   :  { %7348 = vmatmul.mubr.bf16.vlgmr.msra.gmra.mrb[48].mxu1 %v7306_v1 }
 0xd57   :  { %7357 = vmatpush1.bf16.msra.mxu1 %v11204_v13 }
 0xd58   :  { %7358 = vmatprep.subr.bf16.mxu1 %v11205_v5 }
 0xd5b   :  { %7359 = vmatpush1.bf16.msra.mxu1 %v11206_v62  ;;  %v11214_v62 = vld [vmem:[#allocation8 + $0x150] ss:$8 sps:$4 sm:$0xff]  }
 0xd5c   :  { %7360 = vmatprep.subr.bf16.mxu1 %v11207_v44 }
 0xd5f   :  { %7361 = vmatpush1.bf16.msra.mxu1 %v11208_v38 }
 0xd60   :  { %7362 = vmatprep.subr.bf16.mxu1 %v11209_v46  ;;  %v11216_v46 = vld [vmem:[#allocation8 + $0x160] ss:$8 sps:$4 sm:$0xff]  }
 0xd63   :  { %7363 = vmatpush1.bf16.msra.mxu1 %v11210_v43  ;;  %v11217_v43 = vld [vmem:[#allocation8 + $0x174] ss:$8 sps:$4 sm:$0xff]  }
 0xd64   :  { %7364 = vmatprep.subr.bf16.mxu1 %v11211_v3  ;;  %v11218_v3 = vld [vmem:[#allocation8 + $0x170] ss:$8 sps:$4 sm:$0xff]  }
 0xd67   :  { %7365 = vmatpush1.bf16.msra.mxu1 %v11212_v2  ;;  %v11219_v2 = vld [vmem:[#allocation8 + $0x184] ss:$8 sps:$4 sm:$0xff]  }
 0xd68   :  { %7366 = vmatprep.subr.bf16.mxu1 %v11213_v30  ;;  %v11220_v30 = vld [vmem:[#allocation8 + $0x180] ss:$8 sps:$4 sm:$0xff]  }
 0xd69   :  { %v7168_v29 = vpop.f32.mrb[40].mxu1 }
 0xd6a   :  { %v7170_v1 = vpop.f32.mrb[41].mxu1 }
 0xd6b   :  { %v7300_v13 = vsub.f32 %v7170_v1, %v14641_v14  ;;  %v7172_v5 = vpop.f32.mrb[42].mxu1  ;;  %7367 = vmatpush1.bf16.msra.mxu1 %v11214_v62  ;;  %v11222_v1 = vld [vmem:[#allocation8 + $0x190] ss:$8 sps:$4 sm:$0xff]   ;;  %v11223_v14 = vld [vmem:[#allocation8 + $0x1a4] ss:$8 sps:$4 sm:$0xff]  }
 0xd6c   :  { %v7173_v44 = vpop.f32.mrb[43].mxu1  ;;  %7368 = vmatprep.subr.bf16.mxu1 %v11215_v17  ;;  %v11224_v5 = vld [vmem:[#allocation8 + $0x1a0] ss:$8 sps:$4 sm:$0xff]   ;;  %v11225_v17 = vld [vmem:[#allocation8 + $0x1b4] ss:$8 sps:$4 sm:$0xff]  }
 0xd6d   :  { %v7309_v38 = vpack.c.bf16 %v7300_v13, %v7300_v13  ;;  %v11226_v13 = vld [vmem:[#allocation8 + $0x1b0] ss:$8 sps:$4 sm:$0xff]   ;;  %v11227_v62 = vld [vmem:[#allocation8 + $0x1c4] ss:$8 sps:$4 sm:$0xff]   ;;  %v11228_v44 = vld [vmem:[#allocation8 + $0x1c0] ss:$8 sps:$4 sm:$0xff]  }
 0xd6f   :  { %7369 = vmatpush1.bf16.msra.mxu1 %v11216_v46  ;;  %7388 = vmatprep.mubr.bf16.mxu1 %v7309_v38  ;;  %v11229_v38 = vld [vmem:[#allocation8 + $0x1d4] ss:$8 sps:$4 sm:$0xff]   ;;  %v11230_v46 = vld [vmem:[#allocation8 + $0x1d0] ss:$8 sps:$4 sm:$0xff]  }
 0xd70   :  { %7370 = vmatprep.subr.bf16.mxu1 %v11217_v43  ;;  %v11231_v43 = vld [vmem:[#allocation8 + $0x1e4] ss:$8 sps:$4 sm:$0xff]  }
 0xd73   :  { %7371 = vmatpush1.bf16.msra.mxu1 %v11218_v3  ;;  %v14642_v3 = vld [vmem:[#allocation91_spill] sm:$0xff] }
 0xd74   :  { %7372 = vmatprep.subr.bf16.mxu1 %v11219_v2  ;;  %v7299_v2 = vsub.f32 %v7168_v29, %v14642_v3  ;;  %v7537_v3 = vld [vmem:[%s13976_s7 + $0x48] sm:$0xff] }
 0xd77   :  { %7373 = vmatpush1.bf16.msra.mxu1 %v11220_v30  ;;  %v11233_v30 = vld [vmem:[#allocation8 + $0x1f4] ss:$8 sps:$4 sm:$0xff]  }
 0xd78   :  { %7374 = vmatprep.subr.bf16.mxu1 %v11221_v23  ;;  %v11232_v23 = vld [vmem:[#allocation8 + $0x1e0] ss:$8 sps:$4 sm:$0xff]  }
 0xd7b   :  { %7375 = vmatpush1.bf16.msra.mxu1 %v11222_v1  ;;  %v14643_v1 = vld [vmem:[#allocation92_spill] sm:$0xff] }
 0xd7c   :  { %7376 = vmatprep.subr.bf16.mxu1 %v11223_v14  ;;  %v7302_v14 = vsub.f32 %v13635_v36, %v14643_v1  ;;  %v7555_v1 = vld [vmem:[%s13976_s7 + $0xd8] sm:$0xff] }
 0xd7f   :  { %7377 = vmatpush1.bf16.msra.mxu1 %v11224_v5  ;;  %v11234_v5 = vld [vmem:[#allocation8 + $0x1f0] ss:$8 sps:$4 sm:$0xff]  }
 0xd80   :  { %7378 = vmatprep.subr.bf16.mxu1 %v11225_v17  ;;  %v7308_v17 = vpack.c.bf16 %v7299_v2, %v7299_v2  ;;  %v14645_v2 = vld [vmem:[#allocation95_spill] sm:$0xff] }
 0xd83   :  { %7379 = vmatpush1.bf16.msra.mxu1 %v11226_v13  ;;  %v11235_v13 = vld [vmem:[#allocation8 + $0x204] ss:$8 sps:$4 sm:$0xff]  }
 0xd84   :  { %7380 = vmatprep.subr.bf16.mxu1 %v11227_v62  ;;  %v7311_v62 = vpack.c.bf16 %v7302_v14, %v7302_v14 }
 0xd87   :  { %7381 = vmatpush1.bf16.msra.mxu1 %v11228_v44  ;;  %v7535_v44 = vld [vmem:[%s13976_s7 + $0x38] sm:$0xff] }
 0xd88   :  { %7382 = vmatprep.subr.bf16.mxu1 %v11229_v38  ;;  %v7552_v38 = vld [vmem:[%s13976_s7 + $0xc0] sm:$0xff] }
 0xd8b   :  { %7383 = vmatpush1.bf16.msra.mxu1 %v11230_v46 }
 0xd8c   :  { %7384 = vmatprep.subr.bf16.mxu1 %v11231_v43  ;;  %v14644_v43 = vld [vmem:[#allocation94_spill] sm:$0xff] }
 0xd8f   :  { %7385 = vmatpush1.bf16.msra.mxu1 %v11232_v23 }
 0xd90   :  { %7386 = vmatprep.subr.bf16.mxu1 %v11233_v30  ;;  %v7554_v30 = vld [vmem:[%s13976_s7 + $0xd0] sm:$0xff] }
 0xd93   :  { %7387 = vmatpush1.bf16.msra.mxu1 %v11234_v5  ;;  %v14646_v5 = vld [vmem:[#allocation96_spill] sm:$0xff] }
 0xd94   :  { %7397 = vmatprep.subr.bf16.mxu1 %v11235_v13  ;;  %v14647_v13 = vld [vmem:[#allocation97_spill] sm:$0xff] }
 0xd96   :  { %7389 = vmatmul.mubr.bf16.vlgmr.msra.gmra.mrb[48].mxu1 %v7308_v17  ;;  %v13776_v17 = vpack.c.bf16 %v7555_v1, %v7554_v30  ;;  %v7556_v30 = vld [vmem:[%s13976_s7 + $0xe0] sm:$0xff]  ;;  %v7557_v1 = vld [vmem:[%s13976_s7 + $0xe8] sm:$0xff] }
 0xd97   :  { %7398 = vmatpush1.bf16.msra.mxu1 %v13195_v56  ;;  %7429 = vmatprep.mubr.bf16.mxu1 %v7311_v62  ;;  %v7544_v56 = vld [vmem:[%s13976_s7 + $0x80] sm:$0xff]  ;;  %v14648_v62 = vld [vmem:[#allocation98_spill] sm:$0xff] }
 0xd98   :  { %7399 = vmatprep.subr.bf16.mxu1 %v13199_v53  ;;  %v7545_v53 = vld [vmem:[%s13976_s7 + $0x88] sm:$0xff] }
 0xd9b   :  { %7400 = vmatpush1.bf16.msra.mxu1 %v13206_v41  ;;  %v7528_v41 = vld [vmem:[%s13976_s7] sm:$0xff] }
 0xd9c   :  { %7401 = vmatprep.subr.bf16.mxu1 %v13209_v32  ;;  %v13682_v32 = vpack.c.bf16 %v7545_v53, %v7544_v56  ;;  %v14649_v56 = vld [vmem:[#allocation100_spill] sm:$0xff]  ;;  %v14650_v53 = vld [vmem:[#allocation101_spill] sm:$0xff] }
 0xd9e   :  { %9093 = vmatprep.subr.bf16.mxu0 %v13682_v32 }
 0xd9f   :  { %7402 = vmatpush1.bf16.msra.mxu1 %v13212_v6  ;;  %v7529_v6 = vld [vmem:[%s13976_s7 + $0x8] sm:$0xff] }
 0xda0   :  { %7403 = vmatprep.subr.bf16.mxu1 %v13215_v39  ;;  %v7546_v39 = vld [vmem:[%s13976_s7 + $0x90] sm:$0xff] }
 0xda3   :  { %7404 = vmatpush1.bf16.msra.mxu1 %v13220_v33  ;;  %v7547_v33 = vld [vmem:[%s13976_s7 + $0x98] sm:$0xff] }
 0xda4   :  { %7405 = vmatprep.subr.bf16.mxu1 %v13223_v42  ;;  %v13694_v42 = vpack.c.bf16 %v7529_v6, %v7528_v41  ;;  %v14651_v41 = vld [vmem:[#allocation46_spill] sm:$0xff] }
 0xda5   :  { %v7301_v6 = vsub.f32 %v13633_v21, %v14651_v41  ;;  %v7559_v41 = vld [vmem:[%s13976_s7 + $0xf8] sm:$0xff] }
 0xda6   :  { %9095 = vmatpush3.bf16.msra.mxu0 %v13694_v42 }
 0xda7   :  { %7406 = vmatpush1.bf16.msra.mxu1 %v13226_v34  ;;  %v13696_v34 = vpack.c.bf16 %v7547_v33, %v7546_v39  ;;  %v14652_v39 = vld [vmem:[#allocation103_spill] sm:$0xff]  ;;  %v14653_v33 = vld [vmem:[#allocation45_spill] sm:$0xff] }
 0xda8   :  { %7407 = vmatprep.subr.bf16.mxu1 %v13229_v9  ;;  %v7530_v9 = vld [vmem:[%s13976_s7 + $0x10] sm:$0xff] }
 0xda9   :  { %9097 = vmatprep.subr.bf16.mxu0 %v13696_v34 }
 0xdab   :  { %7408 = vmatpush1.bf16.msra.mxu1 %v13234_v51  ;;  %v7531_v51 = vld [vmem:[%s13976_s7 + $0x18] sm:$0xff] }
 0xdac   :  { %7409 = vmatprep.subr.bf16.mxu1 %v13237_v45  ;;  %v7548_v45 = vld [vmem:[%s13976_s7 + $0xa0] sm:$0xff] }
 0xdaf   :  { %7410 = vmatpush1.bf16.msra.mxu1 %v13240_v54  ;;  %v7549_v54 = vld [vmem:[%s13976_s7 + $0xa8] sm:$0xff] }
 0xdb0   :  { %7411 = vmatprep.subr.bf16.mxu1 %v13243_v19  ;;  %v13712_v19 = vpack.c.bf16 %v7531_v51, %v7530_v9  ;;  %v7310_v9 = vpack.c.bf16 %v7301_v6, %v7301_v6 }
 0xdb2   :  { %9099 = vmatpush3.bf16.msra.mxu0 %v13712_v19 }
 0xdb3   :  { %7412 = vmatpush1.bf16.msra.mxu1 %v13248_v15  ;;  %v13716_v15 = vpack.c.bf16 %v7549_v54, %v7548_v45  ;;  %v14673_v45 = vld [vmem:[#allocation133_spill] sm:$0xff]  ;;  %v14674_v54 = vld [vmem:[#allocation134_spill] sm:$0xff] }
 0xdb4   :  { %7413 = vmatprep.subr.bf16.mxu1 %v13251_v24  ;;  %v7532_v24 = vld [vmem:[%s13976_s7 + $0x20] sm:$0xff] }
 0xdb5   :  { %9101 = vmatprep.subr.bf16.mxu0 %v13716_v15 }
 0xdb7   :  { %7414 = vmatpush1.bf16.msra.mxu1 %v13254_v48  ;;  %v7533_v48 = vld [vmem:[%s13976_s7 + $0x28] sm:$0xff] }
 0xdb8   :  { %7415 = vmatprep.subr.bf16.mxu1 %v13257_v59  ;;  %v7550_v59 = vld [vmem:[%s13976_s7 + $0xb0] sm:$0xff]  ;;  %v13732_v36 = vpack.c.bf16 %v7533_v48, %v7532_v24  ;;  %v14675_v24 = vld [vmem:[#allocation135_spill] sm:$0xff]  ;;  %v14676_v48 = vld [vmem:[#allocation136_spill] sm:$0xff] }
 0xdba   :  { %9103 = vmatpush3.bf16.msra.mxu0 %v13732_v36 }
 0xdbb   :  { %7416 = vmatpush1.bf16.msra.mxu1 %v13262_v63  ;;  %v7551_v63 = vld [vmem:[%s13976_s7 + $0xb8] sm:$0xff] }
 0xdbc   :  { %7417 = vmatprep.subr.bf16.mxu1 %v13265_v60  ;;  %v13736_v29 = vpack.c.bf16 %v7551_v63, %v7550_v59  ;;  %v7534_v60 = vld [vmem:[%s13976_s7 + $0x30] sm:$0xff]  ;;  %v14678_v63 = vld [vmem:[#allocation140_spill] sm:$0xff] }
 0xdbd   :  { %v13752_v46 = vpack.c.bf16 %v7535_v44, %v7534_v60  ;;  %v14677_v59 = vld [vmem:[#allocation137_spill] sm:$0xff] }
 0xdbe   :  { %9105 = vmatprep.subr.bf16.mxu0 %v13736_v29  ;;  %v14679_v60 = vld [vmem:[#allocation41_spill] sm:$0xff] }
 0xdbf   :  { %7418 = vmatpush1.bf16.msra.mxu1 %v13268_v7  ;;  %v7553_v7 = vld [vmem:[%s13976_s7 + $0xc8] sm:$0xff]  ;;  %9107 = vmatpush3.bf16.msra.mxu0 %v13752_v46  ;;  %v7305_v44 = vsub.f32 %v14679_v60, %v14678_v63 }
 0xdc0   :  { %7419 = vmatprep.subr.bf16.mxu1 %v13271_v58  ;;  %v13756_v23 = vpack.c.bf16 %v7553_v7, %v7552_v38  ;;  %v7536_v58 = vld [vmem:[%s13976_s7 + $0x40] sm:$0xff]  ;;  %v14680_v38 = vld [vmem:[#allocation138_spill] sm:$0xff] }
 0xdc1   :  { %v13772_v14 = vpack.c.bf16 %v7537_v3, %v7536_v58  ;;  %v14681_v7 = vld [vmem:[#allocation139_spill] sm:$0xff]  ;;  %v7538_v58 = vld [vmem:[%s13976_s7 + $0x50] sm:$0xff]  ;;  %v7539_v3 = vld [vmem:[%s13976_s7 + $0x58] sm:$0xff] }
 0xdc2   :  { %9109 = vmatprep.subr.bf16.mxu0 %v13756_v23 }
 0xdc3   :  { %7420 = vmatpush1.bf16.msra.mxu1 %v14644_v43  ;;  %9111 = vmatpush3.bf16.msra.mxu0 %v13772_v14  ;;  %v7314_v43 = vpack.c.bf16 %v7305_v44, %v7305_v44 }
 0xdc4   :  { %7421 = vmatprep.subr.bf16.mxu1 %v14645_v2  ;;  %9113 = vmatprep.subr.bf16.mxu0 %v13776_v17  ;;  %v13847_v2 = vpack.c.bf16 %v7539_v3, %v7538_v58 }
 0xdc7   :  { %7422 = vmatpush1.bf16.msra.mxu1 %v14646_v5  ;;  %9115 = vmatpush3.bf16.msra.mxu0 %v13847_v2  ;;  %v13856_v5 = vpack.c.bf16 %v7557_v1, %v7556_v30 }
 0xdc8   :  { %7423 = vmatprep.subr.bf16.mxu1 %v14647_v13  ;;  %v7540_v13 = vld [vmem:[%s13976_s7 + $0x60] sm:$0xff] }
 0xdc9   :  { %9117 = vmatprep.subr.bf16.mxu0 %v13856_v5 }
 0xdcb   :  { %7424 = vmatpush1.bf16.msra.mxu1 %v14648_v62  ;;  %v7541_v62 = vld [vmem:[%s13976_s7 + $0x68] sm:$0xff] }
 0xdcc   :  { %7425 = vmatprep.subr.bf16.mxu1 %v14649_v56  ;;  %v13864_v56 = vpack.c.bf16 %v7541_v62, %v7540_v13 }
 0xdce   :  { %9119 = vmatpush3.bf16.msra.mxu0 %v13864_v56 }
 0xdcf   :  { %7426 = vmatpush1.bf16.msra.mxu1 %v14650_v53  ;;  %v7558_v53 = vld [vmem:[%s13976_s7 + $0xf0] sm:$0xff] }
 0xdd0   :  { %7427 = vmatprep.subr.bf16.mxu1 %v14652_v39  ;;  %v9120_v6 = vpack.c.bf16 %v7559_v41, %v7558_v53  ;;  %v7542_v39 = vld [vmem:[%s13976_s7 + $0x70] sm:$0xff] }
 0xdd2   :  { %9121 = vmatprep.subr.bf16.mxu0 %v9120_v6 }
 0xdd3   :  { %7428 = vmatpush1.bf16.msra.mxu1 %v14653_v33  ;;  %v7543_v33 = vld [vmem:[%s13976_s7 + $0x78] sm:$0xff]  ;;  %s11511_s7 = smov [#allocation19]  }
 0xdd4   :  { %7438 = vmatprep.subr.bf16.mxu1 %v14611_v47  ;;  %v14654_v47 = vld [vmem:[#allocation115_spill] sm:$0xff]  ;;  %s7998_s14 = sshll.u32 %s11511_s7, 4  ;;  %s7999_s14 = int_to_ptr.vmem [resolvable:$true] %s7998_s14 }
 0xdd5   :  { %s11456_s17 = scalar_lea.vmem %s7999_s14, 32  ;;  %p11461_p11 = scmp.lt.s32.totalorder %s7999_s14, %s7999_s14 }
 0xdd6   :  { %7430 = vmatmul.mubr.bf16.vlgmr.msra.gmra.mrb[48].mxu1 %v7310_v9  ;;  %v9122_v9 = vpack.c.bf16 %v7543_v33, %v7542_v39  ;;  %p11457_p10 = scmp.ne.s32.totalorder %s7999_s14, %s11456_s17  ;;  %p11462_p12 = scmp.lt.s32.totalorder %s11456_s17, %s11456_s17 }
 0xdd7   :  { %7439 = vmatpush1.bf16.msra.mxu1 %v13316_v31 }
 0xdd8   :  { %7440 = vmatprep.subr.bf16.mxu1 %v13321_v61  ;;  %9123 = vmatpush3.bf16.msra.mxu0 %v9122_v9  ;;  %p11463_p13 = por %p11462_p12, %p11461_p11 }
 0xdd9   :  { %9126 = vmatprep.subr.msk.bf16.mxu0 %vm13882_vm2, %v13682_v32 }
 0xdda   :  { %p11464_p0 = pnand %p11463_p13, %p11457_p10 }
 0xddb   :  { %7441 = vmatpush1.bf16.msra.mxu1 %v13326_v4 }
 0xddc   :  { %7442 = vmatprep.subr.bf16.mxu1 %v14612_v26  ;;  %v14656_v26 = vld [vmem:[#allocation111_spill] sm:$0xff] }
 0xddf   :  { %7443 = vmatpush1.bf16.msra.mxu1 %v13332_v50 }
 0xde0   :  { %7444 = vmatprep.subr.bf16.mxu1 %v13335_v40  ;;  %v14655_v40 = vld [vmem:[#allocation124_spill] sm:$0xff] }
 0xde3   :  { %7445 = vmatpush1.bf16.msra.mxu1 %v14613_v37  ;;  %v14657_v37 = vld [vmem:[#allocation125_spill] sm:$0xff] }
 0xde4   :  { %7446 = vmatprep.subr.bf16.mxu1 %v14614_v12  ;;  %v14658_v12 = vld [vmem:[#allocation112_spill] sm:$0xff] }
 0xde7   :  { %7447 = vmatpush1.bf16.msra.mxu1 %v14615_v27  ;;  %v14659_v27 = vld [vmem:[#allocation126_spill] sm:$0xff] }
 0xde8   :  { %7448 = vmatprep.subr.bf16.mxu1 %v14616_v28  ;;  %v14660_v28 = vld [vmem:[#allocation128_spill] sm:$0xff] }
 0xde9   :  { %v7250_v21 = vpop.f32.mrb[44].mxu1 }
 0xdea   :  { %v7252_v31 = vpop.f32.mrb[45].mxu1 }
 0xdeb   :  { %v7304_v61 = vsub.f32 %v7252_v31, %v14654_v47  ;;  %v7254_v51 = vpop.f32.mrb[46].mxu1  ;;  %7449 = vmatpush1.bf16.msra.mxu1 %v14617_v25  ;;  %v14661_v25 = vld [vmem:[#allocation113_spill] sm:$0xff] }
 0xdec   :  { %v7255_v4 = vpop.f32.mrb[47].mxu1  ;;  %7450 = vmatprep.subr.bf16.mxu1 %v14618_v0  ;;  %v14665_v0 = vmov 0   ;;  %v14684_v47 = vld [vmem:[#allocation141_spill] sm:$0xff] }
 0xded   :  { %v7313_v50 = vpack.c.bf16 %v7304_v61, %v7304_v61  ;;  %v14685_v4 = vld [vmem:[#allocation142_spill] sm:$0xff] }
 0xdef   :  { %7451 = vmatpush1.bf16.msra.mxu1 %v14619_v11  ;;  %7470 = vmatprep.mubr.bf16.mxu1 %v7313_v50  ;;  %v14666_v11 = vld [vmem:[#allocation116_spill] sm:$0xff] }
 0xdf0   :  { %7452 = vmatprep.subr.bf16.mxu1 %v14620_v10  ;;  %v14667_v10 = vld [vmem:[#allocation130_spill] sm:$0xff] }
 0xdf3   :  { %7453 = vmatpush1.bf16.msra.mxu1 %v14621_v52  ;;  %v14668_v52 = vld [vmem:[#allocation117_spill] sm:$0xff] }
 0xdf4   :  { %7454 = vmatprep.subr.bf16.mxu1 %v14622_v22  ;;  %v14669_v22 = vld [vmem:[#allocation131_spill] sm:$0xff] }
 0xdf7   :  { %7455 = vmatpush1.bf16.msra.mxu1 %v14623_v49  ;;  %v14670_v49 = vld [vmem:[#allocation118_spill] sm:$0xff] }
 0xdf8   :  { %7456 = vmatprep.subr.bf16.mxu1 %v14624_v57  ;;  %v14671_v57 = vld [vmem:[#allocation132_spill] sm:$0xff] }
 0xdfb   :  { %7457 = vmatpush1.bf16.msra.mxu1 %v14625_v55  ;;  %v14672_v55 = vld [vmem:[#allocation33_spill] sm:$0xff] }
 0xdfc   :  { %7458 = vmatprep.subr.bf16.mxu1 %v14626_v16  ;;  %v7303_v16 = vsub.f32 %v7250_v21, %v14660_v28 }
 0xdff   :  { %7459 = vmatpush1.bf16.msra.mxu1 %v14627_v35  ;;  %v14662_v35 = vld [vmem:[#allocation127_spill] sm:$0xff] }
 0xe00   :  { %7460 = vmatprep.subr.bf16.mxu1 %v14628_v8  ;;  %v7312_v8 = vpack.c.bf16 %v7303_v16, %v7303_v16  ;;  %v14688_v16 = vld [vmem:[#allocation39_spill] sm:$0xff] }
 0xe03   :  { %7461 = vmatpush1.bf16.msra.mxu1 %v14629_v20  ;;  %v14663_v20 = vld [vmem:[#allocation114_spill] sm:$0xff] }
 0xe04   :  { %7462 = vmatprep.subr.bf16.mxu1 %v14630_v18  ;;  %v14664_v18 = vld [vmem:[#allocation129_spill] sm:$0xff] }
 0xe07   :  { %7463 = vmatpush1.bf16.msra.mxu1 %v14655_v40 }
 0xe08   :  { %7464 = vmatprep.subr.bf16.mxu1 %v14656_v26  ;;  %v14686_v26 = vld [vmem:[#allocation43_spill] sm:$0xff] }
 0xe0b   :  { %7465 = vmatpush1.bf16.msra.mxu1 %v14657_v37 }
 0xe0c   :  { %7466 = vmatprep.subr.bf16.mxu1 %v14658_v12 }
 0xe0f   :  { %7467 = vmatpush1.bf16.msra.mxu1 %v14659_v27  ;;  %v14687_v27 = vld [vmem:[#allocation37_spill] sm:$0xff] }
 0xe10   :  { %7468 = vmatprep.subr.bf16.mxu1 %v14661_v25 }
 0xe13   :  { %7469 = vmatpush1.bf16.msra.mxu1 %v14662_v35  ;;  %v14689_v35 = vld [vmem:[#allocation35_spill] sm:$0xff] }
 0xe14   :  { %7479 = vmatprep.subr.bf16.mxu1 %v14663_v20 }
 0xe16   :  { %7471 = vmatmul.mubr.bf16.vlgmr.msra.gmra.mrb[48].mxu1 %v7312_v8 }
 0xe17   :  { %7480 = vmatpush1.bf16.msra.mxu1 %v14664_v18  ;;  %7511 = vmatprep.mubr.bf16.mxu1 %v14665_v0 }
 0xe18   :  { %7481 = vmatprep.subr.bf16.mxu1 %v14666_v11  ;;  %v8662_v11 = vld [vmem:[#allocation14] ss:$0 sm:$0xff] }
 0xe1b   :  { %7482 = vmatpush1.bf16.msra.mxu1 %v14667_v10 }
 0xe1c   :  { %7483 = vmatprep.subr.bf16.mxu1 %v14668_v52 }
 0xe1f   :  { %7484 = vmatpush1.bf16.msra.mxu1 %v14669_v22  ;;  %v8663_v22 = vld [vmem:[#allocation13] ss:$0 sm:$0xff] }
 0xe20   :  { %7485 = vmatprep.subr.bf16.mxu1 %v14670_v49 }
 0xe23   :  { %7486 = vmatpush1.bf16.msra.mxu1 %v14671_v57 }
 0xe24   :  { %7487 = vmatprep.subr.bf16.mxu1 %v14672_v55 }
 0xe27   :  { %7488 = vmatpush1.bf16.msra.mxu1 %v14673_v45 }
 0xe28   :  { %7489 = vmatprep.subr.bf16.mxu1 %v14674_v54 }
 0xe2b   :  { %7490 = vmatpush1.bf16.msra.mxu1 %v14675_v24 }
 0xe2c   :  { %7491 = vmatprep.subr.bf16.mxu1 %v14676_v48 }
 0xe2f   :  { %7492 = vmatpush1.bf16.msra.mxu1 %v14677_v59 }
 0xe30   :  { %7493 = vmatprep.subr.bf16.mxu1 %v14680_v38  ;;  %v8697_v38 = vld [vmem:[#allocation17] ss:$0 sm:$0xff] }
 0xe33   :  { %7494 = vmatpush1.bf16.msra.mxu1 %v14681_v7 }
 0xe36   :  { %7512 = vmatmul.mubr.bf16.vlgmr.msra.gmra.mrb[48].mxu1 %v7314_v43 }
 0xf09   :  { %v7513_v31 = vpop.f32.mrb[48].mxu1 }
 0xf0a   :  { %v7520_v61 = vmul.f32 %v7513_v31, %v14684_v47  ;;  %v7515_v51 = vpop.f32.mrb[49].mxu1 }
 0xf0b   :  { %v7521_v50 = vmul.f32 %v7515_v51, %v14685_v4  ;;  %v7517_v40 = vpop.f32.mrb[50].mxu1 }
 0xf0c   :  { %v7522_v37 = vsub.f32 %v14686_v26, %v7520_v61  ;;  %v7518_v12 = vpop.f32.mrb[51].mxu1 }
 0xf0d   :  { %v7523_v28 = vsub.f32 %v14687_v27, %v7521_v50 }
 0xf0e   :  { %v7524_v25 = vadd.f32 %v7522_v37, %v14688_v16 }
 0xf0f   :  { %v7525_v8 = vadd.f32 %v7523_v28, %v14689_v35 }
 0xf10   :  { %v7526_v18 = vmax.f32 %v7524_v25, 0.0 }
 0xf11   :  { %v7527_v20 = vmax.f32 %v7525_v8, 0.0 }
 0xf13   :  { %7626 = vmatprep.mubr.f32.mxu0 %v7527_v20 }
 0xf14   :  { %7627 = vmatmul.mubr.f32.vlgmr.msra.gmra.mrb[60].mxu0 %v7526_v18 }
 0xf15   :  { %9129 = vmatpush3.bf16.xpose.msk.msra.mxu0 %vm13882_vm2, %v13694_v42 }
 0xf16   :  { %9132 = vmatprep.subr.msk.bf16.mxu0 %vm13882_vm2, %v13696_v34 }
 0xf1d   :  { %9135 = vmatpush3.bf16.xpose.msk.msra.mxu0 %vm13882_vm2, %v13712_v19 }
 0xf1e   :  { %9138 = vmatprep.subr.msk.bf16.mxu0 %vm13882_vm2, %v13716_v15 }
 0xf25   :  { %9141 = vmatpush3.bf16.xpose.msk.msra.mxu0 %vm13882_vm2, %v13732_v36 }
 0xf26   :  { %9144 = vmatprep.subr.msk.bf16.mxu0 %vm13882_vm2, %v13736_v29 }
 0xf2d   :  { %9147 = vmatpush3.bf16.xpose.msk.msra.mxu0 %vm13882_vm2, %v13752_v46 }
 0xf2e   :  { %9150 = vmatprep.subr.msk.bf16.mxu0 %vm13882_vm2, %v13756_v23 }
 0xf35   :  { %9153 = vmatpush3.bf16.xpose.msk.msra.mxu0 %vm13882_vm2, %v13772_v14 }
 0xf36   :  { %9156 = vmatprep.subr.msk.bf16.mxu0 %vm13882_vm2, %v13776_v17 }
 0xf3d   :  { %9159 = vmatpush3.bf16.xpose.msk.msra.mxu0 %vm13882_vm2, %v13847_v2 }
 0xf3e   :  { %9162 = vmatprep.subr.msk.bf16.mxu0 %vm13882_vm2, %v13856_v5 }
 0xf45   :  { %9165 = vmatpush3.bf16.xpose.msk.msra.mxu0 %vm13882_vm2, %v13864_v56 }
 0xf46   :  { %9168 = vmatprep.subr.msk.bf16.mxu0 %vm13882_vm2, %v9120_v6 }
 0xf4d   :  { %9171 = vmatpush3.bf16.xpose.msk.msra.mxu0 %vm13882_vm2, %v9122_v9 }
 0xf4e   :  { %9173 = vmatprep.subr.bf16.mxu0 %v13682_v32 }
 0xfe7   :  { %v8944_v0 = vpop.f32.mrb[60].mxu0 }
 0xfe8   :  { %v8945_v10 = vpop.f32.mrb[61].mxu0 }
 0xfe9   :  { %v8946_v52 = vadd.f32 %v8945_v10, %v8944_v0 }
 0xfeb   :  { %v7638_v49 = vmul.f32 %v8946_v52, %v8662_v11 }
 0xfed   :  { %v7645_v57 = vadd.f32 %v8663_v22, %v7638_v49 }
 0xfef   :  { %v7646_v55 = vmax.f32 %v7645_v57, 0.0 }
 0xff1   :  { %8979 = vmatprep.mubr.msk.f32.mxu0 %vm7647_vm1, %v7646_v55 }
 0xff2   :  { %8980 = vmatmul.mubr.msk.f32.vlgmr.msra.gmra.mrb[62].mxu0 %vm7647_vm1, %v7646_v55 }
 0xff3   :  { %9175 = vmatpush3.bf16.msra.mxu0 %v13694_v42 }
 0xff4   :  { %9177 = vmatprep.subr.bf16.mxu0 %v13696_v34 }
 0xff7   :  { %9179 = vmatpush3.bf16.msra.mxu0 %v13712_v19 }
 0xff8   :  { %9181 = vmatprep.subr.bf16.mxu0 %v13716_v15  ;;  %v14690_v15 = vmov 0.0  }
 0xffb   :  { %9183 = vmatpush3.bf16.msra.mxu0 %v13732_v36  ;;  %v7894_v36 = vld [vmem:[#allocation16] sm:$0xff] }
 0xffc   :  { %9185 = vmatprep.subr.bf16.mxu0 %v13736_v29  ;;  %v7895_v29 = vld [vmem:[#allocation16 + $0x8] sm:$0xff] }
 0xfff   :  { %9187 = vmatpush3.bf16.msra.mxu0 %v13752_v46  ;;  %v9205_v46 = vpack.c.bf16 %v7895_v29, %v7894_v36 }
0x1000   :  { %9189 = vmatprep.subr.bf16.mxu0 %v13756_v23  ;;  %v11510_v23 = vmov 0.0|0.0  }
0x1003   :  { %9191 = vmatpush3.bf16.msra.mxu0 %v13772_v14  ;;  %v7896_v14 = vld [vmem:[#allocation16 + $0x10] sm:$0xff] }
0x1004   :  { %9193 = vmatprep.subr.bf16.mxu0 %v13776_v17  ;;  %v7897_v17 = vld [vmem:[#allocation16 + $0x18] sm:$0xff] }
0x1005   :  { %v9208_v45 = vpack.c.bf16 %v7897_v17, %v7896_v14 }
0x1007   :  { %9195 = vmatpush3.bf16.msra.mxu0 %v13847_v2 }
0x1008   :  { %9197 = vmatprep.subr.bf16.mxu0 %v13856_v5 }
0x100b   :  { %9199 = vmatpush3.bf16.msra.mxu0 %v13864_v56 }
0x100c   :  { %9201 = vmatprep.subr.bf16.mxu0 %v9120_v6 }
0x100f   :  { %9203 = vmatpush3.bf16.msra.mxu0 %v9122_v9 }
0x1010   :  { %9204 = vmatprep.subr.bf16.mxu0 %v11510_v23 }
0x10c5   :  { %v7813_v32 = vpop.f32.mrb[62].mxu0 }
0x10c6   :  { %v7815_v42 = vpop.f32.mrb[63].mxu0  ;;  %v7818_v19 = vsub.f32 %v7813_v32, %v7526_v18 }
0x10c7   :  { %v7819_v34 = vsub.f32 %v7815_v42, %v7527_v20 }
0x10c9   :  { %7884 = vmatprep.mubr.f32.mxu0 %v7819_v34 }
0x10ca   :  { %7885 = vmatmul.mubr.f32.vlgmr.msra.gmra.mrb[64].mxu0 %v7818_v19 }
0x10cb   :  { %9089 = vmatprep.mubr.msk.f32.mxu0 %vm11509_vm0, %v14690_v15  ;;  %9206 = vmatpush3.bf16.msra.mxu0 %v9205_v46 }
0x10cc   :  { %9207 = vmatprep.subr.bf16.mxu0 %v11510_v23 }
0x10cf   :  { %9209 = vmatpush3.bf16.msra.mxu0 %v9208_v45 }
0x119d   :  { %v9013_v54 = vpop.f32.mrb[64].mxu0 }
0x119e   :  { %v9014_v24 = vpop.f32.mrb[65].mxu0 }
0x119f   :  { %v9015_v48 = vadd.f32 %v9014_v24, %v9013_v54 }
0x11a1   :  { %v7890_v59 = vmul.f32 %v9015_v48, %v8662_v11 }
0x11a3   :  { %v7891_v63 = vsub.f32 %v7646_v55, %v7890_v59 }
0x11a5   :  { %v7892_v60 = vadd.f32 %v8663_v22, %v7891_v63 }
0x11a7   :  { %v7893_v44 = vmax.f32 %v7892_v60, 0.0 }
0x11a9   :  { %9090 = vmatmul.mubr.msk.f32.vlgmr.msra.gmra.mrb[66].mxu0 %vm7647_vm1, %v7893_v44 }
0x127c   :  { %v7974_v7 = vpop.f32.mrb[66].mxu0 }
0x127d   :  { %v7975_v43 = vadd.f32 %v8697_v38, %v7974_v7  ;;  %v9091_v58 = vpop.f32.mrb[67].mxu0 }
0x127f   :  { %v7979_v3 = vsel %vm7978_vm3, %v7975_v43, -inf }
0x1280   :  { %7980 = vmax.xlane.f32.xlu0 %v7979_v3 }
0x130d   :  { %v7981_v2 = vpop.xlane.xlu0 %7980 }
0x130e   :  { %v7982_v30 = vsub.f32 %v7975_v43, %v7981_v2 }
0x1310   :  { %v7983_v1 = vmul.f32 1.442695, %v7982_v30 }
0x1312   :  { %10366 = vpow2.f32 %v7983_v1 }
0x131c   :  { %v10367_v5 = vpop.eup %10366 }
0x131d   :  { %v7985_v13 = vsel %vm7978_vm3, %v10367_v5, 0.0 }
0x131e   :  { %7986 = vadd.xlane.f32.xlu0 %v7985_v13 }
0x13ab   :  { %v7987_v62 = vpop.xlane.xlu0 %7986 }
0x13ac   :  { %10368 = vlog2.f32 %v7987_v62 }
0x13b6   :  { %v10369_v56 = vpop.eup %10368 }
0x13b7   :  { %v7989_v53 = vmul.f32 0.6931472, %v10369_v56 }
0x13b9   :  { %v7990_v41 = vsub.f32 %v7982_v30, %v7989_v53 }
0x13bb   :  { %7991 = vst [vmem:[#allocation19] sm:$0x3] %v7990_v41 }
0x13bc   :  { %11467 = shalt.err (!%p11464_p0)
}
0x13bd   :  { %s11468_s8 = scalar_lea.hbm %s13981_s12, 32 }
0x13be   :  { %p11469_p1 = scmp.ne.s32.totalorder %s13981_s12, %s11468_s8  ;;  %p11472_p2 = scmp.lt.u32.totalorder %s11468_s8, %s13981_s12 }
0x13c0   :  { %p11474_p3 = pnand %p11472_p2, %p11469_p1 }
0x13c2   :  { %11477 = shalt.err (!%p11474_p3)
}
0x13c3   :  { %8001 = dma.vmem_to_hbm [thread:$0]  %s7999_s14, 32, %s13981_s12, [#allocation4]  }
0x13c4   :  { %11490 = dma.done.wait [#allocation4], 32  }
0x13c5   :  { %11491 = vsyncadd [#allocation4], 4294967264 }
0x13c6   :  { %8005 = vsyncpa [#allocation3], 1 }
0x13c7   :  { %8006 = vsyncpa [#allocation6], 1 }
0x13c8   :  { %8007 = vsyncpa [#allocation9], 1 }
0x13c9   :  { %8008 = vsyncpa [#allocation12], 1 }
0x13ca   :  { %8009 = vsyncpa [#allocation15], 1 }
0x13cb   :  { %8010 = vsyncpa [#allocation18], 1 }
0x13cc   :  { %8011 = vsyncpa [#allocation4], 1 }

</bundles_post_ra>
